<compile_context>
chip_gen: v7x
topology: tpu7x:2x2x1
jax: 0.10.0
libtpu: 0.0.40
codegen_flags: <defaults>
</compile_context>

<pallas_src>
import functools

import jax
import jax.numpy as jnp
import numpy as np
from jax.experimental import pallas as pl
from jax.experimental.pallas import tpu as pltpu


# --------------------------- fused coupling-layer kernel ---------------------------

def _coupling_layer_kernel(x_ref, m_ref, w1_ref, b1_ref, w2_ref, b2_ref,
                           w3_ref, b3_ref, o_ref, ssum_ref, xp1_ref, xp2_ref,
                           *, reverse):
    """One full RealNVP coupling layer for a batch tile, entirely in VMEM.

    x_ref   : (bt, H, W, C)   input activations (f32)
    m_ref   : (1, H, W, C)    checkerboard mask for this layer (f32)
    w*_ref  : flattened im2col weights of the fused s/t conv stack
              w1: (9*C, 2h)   w2: (9*2h, 2h) block-diag   w3: (9*2h, 2*C) block-diag
    b*_ref  : (1, cout) f32 biases
    o_ref   : (bt, H, W, C)   updated activations
    ssum_ref: (bt, 1, 1, 1)   per-sample sum of s (log-det-Jacobian contribution)
    xp1/xp2 : padded VMEM scratch buffers for the im2col taps
    """
    bt, H, W, C = x_ref.shape

    x = x_ref[...]
    m = m_ref[...]                      # (1,H,W,C) broadcasts over the batch tile
    x_static = x * m

    # Zero the padded scratch buffers (halo rows/cols); interiors are overwritten.
    xp1_ref[...] = jnp.zeros_like(xp1_ref)
    xp2_ref[...] = jnp.zeros_like(xp2_ref)

    def conv3x3(xp_ref, inp, wf_ref, b_ref, relu):
        """3x3 SAME conv as a single im2col MXU matmul (K = 9*cin)."""
        cin = inp.shape[-1]
        cout = wf_ref.shape[-1]
        # Interior lives at rows [1, H+1), cols [8, 8+W): the column offset of 8
        # keeps the store sublane-aligned; zero halo sits at col 7 / col 8+W and
        # rows 0 / H+1.  Tap (dy,dx) then reads rows [dy, dy+H), cols [7+dx, 7+dx+W).
        xp_ref[:, 1:H + 1, 8:8 + W, :] = inp.astype(xp_ref.dtype)
        taps = []
        for dy in range(3):
            for dx in range(3):
                taps.append(
                    xp_ref[:, dy:dy + H, 7 + dx:7 + dx + W, :]
                    .reshape(bt * H * W, cin))
        patches = jnp.concatenate(taps, axis=-1)           # (bt*H*W, 9*cin)
        acc = jnp.dot(patches, wf_ref[...],
                      preferred_element_type=jnp.float32) + b_ref[...]
        if relu:
            acc = jnp.maximum(acc, 0.0)
        return acc.reshape(bt, H, W, cout)

    # Fused s/t conv stack: s occupies channels [:h]/[:C], t occupies [h:]/[C:].
    h = conv3x3(xp1_ref, x_static, w1_ref, b1_ref, relu=True)     # (bt,H,W,2h)
    h = conv3x3(xp2_ref, h, w2_ref, b2_ref, relu=True)            # (bt,H,W,2h)
    st = conv3x3(xp2_ref, h, w3_ref, b3_ref, relu=False)          # (bt,H,W,2C)
    s = st[..., :C]
    t = st[..., C:]

    x_dyn = x * (1.0 - m)
    if reverse:
        x_dyn = (x_dyn - t) * jnp.exp(-s)
    else:
        x_dyn = x_dyn * jnp.exp(s) + t
    o_ref[...] = (x_static + x_dyn).astype(o_ref.dtype)
    # One scalar per sample in the tile; lane density is immaterial at this size.
    ssum_ref[...] = jnp.sum(s, axis=(1, 2, 3), keepdims=True)


# ------------------------------- kernel wrapper -------------------------------

def _const_spec(shape):
    n = len(shape)
    return pl.BlockSpec(tuple(shape), lambda b: (0,) * n)


def coupling_layer(x, mask, fused_w, *, reverse, block_b=1,
                   vmem_limit_bytes=32 * 1024 * 1024):
    """One fused coupling layer: mask -> fused s/t conv stack -> affine update + sum(s)."""
    B, H, W, C = x.shape
    w1f, b1, w2f, b2, w3f, b3 = fused_w
    two_h = w2f.shape[-1]
    mm_dtype = w1f.dtype
    assert B % block_b == 0, "batch must be divisible by the batch tile"
    grid = (B // block_b,)
    wp = W + 16          # padded scratch width: left halo at col 7, right at col 8+W
    # TODO(synk): for large H/W, additionally tile the grid over rows with a +2 halo
    # index_map; at these sizes one sample fits VMEM comfortably on v5e/v6e/v7x.

    kern = functools.partial(_coupling_layer_kernel, reverse=reverse)
    x_new, ssum = pl.pallas_call(
        kern,
        grid=grid,
        in_specs=[
            pl.BlockSpec((block_b, H, W, C), lambda b: (b, 0, 0, 0)),
            _const_spec(mask.shape),
            _const_spec(w1f.shape), _const_spec(b1.shape),
            _const_spec(w2f.shape), _const_spec(b2.shape),
            _const_spec(w3f.shape), _const_spec(b3.shape),
        ],
        out_specs=(
            pl.BlockSpec((block_b, H, W, C), lambda b: (b, 0, 0, 0)),
            pl.BlockSpec((block_b, 1, 1, 1), lambda b: (b, 0, 0, 0)),
        ),
        out_shape=(
            jax.ShapeDtypeStruct((B, H, W, C), x.dtype),
            jax.ShapeDtypeStruct((B, 1, 1, 1), jnp.float32),
        ),
        scratch_shapes=[
            pltpu.VMEM((block_b, H + 2, wp, C), mm_dtype),       # conv1 padded input
            pltpu.VMEM((block_b, H + 2, wp, two_h), mm_dtype),   # conv2/3 padded input
        ],
        compiler_params=pltpu.CompilerParams(
            dimension_semantics=("parallel",),    # batch tiles -> megacore / v7x 2 TCs
            vmem_limit_bytes=vmem_limit_bytes,    # explicit budget (fits 64 MiB v7x)
        ),
    )(x, mask, w1f, b1, w2f, b2, w3f, b3)
    return x_new, ssum.reshape(B)


# ------------------------------- model (glue) ---------------------------------

def make_checkerboard_mask(H, W, C):
    ii = np.arange(H)[:, None]
    jj = np.arange(W)[None, :]
    cb = ((ii % 2 + jj) % 2).astype(np.float32)          # mask[i,j] = (i%2 + j) % 2
    return jnp.asarray(np.broadcast_to(cb[None, :, :, None], (1, H, W, C)).copy())


def init_net_params(key, cin, hidden, scale=0.05):
    """One s- or t-net: Conv3x3(cin->h) -> ReLU -> Conv3x3(h->h) -> ReLU -> Conv3x3(h->cin)."""
    ks = jax.random.split(key, 6)

    def rnd(k, shape):
        return scale * jax.random.normal(k, shape, jnp.float32)

    return [
        (rnd(ks[0], (3, 3, cin, hidden)), rnd(ks[1], (hidden,))),
        (rnd(ks[2], (3, 3, hidden, hidden)), rnd(ks[3], (hidden,))),
        (rnd(ks[4], (3, 3, hidden, cin)), rnd(ks[5], (cin,))),
    ]


def init_realnvp_params(key, input_channels, hidden_channels, n_layers):
    keys = jax.random.split(key, 2 * n_layers)
    return {
        "s": [init_net_params(keys[i], input_channels, hidden_channels)
              for i in range(n_layers)],
        "t": [init_net_params(keys[n_layers + i], input_channels, hidden_channels)
              for i in range(n_layers)],
    }


def _fuse_st_weights(s_net, t_net, mm_dtype):
    """Fuse the s- and t-net conv weights into single fat matmuls.

    Layer 1 shares its input -> concatenate along Cout.  Layers 2/3 act on the
    concatenated hidden state -> block-diagonal over channels (half the MACs are
    structural zeros, but each conv becomes ONE wide MXU matmul).  Weights are
    flattened to (9*Cin, Cout), matching the in-kernel im2col patch ordering
    (dy-major, then dx, then input channel).
    """
    (sw1, sb1), (sw2, sb2), (sw3, sb3) = s_net
    (tw1, tb1), (tw2, tb2), (tw3, tb3) = t_net
    C, hid = sw1.shape[2], sw1.shape[3]

    w1 = jnp.concatenate([sw1, tw1], axis=3)                                # (3,3,C,2h)
    zhh = jnp.zeros((3, 3, hid, hid), sw2.dtype)
    w2 = jnp.concatenate([jnp.concatenate([sw2, zhh], axis=3),
                          jnp.concatenate([zhh, tw2], axis=3)], axis=2)     # (3,3,2h,2h)
    zhc = jnp.zeros((3, 3, hid, C), sw3.dtype)
    w3 = jnp.concatenate([jnp.concatenate([sw3, zhc], axis=3),
                          jnp.concatenate([zhc, tw3], axis=3)], axis=2)     # (3,3,2h,2C)

    def flat(w):
        return w.reshape(-1, w.shape[-1]).astype(mm_dtype)

    def bias(a, b):
        return jnp.concatenate([a, b]).reshape(1, -1).astype(jnp.float32)

    return (flat(w1), bias(sb1, tb1),
            flat(w2), bias(sb2, tb2),
            flat(w3), bias(sb3, tb3))


def realnvp_forward(x_nchw, params, *, reverse=False, mm_dtype=jnp.bfloat16,
                    block_b=1):
    """Matches RealNVP.forward: returns (x, log_det_jacobian).

    mm_dtype controls MXU input precision (bf16 recommended on v6e/v7x);
    accumulation, biases and the coupling math stay in f32.
    """
    x = jnp.transpose(x_nchw, (0, 2, 3, 1)).astype(jnp.float32)   # NCHW -> NHWC
    B, H, W, C = x.shape
    mask = make_checkerboard_mask(H, W, C)
    inv_mask = 1.0 - mask
    n_layers = len(params["s"])
    ldj = jnp.zeros((B,), jnp.float32)

    order = range(n_layers) if not reverse else reversed(range(n_layers))
    invert_switch = False
    for i in order:
        m = inv_mask if invert_switch else mask
        fused_w = _fuse_st_weights(params["s"][i], params["t"][i], mm_dtype)
        x, ssum = coupling_layer(x, m, fused_w, reverse=reverse, block_b=block_b)
        ldj = ldj + (-ssum if reverse else ssum)
        invert_switch = not invert_switch

    # TODO(synk): RealNVP.loss uses a torch prior distribution; not part of forward.
    return jnp.transpose(x, (0, 3, 1, 2)), ldj                    # back to NCHW


# ----------------------------- pure-JAX reference ----------------------------

def _conv_ref(x, w, b, mm_dtype):
    y = jax.lax.conv_general_dilated(
        x.astype(mm_dtype), w.astype(mm_dtype),
        window_strides=(1, 1), padding="SAME",
        dimension_numbers=("NHWC", "HWIO", "NHWC"),
        preferred_element_type=jnp.float32)
    return y + b


def _net_ref(net, x, mm_dtype):
    (w1, b1), (w2, b2), (w3, b3) = net
    h = jax.nn.relu(_conv_ref(x, w1, b1, mm_dtype))
    h = jax.nn.relu(_conv_ref(h, w2, b2, mm_dtype))
    return _conv_ref(h, w3, b3, mm_dtype)


def realnvp_reference(x_nchw, params, *, reverse=False, mm_dtype=jnp.float32):
    x = jnp.transpose(x_nchw, (0, 2, 3, 1)).astype(jnp.float32)
    B, H, W, C = x.shape
    mask = make_checkerboard_mask(H, W, C)
    n_layers = len(params["s"])
    ldj = jnp.zeros((B,), jnp.float32)
    order = range(n_layers) if not reverse else reversed(range(n_layers))
    invert_switch = False
    for i in order:
        m = (1.0 - mask) if invert_switch else mask
        x_static = x * m
        x_dynamic = x * (1.0 - m)
        s = _net_ref(params["s"][i], x_static, mm_dtype)
        t = _net_ref(params["t"][i], x_static, mm_dtype)
        if reverse:
            x_dynamic = (x_dynamic - t) * jnp.exp(-s)
            ldj = ldj - jnp.sum(s, axis=(1, 2, 3))
        else:
            x_dynamic = x_dynamic * jnp.exp(s) + t
            ldj = ldj + jnp.sum(s, axis=(1, 2, 3))
        x = x_static + x_dynamic
        invert_switch = not invert_switch
    return jnp.transpose(x, (0, 3, 1, 2)), ldj


# ----------------------------------- main -------------------------------------

if __name__ == "__main__":
    B, C, H, W = 2, 4, 16, 16
    hidden_channels = 32
    n_layers = 2

    key = jax.random.PRNGKey(0)
    kx, kp = jax.random.split(key)
    x = jax.random.normal(kx, (B, C, H, W), jnp.float32)
    params = init_realnvp_params(kp, C, hidden_channels, n_layers)

    fwd = jax.jit(realnvp_forward, static_argnames=("reverse", "mm_dtype", "block_b"))

    # f32 MXU path: exact semantics of the PyTorch module, tight check.
    for reverse in (False, True):
        y, ldj = fwd(x, params, reverse=reverse, mm_dtype=jnp.float32)
        y = jax.block_until_ready(y)
        ldj = jax.block_until_ready(ldj)
        y_ref, ldj_ref = realnvp_reference(x, params, reverse=reverse,
                                           mm_dtype=jnp.float32)
        assert y.shape == (B, C, H, W) and ldj.shape == (B,)
        assert np.allclose(np.asarray(y), np.asarray(y_ref), rtol=1e-4, atol=1e-4)
        assert np.allclose(np.asarray(ldj), np.asarray(ldj_ref), rtol=1e-4, atol=1e-4)

    # bf16 MXU-input path (recommended on v6e/v7x); compared against a reference
    # that quantizes conv inputs/weights at the same points (f32 accumulation).
    for reverse in (False, True):
        y, ldj = fwd(x, params, reverse=reverse, mm_dtype=jnp.bfloat16)
        y = jax.block_until_ready(y)
        ldj = jax.block_until_ready(ldj)
        y_ref, ldj_ref = realnvp_reference(x, params, reverse=reverse,
                                           mm_dtype=jnp.bfloat16)
        assert np.allclose(np.asarray(y), np.asarray(y_ref), rtol=1e-3, atol=1e-3)
        assert np.allclose(np.asarray(ldj), np.asarray(ldj_ref), rtol=1e-3, atol=1e-3)

    print("KERNEL_OK")
</pallas_src>

<mosaic_0001>
module attributes {stable_mosaic.version = 11 : i64} {
  func.func @_coupling_layer_kernel(%arg0: i32, %arg1: memref<1x16x16x4xf32, #tpu.memory_space<vmem>>, %arg2: memref<1x16x16x4xf32, #tpu.memory_space<vmem>>, %arg3: memref<36x64xf32, #tpu.memory_space<vmem>>, %arg4: memref<1x64xf32, #tpu.memory_space<vmem>>, %arg5: memref<576x64xf32, #tpu.memory_space<vmem>>, %arg6: memref<1x64xf32, #tpu.memory_space<vmem>>, %arg7: memref<576x8xf32, #tpu.memory_space<vmem>>, %arg8: memref<1x8xf32, #tpu.memory_space<vmem>>, %arg9: memref<1x16x16x4xf32, #tpu.memory_space<vmem>>, %arg10: memref<1x1x1x1xf32, #tpu.memory_space<vmem>>, %arg11: memref<1x18x32x4xf32, #tpu.memory_space<vmem>>, %arg12: memref<1x18x32x64xf32, #tpu.memory_space<vmem>>) attributes {dimension_semantics = [#tpu.dimension_semantics<parallel>], iteration_bounds = array<i64: 2>, scalar_prefetch = 0 : i64, scratch_operands = 2 : i64, tpu.core_type = #tpu.core_type<tc>, window_params = [{transform_indices = @transform_0, window_bounds = array<i64: 1, 16, 16, 4>}, {pipeline_mode = #tpu.pipeline_mode<synchronous>, transform_indices = @transform_1, window_bounds = array<i64: 1, 16, 16, 4>}, {pipeline_mode = #tpu.pipeline_mode<synchronous>, transform_indices = @transform_2, window_bounds = array<i64: 36, 64>}, {pipeline_mode = #tpu.pipeline_mode<synchronous>, transform_indices = @transform_3, window_bounds = array<i64: 1, 64>}, {pipeline_mode = #tpu.pipeline_mode<synchronous>, transform_indices = @transform_4, window_bounds = array<i64: 576, 64>}, {pipeline_mode = #tpu.pipeline_mode<synchronous>, transform_indices = @transform_5, window_bounds = array<i64: 1, 64>}, {pipeline_mode = #tpu.pipeline_mode<synchronous>, transform_indices = @transform_6, window_bounds = array<i64: 576, 8>}, {pipeline_mode = #tpu.pipeline_mode<synchronous>, transform_indices = @transform_7, window_bounds = array<i64: 1, 8>}, {transform_indices = @transform_8, window_bounds = array<i64: 1, 16, 16, 4>}, {transform_indices = @transform_9, window_bounds = array<i64: 1, 1, 1, 1>}]} {
    %c0 = arith.constant 0 : index
    %c0_0 = arith.constant 0 : index
    %c0_1 = arith.constant 0 : index
    %c0_2 = arith.constant 0 : index
    %0 = vector.load %arg1[%c0, %c0_0, %c0_1, %c0_2] : memref<1x16x16x4xf32, #tpu.memory_space<vmem>>, vector<1x16x16x4xf32>
    %c0_3 = arith.constant 0 : index
    %c0_4 = arith.constant 0 : index
    %c0_5 = arith.constant 0 : index
    %c0_6 = arith.constant 0 : index
    %1 = vector.load %arg2[%c0_3, %c0_4, %c0_5, %c0_6] : memref<1x16x16x4xf32, #tpu.memory_space<vmem>>, vector<1x16x16x4xf32>
    %2 = arith.mulf %0, %1 : vector<1x16x16x4xf32>
    %cst = arith.constant 0.000000e+00 : f32
    %3 = vector.broadcast %cst : f32 to vector<1x18x32x4xf32>
    %c0_7 = arith.constant 0 : index
    %c0_8 = arith.constant 0 : index
    %c0_9 = arith.constant 0 : index
    %c0_10 = arith.constant 0 : index
    %4 = vector.load %arg11[%c0_7, %c0_8, %c0_9, %c0_10] : memref<1x18x32x4xf32, #tpu.memory_space<vmem>>, vector<1x18x32x4xf32>
    tpu.vector_store %arg11[%c0_7, %c0_8, %c0_9, %c0_10], %3 {strides = array<i32>} : memref<1x18x32x4xf32, #tpu.memory_space<vmem>>, vector<1x18x32x4xf32>,
    %cst_11 = arith.constant 0.000000e+00 : f32
    %5 = vector.broadcast %cst_11 : f32 to vector<1x18x32x64xf32>
    %c0_12 = arith.constant 0 : index
    %c0_13 = arith.constant 0 : index
    %c0_14 = arith.constant 0 : index
    %c0_15 = arith.constant 0 : index
    %6 = vector.load %arg12[%c0_12, %c0_13, %c0_14, %c0_15] : memref<1x18x32x64xf32, #tpu.memory_space<vmem>>, vector<1x18x32x64xf32>
    tpu.vector_store %arg12[%c0_12, %c0_13, %c0_14, %c0_15], %5 {strides = array<i32>} : memref<1x18x32x64xf32, #tpu.memory_space<vmem>>, vector<1x18x32x64xf32>,
    %c0_16 = arith.constant 0 : index
    %c1 = arith.constant 1 : index
    %c8 = arith.constant 8 : index
    %c0_17 = arith.constant 0 : index
    %7 = vector.load %arg11[%c0_16, %c1, %c8, %c0_17] : memref<1x18x32x4xf32, #tpu.memory_space<vmem>>, vector<1x16x16x4xf32>
    tpu.vector_store %arg11[%c0_16, %c1, %c8, %c0_17], %2 {strides = array<i32>} : memref<1x18x32x4xf32, #tpu.memory_space<vmem>>, vector<1x16x16x4xf32>,
    %c0_18 = arith.constant 0 : index
    %c0_19 = arith.constant 0 : index
    %c7 = arith.constant 7 : index
    %c0_20 = arith.constant 0 : index
    %8 = vector.load %arg11[%c0_18, %c0_19, %c7, %c0_20] : memref<1x18x32x4xf32, #tpu.memory_space<vmem>>, vector<1x16x16x4xf32>
    %9 = vector.shape_cast %8 : vector<1x16x16x4xf32> to vector<256x4xf32>
    %c0_21 = arith.constant 0 : index
    %c0_22 = arith.constant 0 : index
    %c8_23 = arith.constant 8 : index
    %c0_24 = arith.constant 0 : index
    %10 = vector.load %arg11[%c0_21, %c0_22, %c8_23, %c0_24] : memref<1x18x32x4xf32, #tpu.memory_space<vmem>>, vector<1x16x16x4xf32>
    %11 = vector.shape_cast %10 : vector<1x16x16x4xf32> to vector<256x4xf32>
    %c0_25 = arith.constant 0 : index
    %c0_26 = arith.constant 0 : index
    %c9 = arith.constant 9 : index
    %c0_27 = arith.constant 0 : index
    %12 = vector.load %arg11[%c0_25, %c0_26, %c9, %c0_27] : memref<1x18x32x4xf32, #tpu.memory_space<vmem>>, vector<1x16x16x4xf32>
    %13 = vector.shape_cast %12 : vector<1x16x16x4xf32> to vector<256x4xf32>
    %c0_28 = arith.constant 0 : index
    %c1_29 = arith.constant 1 : index
    %c7_30 = arith.constant 7 : index
    %c0_31 = arith.constant 0 : index
    %14 = vector.load %arg11[%c0_28, %c1_29, %c7_30, %c0_31] : memref<1x18x32x4xf32, #tpu.memory_space<vmem>>, vector<1x16x16x4xf32>
    %15 = vector.shape_cast %14 : vector<1x16x16x4xf32> to vector<256x4xf32>
    %c0_32 = arith.constant 0 : index
    %c1_33 = arith.constant 1 : index
    %c8_34 = arith.constant 8 : index
    %c0_35 = arith.constant 0 : index
    %16 = vector.load %arg11[%c0_32, %c1_33, %c8_34, %c0_35] : memref<1x18x32x4xf32, #tpu.memory_space<vmem>>, vector<1x16x16x4xf32>
    %17 = vector.shape_cast %16 : vector<1x16x16x4xf32> to vector<256x4xf32>
    %c0_36 = arith.constant 0 : index
    %c1_37 = arith.constant 1 : index
    %c9_38 = arith.constant 9 : index
    %c0_39 = arith.constant 0 : index
    %18 = vector.load %arg11[%c0_36, %c1_37, %c9_38, %c0_39] : memref<1x18x32x4xf32, #tpu.memory_space<vmem>>, vector<1x16x16x4xf32>
    %19 = vector.shape_cast %18 : vector<1x16x16x4xf32> to vector<256x4xf32>
    %c0_40 = arith.constant 0 : index
    %c2 = arith.constant 2 : index
    %c7_41 = arith.constant 7 : index
    %c0_42 = arith.constant 0 : index
    %20 = vector.load %arg11[%c0_40, %c2, %c7_41, %c0_42] : memref<1x18x32x4xf32, #tpu.memory_space<vmem>>, vector<1x16x16x4xf32>
    %21 = vector.shape_cast %20 : vector<1x16x16x4xf32> to vector<256x4xf32>
    %c0_43 = arith.constant 0 : index
    %c2_44 = arith.constant 2 : index
    %c8_45 = arith.constant 8 : index
    %c0_46 = arith.constant 0 : index
    %22 = vector.load %arg11[%c0_43, %c2_44, %c8_45, %c0_46] : memref<1x18x32x4xf32, #tpu.memory_space<vmem>>, vector<1x16x16x4xf32>
    %23 = vector.shape_cast %22 : vector<1x16x16x4xf32> to vector<256x4xf32>
    %c0_47 = arith.constant 0 : index
    %c2_48 = arith.constant 2 : index
    %c9_49 = arith.constant 9 : index
    %c0_50 = arith.constant 0 : index
    %24 = vector.load %arg11[%c0_47, %c2_48, %c9_49, %c0_50] : memref<1x18x32x4xf32, #tpu.memory_space<vmem>>, vector<1x16x16x4xf32>
    %25 = vector.shape_cast %24 : vector<1x16x16x4xf32> to vector<256x4xf32>
    %26 = tpu.concatenate %9, %11, %13, %15, %17, %19, %21, %23, %25 in 1 : vector<256x4xf32>, vector<256x4xf32>, vector<256x4xf32>, vector<256x4xf32>, vector<256x4xf32>, vector<256x4xf32>, vector<256x4xf32>, vector<256x4xf32>, vector<256x4xf32> -> vector<256x36xf32>
    %c0_51 = arith.constant 0 : index
    %c0_52 = arith.constant 0 : index
    %27 = vector.load %arg3[%c0_51, %c0_52] : memref<36x64xf32, #tpu.memory_space<vmem>>, vector<36x64xf32>
    %cst_53 = arith.constant dense<0.000000e+00> : vector<256x64xf32>
    %28 = tpu.matmul %26, %27, %cst_53 {dimension_numbers = #tpu.dot_dimension_numbers<[1], [0], [0], [1], [0, 0, 1, 1], [], []>} : vector<256x36xf32>, vector<36x64xf32>, vector<256x64xf32> -> vector<256x64xf32>
    %c0_54 = arith.constant 0 : index
    %c0_55 = arith.constant 0 : index
    %29 = vector.load %arg4[%c0_54, %c0_55] : memref<1x64xf32, #tpu.memory_space<vmem>>, vector<1x64xf32>
    %30 = vector.broadcast %29 : vector<1x64xf32> to vector<256x64xf32>
    %31 = arith.addf %28, %30 : vector<256x64xf32>
    %cst_56 = arith.constant 0.000000e+00 : f32
    %32 = vector.broadcast %cst_56 : f32 to vector<256x64xf32>
    %33 = arith.maximumf %31, %32 : vector<256x64xf32>
    %34 = vector.shape_cast %33 : vector<256x64xf32> to vector<1x16x16x64xf32>
    %c0_57 = arith.constant 0 : index
    %c1_58 = arith.constant 1 : index
    %c8_59 = arith.constant 8 : index
    %c0_60 = arith.constant 0 : index
    %35 = vector.load %arg12[%c0_57, %c1_58, %c8_59, %c0_60] : memref<1x18x32x64xf32, #tpu.memory_space<vmem>>, vector<1x16x16x64xf32>
    tpu.vector_store %arg12[%c0_57, %c1_58, %c8_59, %c0_60], %34 {strides = array<i32>} : memref<1x18x32x64xf32, #tpu.memory_space<vmem>>, vector<1x16x16x64xf32>,
    %c0_61 = arith.constant 0 : index
    %c0_62 = arith.constant 0 : index
    %c7_63 = arith.constant 7 : index
    %c0_64 = arith.constant 0 : index
    %36 = vector.load %arg12[%c0_61, %c0_62, %c7_63, %c0_64] : memref<1x18x32x64xf32, #tpu.memory_space<vmem>>, vector<1x16x16x64xf32>
    %37 = vector.shape_cast %36 : vector<1x16x16x64xf32> to vector<256x64xf32>
    %c0_65 = arith.constant 0 : index
    %c0_66 = arith.constant 0 : index
    %c8_67 = arith.constant 8 : index
    %c0_68 = arith.constant 0 : index
    %38 = vector.load %arg12[%c0_65, %c0_66, %c8_67, %c0_68] : memref<1x18x32x64xf32, #tpu.memory_space<vmem>>, vector<1x16x16x64xf32>
    %39 = vector.shape_cast %38 : vector<1x16x16x64xf32> to vector<256x64xf32>
    %c0_69 = arith.constant 0 : index
    %c0_70 = arith.constant 0 : index
    %c9_71 = arith.constant 9 : index
    %c0_72 = arith.constant 0 : index
    %40 = vector.load %arg12[%c0_69, %c0_70, %c9_71, %c0_72] : memref<1x18x32x64xf32, #tpu.memory_space<vmem>>, vector<1x16x16x64xf32>
    %41 = vector.shape_cast %40 : vector<1x16x16x64xf32> to vector<256x64xf32>
    %c0_73 = arith.constant 0 : index
    %c1_74 = arith.constant 1 : index
    %c7_75 = arith.constant 7 : index
    %c0_76 = arith.constant 0 : index
    %42 = vector.load %arg12[%c0_73, %c1_74, %c7_75, %c0_76] : memref<1x18x32x64xf32, #tpu.memory_space<vmem>>, vector<1x16x16x64xf32>
    %43 = vector.shape_cast %42 : vector<1x16x16x64xf32> to vector<256x64xf32>
    %c0_77 = arith.constant 0 : index
    %c1_78 = arith.constant 1 : index
    %c8_79 = arith.constant 8 : index
    %c0_80 = arith.constant 0 : index
    %44 = vector.load %arg12[%c0_77, %c1_78, %c8_79, %c0_80] : memref<1x18x32x64xf32, #tpu.memory_space<vmem>>, vector<1x16x16x64xf32>
    %45 = vector.shape_cast %44 : vector<1x16x16x64xf32> to vector<256x64xf32>
    %c0_81 = arith.constant 0 : index
    %c1_82 = arith.constant 1 : index
    %c9_83 = arith.constant 9 : index
    %c0_84 = arith.constant 0 : index
    %46 = vector.load %arg12[%c0_81, %c1_82, %c9_83, %c0_84] : memref<1x18x32x64xf32, #tpu.memory_space<vmem>>, vector<1x16x16x64xf32>
    %47 = vector.shape_cast %46 : vector<1x16x16x64xf32> to vector<256x64xf32>
    %c0_85 = arith.constant 0 : index
    %c2_86 = arith.constant 2 : index
    %c7_87 = arith.constant 7 : index
    %c0_88 = arith.constant 0 : index
    %48 = vector.load %arg12[%c0_85, %c2_86, %c7_87, %c0_88] : memref<1x18x32x64xf32, #tpu.memory_space<vmem>>, vector<1x16x16x64xf32>
    %49 = vector.shape_cast %48 : vector<1x16x16x64xf32> to vector<256x64xf32>
    %c0_89 = arith.constant 0 : index
    %c2_90 = arith.constant 2 : index
    %c8_91 = arith.constant 8 : index
    %c0_92 = arith.constant 0 : index
    %50 = vector.load %arg12[%c0_89, %c2_90, %c8_91, %c0_92] : memref<1x18x32x64xf32, #tpu.memory_space<vmem>>, vector<1x16x16x64xf32>
    %51 = vector.shape_cast %50 : vector<1x16x16x64xf32> to vector<256x64xf32>
    %c0_93 = arith.constant 0 : index
    %c2_94 = arith.constant 2 : index
    %c9_95 = arith.constant 9 : index
    %c0_96 = arith.constant 0 : index
    %52 = vector.load %arg12[%c0_93, %c2_94, %c9_95, %c0_96] : memref<1x18x32x64xf32, #tpu.memory_space<vmem>>, vector<1x16x16x64xf32>
    %53 = vector.shape_cast %52 : vector<1x16x16x64xf32> to vector<256x64xf32>
    %54 = tpu.concatenate %37, %39, %41, %43, %45, %47, %49, %51, %53 in 1 : vector<256x64xf32>, vector<256x64xf32>, vector<256x64xf32>, vector<256x64xf32>, vector<256x64xf32>, vector<256x64xf32>, vector<256x64xf32>, vector<256x64xf32>, vector<256x64xf32> -> vector<256x576xf32>
    %c0_97 = arith.constant 0 : index
    %c0_98 = arith.constant 0 : index
    %55 = vector.load %arg5[%c0_97, %c0_98] : memref<576x64xf32, #tpu.memory_space<vmem>>, vector<576x64xf32>
    %cst_99 = arith.constant dense<0.000000e+00> : vector<256x64xf32>
    %56 = tpu.matmul %54, %55, %cst_99 {dimension_numbers = #tpu.dot_dimension_numbers<[1], [0], [0], [1], [0, 0, 1, 1], [], []>} : vector<256x576xf32>, vector<576x64xf32>, vector<256x64xf32> -> vector<256x64xf32>
    %c0_100 = arith.constant 0 : index
    %c0_101 = arith.constant 0 : index
    %57 = vector.load %arg6[%c0_100, %c0_101] : memref<1x64xf32, #tpu.memory_space<vmem>>, vector<1x64xf32>
    %58 = vector.broadcast %57 : vector<1x64xf32> to vector<256x64xf32>
    %59 = arith.addf %56, %58 : vector<256x64xf32>
    %cst_102 = arith.constant 0.000000e+00 : f32
    %60 = vector.broadcast %cst_102 : f32 to vector<256x64xf32>
    %61 = arith.maximumf %59, %60 : vector<256x64xf32>
    %62 = vector.shape_cast %61 : vector<256x64xf32> to vector<1x16x16x64xf32>
    %c0_103 = arith.constant 0 : index
    %c1_104 = arith.constant 1 : index
    %c8_105 = arith.constant 8 : index
    %c0_106 = arith.constant 0 : index
    %63 = vector.load %arg12[%c0_103, %c1_104, %c8_105, %c0_106] : memref<1x18x32x64xf32, #tpu.memory_space<vmem>>, vector<1x16x16x64xf32>
    tpu.vector_store %arg12[%c0_103, %c1_104, %c8_105, %c0_106], %62 {strides = array<i32>} : memref<1x18x32x64xf32, #tpu.memory_space<vmem>>, vector<1x16x16x64xf32>,
    %c0_107 = arith.constant 0 : index
    %c0_108 = arith.constant 0 : index
    %c7_109 = arith.constant 7 : index
    %c0_110 = arith.constant 0 : index
    %64 = vector.load %arg12[%c0_107, %c0_108, %c7_109, %c0_110] : memref<1x18x32x64xf32, #tpu.memory_space<vmem>>, vector<1x16x16x64xf32>
    %65 = vector.shape_cast %64 : vector<1x16x16x64xf32> to vector<256x64xf32>
    %c0_111 = arith.constant 0 : index
    %c0_112 = arith.constant 0 : index
    %c8_113 = arith.constant 8 : index
    %c0_114 = arith.constant 0 : index
    %66 = vector.load %arg12[%c0_111, %c0_112, %c8_113, %c0_114] : memref<1x18x32x64xf32, #tpu.memory_space<vmem>>, vector<1x16x16x64xf32>
    %67 = vector.shape_cast %66 : vector<1x16x16x64xf32> to vector<256x64xf32>
    %c0_115 = arith.constant 0 : index
    %c0_116 = arith.constant 0 : index
    %c9_117 = arith.constant 9 : index
    %c0_118 = arith.constant 0 : index
    %68 = vector.load %arg12[%c0_115, %c0_116, %c9_117, %c0_118] : memref<1x18x32x64xf32, #tpu.memory_space<vmem>>, vector<1x16x16x64xf32>
    %69 = vector.shape_cast %68 : vector<1x16x16x64xf32> to vector<256x64xf32>
    %c0_119 = arith.constant 0 : index
    %c1_120 = arith.constant 1 : index
    %c7_121 = arith.constant 7 : index
    %c0_122 = arith.constant 0 : index
    %70 = vector.load %arg12[%c0_119, %c1_120, %c7_121, %c0_122] : memref<1x18x32x64xf32, #tpu.memory_space<vmem>>, vector<1x16x16x64xf32>
    %71 = vector.shape_cast %70 : vector<1x16x16x64xf32> to vector<256x64xf32>
    %c0_123 = arith.constant 0 : index
    %c1_124 = arith.constant 1 : index
    %c8_125 = arith.constant 8 : index
    %c0_126 = arith.constant 0 : index
    %72 = vector.load %arg12[%c0_123, %c1_124, %c8_125, %c0_126] : memref<1x18x32x64xf32, #tpu.memory_space<vmem>>, vector<1x16x16x64xf32>
    %73 = vector.shape_cast %72 : vector<1x16x16x64xf32> to vector<256x64xf32>
    %c0_127 = arith.constant 0 : index
    %c1_128 = arith.constant 1 : index
    %c9_129 = arith.constant 9 : index
    %c0_130 = arith.constant 0 : index
    %74 = vector.load %arg12[%c0_127, %c1_128, %c9_129, %c0_130] : memref<1x18x32x64xf32, #tpu.memory_space<vmem>>, vector<1x16x16x64xf32>
    %75 = vector.shape_cast %74 : vector<1x16x16x64xf32> to vector<256x64xf32>
    %c0_131 = arith.constant 0 : index
    %c2_132 = arith.constant 2 : index
    %c7_133 = arith.constant 7 : index
    %c0_134 = arith.constant 0 : index
    %76 = vector.load %arg12[%c0_131, %c2_132, %c7_133, %c0_134] : memref<1x18x32x64xf32, #tpu.memory_space<vmem>>, vector<1x16x16x64xf32>
    %77 = vector.shape_cast %76 : vector<1x16x16x64xf32> to vector<256x64xf32>
    %c0_135 = arith.constant 0 : index
    %c2_136 = arith.constant 2 : index
    %c8_137 = arith.constant 8 : index
    %c0_138 = arith.constant 0 : index
    %78 = vector.load %arg12[%c0_135, %c2_136, %c8_137, %c0_138] : memref<1x18x32x64xf32, #tpu.memory_space<vmem>>, vector<1x16x16x64xf32>
    %79 = vector.shape_cast %78 : vector<1x16x16x64xf32> to vector<256x64xf32>
    %c0_139 = arith.constant 0 : index
    %c2_140 = arith.constant 2 : index
    %c9_141 = arith.constant 9 : index
    %c0_142 = arith.constant 0 : index
    %80 = vector.load %arg12[%c0_139, %c2_140, %c9_141, %c0_142] : memref<1x18x32x64xf32, #tpu.memory_space<vmem>>, vector<1x16x16x64xf32>
    %81 = vector.shape_cast %80 : vector<1x16x16x64xf32> to vector<256x64xf32>
    %82 = tpu.concatenate %65, %67, %69, %71, %73, %75, %77, %79, %81 in 1 : vector<256x64xf32>, vector<256x64xf32>, vector<256x64xf32>, vector<256x64xf32>, vector<256x64xf32>, vector<256x64xf32>, vector<256x64xf32>, vector<256x64xf32>, vector<256x64xf32> -> vector<256x576xf32>
    %c0_143 = arith.constant 0 : index
    %c0_144 = arith.constant 0 : index
    %83 = vector.load %arg7[%c0_143, %c0_144] : memref<576x8xf32, #tpu.memory_space<vmem>>, vector<576x8xf32>
    %cst_145 = arith.constant dense<0.000000e+00> : vector<256x8xf32>
    %84 = tpu.matmul %82, %83, %cst_145 {dimension_numbers = #tpu.dot_dimension_numbers<[1], [0], [0], [1], [0, 0, 1, 1], [], []>} : vector<256x576xf32>, vector<576x8xf32>, vector<256x8xf32> -> vector<256x8xf32>
    %c0_146 = arith.constant 0 : index
    %c0_147 = arith.constant 0 : index
    %85 = vector.load %arg8[%c0_146, %c0_147] : memref<1x8xf32, #tpu.memory_space<vmem>>, vector<1x8xf32>
    %86 = vector.broadcast %85 : vector<1x8xf32> to vector<256x8xf32>
    %87 = arith.addf %84, %86 : vector<256x8xf32>
    %88 = vector.shape_cast %87 : vector<256x8xf32> to vector<1x16x16x8xf32>
    %89 = vector.extract_strided_slice %88 {offsets = [0, 0, 0, 0], sizes = [1, 16, 16, 4], strides = [1, 1, 1, 1]} : vector<1x16x16x8xf32> to vector<1x16x16x4xf32>
    %90 = vector.extract_strided_slice %88 {offsets = [0, 0, 0, 4], sizes = [1, 16, 16, 4], strides = [1, 1, 1, 1]} : vector<1x16x16x8xf32> to vector<1x16x16x4xf32>
    %cst_148 = arith.constant 1.000000e+00 : f32
    %91 = vector.broadcast %cst_148 : f32 to vector<1x16x16x4xf32>
    %92 = arith.subf %91, %1 : vector<1x16x16x4xf32>
    %93 = arith.mulf %0, %92 : vector<1x16x16x4xf32>
    %94 = math.exp %89 : vector<1x16x16x4xf32>
    %95 = arith.mulf %93, %94 : vector<1x16x16x4xf32>
    %96 = arith.addf %95, %90 : vector<1x16x16x4xf32>
    %97 = arith.addf %2, %96 : vector<1x16x16x4xf32>
    %c0_149 = arith.constant 0 : index
    %c0_150 = arith.constant 0 : index
    %c0_151 = arith.constant 0 : index
    %c0_152 = arith.constant 0 : index
    %98 = vector.load %arg9[%c0_149, %c0_150, %c0_151, %c0_152] : memref<1x16x16x4xf32, #tpu.memory_space<vmem>>, vector<1x16x16x4xf32>
    tpu.vector_store %arg9[%c0_149, %c0_150, %c0_151, %c0_152], %97 {strides = array<i32>} : memref<1x16x16x4xf32, #tpu.memory_space<vmem>>, vector<1x16x16x4xf32>,
    %cst_153 = arith.constant dense<0.000000e+00> : vector<1xf32>
    %99 = vector.multi_reduction <add>, %89, %cst_153 [1, 2, 3] : vector<1x16x16x4xf32> to vector<1xf32>
    %100 = vector.shape_cast %99 : vector<1xf32> to vector<1x1x1x1xf32>
    %c0_154 = arith.constant 0 : index
    %c0_155 = arith.constant 0 : index
    %c0_156 = arith.constant 0 : index
    %c0_157 = arith.constant 0 : index
    %101 = vector.load %arg10[%c0_154, %c0_155, %c0_156, %c0_157] : memref<1x1x1x1xf32, #tpu.memory_space<vmem>>, vector<1x1x1x1xf32>
    tpu.vector_store %arg10[%c0_154, %c0_155, %c0_156, %c0_157], %100 {strides = array<i32>} : memref<1x1x1x1xf32, #tpu.memory_space<vmem>>, vector<1x1x1x1xf32>,
    return
  }
  func.func @transform_0(%arg0: i32) -> (i32, i32, i32, i32) {
    %c0_i32 = arith.constant 0 : i32
    %c0_i32_0 = arith.constant 0 : i32
    %c0_i32_1 = arith.constant 0 : i32
    %c0_i32_2 = arith.constant 0 : i32
    return %arg0, %c0_i32, %c0_i32_0, %c0_i32_1 : i32, i32, i32, i32
  }
  func.func @transform_1(%arg0: i32) -> (i32, i32, i32, i32) {
    %c0_i32 = arith.constant 0 : i32
    %c0_i32_0 = arith.constant 0 : i32
    %c0_i32_1 = arith.constant 0 : i32
    %c0_i32_2 = arith.constant 0 : i32
    %c0_i32_3 = arith.constant 0 : i32
    return %c0_i32, %c0_i32_0, %c0_i32_1, %c0_i32_2 : i32, i32, i32, i32
  }
  func.func @transform_2(%arg0: i32) -> (i32, i32) {
    %c0_i32 = arith.constant 0 : i32
    %c0_i32_0 = arith.constant 0 : i32
    %c0_i32_1 = arith.constant 0 : i32
    return %c0_i32, %c0_i32_0 : i32, i32
  }
  func.func @transform_3(%arg0: i32) -> (i32, i32) {
    %c0_i32 = arith.constant 0 : i32
    %c0_i32_0 = arith.constant 0 : i32
    %c0_i32_1 = arith.constant 0 : i32
    return %c0_i32, %c0_i32_0 : i32, i32
  }
  func.func @transform_4(%arg0: i32) -> (i32, i32) {
    %c0_i32 = arith.constant 0 : i32
    %c0_i32_0 = arith.constant 0 : i32
    %c0_i32_1 = arith.constant 0 : i32
    return %c0_i32, %c0_i32_0 : i32, i32
  }
  func.func @transform_5(%arg0: i32) -> (i32, i32) {
    %c0_i32 = arith.constant 0 : i32
    %c0_i32_0 = arith.constant 0 : i32
    %c0_i32_1 = arith.constant 0 : i32
    return %c0_i32, %c0_i32_0 : i32, i32
  }
  func.func @transform_6(%arg0: i32) -> (i32, i32) {
    %c0_i32 = arith.constant 0 : i32
    %c0_i32_0 = arith.constant 0 : i32
    %c0_i32_1 = arith.constant 0 : i32
    return %c0_i32, %c0_i32_0 : i32, i32
  }
  func.func @transform_7(%arg0: i32) -> (i32, i32) {
    %c0_i32 = arith.constant 0 : i32
    %c0_i32_0 = arith.constant 0 : i32
    %c0_i32_1 = arith.constant 0 : i32
    return %c0_i32, %c0_i32_0 : i32, i32
  }
  func.func @transform_8(%arg0: i32) -> (i32, i32, i32, i32) {
    %c0_i32 = arith.constant 0 : i32
    %c0_i32_0 = arith.constant 0 : i32
    %c0_i32_1 = arith.constant 0 : i32
    %c0_i32_2 = arith.constant 0 : i32
    return %arg0, %c0_i32, %c0_i32_0, %c0_i32_1 : i32, i32, i32, i32
  }
  func.func @transform_9(%arg0: i32) -> (i32, i32, i32, i32) {
    %c0_i32 = arith.constant 0 : i32
    %c0_i32_0 = arith.constant 0 : i32
    %c0_i32_1 = arith.constant 0 : i32
    %c0_i32_2 = arith.constant 0 : i32
    return %arg0, %c0_i32, %c0_i32_0, %c0_i32_1 : i32, i32, i32, i32
  }
}

</mosaic_0001>

<bundles_post_ra>
// kernel: realnvp_forward.2
= control target key start
LH: loop header
LB: loop body
LE: loop exit
PB: predicated region body
PF: predicated region fallthrough
CT: control target
= control target key end

     0   :  { %s8454_s30 = smov 0   ;;  %s12639_s0 = inlined_call_operand.vmem [shape: f32[2,16,16,4], index: 0, kind: input, shape index: {}]   ;;  %s12640_s1 = inlined_call_operand.vmem [shape: f32[1,16,16,4], index: 1, kind: input, shape index: {}]   ;;  %s12641_s2 = inlined_call_operand.vmem [shape: f32[36,64], index: 2, kind: input, shape index: {}]   ;;  %s12642_s3 = inlined_call_operand.vmem [shape: f32[1,64], index: 3, kind: input, shape index: {}]   ;;  %s12643_s4 = inlined_call_operand.vmem [shape: f32[576,64], index: 4, kind: input, shape index: {}]   ;;  %s12644_s5 = inlined_call_operand.vmem [shape: f32[1,64], index: 5, kind: input, shape index: {}]   ;;  %s12645_s6 = inlined_call_operand.vmem [shape: f32[576,8], index: 6, kind: input, shape index: {}]   ;;  %s12646_s7 = inlined_call_operand.vmem [shape: f32[1,8], index: 7, kind: input, shape index: {}]   ;;  %s12647_s8 = inlined_call_operand.vmem [shape: f32[2,16,16,4], index: 8, kind: output, shape index: {0}]   ;;  %s12648_s9 = inlined_call_operand.vmem [shape: f32[2,1,1,1], index: 9, kind: output, shape index: {1}]  }
   0x1 LB: > { %s6754_s10 = sadd.s32 4294967295, %s8390_s30   ;;  %p6758_p0 = scmp.ge.s32.totalorder %s8390_s30, 1  ;;  %s8390_s30 = sphi %s8454_s30, %s20_s30  }
   0x2   : > { %p290_p1 = scmp.lt.s32.totalorder %s8390_s30, 3 }
   0x4   : > { %p291_p2 = pnand %p6758_p0, %p290_p1 }
   0x6   : > { %294 = sbr.rel (%p291_p2) target bundleno = 2026 (0x7ea), region = 52 }
   0xd   : > { %vm438_vm0 = vcmask 31744   ;;  %v8392_v0 = vmov 0.0   ;;  %p329_p3 = scmp.lt.s32.totalorder %s6754_s10, 1  ;;  %v374_v1 = vld [vmem:[%s12640_s1] sm:$0xff]  ;;  %v375_v2 = vld [vmem:[%s12640_s1 + $0x8] sm:$0xff]  ;;  %v376_v3 = vld [vmem:[%s12640_s1 + $0x10] sm:$0xff] }
   0xe   : > { %440 = vst.msk [vmem:[#allocation2 + $0x8] sm:$0xff] %vm438_vm0, %v8392_v0  ;;  %441 = vst.msk [vmem:[#allocation2 + $0x10] sm:$0xff] %vm438_vm0, %v8392_v0  ;;  %v377_v4 = vld [vmem:[%s12640_s1 + $0x18] sm:$0xff]  ;;  %v378_v5 = vld [vmem:[%s12640_s1 + $0x20] sm:$0xff]  ;;  %s8393_s17 = smov 8   ;;  %s8394_s18 = smov 4  }
   0xf   : > { %439 = vst.msk [vmem:[#allocation2] sm:$0xff] %vm438_vm0, %v8392_v0  ;;  %442 = vst.msk [vmem:[#allocation2 + $0x18] sm:$0xff] %vm438_vm0, %v8392_v0  ;;  %s12867_s10 = smov (!%p329_p3, %s6754_s10), 1  ;;  %v379_v6 = vld [vmem:[%s12640_s1 + $0x28] sm:$0xff]  ;;  %v380_v7 = vld [vmem:[%s12640_s1 + $0x30] sm:$0xff]  ;;  %s8395_s19 = smov 12  }
  0x10   : > { %443 = vst.msk [vmem:[#allocation2 + $0x20] sm:$0xff] %vm438_vm0, %v8392_v0  ;;  %444 = vst.msk [vmem:[#allocation2 + $0x28] sm:$0xff] %vm438_vm0, %v8392_v0  ;;  %s6865_s15 = sshll.u32 %s12867_s10, 8  ;;  %v381_v8 = vld [vmem:[%s12640_s1 + $0x38] sm:$0xff]  ;;  %v382_v12 = vld [vmem:[%s12640_s1 + $0x40] sm:$0xff]  ;;  %s8396_s20 = smov 16  }
  0x11   : > { %445 = vst.msk [vmem:[#allocation2 + $0x30] sm:$0xff] %vm438_vm0, %v8392_v0  ;;  %446 = vst.msk [vmem:[#allocation2 + $0x38] sm:$0xff] %vm438_vm0, %v8392_v0  ;;  %s8633_s24 = scalar_lea.vmem %s12639_s0, %s6865_s15  ;;  %v383_v13 = vld [vmem:[%s12640_s1 + $0x48] sm:$0xff]  ;;  %s8397_s21 = smov 20   ;;  %v2193_v43 = vld [vmem:[%s12641_s2] sm:$0xff]  ;;  %vm2302_vm1 = vcmask 1043456  }
  0x12   : > { %447 = vst.msk [vmem:[#allocation2 + $0x40] sm:$0xff] %vm438_vm0, %v8392_v0  ;;  %448 = vst.msk [vmem:[#allocation2 + $0x48] sm:$0xff] %vm438_vm0, %v8392_v0  ;;  %v342_v9 = vld [vmem:[%s8633_s24] sm:$0xff]  ;;  %v343_v10 = vld [vmem:[%s8633_s24 + $0x8] sm:$0xff]  ;;  %s8398_s22 = smov 24   ;;  %s8399_s23 = smov 28  }
  0x13   : > { %449 = vst.msk [vmem:[#allocation2 + $0x50] sm:$0xff] %vm438_vm0, %v8392_v0  ;;  %450 = vst.msk [vmem:[#allocation2 + $0x58] sm:$0xff] %vm438_vm0, %v8392_v0  ;;  %v344_v11 = vld [vmem:[%s8633_s24 + $0x10] sm:$0xff]  ;;  %v8653_v17 = vmul.f32 %v374_v1, %v342_v9  ;;  %v8655_v18 = vmul.f32 %v375_v2, %v343_v10  ;;  %v345_v21 = vld [vmem:[%s8633_s24 + $0x18] sm:$0xff]  ;;  %s8400_s27 = smov 32   ;;  %vm1962_vm2 = vcmask 64512  }
  0x14   : > { %451 = vst.msk [vmem:[#allocation2 + $0x60] sm:$0xff] %vm438_vm0, %v8392_v0  ;;  %452 = vst.msk [vmem:[#allocation2 + $0x68] sm:$0xff] %vm438_vm0, %v8392_v0  ;;  %v8657_v19 = vmul.f32 %v376_v3, %v344_v11  ;;  %v346_v22 = vld [vmem:[%s8633_s24 + $0x20] sm:$0xff]  ;;  %v8667_v23 = vmul.f32 %v377_v4, %v345_v21  ;;  %v347_v25 = vld [vmem:[%s8633_s24 + $0x28] sm:$0xff]  ;;  %vm1995_vm3 = vcmask 97280   ;;  %vm2028_vm4 = vcmask 130048  }
  0x15   : > { %453 = vst.msk [vmem:[#allocation2 + $0x70] sm:$0xff] %vm438_vm0, %v8392_v0  ;;  %454 = vst.msk [vmem:[#allocation2 + $0x78] sm:$0xff] %vm438_vm0, %v8392_v0  ;;  %v681_v14 = vld [vmem:[#allocation2 + $0x9] sm:$0xff]  ;;  %v8671_v24 = vmul.f32 %v378_v5, %v346_v22  ;;  %v349_v27 = vld [vmem:[%s8633_s24 + $0x38] sm:$0xff]  ;;  %v8676_v28 = vmul.f32 %v379_v6, %v347_v25  ;;  %vm2061_vm5 = vcmask 162816   ;;  %vm2094_vm6 = vcmask 195584  }
  0x16   : > { %455 = vst.msk [vmem:[#allocation2 + $0x80] sm:$0xff] %vm438_vm0, %v8392_v0  ;;  %456 = vst.msk [vmem:[#allocation2 + $0x88] sm:$0xff] %vm438_vm0, %v8392_v0  ;;  %v649_v15 = vld [vmem:[#allocation2 + $0x8] sm:$0xff]  ;;  %v682_v16 = vld [vmem:[#allocation2 + $0x11] sm:$0xff]  ;;  %1066 = vrot.lane.b32.xlu1 %v681_v14, %s8393_s17  ;;  %v8680_v30 = vmul.f32 %v381_v8, %v349_v27  ;;  %vm2127_vm7 = vcmask 228352   ;;  %vm2160_vm8 = vcmask 261120  }
  0x17   : > { %457 = vst.msk [vmem:[#allocation2 + $0x90] sm:$0xff] %vm438_vm0, %v8392_v0  ;;  %458 = vst.msk [vmem:[#allocation2 + $0x98] sm:$0xff] %vm438_vm0, %v8392_v0  ;;  %938 = vrot.lane.b32.xlu0 %v649_v15, %s8394_s18  ;;  %v650_v20 = vld [vmem:[#allocation2 + $0x10] sm:$0xff]  ;;  %v350_v31 = vld [vmem:[%s8633_s24 + $0x40] sm:$0xff]  ;;  %vm2205_vm9 = vcmask 293888   ;;  %vm511_vm10 = vcmask 523264  }
  0x18   : > { %459 = vst.msk [vmem:[#allocation2 + $0xa0] sm:$0xff] %vm438_vm0, %v8392_v0  ;;  %460 = vst.msk [vmem:[#allocation2 + $0xa8] sm:$0xff] %vm438_vm0, %v8392_v0  ;;  %v348_v26 = vld [vmem:[%s8633_s24 + $0x30] sm:$0xff]  ;;  %v351_v32 = vld [vmem:[%s8633_s24 + $0x48] sm:$0xff]  ;;  %v8688_v33 = vmul.f32 %v382_v12, %v350_v31  ;;  %s8403_s28 = smov 124   ;;  %vm6672_vm11 = vcmask 0  }
  0x19   : > { %461 = vst.msk [vmem:[#allocation2 + $0xb0] sm:$0xff] %vm438_vm0, %v8392_v0  ;;  %462 = vst.msk [vmem:[#allocation2 + $0xb8] sm:$0xff] %vm438_vm0, %v8392_v0  ;;  %v8678_v29 = vmul.f32 %v380_v7, %v348_v26  ;;  %v8690_v34 = vmul.f32 %v383_v13, %v351_v32  ;;  %v2194_v44 = vld [vmem:[%s12641_s2 + $0x8] sm:$0xff]  ;;  %v2195_v45 = vld [vmem:[%s12641_s2 + $0x10] sm:$0xff] }
  0x1a   : > { %463 = vst.msk [vmem:[#allocation2 + $0xc0] sm:$0xff] %vm438_vm0, %v8392_v0  ;;  %464 = vst.msk [vmem:[#allocation2 + $0xc8] sm:$0xff] %vm438_vm0, %v8392_v0  ;;  %1068 = vrot.lane.b32.xlu1 %v682_v16, %s8393_s17  ;;  %v7170_v46 = vpack.c.bf16 %v2194_v44, %v2193_v43  ;;  %v2196_v47 = vld [vmem:[%s12641_s2 + $0x18] sm:$0xff]  ;;  %v352_v48 = vld [vmem:[%s8633_s24 + $0x50] sm:$0xff] }
  0x1b   : > { %465 = vst.msk [vmem:[#allocation2 + $0xd0] sm:$0xff] %vm438_vm0, %v8392_v0  ;;  %466 = vst.msk [vmem:[#allocation2 + $0xd8] sm:$0xff] %vm438_vm0, %v8392_v0  ;;  %940 = vrot.lane.b32.xlu0 %v650_v20, %s8394_s18  ;;  %v7174_v49 = vpack.c.bf16 %v2196_v47, %v2195_v45  ;;  %v384_v50 = vld [vmem:[%s12640_s1 + $0x50] sm:$0xff]  ;;  %v353_v51 = vld [vmem:[%s8633_s24 + $0x58] sm:$0xff] }
  0x1c   : > { %467 = vst.msk [vmem:[#allocation2 + $0xe0] sm:$0xff] %vm438_vm0, %v8392_v0  ;;  %468 = vst.msk [vmem:[#allocation2 + $0xe8] sm:$0xff] %vm438_vm0, %v8392_v0  ;;  %v385_v52 = vld [vmem:[%s12640_s1 + $0x58] sm:$0xff]  ;;  %v8744_v53 = vmul.f32 %v384_v50, %v352_v48  ;;  %7171 = vmatprep.subr.bf16.mxu0 %v7170_v46  ;;  %v2197_v57 = vld [vmem:[%s12641_s2 + $0x20] sm:$0xf] }
  0x1d   : > { %469 = vst.msk [vmem:[#allocation2 + $0xf0] sm:$0xff] %vm438_vm0, %v8392_v0  ;;  %470 = vst.msk [vmem:[#allocation2 + $0xf8] sm:$0xff] %vm438_vm0, %v8392_v0  ;;  %v8746_v54 = vmul.f32 %v385_v52, %v353_v51  ;;  %7173 = vmatpush3.bf16.msra.mxu0 %v7170_v46  ;;  %v354_v60 = vld [vmem:[%s8633_s24 + $0x60] sm:$0xff]  ;;  %v355_v62 = vld [vmem:[%s8633_s24 + $0x68] sm:$0xff] }
  0x1e   : > { %471 = vst.msk [vmem:[#allocation2 + $0x100] sm:$0xff] %vm438_vm0, %v8392_v0  ;;  %472 = vst.msk [vmem:[#allocation2 + $0x108] sm:$0xff] %vm438_vm0, %v8392_v0  ;;  %7175 = vmatprep.subr.bf16.mxu0 %v7174_v49  ;;  %v386_v61 = vld [vmem:[%s12640_s1 + $0x60] sm:$0xff]  ;;  %v387_v1 = vld [vmem:[%s12640_s1 + $0x68] sm:$0xff] }
  0x1f   : > { %473 = vst.msk [vmem:[#allocation2 + $0x110] sm:$0xff] %vm438_vm0, %v8392_v0  ;;  %474 = vst.msk [vmem:[#allocation2 + $0x118] sm:$0xff] %vm438_vm0, %v8392_v0  ;;  %v8772_v63 = vmul.f32 %v386_v61, %v354_v60  ;;  %v8779_v2 = vmul.f32 %v387_v1, %v355_v62  ;;  %v356_v9 = vld [vmem:[%s8633_s24 + $0x70] sm:$0xff]  ;;  %v357_v11 = vld [vmem:[%s8633_s24 + $0x78] sm:$0xff] }
  0x20   : > { %475 = vst.msk [vmem:[#allocation2 + $0x120] sm:$0xff] %vm438_vm0, %v8392_v0  ;;  %476 = vst.msk [vmem:[#allocation2 + $0x128] sm:$0xff] %vm438_vm0, %v8392_v0  ;;  %v388_v10 = vld [vmem:[%s12640_s1 + $0x70] sm:$0xff]  ;;  %v389_v13 = vld [vmem:[%s12640_s1 + $0x78] sm:$0xff] }
  0x21   : > { %477 = vst.msk [vmem:[#allocation2 + $0x130] sm:$0xff] %vm438_vm0, %v8392_v0  ;;  %478 = vst.msk [vmem:[#allocation2 + $0x138] sm:$0xff] %vm438_vm0, %v8392_v0  ;;  %7177 = vmatpush3.bf16.msra.mxu0 %v7174_v49  ;;  %v8812_v12 = vmul.f32 %v388_v10, %v356_v9  ;;  %v8819_v14 = vmul.f32 %v389_v13, %v357_v11  ;;  %v358_v26 = vld [vmem:[%s8633_s24 + $0x80] sm:$0xff]  ;;  %v359_v31 = vld [vmem:[%s8633_s24 + $0x88] sm:$0xff] }
  0x22   : > { %479 = vst.msk [vmem:[#allocation2 + $0x140] sm:$0xff] %vm438_vm0, %v8392_v0  ;;  %480 = vst.msk [vmem:[#allocation2 + $0x148] sm:$0xff] %vm438_vm0, %v8392_v0  ;;  %6992 = vmatprep.subr.msk.mxu0 %vm2302_vm1, %v2197_v57  ;;  %v390_v27 = vld [vmem:[%s12640_s1 + $0x80] sm:$0xff]  ;;  %v618_v1 = vld [vmem:[#allocation2 + $0xf] sm:$0xff] }
  0x23   : > { %481 = vst.msk [vmem:[#allocation2 + $0x150] sm:$0xff] %vm438_vm0, %v8392_v0  ;;  %482 = vst.msk [vmem:[#allocation2 + $0x158] sm:$0xff] %vm438_vm0, %v8392_v0  ;;  %v8852_v32 = vmul.f32 %v390_v27, %v358_v26  ;;  %v360_v10 = vld [vmem:[%s8633_s24 + $0x90] sm:$0xff]  ;;  %v361_v13 = vld [vmem:[%s8633_s24 + $0x98] sm:$0xff] }
  0x24   : > { %483 = vst.msk [vmem:[#allocation2 + $0x160] sm:$0xff] %vm438_vm0, %v8392_v0  ;;  %484 = vst.msk [vmem:[#allocation2 + $0x168] sm:$0xff] %vm438_vm0, %v8392_v0  ;;  %v392_v11 = vld [vmem:[%s12640_s1 + $0x90] sm:$0xff] }
  0x25   : > { %485 = vst.msk [vmem:[#allocation2 + $0x170] sm:$0xff] %vm438_vm0, %v8392_v0  ;;  %486 = vst.msk [vmem:[#allocation2 + $0x178] sm:$0xff] %vm438_vm0, %v8392_v0  ;;  %6993 = vmatpush3.msk.msra.mxu0 %vm2302_vm1, %v2197_v57 }
  0x26   : > { %487 = vst.msk [vmem:[#allocation2 + $0x180] sm:$0xff] %vm438_vm0, %v8392_v0  ;;  %488 = vst.msk [vmem:[#allocation2 + $0x188] sm:$0xff] %vm438_vm0, %v8392_v0 }
  0x27   : > { %489 = vst.msk [vmem:[#allocation2 + $0x190] sm:$0xff] %vm438_vm0, %v8392_v0  ;;  %490 = vst.msk [vmem:[#allocation2 + $0x198] sm:$0xff] %vm438_vm0, %v8392_v0 }
  0x28   : > { %491 = vst.msk [vmem:[#allocation2 + $0x1a0] sm:$0xff] %vm438_vm0, %v8392_v0  ;;  %492 = vst.msk [vmem:[#allocation2 + $0x1a8] sm:$0xff] %vm438_vm0, %v8392_v0 }
  0x29   : > { %493 = vst.msk [vmem:[#allocation2 + $0x1b0] sm:$0xff] %vm438_vm0, %v8392_v0  ;;  %494 = vst.msk [vmem:[#allocation2 + $0x1b8] sm:$0xff] %vm438_vm0, %v8392_v0 }
  0x2a   : > { %495 = vst.msk [vmem:[#allocation2 + $0x1c0] sm:$0xff] %vm438_vm0, %v8392_v0  ;;  %496 = vst.msk [vmem:[#allocation2 + $0x1c8] sm:$0xff] %vm438_vm0, %v8392_v0 }
  0x2b   : > { %497 = vst.msk [vmem:[#allocation2 + $0x1d0] sm:$0xff] %vm438_vm0, %v8392_v0  ;;  %498 = vst.msk [vmem:[#allocation2 + $0x1d8] sm:$0xff] %vm438_vm0, %v8392_v0 }
  0x2c   : > { %499 = vst.msk [vmem:[#allocation2 + $0x1e0] sm:$0xff] %vm438_vm0, %v8392_v0  ;;  %500 = vst.msk [vmem:[#allocation2 + $0x1e8] sm:$0xff] %vm438_vm0, %v8392_v0 }
  0x2d   : > { %501 = vst.msk [vmem:[#allocation2 + $0x1f0] sm:$0xff] %vm438_vm0, %v8392_v0  ;;  %502 = vst.msk [vmem:[#allocation2 + $0x1f8] sm:$0xff] %vm438_vm0, %v8392_v0 }
  0x2e   : > { %503 = vst.msk [vmem:[#allocation2 + $0x200] sm:$0xff] %vm438_vm0, %v8392_v0  ;;  %504 = vst.msk [vmem:[#allocation2 + $0x208] sm:$0xff] %vm438_vm0, %v8392_v0 }
  0x2f   : > { %505 = vst.msk [vmem:[#allocation2 + $0x210] sm:$0xff] %vm438_vm0, %v8392_v0  ;;  %506 = vst.msk [vmem:[#allocation2 + $0x218] sm:$0xff] %vm438_vm0, %v8392_v0 }
  0x30   : > { %507 = vst.msk [vmem:[#allocation2 + $0x220] sm:$0xff] %vm438_vm0, %v8392_v0  ;;  %508 = vst.msk [vmem:[#allocation2 + $0x228] sm:$0xff] %vm438_vm0, %v8392_v0 }
  0x31   : > { %509 = vst.msk [vmem:[#allocation2 + $0x230] sm:$0xff] %vm438_vm0, %v8392_v0  ;;  %510 = vst.msk [vmem:[#allocation2 + $0x238] sm:$0xff] %vm438_vm0, %v8392_v0 }
  0x32   : > { %12707 = vst [vmem:[#allocation4_spill] sm:$0xff] %v8653_v17  ;;  %12708 = vst [vmem:[#allocation5_spill] sm:$0xff] %v8655_v18 }
  0x33   : > { %12709 = vst [vmem:[#allocation6_spill] sm:$0xff] %v8657_v19  ;;  %585 = vst.msk [vmem:[#allocation2 + $0x28] sm:$0xff] %vm438_vm0, %v8653_v17 }
  0x34   : > { %586 = vst.msk [vmem:[#allocation2 + $0x30] sm:$0xff] %vm438_vm0, %v8655_v18  ;;  %12710 = vst [vmem:[#allocation7_spill] sm:$0xff] %v8667_v23 }
  0x35   : > { %587 = vst.msk [vmem:[#allocation2 + $0x48] sm:$0xff] %vm438_vm0, %v8657_v19  ;;  %12711 = vst [vmem:[#allocation8_spill] sm:$0xff] %v8671_v24 }
  0x36   : > { %12712 = vst [vmem:[#allocation9_spill] sm:$0xff] %v8676_v28  ;;  %12713 = vst [vmem:[#allocation10_spill] sm:$0xff] %v8678_v29 }
  0x37   : > { %12714 = vst [vmem:[#allocation11_spill] sm:$0xff] %v8680_v30  ;;  %588 = vst.msk [vmem:[#allocation2 + $0x50] sm:$0xff] %vm438_vm0, %v8667_v23 }
  0x38   : > { %589 = vst.msk [vmem:[#allocation2 + $0x68] sm:$0xff] %vm438_vm0, %v8671_v24  ;;  %12715 = vst [vmem:[#allocation12_spill] sm:$0xff] %v8688_v33 }
  0x39   : > { %12716 = vst [vmem:[#allocation13_spill] sm:$0xff] %v8690_v34  ;;  %590 = vst.msk [vmem:[#allocation2 + $0x70] sm:$0xff] %vm438_vm0, %v8676_v28 }
  0x3a   : > { %591 = vst.msk [vmem:[#allocation2 + $0x88] sm:$0xff] %vm438_vm0, %v8678_v29  ;;  %592 = vst.msk [vmem:[#allocation2 + $0x90] sm:$0xff] %vm438_vm0, %v8680_v30  ;;  %v8706_v36 = vld [vmem:[#allocation2 + $0x27] sm:$0xff] }
  0x3b   : > { %593 = vst.msk [vmem:[#allocation2 + $0xa8] sm:$0xff] %vm438_vm0, %v8688_v33  ;;  %594 = vst.msk [vmem:[#allocation2 + $0xb0] sm:$0xff] %vm438_vm0, %v8690_v34  ;;  %v8704_v35 = vld [vmem:[#allocation2 + $0x2f] sm:$0xff]  ;;  %1194 = vrot.lane.b32.xlu0 %v8706_v36, %s8395_s19 }
  0x3c   : > { %1196 = vrot.lane.b32.xlu1 %v8704_v35, %s8395_s19  ;;  %v746_v37 = vld [vmem:[#allocation2 + $0x30] sm:$0xff]  ;;  %v745_v38 = vld [vmem:[#allocation2 + $0x28] sm:$0xff]  ;;  %12717 = vst [vmem:[#allocation14_spill] sm:$0xff] %v8744_v53  ;;  %12718 = vst [vmem:[#allocation15_spill] sm:$0xff] %v8746_v54 }
  0x3d   : > { %v778_v39 = vld [vmem:[#allocation2 + $0x31] sm:$0xff]  ;;  %v777_v40 = vld [vmem:[#allocation2 + $0x29] sm:$0xff]  ;;  %595 = vst.msk [vmem:[#allocation2 + $0xc8] sm:$0xff] %vm438_vm0, %v8744_v53  ;;  %596 = vst.msk [vmem:[#allocation2 + $0xd0] sm:$0xff] %vm438_vm0, %v8746_v54 }
  0x3e   : > { %v8716_v41 = vld [vmem:[#allocation2 + $0x4f] sm:$0xff]  ;;  %v8718_v42 = vld [vmem:[#allocation2 + $0x47] sm:$0xff]  ;;  %12719 = vst [vmem:[#allocation16_spill] sm:$0xff] %v8772_v63  ;;  %12720 = vst [vmem:[#allocation17_spill] sm:$0xff] %v8779_v2 }
  0x3f   : > { %1322 = vrot.lane.b32.xlu0 %v745_v38, %s8396_s20  ;;  %v843_v55 = vld [vmem:[#allocation2 + $0x50] sm:$0xff]  ;;  %v842_v56 = vld [vmem:[#allocation2 + $0x48] sm:$0xff]  ;;  %597 = vst.msk [vmem:[#allocation2 + $0xe8] sm:$0xff] %vm438_vm0, %v8772_v63  ;;  %598 = vst.msk [vmem:[#allocation2 + $0xf0] sm:$0xff] %vm438_vm0, %v8779_v2 }
  0x40   : > { %1324 = vrot.lane.b32.xlu1 %v746_v37, %s8396_s20  ;;  %v874_v58 = vld [vmem:[#allocation2 + $0x49] sm:$0xff]  ;;  %v875_v59 = vld [vmem:[#allocation2 + $0x51] sm:$0xff]  ;;  %12721 = vst [vmem:[#allocation18_spill] sm:$0xff] %v8812_v12  ;;  %12722 = vst [vmem:[#allocation19_spill] sm:$0xff] %v8819_v14 }
  0x41   : > { %v8787_v3 = vld [vmem:[#allocation2 + $0x67] sm:$0xff]  ;;  %v8789_v4 = vld [vmem:[#allocation2 + $0x6f] sm:$0xff]  ;;  %599 = vst.msk [vmem:[#allocation2 + $0x108] sm:$0xff] %vm438_vm0, %v8812_v12  ;;  %600 = vst.msk [vmem:[#allocation2 + $0x110] sm:$0xff] %vm438_vm0, %v8819_v14 }
  0x42   : > { %v844_v5 = vld [vmem:[#allocation2 + $0x68] sm:$0xff]  ;;  %v845_v6 = vld [vmem:[#allocation2 + $0x70] sm:$0xff]  ;;  %12723 = vst [vmem:[#allocation20_spill] sm:$0xff] %v8852_v32  ;;  %601 = vst.msk [vmem:[#allocation2 + $0x128] sm:$0xff] %vm438_vm0, %v8852_v32 }
  0x43   : > { %1450 = vrot.lane.b32.xlu0 %v777_v40, %s8397_s21  ;;  %v876_v7 = vld [vmem:[#allocation2 + $0x69] sm:$0xff]  ;;  %v877_v8 = vld [vmem:[#allocation2 + $0x71] sm:$0xff]  ;;  %518 = vst.msk [vmem:[#allocation3 + $0x30] sm:$0xff] %vm511_vm10, %v8392_v0  ;;  %512 = vst.msk [vmem:[#allocation3] sm:$0xff] %vm511_vm10, %v8392_v0 }
  0x44   : > { %1452 = vrot.lane.b32.xlu1 %v778_v39, %s8397_s21  ;;  %v8827_v15 = vld [vmem:[#allocation2 + $0x87] sm:$0xff]  ;;  %v8829_v16 = vld [vmem:[#allocation2 + $0x8f] sm:$0xff]  ;;  %513 = vst.msk [vmem:[#allocation3 + $0x8] sm:$0xff] %vm511_vm10, %v8392_v0  ;;  %514 = vst.msk [vmem:[#allocation3 + $0x10] sm:$0xff] %vm511_vm10, %v8392_v0 }
  0x45   : > { %v846_v20 = vld [vmem:[#allocation2 + $0x88] sm:$0xff]  ;;  %v847_v21 = vld [vmem:[#allocation2 + $0x90] sm:$0xff]  ;;  %515 = vst.msk [vmem:[#allocation3 + $0x18] sm:$0xff] %vm511_vm10, %v8392_v0  ;;  %516 = vst.msk [vmem:[#allocation3 + $0x20] sm:$0xff] %vm511_vm10, %v8392_v0 }
  0x46   : > { %v878_v22 = vld [vmem:[#allocation2 + $0x89] sm:$0xff]  ;;  %v879_v25 = vld [vmem:[#allocation2 + $0x91] sm:$0xff]  ;;  %517 = vst.msk [vmem:[#allocation3 + $0x28] sm:$0xff] %vm511_vm10, %v8392_v0  ;;  %519 = vst.msk [vmem:[#allocation3 + $0x38] sm:$0xff] %vm511_vm10, %v8392_v0 }
  0x47   : > { %1578 = vrot.lane.b32.xlu0 %v8718_v42, %s8398_s22  ;;  %v8867_v43 = vld [vmem:[#allocation2 + $0xa7] sm:$0xff]  ;;  %v8869_v44 = vld [vmem:[#allocation2 + $0xaf] sm:$0xff]  ;;  %520 = vst.msk [vmem:[#allocation3 + $0x40] sm:$0xff] %vm511_vm10, %v8392_v0  ;;  %521 = vst.msk [vmem:[#allocation3 + $0x48] sm:$0xff] %vm511_vm10, %v8392_v0 }
  0x48   : > { %1580 = vrot.lane.b32.xlu1 %v8716_v41, %s8398_s22  ;;  %v8875_v47 = vld [vmem:[#allocation2 + $0xa8] sm:$0xff]  ;;  %v8877_v48 = vld [vmem:[#allocation2 + $0xb0] sm:$0xff]  ;;  %522 = vst.msk [vmem:[#allocation3 + $0x50] sm:$0xff] %vm511_vm10, %v8392_v0  ;;  %523 = vst.msk [vmem:[#allocation3 + $0x58] sm:$0xff] %vm511_vm10, %v8392_v0 }
  0x49   : > { %v8883_v49 = vld [vmem:[#allocation2 + $0xa9] sm:$0xff]  ;;  %v8888_v52 = vld [vmem:[#allocation2 + $0xb1] sm:$0xff]  ;;  %524 = vst.msk [vmem:[#allocation3 + $0x60] sm:$0xff] %vm511_vm10, %v8392_v0  ;;  %525 = vst.msk [vmem:[#allocation3 + $0x68] sm:$0xff] %vm511_vm10, %v8392_v0 }
  0x4a   : > { %526 = vst.msk [vmem:[#allocation3 + $0x70] sm:$0xff] %vm511_vm10, %v8392_v0  ;;  %527 = vst.msk [vmem:[#allocation3 + $0x78] sm:$0xff] %vm511_vm10, %v8392_v0 }
  0x4b   : > { %1706 = vrot.lane.b32.xlu0 %v842_v56, %s8399_s23  ;;  %528 = vst.msk [vmem:[#allocation3 + $0x80] sm:$0xff] %vm511_vm10, %v8392_v0  ;;  %529 = vst.msk [vmem:[#allocation3 + $0x88] sm:$0xff] %vm511_vm10, %v8392_v0 }
  0x4c   : > { %1708 = vrot.lane.b32.xlu1 %v843_v55, %s8399_s23  ;;  %530 = vst.msk [vmem:[#allocation3 + $0x90] sm:$0xff] %vm511_vm10, %v8392_v0  ;;  %531 = vst.msk [vmem:[#allocation3 + $0x98] sm:$0xff] %vm511_vm10, %v8392_v0 }
  0x4d   : > { %532 = vst.msk [vmem:[#allocation3 + $0xa0] sm:$0xff] %vm511_vm10, %v8392_v0  ;;  %533 = vst.msk [vmem:[#allocation3 + $0xa8] sm:$0xff] %vm511_vm10, %v8392_v0 }
  0x4e   : > { %534 = vst.msk [vmem:[#allocation3 + $0xb0] sm:$0xff] %vm511_vm10, %v8392_v0  ;;  %535 = vst.msk [vmem:[#allocation3 + $0xb8] sm:$0xff] %vm511_vm10, %v8392_v0 }
  0x4f   : > { %1834 = vrot.lane.b32.xlu0 %v874_v58, %s8400_s27  ;;  %536 = vst.msk [vmem:[#allocation3 + $0xc0] sm:$0xff] %vm511_vm10, %v8392_v0  ;;  %537 = vst.msk [vmem:[#allocation3 + $0xc8] sm:$0xff] %vm511_vm10, %v8392_v0 }
  0x50   : > { %942 = vrot.lane.b32.xlu1 %v745_v38, %s8394_s18  ;;  %538 = vst.msk [vmem:[#allocation3 + $0xd0] sm:$0xff] %vm511_vm10, %v8392_v0  ;;  %539 = vst.msk [vmem:[#allocation3 + $0xd8] sm:$0xff] %vm511_vm10, %v8392_v0 }
  0x51   : > { %540 = vst.msk [vmem:[#allocation3 + $0xe0] sm:$0xff] %vm511_vm10, %v8392_v0  ;;  %541 = vst.msk [vmem:[#allocation3 + $0xe8] sm:$0xff] %vm511_vm10, %v8392_v0 }
  0x52   : > { %542 = vst.msk [vmem:[#allocation3 + $0xf0] sm:$0xff] %vm511_vm10, %v8392_v0  ;;  %543 = vst.msk [vmem:[#allocation3 + $0xf8] sm:$0xff] %vm511_vm10, %v8392_v0 }
  0x53   : > { %1836 = vrot.lane.b32.xlu0 %v875_v59, %s8400_s27  ;;  %544 = vst.msk [vmem:[#allocation3 + $0x100] sm:$0xff] %vm511_vm10, %v8392_v0  ;;  %545 = vst.msk [vmem:[#allocation3 + $0x108] sm:$0xff] %vm511_vm10, %v8392_v0 }
  0x54   : > { %944 = vrot.lane.b32.xlu1 %v746_v37, %s8394_s18  ;;  %v391_v37 = vld [vmem:[%s12640_s1 + $0x88] sm:$0xff]  ;;  %546 = vst.msk [vmem:[#allocation3 + $0x110] sm:$0xff] %vm511_vm10, %v8392_v0  ;;  %547 = vst.msk [vmem:[#allocation3 + $0x118] sm:$0xff] %vm511_vm10, %v8392_v0 }
  0x55   : > { %v8859_v38 = vmul.f32 %v391_v37, %v359_v31  ;;  %548 = vst.msk [vmem:[#allocation3 + $0x120] sm:$0xff] %vm511_vm10, %v8392_v0  ;;  %549 = vst.msk [vmem:[#allocation3 + $0x128] sm:$0xff] %vm511_vm10, %v8392_v0 }
  0x56   : > { %550 = vst.msk [vmem:[#allocation3 + $0x130] sm:$0xff] %vm511_vm10, %v8392_v0  ;;  %551 = vst.msk [vmem:[#allocation3 + $0x138] sm:$0xff] %vm511_vm10, %v8392_v0 }
  0x57   : > { %1070 = vrot.lane.b32.xlu0 %v777_v40, %s8393_s17  ;;  %12724 = vst [vmem:[#allocation21_spill] sm:$0xff] %v8859_v38  ;;  %602 = vst.msk [vmem:[#allocation2 + $0x130] sm:$0xff] %vm438_vm0, %v8859_v38 }
  0x58   : > { %1072 = vrot.lane.b32.xlu1 %v778_v39, %s8393_s17  ;;  %552 = vst.msk [vmem:[#allocation3 + $0x140] sm:$0xff] %vm511_vm10, %v8392_v0  ;;  %553 = vst.msk [vmem:[#allocation3 + $0x148] sm:$0xff] %vm511_vm10, %v8392_v0 }
  0x59   : > { %554 = vst.msk [vmem:[#allocation3 + $0x150] sm:$0xff] %vm511_vm10, %v8392_v0  ;;  %555 = vst.msk [vmem:[#allocation3 + $0x158] sm:$0xff] %vm511_vm10, %v8392_v0 }
  0x5a   : > { %556 = vst.msk [vmem:[#allocation3 + $0x160] sm:$0xff] %vm511_vm10, %v8392_v0  ;;  %557 = vst.msk [vmem:[#allocation3 + $0x168] sm:$0xff] %vm511_vm10, %v8392_v0 }
  0x5b   : > { %1198 = vrot.lane.b32.xlu0 %v8718_v42, %s8395_s19  ;;  %558 = vst.msk [vmem:[#allocation3 + $0x170] sm:$0xff] %vm511_vm10, %v8392_v0  ;;  %559 = vst.msk [vmem:[#allocation3 + $0x178] sm:$0xff] %vm511_vm10, %v8392_v0 }
  0x5c   : > { %1200 = vrot.lane.b32.xlu1 %v8716_v41, %s8395_s19  ;;  %560 = vst.msk [vmem:[#allocation3 + $0x180] sm:$0xff] %vm511_vm10, %v8392_v0  ;;  %561 = vst.msk [vmem:[#allocation3 + $0x188] sm:$0xff] %vm511_vm10, %v8392_v0 }
  0x5d   : > { %562 = vst.msk [vmem:[#allocation3 + $0x190] sm:$0xff] %vm511_vm10, %v8392_v0  ;;  %563 = vst.msk [vmem:[#allocation3 + $0x198] sm:$0xff] %vm511_vm10, %v8392_v0 }
  0x5e   : > { %564 = vst.msk [vmem:[#allocation3 + $0x1a0] sm:$0xff] %vm511_vm10, %v8392_v0  ;;  %565 = vst.msk [vmem:[#allocation3 + $0x1a8] sm:$0xff] %vm511_vm10, %v8392_v0 }
  0x5f   : > { %1326 = vrot.lane.b32.xlu0 %v842_v56, %s8396_s20  ;;  %566 = vst.msk [vmem:[#allocation3 + $0x1b0] sm:$0xff] %vm511_vm10, %v8392_v0  ;;  %567 = vst.msk [vmem:[#allocation3 + $0x1b8] sm:$0xff] %vm511_vm10, %v8392_v0 }
  0x60   : > { %1328 = vrot.lane.b32.xlu1 %v843_v55, %s8396_s20  ;;  %568 = vst.msk [vmem:[#allocation3 + $0x1c0] sm:$0xff] %vm511_vm10, %v8392_v0  ;;  %569 = vst.msk [vmem:[#allocation3 + $0x1c8] sm:$0xff] %vm511_vm10, %v8392_v0 }
  0x61   : > { %570 = vst.msk [vmem:[#allocation3 + $0x1d0] sm:$0xff] %vm511_vm10, %v8392_v0  ;;  %571 = vst.msk [vmem:[#allocation3 + $0x1d8] sm:$0xff] %vm511_vm10, %v8392_v0 }
  0x62   : > { %572 = vst.msk [vmem:[#allocation3 + $0x1e0] sm:$0xff] %vm511_vm10, %v8392_v0  ;;  %573 = vst.msk [vmem:[#allocation3 + $0x1e8] sm:$0xff] %vm511_vm10, %v8392_v0 }
  0x63   : > { %1454 = vrot.lane.b32.xlu0 %v874_v58, %s8397_s21  ;;  %574 = vst.msk [vmem:[#allocation3 + $0x1f0] sm:$0xff] %vm511_vm10, %v8392_v0  ;;  %575 = vst.msk [vmem:[#allocation3 + $0x1f8] sm:$0xff] %vm511_vm10, %v8392_v0 }
  0x64   : > { %1456 = vrot.lane.b32.xlu1 %v875_v59, %s8397_s21  ;;  %576 = vst.msk [vmem:[#allocation3 + $0x200] sm:$0xff] %vm511_vm10, %v8392_v0  ;;  %577 = vst.msk [vmem:[#allocation3 + $0x208] sm:$0xff] %vm511_vm10, %v8392_v0 }
  0x65   : > { %578 = vst.msk [vmem:[#allocation3 + $0x210] sm:$0xff] %vm511_vm10, %v8392_v0  ;;  %579 = vst.msk [vmem:[#allocation3 + $0x218] sm:$0xff] %vm511_vm10, %v8392_v0 }
  0x66   : > { %580 = vst.msk [vmem:[#allocation3 + $0x220] sm:$0xff] %vm511_vm10, %v8392_v0  ;;  %581 = vst.msk [vmem:[#allocation3 + $0x228] sm:$0xff] %vm511_vm10, %v8392_v0 }
  0x67   : > { %1582 = vrot.lane.b32.xlu0 %v8787_v3, %s8398_s22  ;;  %582 = vst.msk [vmem:[#allocation3 + $0x230] sm:$0xff] %vm511_vm10, %v8392_v0  ;;  %583 = vst.msk [vmem:[#allocation3 + $0x238] sm:$0xff] %vm511_vm10, %v8392_v0  ;;  %v399_v0 = vld [vmem:[%s12640_s1 + $0xc8] sm:$0xff] }
  0x68   : > { %1584 = vrot.lane.b32.xlu1 %v8789_v4, %s8398_s22 }
  0x6b   : > { %1710 = vrot.lane.b32.xlu0 %v844_v5, %s8399_s23 }
  0x6c   : > { %1712 = vrot.lane.b32.xlu1 %v845_v6, %s8399_s23 }
  0x6f   : > { %1838 = vrot.lane.b32.xlu0 %v876_v7, %s8400_s27 }
  0x70   : > { %946 = vrot.lane.b32.xlu1 %v842_v56, %s8394_s18 }
  0x73   : > { %1840 = vrot.lane.b32.xlu0 %v877_v8, %s8400_s27 }
  0x74   : > { %948 = vrot.lane.b32.xlu1 %v843_v55, %s8394_s18 }
  0x77   : > { %1074 = vrot.lane.b32.xlu0 %v874_v58, %s8393_s17 }
  0x78   : > { %1076 = vrot.lane.b32.xlu1 %v875_v59, %s8393_s17  ;;  %v617_v59 = vld [vmem:[#allocation2 + $0x7] sm:$0xff] }
  0x7b   : > { %1202 = vrot.lane.b32.xlu0 %v8787_v3, %s8395_s19 }
  0x7c   : > { %1204 = vrot.lane.b32.xlu1 %v8789_v4, %s8395_s19 }
  0x7f   : > { %1330 = vrot.lane.b32.xlu0 %v844_v5, %s8396_s20 }
  0x80   : > { %1332 = vrot.lane.b32.xlu1 %v845_v6, %s8396_s20 }
  0x83   : > { %1458 = vrot.lane.b32.xlu0 %v876_v7, %s8397_s21 }
  0x84   : > { %1460 = vrot.lane.b32.xlu1 %v877_v8, %s8397_s21 }
  0x87   : > { %1586 = vrot.lane.b32.xlu0 %v8827_v15, %s8398_s22 }
  0x88   : > { %1588 = vrot.lane.b32.xlu1 %v8829_v16, %s8398_s22  ;;  %v1067_v39 = vpop.permute.xlu1 %1066 }
  0x89   : > { %v939_v40 = vpop.permute.xlu0 %938 }
  0x8a   : > { %v1930_v60 = vsel %vm438_vm0, %v617_v59, %v939_v40 }
  0x8b   : > { %1714 = vrot.lane.b32.xlu0 %v846_v20, %s8399_s23 }
  0x8c   : > { %1716 = vrot.lane.b32.xlu1 %v847_v21, %s8399_s23  ;;  %v1069_v45 = vpop.permute.xlu1 %1068 }
  0x8d   : > { %v941_v46 = vpop.permute.xlu0 %940 }
  0x8f   : > { %1842 = vrot.lane.b32.xlu0 %v878_v22, %s8400_s27 }
  0x90   : > { %950 = vrot.lane.b32.xlu1 %v844_v5, %s8394_s18  ;;  %v1963_v5 = vsel %vm1962_vm2, %v1930_v60, %v1067_v39 }
  0x93   : > { %1844 = vrot.lane.b32.xlu0 %v879_v25, %s8400_s27 }
  0x94   : > { %952 = vrot.lane.b32.xlu1 %v845_v6, %s8394_s18  ;;  %v1931_v6 = vsel %vm438_vm0, %v618_v1, %v941_v46 }
  0x95   : > { %v1964_v27 = vsel %vm1962_vm2, %v1931_v6, %v1069_v45  ;;  %v8951_v6 = vld [vmem:[#allocation2 + $0xd0] sm:$0xff] }
  0x97   : > { %1078 = vrot.lane.b32.xlu0 %v876_v7, %s8393_s17 }
  0x98   : > { %1080 = vrot.lane.b32.xlu1 %v877_v8, %s8393_s17 }
  0x9b   : > { %1206 = vrot.lane.b32.xlu0 %v8827_v15, %s8395_s19 }
  0x9c   : > { %1208 = vrot.lane.b32.xlu1 %v8829_v16, %s8395_s19 }
  0x9f   : > { %1334 = vrot.lane.b32.xlu0 %v846_v20, %s8396_s20 }
  0xa0   : > { %1336 = vrot.lane.b32.xlu1 %v847_v21, %s8396_s20 }
  0xa3   : > { %1462 = vrot.lane.b32.xlu0 %v878_v22, %s8397_s21 }
  0xa4   : > { %1464 = vrot.lane.b32.xlu1 %v879_v25, %s8397_s21 }
  0xa7   : > { %1590 = vrot.lane.b32.xlu0 %v8867_v43, %s8398_s22 }
  0xa8   : > { %1592 = vrot.lane.b32.xlu1 %v8869_v44, %s8398_s22 }
  0xab   : > { %1718 = vrot.lane.b32.xlu0 %v8875_v47, %s8399_s23 }
  0xac   : > { %1720 = vrot.lane.b32.xlu1 %v8877_v48, %s8399_s23 }
  0xad   : > { %v1195_v51 = vpop.permute.xlu0 %1194 }
  0xae   : > { %v1197_v50 = vpop.permute.xlu1 %1196  ;;  %v1996_v7 = vsel %vm1995_vm3, %v1963_v5, %v1195_v51 }
  0xaf   : > { %1846 = vrot.lane.b32.xlu0 %v8883_v49, %s8400_s27  ;;  %v1997_v37 = vsel %vm1995_vm3, %v1964_v27, %v1197_v50 }
  0xb0   : > { %954 = vrot.lane.b32.xlu1 %v846_v20, %s8394_s18 }
  0xb1   : > { %v1323_v56 = vpop.permute.xlu0 %1322 }
  0xb2   : > { %v1325_v55 = vpop.permute.xlu1 %1324  ;;  %v2029_v20 = vsel %vm2028_vm4, %v1996_v7, %v1323_v56  ;;  %v8957_v7 = vld [vmem:[#allocation2 + $0xc9] sm:$0xff] }
  0xb3   : > { %1848 = vrot.lane.b32.xlu0 %v8888_v52, %s8400_s27  ;;  %v2030_v51 = vsel %vm2028_vm4, %v1997_v37, %v1325_v55 }
  0xb4   : > { %956 = vrot.lane.b32.xlu1 %v847_v21, %s8394_s18  ;;  %v8909_v21 = vmul.f32 %v392_v11, %v360_v10  ;;  %v8963_v10 = vld [vmem:[#allocation2 + $0xd1] sm:$0xff] }
  0xb5   : > { %v1451_v58 = vpop.permute.xlu0 %1450 }
  0xb6   : > { %v1453_v57 = vpop.permute.xlu1 %1452  ;;  %12725 = vst [vmem:[#allocation22_spill] sm:$0xff] %v8909_v21  ;;  %603 = vst.msk [vmem:[#allocation2 + $0x148] sm:$0xff] %vm438_vm0, %v8909_v21 }
  0xb7   : > { %1082 = vrot.lane.b32.xlu0 %v878_v22, %s8393_s17  ;;  %v393_v22 = vld [vmem:[%s12640_s1 + $0x98] sm:$0xff]  ;;  %v2063_v45 = vsel %vm2061_vm5, %v2030_v51, %v1453_v57  ;;  %v395_v51 = vld [vmem:[%s12640_s1 + $0xa8] sm:$0xff] }
  0xb8   : > { %1084 = vrot.lane.b32.xlu1 %v879_v25, %s8393_s17  ;;  %v2062_v25 = vsel %vm2061_vm5, %v2029_v20, %v1451_v58  ;;  %v8919_v26 = vmul.f32 %v393_v22, %v361_v13  ;;  %v8938_v58 = vld [vmem:[#allocation2 + $0xc7] sm:$0xff] }
  0xb9   : > { %v1579_v62 = vpop.permute.xlu0 %1578 }
  0xba   : > { %v1581_v61 = vpop.permute.xlu1 %1580  ;;  %12726 = vst [vmem:[#allocation23_spill] sm:$0xff] %v8919_v26  ;;  %v2095_v31 = vsel %vm2094_vm6, %v2062_v25, %v1579_v62  ;;  %604 = vst.msk [vmem:[#allocation2 + $0x150] sm:$0xff] %vm438_vm0, %v8919_v26  ;;  %v8941_v62 = vld [vmem:[#allocation2 + $0xcf] sm:$0xff] }
  0xbb   : > { %1210 = vrot.lane.b32.xlu0 %v8867_v43, %s8395_s19  ;;  %v2096_v50 = vsel %vm2094_vm6, %v2063_v45, %v1581_v61  ;;  %v8949_v61 = vld [vmem:[#allocation2 + $0xc8] sm:$0xff] }
  0xbc   : > { %1212 = vrot.lane.b32.xlu1 %v8869_v44, %s8395_s19 }
  0xbd   : > { %v1707_v9 = vpop.permute.xlu0 %1706 }
  0xbe   : > { %v1709_v8 = vpop.permute.xlu1 %1708  ;;  %v2128_v39 = vsel %vm2127_vm7, %v2095_v31, %v1707_v9 }
  0xbf   : > { %1338 = vrot.lane.b32.xlu0 %v8875_v47, %s8396_s20  ;;  %v2129_v59 = vsel %vm2127_vm7, %v2096_v50, %v1709_v8 }
  0xc0   : > { %1340 = vrot.lane.b32.xlu1 %v8877_v48, %s8396_s20 }
  0xc1   : > { %v1835_v40 = vpop.permute.xlu0 %1834 }
  0xc2   : > { %v943_v46 = vpop.permute.xlu1 %942  ;;  %v2161_v56 = vsel %vm2160_vm8, %v2128_v39, %v1835_v40  ;;  %v362_v39 = vld [vmem:[%s8633_s24 + $0xa0] sm:$0xff]  ;;  %v363_v40 = vld [vmem:[%s8633_s24 + $0xa8] sm:$0xff] }
  0xc3   : > { %6994 = vmatprep.mubr.msk.f32.mxu0 %vm2205_vm9, %v2161_v56  ;;  %1466 = vrot.lane.b32.xlu0 %v8883_v49, %s8397_s21  ;;  %v1932_v27 = vsel %vm438_vm0, %v8706_v36, %v943_v46  ;;  %v8997_v50 = vmul.f32 %v395_v51, %v363_v40 }
  0xc4   : > { %1468 = vrot.lane.b32.xlu1 %v8888_v52, %s8397_s21 }
  0xc5   : > { %v1837_v60 = vpop.permute.xlu0 %1836  ;;  %12728 = vst [vmem:[#allocation25_spill] sm:$0xff] %v8997_v50  ;;  %606 = vst.msk [vmem:[#allocation2 + $0x170] sm:$0xff] %vm438_vm0, %v8997_v50 }
  0xc6   : > { %v945_v55 = vpop.permute.xlu1 %944  ;;  %v2162_v57 = vsel %vm2160_vm8, %v2129_v59, %v1837_v60 }
  0xc7   : > { %6995 = vmatmul.mubr.msk.f32.vlgmr.msra.gmra.mrb[0].mxu0 %vm2205_vm9, %v2162_v57  ;;  %1594 = vrot.lane.b32.xlu0 %v8938_v58, %s8398_s22  ;;  %v1933_v56 = vsel %vm438_vm0, %v8704_v35, %v945_v55 }
  0xc8   : > { %1596 = vrot.lane.b32.xlu1 %v8941_v62, %s8398_s22 }
  0xc9   : > { %v1071_v1 = vpop.permute.xlu0 %1070 }
  0xca   : > { %v1073_v5 = vpop.permute.xlu1 %1072  ;;  %v1965_v31 = vsel %vm1962_vm2, %v1932_v27, %v1071_v1 }
  0xcb   : > { %1722 = vrot.lane.b32.xlu0 %v8949_v61, %s8399_s23  ;;  %v1966_v59 = vsel %vm1962_vm2, %v1933_v56, %v1073_v5 }
  0xcc   : > { %1724 = vrot.lane.b32.xlu1 %v8951_v6, %s8399_s23 }
  0xcd   : > { %v1199_v8 = vpop.permute.xlu0 %1198 }
  0xce   : > { %v1201_v9 = vpop.permute.xlu1 %1200 }
  0xcf   : > { %1850 = vrot.lane.b32.xlu0 %v8957_v7, %s8400_s27  ;;  %v1999_v57 = vsel %vm1995_vm3, %v1966_v59, %v1201_v9 }
  0xd0   : > { %958 = vrot.lane.b32.xlu1 %v8875_v47, %s8394_s18 }
  0xd1   : > { %v1327_v11 = vpop.permute.xlu0 %1326 }
  0xd2   : > { %v1329_v13 = vpop.permute.xlu1 %1328 }
  0xd3   : > { %1852 = vrot.lane.b32.xlu0 %v8963_v10, %s8400_s27 }
  0xd4   : > { %960 = vrot.lane.b32.xlu1 %v8877_v48, %s8394_s18  ;;  %v1998_v48 = vsel %vm1995_vm3, %v1965_v31, %v1199_v8  ;;  %v2032_v8 = vsel %vm2028_vm4, %v1999_v57, %v1329_v13  ;;  %v9021_v31 = vld [vmem:[#allocation2 + $0xef] sm:$0xff] }
  0xd5   : > { %v1455_v20 = vpop.permute.xlu0 %1454  ;;  %v2031_v36 = vsel %vm2028_vm4, %v1998_v48, %v1327_v11 }
  0xd6   : > { %v1457_v22 = vpop.permute.xlu1 %1456  ;;  %v2064_v45 = vsel %vm2061_vm5, %v2031_v36, %v1455_v20  ;;  %v9018_v20 = vld [vmem:[#allocation2 + $0xe7] sm:$0xff]  ;;  %v9043_v36 = vld [vmem:[#allocation2 + $0xf1] sm:$0xff] }
  0xd7   : > { %1086 = vrot.lane.b32.xlu0 %v8883_v49, %s8393_s17  ;;  %v2065_v11 = vsel %vm2061_vm5, %v2032_v8, %v1457_v22  ;;  %v364_v8 = vld [vmem:[%s8633_s24 + $0xb0] sm:$0xff] }
  0xd8   : > { %1088 = vrot.lane.b32.xlu1 %v8888_v52, %s8393_s17  ;;  %v394_v52 = vld [vmem:[%s12640_s1 + $0xa0] sm:$0xff] }
  0xd9   : > { %v1583_v47 = vpop.permute.xlu0 %1582  ;;  %v8987_v46 = vmul.f32 %v394_v52, %v362_v39  ;;  %v9031_v39 = vld [vmem:[#allocation2 + $0xf0] sm:$0xff] }
  0xda   : > { %v1585_v25 = vpop.permute.xlu1 %1584  ;;  %v2097_v60 = vsel %vm2094_vm6, %v2064_v45, %v1583_v47 }
  0xdb   : > { %1214 = vrot.lane.b32.xlu0 %v8938_v58, %s8395_s19  ;;  %12727 = vst [vmem:[#allocation24_spill] sm:$0xff] %v8987_v46  ;;  %605 = vst.msk [vmem:[#allocation2 + $0x168] sm:$0xff] %vm438_vm0, %v8987_v46  ;;  %v2098_v9 = vsel %vm2094_vm6, %v2065_v11, %v1585_v25  ;;  %v9029_v25 = vld [vmem:[#allocation2 + $0xe8] sm:$0xff]  ;;  %v397_v11 = vld [vmem:[%s12640_s1 + $0xb8] sm:$0xff] }
  0xdc   : > { %1216 = vrot.lane.b32.xlu1 %v8941_v62, %s8395_s19 }
  0xdd   : > { %v1711_v37 = vpop.permute.xlu0 %1710 }
  0xde   : > { %v1713_v49 = vpop.permute.xlu1 %1712  ;;  %v2130_v35 = vsel %vm2127_vm7, %v2097_v60, %v1711_v37 }
  0xdf   : > { %1342 = vrot.lane.b32.xlu0 %v8949_v61, %s8396_s20  ;;  %v2131_v47 = vsel %vm2127_vm7, %v2098_v9, %v1713_v49  ;;  %v9037_v49 = vld [vmem:[#allocation2 + $0xe9] sm:$0xff] }
  0xe0   : > { %1344 = vrot.lane.b32.xlu1 %v8951_v6, %s8396_s20 }
  0xe1   : > { %v1839_v55 = vpop.permute.xlu0 %1838 }
  0xe2   : > { %v947_v1 = vpop.permute.xlu1 %946  ;;  %v2163_v5 = vsel %vm2160_vm8, %v2130_v35, %v1839_v55 }
  0xe3   : > { %1470 = vrot.lane.b32.xlu0 %v8957_v7, %s8397_s21  ;;  %6997 = vmatprep.mubr.msk.f32.mxu0 %vm2205_vm9, %v2163_v5  ;;  %v1934_v57 = vsel %vm438_vm0, %v8718_v42, %v947_v1  ;;  %v365_v5 = vld [vmem:[%s8633_s24 + $0xb8] sm:$0xff] }
  0xe4   : > { %1472 = vrot.lane.b32.xlu1 %v8963_v10, %s8397_s21 }
  0xe5   : > { %v1841_v27 = vpop.permute.xlu0 %1840 }
  0xe6   : > { %v949_v13 = vpop.permute.xlu1 %948  ;;  %v2164_v22 = vsel %vm2160_vm8, %v2131_v47, %v1841_v27  ;;  %v9077_v27 = vmul.f32 %v397_v11, %v365_v5  ;;  %v9121_v5 = vld [vmem:[#allocation2 + $0x109] sm:$0xff] }
  0xe7   : > { %1598 = vrot.lane.b32.xlu0 %v9018_v20, %s8398_s22  ;;  %6998 = vmatmul.mubr.msk.f32.gmra.mrb[2].mxu0 %vm2205_vm9, %v2164_v22  ;;  %v1935_v9 = vsel %vm438_vm0, %v8716_v41, %v949_v13 }
  0xe8   : > { %1600 = vrot.lane.b32.xlu1 %v9021_v31, %s8398_s22  ;;  %12730 = vst [vmem:[#allocation27_spill] sm:$0xff] %v9077_v27  ;;  %608 = vst.msk [vmem:[#allocation2 + $0x190] sm:$0xff] %vm438_vm0, %v9077_v27 }
  0xe9   : > { %v1075_v48 = vpop.permute.xlu0 %1074 }
  0xea   : > { %v1077_v37 = vpop.permute.xlu1 %1076  ;;  %v1967_v35 = vsel %vm1962_vm2, %v1934_v57, %v1075_v48  ;;  %v9098_v57 = vld [vmem:[#allocation2 + $0x107] sm:$0xff] }
  0xeb   : > { %1726 = vrot.lane.b32.xlu0 %v9029_v25, %s8399_s23  ;;  %v1968_v22 = vsel %vm1962_vm2, %v1935_v9, %v1077_v37  ;;  %v9131_v9 = vld [vmem:[#allocation2 + $0x111] sm:$0xff] }
  0xec   : > { %1728 = vrot.lane.b32.xlu1 %v9031_v39, %s8399_s23 }
  0xed   : > { %v1203_v52 = vpop.permute.xlu0 %1202 }
  0xee   : > { %v1205_v40 = vpop.permute.xlu1 %1204 }
  0xef   : > { %1854 = vrot.lane.b32.xlu0 %v9037_v49, %s8400_s27 }
  0xf0   : > { %962 = vrot.lane.b32.xlu1 %v8949_v61, %s8394_s18 }
  0xf1   : > { %v1331_v51 = vpop.permute.xlu0 %1330 }
  0xf2   : > { %v1333_v56 = vpop.permute.xlu1 %1332 }
  0xf3   : > { %1856 = vrot.lane.b32.xlu0 %v9043_v36, %s8400_s27 }
  0xf4   : > { %964 = vrot.lane.b32.xlu1 %v8951_v6, %s8394_s18  ;;  %v2000_v6 = vsel %vm1995_vm3, %v1967_v35, %v1203_v52  ;;  %v2001_v52 = vsel %vm1995_vm3, %v1968_v22, %v1205_v40 }
  0xf5   : > { %v1459_v45 = vpop.permute.xlu0 %1458  ;;  %v2033_v42 = vsel %vm2028_vm4, %v2000_v6, %v1331_v51 }
  0xf6   : > { %v1461_v59 = vpop.permute.xlu1 %1460  ;;  %v2066_v47 = vsel %vm2061_vm5, %v2033_v42, %v1459_v45  ;;  %v2034_v45 = vsel %vm2028_vm4, %v2001_v52, %v1333_v56 }
  0xf7   : > { %1090 = vrot.lane.b32.xlu0 %v8957_v7, %s8393_s17 }
  0xf8   : > { %1092 = vrot.lane.b32.xlu1 %v8963_v10, %s8393_s17  ;;  %v396_v10 = vld [vmem:[%s12640_s1 + $0xb0] sm:$0xff] }
  0xf9   : > { %v1587_v61 = vpop.permute.xlu0 %1586  ;;  %v9067_v1 = vmul.f32 %v396_v10, %v364_v8 }
  0xfa   : > { %v1589_v60 = vpop.permute.xlu1 %1588  ;;  %v2099_v48 = vsel %vm2094_vm6, %v2066_v47, %v1587_v61  ;;  %v2067_v61 = vsel %vm2061_vm5, %v2034_v45, %v1461_v59  ;;  %v398_v45 = vld [vmem:[%s12640_s1 + $0xc0] sm:$0xff] }
  0xfb   : > { %1218 = vrot.lane.b32.xlu0 %v9018_v20, %s8395_s19  ;;  %12729 = vst [vmem:[#allocation26_spill] sm:$0xff] %v9067_v1  ;;  %607 = vst.msk [vmem:[#allocation2 + $0x188] sm:$0xff] %vm438_vm0, %v9067_v1  ;;  %v2100_v40 = vsel %vm2094_vm6, %v2067_v61, %v1589_v60  ;;  %v9111_v60 = vld [vmem:[#allocation2 + $0x108] sm:$0xff] }
  0xfc   : > { %1220 = vrot.lane.b32.xlu1 %v9021_v31, %s8395_s19 }
  0xfd   : > { %v1715_v55 = vpop.permute.xlu0 %1714 }
  0xfe   : > { %v1717_v7 = vpop.permute.xlu1 %1716  ;;  %v2132_v41 = vsel %vm2127_vm7, %v2099_v48, %v1715_v55  ;;  %v9103_v55 = vld [vmem:[#allocation2 + $0x10f] sm:$0xff] }
  0xff   : > { %1346 = vrot.lane.b32.xlu0 %v9029_v25, %s8396_s20  ;;  %v2133_v35 = vsel %vm2127_vm7, %v2100_v40, %v1717_v7  ;;  %v9115_v7 = vld [vmem:[#allocation2 + $0x110] sm:$0xff] }
 0x100   : > { %1348 = vrot.lane.b32.xlu1 %v9031_v39, %s8396_s20 }
 0x101   : > { %v1843_v13 = vpop.permute.xlu0 %1842 }
 0x102   : > { %v951_v51 = vpop.permute.xlu1 %950  ;;  %v2165_v37 = vsel %vm2160_vm8, %v2132_v41, %v1843_v13 }
 0x103   : > { %1474 = vrot.lane.b32.xlu0 %v9037_v49, %s8397_s21  ;;  %7000 = vmatprep.mubr.msk.f32.mxu0 %vm2205_vm9, %v2165_v37  ;;  %v1936_v13 = vsel %vm438_vm0, %v8787_v3, %v951_v51  ;;  %v366_v51 = vld [vmem:[%s8633_s24 + $0xc0] sm:$0xff]  ;;  %v367_v37 = vld [vmem:[%s8633_s24 + $0xc8] sm:$0xff] }
 0x104   : > { %1476 = vrot.lane.b32.xlu1 %v9043_v36, %s8397_s21  ;;  %v9316_v40 = vmul.f32 %v398_v45, %v366_v51  ;;  %v9358_v51 = vld [vmem:[#allocation2 + $0x12f] sm:$0xff] }
 0x105   : > { %v1845_v6 = vpop.permute.xlu0 %1844 }
 0x106   : > { %v9101_v56 = vpop.permute.xlu1 %952  ;;  %v2166_v59 = vsel %vm2160_vm8, %v2133_v35, %v1845_v6  ;;  %12731 = vst [vmem:[#allocation28_spill] sm:$0xff] %v9316_v40  ;;  %609 = vst.msk [vmem:[#allocation2 + $0x1a8] sm:$0xff] %vm438_vm0, %v9316_v40 }
 0x107   : > { %1602 = vrot.lane.b32.xlu0 %v9098_v57, %s8398_s22  ;;  %7001 = vmatmul.mubr.msk.f32.gmra.mrb[4].mxu0 %vm2205_vm9, %v2166_v59  ;;  %v1937_v35 = vsel %vm438_vm0, %v8789_v4, %v9101_v56  ;;  %v9328_v59 = vmul.f32 %v399_v0, %v367_v37 }
 0x108   : > { %1604 = vrot.lane.b32.xlu1 %v9103_v55, %s8398_s22 }
 0x109   : > { %v1079_v8 = vpop.permute.xlu0 %1078  ;;  %12732 = vst [vmem:[#allocation29_spill] sm:$0xff] %v9328_v59  ;;  %610 = vst.msk [vmem:[#allocation2 + $0x1b0] sm:$0xff] %vm438_vm0, %v9328_v59 }
 0x10a   : > { %v9113_v10 = vpop.permute.xlu1 %1080 }
 0x10b   : > { %1730 = vrot.lane.b32.xlu0 %v9111_v60, %s8399_s23 }
 0x10c   : > { %1732 = vrot.lane.b32.xlu1 %v9115_v7, %s8399_s23 }
 0x10d   : > { %v9123_v42 = vpop.permute.xlu0 %1206 }
 0x10e   : > { %v9125_v11 = vpop.permute.xlu1 %1208 }
 0x10f   : > { %1858 = vrot.lane.b32.xlu0 %v9121_v5, %s8400_s27 }
 0x110   : > { %966 = vrot.lane.b32.xlu1 %v9029_v25, %s8394_s18 }
 0x111   : > { %v9133_v47 = vpop.permute.xlu0 %1334 }
 0x112   : > { %v9135_v22 = vpop.permute.xlu1 %1336 }
 0x113   : > { %1860 = vrot.lane.b32.xlu0 %v9131_v9, %s8400_s27 }
 0x114   : > { %968 = vrot.lane.b32.xlu1 %v9031_v39, %s8394_s18  ;;  %v9158_v39 = vsel %vm1962_vm2, %v1936_v13, %v1079_v8  ;;  %v1970_v8 = vsel %vm1962_vm2, %v1937_v35, %v9113_v10 }
 0x115   : > { %v9141_v48 = vpop.permute.xlu0 %1462  ;;  %v2002_v3 = vsel %vm1995_vm3, %v9158_v39, %v9123_v42  ;;  %v2003_v4 = vsel %vm1995_vm3, %v1970_v8, %v9125_v11  ;;  %v9355_v39 = vld [vmem:[#allocation2 + $0x127] sm:$0xff] }
 0x116   : > { %v9143_v52 = vpop.permute.xlu1 %1464  ;;  %v2035_v61 = vsel %vm2028_vm4, %v2002_v3, %v9133_v47  ;;  %v2036_v10 = vsel %vm2028_vm4, %v2003_v4, %v9135_v22 }
 0x117   : > { %1094 = vrot.lane.b32.xlu0 %v9037_v49, %s8393_s17  ;;  %v2068_v6 = vsel %vm2061_vm5, %v2035_v61, %v9141_v48  ;;  %v2069_v13 = vsel %vm2061_vm5, %v2036_v10, %v9143_v52  ;;  %v9368_v61 = vld [vmem:[#allocation2 + $0x130] sm:$0xff] }
 0x118   : > { %1096 = vrot.lane.b32.xlu1 %v9043_v36, %s8393_s17 }
 0x119   : > { %v9149_v25 = vpop.permute.xlu0 %1590 }
 0x11a   : > { %v9151_v41 = vpop.permute.xlu1 %1592  ;;  %v2101_v42 = vsel %vm2094_vm6, %v2068_v6, %v9149_v25  ;;  %v9380_v6 = vld [vmem:[#allocation2 + $0x131] sm:$0xff] }
 0x11b   : > { %1222 = vrot.lane.b32.xlu0 %v9098_v57, %s8395_s19  ;;  %v2102_v11 = vsel %vm2094_vm6, %v2069_v13, %v9151_v41  ;;  %v9366_v41 = vld [vmem:[#allocation2 + $0x128] sm:$0xff] }
 0x11c   : > { %1224 = vrot.lane.b32.xlu1 %v9103_v55, %s8395_s19 }
 0x11d   : > { %v1719_v49 = vpop.permute.xlu0 %1718 }
 0x11e   : > { %v1721_v36 = vpop.permute.xlu1 %1720  ;;  %v2134_v56 = vsel %vm2127_vm7, %v2101_v42, %v1719_v49 }
 0x11f   : > { %1350 = vrot.lane.b32.xlu0 %v9111_v60, %s8396_s20  ;;  %v2135_v22 = vsel %vm2127_vm7, %v2102_v11, %v1721_v36  ;;  %v9374_v36 = vld [vmem:[#allocation2 + $0x129] sm:$0xff]  ;;  %v369_v11 = vld [vmem:[%s8633_s24 + $0xd8] sm:$0xff] }
 0x120   : > { %1352 = vrot.lane.b32.xlu1 %v9115_v7, %s8396_s20 }
 0x121   : > { %v1847_v47 = vpop.permute.xlu0 %1846 }
 0x122   : > { %v955_v48 = vpop.permute.xlu1 %954  ;;  %v2167_v25 = vsel %vm2160_vm8, %v2134_v56, %v1847_v47 }
 0x123   : > { %1478 = vrot.lane.b32.xlu0 %v9121_v5, %s8397_s21  ;;  %7003 = vmatprep.mubr.msk.f32.mxu0 %vm2205_vm9, %v2167_v25  ;;  %v1938_v10 = vsel %vm438_vm0, %v8827_v15, %v955_v48 }
 0x124   : > { %1480 = vrot.lane.b32.xlu1 %v9131_v9, %s8397_s21 }
 0x125   : > { %v1849_v3 = vpop.permute.xlu0 %1848 }
 0x126   : > { %v957_v49 = vpop.permute.xlu1 %956  ;;  %v2168_v52 = vsel %vm2160_vm8, %v2135_v22, %v1849_v3  ;;  %v401_v3 = vld [vmem:[%s12640_s1 + $0xd8] sm:$0xff] }
 0x127   : > { %1606 = vrot.lane.b32.xlu0 %v9355_v39, %s8398_s22  ;;  %7004 = vmatmul.mubr.msk.f32.gmra.mrb[6].mxu0 %vm2205_vm9, %v2168_v52  ;;  %v1939_v52 = vsel %vm438_vm0, %v8829_v16, %v957_v49 }
 0x128   : > { %1608 = vrot.lane.b32.xlu1 %v9358_v51, %s8398_s22 }
 0x129   : > { %v1083_v45 = vpop.permute.xlu0 %1082 }
 0x12a   : > { %v1085_v37 = vpop.permute.xlu1 %1084  ;;  %v1971_v25 = vsel %vm1962_vm2, %v1938_v10, %v1083_v45 }
 0x12b   : > { %1734 = vrot.lane.b32.xlu0 %v9366_v41, %s8399_s23  ;;  %v1972_v10 = vsel %vm1962_vm2, %v1939_v52, %v1085_v37  ;;  %v9454_v52 = vld [vmem:[#allocation2 + $0x149] sm:$0xff] }
 0x12c   : > { %1736 = vrot.lane.b32.xlu1 %v9368_v61, %s8399_s23 }
 0x12d   : > { %v1211_v0 = vpop.permute.xlu0 %1210 }
 0x12e   : > { %v1213_v35 = vpop.permute.xlu1 %1212 }
 0x12f   : > { %1862 = vrot.lane.b32.xlu0 %v9374_v36, %s8400_s27 }
 0x130   : > { %970 = vrot.lane.b32.xlu1 %v9111_v60, %s8394_s18 }
 0x131   : > { %v1339_v8 = vpop.permute.xlu0 %1338 }
 0x132   : > { %v1341_v42 = vpop.permute.xlu1 %1340 }
 0x133   : > { %1864 = vrot.lane.b32.xlu0 %v9380_v6, %s8400_s27 }
 0x134   : > { %972 = vrot.lane.b32.xlu1 %v9115_v7, %s8394_s18  ;;  %v2004_v7 = vsel %vm1995_vm3, %v1971_v25, %v1211_v0  ;;  %v9414_v0 = vmul.f32 %v401_v3, %v369_v11  ;;  %v2005_v25 = vsel %vm1995_vm3, %v1972_v10, %v1213_v35  ;;  %v9448_v3 = vld [vmem:[#allocation2 + $0x150] sm:$0xff] }
 0x135   : > { %v1467_v4 = vpop.permute.xlu0 %1466  ;;  %v2037_v22 = vsel %vm2028_vm4, %v2004_v7, %v1339_v8 }
 0x136   : > { %v1469_v56 = vpop.permute.xlu1 %1468  ;;  %v2070_v45 = vsel %vm2061_vm5, %v2037_v22, %v1467_v4  ;;  %12734 = vst [vmem:[#allocation31_spill] sm:$0xff] %v9414_v0  ;;  %612 = vst.msk [vmem:[#allocation2 + $0x1d0] sm:$0xff] %vm438_vm0, %v9414_v0  ;;  %v2038_v4 = vsel %vm2028_vm4, %v2005_v25, %v1341_v42 }
 0x137   : > { %1098 = vrot.lane.b32.xlu0 %v9121_v5, %s8393_s17  ;;  %v368_v5 = vld [vmem:[%s8633_s24 + $0xd0] sm:$0xff] }
 0x138   : > { %1100 = vrot.lane.b32.xlu1 %v9131_v9, %s8393_s17  ;;  %v400_v9 = vld [vmem:[%s12640_s1 + $0xd0] sm:$0xff] }
 0x139   : > { %v1595_v60 = vpop.permute.xlu0 %1594  ;;  %v9404_v48 = vmul.f32 %v400_v9, %v368_v5  ;;  %v9438_v9 = vld [vmem:[#allocation2 + $0x14f] sm:$0xff] }
 0x13a   : > { %v1597_v47 = vpop.permute.xlu1 %1596  ;;  %v2103_v8 = vsel %vm2094_vm6, %v2070_v45, %v1595_v60  ;;  %v2071_v60 = vsel %vm2061_vm5, %v2038_v4, %v1469_v56 }
 0x13b   : > { %1226 = vrot.lane.b32.xlu0 %v9355_v39, %s8395_s19  ;;  %12733 = vst [vmem:[#allocation30_spill] sm:$0xff] %v9404_v48  ;;  %611 = vst.msk [vmem:[#allocation2 + $0x1c8] sm:$0xff] %vm438_vm0, %v9404_v48  ;;  %v2104_v35 = vsel %vm2094_vm6, %v2071_v60, %v1597_v47  ;;  %v9446_v47 = vld [vmem:[#allocation2 + $0x148] sm:$0xff] }
 0x13c   : > { %1228 = vrot.lane.b32.xlu1 %v9358_v51, %s8395_s19 }
 0x13d   : > { %v1723_v13 = vpop.permute.xlu0 %1722 }
 0x13e   : > { %v1725_v15 = vpop.permute.xlu1 %1724  ;;  %v2136_v16 = vsel %vm2127_vm7, %v2103_v8, %v1723_v13  ;;  %v9435_v13 = vld [vmem:[#allocation2 + $0x147] sm:$0xff]  ;;  %v9460_v8 = vld [vmem:[#allocation2 + $0x151] sm:$0xff] }
 0x13f   : > { %1354 = vrot.lane.b32.xlu0 %v9366_v41, %s8396_s20  ;;  %v2137_v5 = vsel %vm2127_vm7, %v2104_v35, %v1725_v15 }
 0x140   : > { %1356 = vrot.lane.b32.xlu1 %v9368_v61, %s8396_s20 }
 0x141   : > { %v1851_v49 = vpop.permute.xlu0 %1850 }
 0x142   : > { %v2169_v37 = vsel %vm2160_vm8, %v2136_v16, %v1851_v49  ;;  %v959_v7 = vpop.permute.xlu1 %958 }
 0x143   : > { %1482 = vrot.lane.b32.xlu0 %v9374_v36, %s8397_s21  ;;  %7006 = vmatprep.mubr.msk.f32.mxu0 %vm2205_vm9, %v2169_v37  ;;  %v1940_v60 = vsel %vm438_vm0, %v8867_v43, %v959_v7 }
 0x144   : > { %1484 = vrot.lane.b32.xlu1 %v9380_v6, %s8397_s21 }
 0x145   : > { %v1853_v42 = vpop.permute.xlu0 %1852 }
 0x146   : > { %v2170_v11 = vsel %vm2160_vm8, %v2137_v5, %v1853_v42  ;;  %v961_v56 = vpop.permute.xlu1 %960  ;;  %v371_v42 = vld [vmem:[%s8633_s24 + $0xe8] sm:$0xff] }
 0x147   : > { %1610 = vrot.lane.b32.xlu0 %v9435_v13, %s8398_s22  ;;  %7007 = vmatmul.mubr.msk.f32.gmra.mrb[8].mxu0 %vm2205_vm9, %v2170_v11 }
 0x148   : > { %1612 = vrot.lane.b32.xlu1 %v9438_v9, %s8398_s22 }
 0x149   : > { %v1087_v22 = vpop.permute.xlu0 %1086 }
 0x14a   : > { %v1089_v15 = vpop.permute.xlu1 %1088  ;;  %v1973_v35 = vsel %vm1962_vm2, %v1940_v60, %v1087_v22  ;;  %v403_v22 = vld [vmem:[%s12640_s1 + $0xe8] sm:$0xff]  ;;  %v1941_v60 = vsel %vm438_vm0, %v8869_v44, %v961_v56 }
 0x14b   : > { %1738 = vrot.lane.b32.xlu0 %v9446_v47, %s8399_s23  ;;  %v1974_v0 = vsel %vm1962_vm2, %v1941_v60, %v1089_v15  ;;  %v9534_v60 = vld [vmem:[#allocation2 + $0x169] sm:$0xff] }
 0x14c   : > { %1740 = vrot.lane.b32.xlu1 %v9448_v3, %s8399_s23 }
 0x14d   : > { %v1215_v45 = vpop.permute.xlu0 %1214 }
 0x14e   : > { %v1217_v10 = vpop.permute.xlu1 %1216 }
 0x14f   : > { %1866 = vrot.lane.b32.xlu0 %v9454_v52, %s8400_s27 }
 0x150   : > { %974 = vrot.lane.b32.xlu1 %v9366_v41, %s8394_s18 }
 0x151   : > { %v1343_v25 = vpop.permute.xlu0 %1342 }
 0x152   : > { %v1345_v16 = vpop.permute.xlu1 %1344 }
 0x153   : > { %1868 = vrot.lane.b32.xlu0 %v9460_v8, %s8400_s27 }
 0x154   : > { %976 = vrot.lane.b32.xlu1 %v9368_v61, %s8394_s18  ;;  %v2006_v61 = vsel %vm1995_vm3, %v1973_v35, %v1215_v45  ;;  %v9494_v35 = vmul.f32 %v403_v22, %v371_v42  ;;  %v9528_v22 = vld [vmem:[#allocation2 + $0x170] sm:$0xff] }
 0x155   : > { %v1471_v49 = vpop.permute.xlu0 %1470  ;;  %v2039_v11 = vsel %vm2028_vm4, %v2006_v61, %v1343_v25  ;;  %v2007_v61 = vsel %vm1995_vm3, %v1974_v0, %v1217_v10  ;;  %v9515_v10 = vld [vmem:[#allocation2 + $0x167] sm:$0xff] }
 0x156   : > { %v1473_v4 = vpop.permute.xlu1 %1472  ;;  %v2072_v45 = vsel %vm2061_vm5, %v2039_v11, %v1471_v49  ;;  %12736 = vst [vmem:[#allocation33_spill] sm:$0xff] %v9494_v35  ;;  %614 = vst.msk [vmem:[#allocation2 + $0x1f0] sm:$0xff] %vm438_vm0, %v9494_v35  ;;  %v2040_v49 = vsel %vm2028_vm4, %v2007_v61, %v1345_v16  ;;  %v9540_v61 = vld [vmem:[#allocation2 + $0x171] sm:$0xff] }
 0x157   : > { %1102 = vrot.lane.b32.xlu0 %v9374_v36, %s8393_s17  ;;  %v370_v36 = vld [vmem:[%s8633_s24 + $0xe0] sm:$0xff] }
 0x158   : > { %1104 = vrot.lane.b32.xlu1 %v9380_v6, %s8393_s17  ;;  %v402_v6 = vld [vmem:[%s12640_s1 + $0xe0] sm:$0xff] }
 0x159   : > { %v1599_v41 = vpop.permute.xlu0 %1598  ;;  %v9484_v7 = vmul.f32 %v402_v6, %v370_v36  ;;  %v9518_v6 = vld [vmem:[#allocation2 + $0x16f] sm:$0xff] }
 0x15a   : > { %v1601_v37 = vpop.permute.xlu1 %1600  ;;  %v2105_v25 = vsel %vm2094_vm6, %v2072_v45, %v1599_v41  ;;  %v2073_v41 = vsel %vm2061_vm5, %v2040_v49, %v1473_v4 }
 0x15b   : > { %1230 = vrot.lane.b32.xlu0 %v9435_v13, %s8395_s19  ;;  %12735 = vst [vmem:[#allocation32_spill] sm:$0xff] %v9484_v7  ;;  %613 = vst.msk [vmem:[#allocation2 + $0x1e8] sm:$0xff] %vm438_vm0, %v9484_v7  ;;  %v2106_v0 = vsel %vm2094_vm6, %v2073_v41, %v1601_v37  ;;  %v9526_v37 = vld [vmem:[#allocation2 + $0x168] sm:$0xff] }
 0x15c   : > { %1232 = vrot.lane.b32.xlu1 %v9438_v9, %s8395_s19 }
 0x15d   : > { %v1727_v5 = vpop.permute.xlu0 %1726 }
 0x15e   : > { %v1729_v43 = vpop.permute.xlu1 %1728  ;;  %v2138_v44 = vsel %vm2127_vm7, %v2105_v25, %v1727_v5 }
 0x15f   : > { %1358 = vrot.lane.b32.xlu0 %v9446_v47, %s8396_s20  ;;  %v2139_v5 = vsel %vm2127_vm7, %v2106_v0, %v1729_v43 }
 0x160   : > { %1360 = vrot.lane.b32.xlu1 %v9448_v3, %s8396_s20 }
 0x161   : > { %v1855_v56 = vpop.permute.xlu0 %1854 }
 0x162   : > { %v2171_v15 = vsel %vm2160_vm8, %v2138_v44, %v1855_v56  ;;  %v963_v36 = vpop.permute.xlu1 %962 }
 0x163   : > { %1486 = vrot.lane.b32.xlu0 %v9454_v52, %s8397_s21  ;;  %7009 = vmatprep.mubr.msk.f32.mxu0 %vm2205_vm9, %v2171_v15  ;;  %v1942_v0 = vsel %vm438_vm0, %v8938_v58, %v963_v36 }
 0x164   : > { %1488 = vrot.lane.b32.xlu1 %v9460_v8, %s8397_s21 }
 0x165   : > { %v1857_v16 = vpop.permute.xlu0 %1856 }
 0x166   : > { %v2172_v42 = vsel %vm2160_vm8, %v2139_v5, %v1857_v16  ;;  %v965_v4 = vpop.permute.xlu1 %964 }
 0x167   : > { %1614 = vrot.lane.b32.xlu0 %v9515_v10, %s8398_s22  ;;  %7010 = vmatmul.mubr.msk.f32.gmra.mrb[10].mxu0 %vm2205_vm9, %v2172_v42  ;;  %v373_v42 = vld [vmem:[%s8633_s24 + $0xf8] sm:$0xff] }
 0x168   : > { %1616 = vrot.lane.b32.xlu1 %v9518_v6, %s8398_s22 }
 0x169   : > { %v1091_v11 = vpop.permute.xlu0 %1090 }
 0x16a   : > { %v1093_v43 = vpop.permute.xlu1 %1092  ;;  %v1975_v5 = vsel %vm1962_vm2, %v1942_v0, %v1091_v11  ;;  %v405_v11 = vld [vmem:[%s12640_s1 + $0xf8] sm:$0xff]  ;;  %v1943_v0 = vsel %vm438_vm0, %v8941_v62, %v965_v4 }
 0x16b   : > { %1742 = vrot.lane.b32.xlu0 %v9526_v37, %s8399_s23  ;;  %v1976_v7 = vsel %vm1962_vm2, %v1943_v0, %v1093_v43  ;;  %v9614_v0 = vld [vmem:[#allocation2 + $0x189] sm:$0xff] }
 0x16c   : > { %1744 = vrot.lane.b32.xlu1 %v9528_v22, %s8399_s23 }
 0x16d   : > { %v1219_v45 = vpop.permute.xlu0 %1218 }
 0x16e   : > { %v1221_v25 = vpop.permute.xlu1 %1220 }
 0x16f   : > { %1870 = vrot.lane.b32.xlu0 %v9534_v60, %s8400_s27 }
 0x170   : > { %978 = vrot.lane.b32.xlu1 %v9446_v47, %s8394_s18 }
 0x171   : > { %v1347_v44 = vpop.permute.xlu0 %1346 }
 0x172   : > { %v1349_v56 = vpop.permute.xlu1 %1348 }
 0x173   : > { %1872 = vrot.lane.b32.xlu0 %v9540_v61, %s8400_s27 }
 0x174   : > { %980 = vrot.lane.b32.xlu1 %v9448_v3, %s8394_s18  ;;  %v2008_v3 = vsel %vm1995_vm3, %v1975_v5, %v1219_v45  ;;  %v9574_v5 = vmul.f32 %v405_v11, %v373_v42  ;;  %v9608_v11 = vld [vmem:[#allocation2 + $0x190] sm:$0xff] }
 0x175   : > { %v1475_v49 = vpop.permute.xlu0 %1474  ;;  %v2041_v35 = vsel %vm2028_vm4, %v2008_v3, %v1347_v44  ;;  %v2009_v3 = vsel %vm1995_vm3, %v1976_v7, %v1221_v25  ;;  %v9595_v25 = vld [vmem:[#allocation2 + $0x187] sm:$0xff] }
 0x176   : > { %v1477_v15 = vpop.permute.xlu1 %1476  ;;  %v2074_v45 = vsel %vm2061_vm5, %v2041_v35, %v1475_v49  ;;  %12738 = vst [vmem:[#allocation35_spill] sm:$0xff] %v9574_v5  ;;  %616 = vst.msk [vmem:[#allocation2 + $0x210] sm:$0xff] %vm438_vm0, %v9574_v5  ;;  %v2042_v4 = vsel %vm2028_vm4, %v2009_v3, %v1349_v56  ;;  %v9620_v3 = vld [vmem:[#allocation2 + $0x191] sm:$0xff] }
 0x177   : > { %1106 = vrot.lane.b32.xlu0 %v9454_v52, %s8393_s17  ;;  %v372_v52 = vld [vmem:[%s8633_s24 + $0xf0] sm:$0xff] }
 0x178   : > { %1108 = vrot.lane.b32.xlu1 %v9460_v8, %s8393_s17  ;;  %v404_v8 = vld [vmem:[%s12640_s1 + $0xf0] sm:$0xff] }
 0x179   : > { %v1603_v47 = vpop.permute.xlu0 %1602  ;;  %v9564_v36 = vmul.f32 %v404_v8, %v372_v52  ;;  %v9598_v52 = vld [vmem:[#allocation2 + $0x18f] sm:$0xff] }
 0x17a   : > { %v1605_v41 = vpop.permute.xlu1 %1604  ;;  %v2107_v44 = vsel %vm2094_vm6, %v2074_v45, %v1603_v47  ;;  %v2075_v47 = vsel %vm2061_vm5, %v2042_v4, %v1477_v15 }
 0x17b   : > { %1234 = vrot.lane.b32.xlu0 %v9515_v10, %s8395_s19  ;;  %12737 = vst [vmem:[#allocation34_spill] sm:$0xff] %v9564_v36  ;;  %615 = vst.msk [vmem:[#allocation2 + $0x208] sm:$0xff] %vm438_vm0, %v9564_v36  ;;  %v2108_v7 = vsel %vm2094_vm6, %v2075_v47, %v1605_v41  ;;  %v9606_v41 = vld [vmem:[#allocation2 + $0x188] sm:$0xff] }
 0x17c   : > { %1236 = vrot.lane.b32.xlu1 %v9518_v6, %s8395_s19 }
 0x17d   : > { %v1731_v16 = vpop.permute.xlu0 %1730 }
 0x17e   : > { %v1733_v58 = vpop.permute.xlu1 %1732  ;;  %v2140_v62 = vsel %vm2127_vm7, %v2107_v44, %v1731_v16 }
 0x17f   : > { %1362 = vrot.lane.b32.xlu0 %v9526_v37, %s8396_s20  ;;  %v2141_v16 = vsel %vm2127_vm7, %v2108_v7, %v1733_v58 }
 0x180   : > { %1364 = vrot.lane.b32.xlu1 %v9528_v22, %s8396_s20 }
 0x181   : > { %v1859_v35 = vpop.permute.xlu0 %1858 }
 0x182   : > { %v2173_v43 = vsel %vm2160_vm8, %v2140_v62, %v1859_v35  ;;  %v967_v49 = vpop.permute.xlu1 %966 }
 0x183   : > { %1490 = vrot.lane.b32.xlu0 %v9534_v60, %s8397_s21  ;;  %7012 = vmatprep.mubr.msk.f32.mxu0 %vm2205_vm9, %v2173_v43 }
 0x184   : > { %1492 = vrot.lane.b32.xlu1 %v9540_v61, %s8397_s21 }
 0x185   : > { %v1861_v56 = vpop.permute.xlu0 %1860 }
 0x186   : > { %v2174_v8 = vsel %vm2160_vm8, %v2141_v16, %v1861_v56  ;;  %v969_v15 = vpop.permute.xlu1 %968  ;;  %v1944_v56 = vsel %vm438_vm0, %v9018_v20, %v967_v49 }
 0x187   : > { %1618 = vrot.lane.b32.xlu0 %v9595_v25, %s8398_s22  ;;  %7013 = vmatmul.mubr.msk.f32.gmra.mrb[12].mxu0 %vm2205_vm9, %v2174_v8 }
 0x188   : > { %1620 = vrot.lane.b32.xlu1 %v9598_v52, %s8398_s22 }
 0x189   : > { %v1095_v42 = vpop.permute.xlu0 %1094 }
 0x18a   : > { %v1097_v58 = vpop.permute.xlu1 %1096 }
 0x18b   : > { %1746 = vrot.lane.b32.xlu0 %v9606_v41, %s8399_s23 }
 0x18c   : > { %1748 = vrot.lane.b32.xlu1 %v9608_v11, %s8399_s23 }
 0x18d   : > { %v1223_v45 = vpop.permute.xlu0 %1222 }
 0x18e   : > { %v1225_v44 = vpop.permute.xlu1 %1224 }
 0x18f   : > { %1874 = vrot.lane.b32.xlu0 %v9614_v0, %s8400_s27 }
 0x190   : > { %982 = vrot.lane.b32.xlu1 %v9526_v37, %s8394_s18  ;;  %v9633_v37 = vld [vmem:[%s12642_s3] ss:$0 sm:$0xff] }
 0x191   : > { %v1351_v62 = vpop.permute.xlu0 %1350 }
 0x192   : > { %v1353_v35 = vpop.permute.xlu1 %1352 }
 0x193   : > { %1876 = vrot.lane.b32.xlu0 %v9620_v3, %s8400_s27 }
 0x194   : > { %984 = vrot.lane.b32.xlu1 %v9528_v22, %s8394_s18 }
 0x195   : > { %v1479_v4 = vpop.permute.xlu0 %1478 }
 0x196   : > { %v1481_v43 = vpop.permute.xlu1 %1480 }
 0x197   : > { %1110 = vrot.lane.b32.xlu0 %v9534_v60, %s8393_s17  ;;  %v1977_v60 = vsel %vm1962_vm2, %v1944_v56, %v1095_v42 }
 0x198   : > { %1112 = vrot.lane.b32.xlu1 %v9540_v61, %s8393_s17  ;;  %v2010_v5 = vsel %vm1995_vm3, %v1977_v60, %v1223_v45  ;;  %v9687_v60 = vld [vmem:[#allocation2 + $0x1a9] sm:$0xff] }
 0x199   : > { %v1607_v47 = vpop.permute.xlu0 %1606  ;;  %v2043_v59 = vsel %vm2028_vm4, %v2010_v5, %v1351_v62 }
 0x19a   : > { %v1609_v7 = vpop.permute.xlu1 %1608  ;;  %v6996_v16 = vpop.f32.mrb[0].mxu0  ;;  %v2076_v40 = vsel %vm2061_vm5, %v2043_v59, %v1479_v4 }
 0x19b   : > { %v2378_v22 = vadd.f32 %v6996_v16, %v9633_v37  ;;  %v2372_v8 = vpop.f32.mrb[1].mxu0  ;;  %1238 = vrot.lane.b32.xlu0 %v9595_v25, %s8395_s19  ;;  %v1945_v16 = vsel %vm438_vm0, %v9021_v31, %v969_v15  ;;  %v2109_v45 = vsel %vm2094_vm6, %v2076_v40, %v1607_v47 }
 0x19c   : > { %v2373_v61 = vadd.f32 %v9633_v37, %v2372_v8  ;;  %1240 = vrot.lane.b32.xlu1 %v9598_v52, %s8395_s19  ;;  %v1978_v42 = vsel %vm1962_vm2, %v1945_v16, %v1097_v58  ;;  %v9668_v58 = vld [vmem:[#allocation2 + $0x1a7] sm:$0xff] }
 0x19d   : > { %v2532_v36 = vmax.f32 %v2378_v22, 0.0  ;;  %v1735_v48 = vpop.permute.xlu0 %1734  ;;  %v2011_v5 = vsel %vm1995_vm3, %v1978_v42, %v1225_v44  ;;  %v9681_v22 = vld [vmem:[#allocation2 + $0x1b0] sm:$0xff] }
 0x19e   : > { %v2531_v20 = vmax.f32 %v2373_v61, 0.0  ;;  %v1737_v49 = vpop.permute.xlu1 %1736  ;;  %v2142_v31 = vsel %vm2127_vm7, %v2109_v45, %v1735_v48  ;;  %v2044_v59 = vsel %vm2028_vm4, %v2011_v5, %v1353_v35  ;;  %v9671_v35 = vld [vmem:[#allocation2 + $0x1af] sm:$0xff] }
 0x19f   : > { %2565 = vst.msk [vmem:[#allocation3 + $0x30] sm:$0xff] %vm511_vm10, %v2532_v36  ;;  %1366 = vrot.lane.b32.xlu0 %v9606_v41, %s8396_s20  ;;  %v2077_v4 = vsel %vm2061_vm5, %v2044_v59, %v1481_v43 }
 0x1a0   : > { %2564 = vst.msk [vmem:[#allocation3 + $0x28] sm:$0xff] %vm511_vm10, %v2531_v20  ;;  %1368 = vrot.lane.b32.xlu1 %v9608_v11, %s8396_s20  ;;  %v2110_v40 = vsel %vm2094_vm6, %v2077_v4, %v1609_v7  ;;  %v9679_v7 = vld [vmem:[#allocation2 + $0x1a8] sm:$0xff] }
 0x1a1   : > { %v1863_v15 = vpop.permute.xlu0 %1862  ;;  %v2143_v48 = vsel %vm2127_vm7, %v2110_v40, %v1737_v49  ;;  %v9693_v49 = vld [vmem:[#allocation2 + $0x1b1] sm:$0xff] }
 0x1a2   : > { %v2175_v36 = vsel %vm2160_vm8, %v2142_v31, %v1863_v15  ;;  %v971_v62 = vpop.permute.xlu1 %970 }
 0x1a3   : > { %1494 = vrot.lane.b32.xlu0 %v9614_v0, %s8397_s21  ;;  %7015 = vmatprep.mubr.msk.f32.mxu0 %vm2205_vm9, %v2175_v36  ;;  %v1946_v59 = vsel %vm438_vm0, %v9098_v57, %v971_v62 }
 0x1a4   : > { %1496 = vrot.lane.b32.xlu1 %v9620_v3, %s8397_s21 }
 0x1a5   : > { %v1865_v44 = vpop.permute.xlu0 %1864 }
 0x1a6   : > { %v2176_v47 = vsel %vm2160_vm8, %v2143_v48, %v1865_v44  ;;  %v973_v43 = vpop.permute.xlu1 %972 }
 0x1a7   : > { %1622 = vrot.lane.b32.xlu0 %v9668_v58, %s8398_s22  ;;  %7016 = vmatmul.mubr.msk.f32.gmra.mrb[14].mxu0 %vm2205_vm9, %v2176_v47  ;;  %v1947_v47 = vsel %vm438_vm0, %v9103_v55, %v973_v43 }
 0x1a8   : > { %1624 = vrot.lane.b32.xlu1 %v9671_v35, %s8398_s22 }
 0x1a9   : > { %v1099_v56 = vpop.permute.xlu0 %1098 }
 0x1aa   : > { %v1101_v8 = vpop.permute.xlu1 %1100  ;;  %v1979_v4 = vsel %vm1962_vm2, %v1946_v59, %v1099_v56 }
 0x1ab   : > { %1750 = vrot.lane.b32.xlu0 %v9679_v7, %s8399_s23  ;;  %v1980_v56 = vsel %vm1962_vm2, %v1947_v47, %v1101_v8  ;;  %v9761_v47 = vld [vmem:[#allocation2 + $0x1d1] sm:$0xff] }
 0x1ac   : > { %1752 = vrot.lane.b32.xlu1 %v9681_v22, %s8399_s23 }
 0x1ad   : > { %v1227_v61 = vpop.permute.xlu0 %1226 }
 0x1ae   : > { %v1229_v20 = vpop.permute.xlu1 %1228 }
 0x1af   : > { %1878 = vrot.lane.b32.xlu0 %v9687_v60, %s8400_s27 }
 0x1b0   : > { %986 = vrot.lane.b32.xlu1 %v9606_v41, %s8394_s18 }
 0x1b1   : > { %v1355_v16 = vpop.permute.xlu0 %1354 }
 0x1b2   : > { %v1357_v42 = vpop.permute.xlu1 %1356 }
 0x1b3   : > { %1880 = vrot.lane.b32.xlu0 %v9693_v49, %s8400_s27 }
 0x1b4   : > { %988 = vrot.lane.b32.xlu1 %v9608_v11, %s8394_s18 }
 0x1b5   : > { %v1483_v45 = vpop.permute.xlu0 %1482 }
 0x1b6   : > { %v1485_v5 = vpop.permute.xlu1 %1484 }
 0x1b7   : > { %1114 = vrot.lane.b32.xlu0 %v9614_v0, %s8393_s17 }
 0x1b8   : > { %1116 = vrot.lane.b32.xlu1 %v9620_v3, %s8393_s17  ;;  %v2012_v3 = vsel %vm1995_vm3, %v1979_v4, %v1227_v61  ;;  %v9739_v4 = vld [vmem:[#allocation2 + $0x1cf] sm:$0xff] }
 0x1b9   : > { %v1611_v31 = vpop.permute.xlu0 %1610  ;;  %v2045_v44 = vsel %vm2028_vm4, %v2012_v3, %v1355_v16  ;;  %v2013_v16 = vsel %vm1995_vm3, %v1980_v56, %v1229_v20  ;;  %v9736_v20 = vld [vmem:[#allocation2 + $0x1c7] sm:$0xff] }
 0x1ba   : > { %v1613_v41 = vpop.permute.xlu1 %1612  ;;  %v6999_v15 = vpop.f32.mrb[2].mxu0 }
 0x1bb   : > { %v2388_v36 = vadd.f32 %v6999_v15, %v9633_v37  ;;  %1242 = vrot.lane.b32.xlu0 %v9668_v58, %s8395_s19  ;;  %v2382_v11 = vpop.f32.mrb[3].mxu0  ;;  %v2078_v15 = vsel %vm2061_vm5, %v2045_v44, %v1483_v45  ;;  %v2046_v45 = vsel %vm2028_vm4, %v2013_v16, %v1357_v42  ;;  %v9755_v44 = vld [vmem:[#allocation2 + $0x1c9] sm:$0xff] }
 0x1bc   : > { %1244 = vrot.lane.b32.xlu1 %v9671_v35, %s8395_s19  ;;  %v2383_v0 = vadd.f32 %v9633_v37, %v2382_v11  ;;  %v2111_v61 = vsel %vm2094_vm6, %v2078_v15, %v1611_v31  ;;  %v2079_v11 = vsel %vm2061_vm5, %v2046_v45, %v1485_v5 }
 0x1bd   : > { %v2534_v40 = vmax.f32 %v2388_v36, 0.0  ;;  %v1739_v48 = vpop.permute.xlu0 %1738  ;;  %v2112_v8 = vsel %vm2094_vm6, %v2079_v11, %v1613_v41  ;;  %v9747_v41 = vld [vmem:[#allocation2 + $0x1c8] sm:$0xff] }
 0x1be   : > { %v2533_v57 = vmax.f32 %v2383_v0, 0.0  ;;  %v1741_v62 = vpop.permute.xlu1 %1740  ;;  %v2144_v55 = vsel %vm2127_vm7, %v2111_v61, %v1739_v48 }
 0x1bf   : > { %2567 = vst.msk [vmem:[#allocation3 + $0x50] sm:$0xff] %vm511_vm10, %v2534_v40  ;;  %1370 = vrot.lane.b32.xlu0 %v9679_v7, %s8396_s20  ;;  %v2145_v31 = vsel %vm2127_vm7, %v2112_v8, %v1741_v62  ;;  %v9749_v40 = vld [vmem:[#allocation2 + $0x1d0] sm:$0xff] }
 0x1c0   : > { %2566 = vst.msk [vmem:[#allocation3 + $0x48] sm:$0xff] %vm511_vm10, %v2533_v57  ;;  %1372 = vrot.lane.b32.xlu1 %v9681_v22, %s8396_s20 }
 0x1c1   : > { %v1867_v43 = vpop.permute.xlu0 %1866 }
 0x1c2   : > { %v2177_v59 = vsel %vm2160_vm8, %v2144_v55, %v1867_v43  ;;  %v975_v36 = vpop.permute.xlu1 %974 }
 0x1c3   : > { %1498 = vrot.lane.b32.xlu0 %v9687_v60, %s8397_s21  ;;  %7018 = vmatprep.mubr.msk.f32.mxu0 %vm2205_vm9, %v2177_v59  ;;  %v1948_v45 = vsel %vm438_vm0, %v9355_v39, %v975_v36 }
 0x1c4   : > { %1500 = vrot.lane.b32.xlu1 %v9693_v49, %s8397_s21 }
 0x1c5   : > { %v1869_v42 = vpop.permute.xlu0 %1868 }
 0x1c6   : > { %v2178_v0 = vsel %vm2160_vm8, %v2145_v31, %v1869_v42  ;;  %v977_v5 = vpop.permute.xlu1 %976 }
 0x1c7   : > { %1626 = vrot.lane.b32.xlu0 %v9736_v20, %s8398_s22  ;;  %7019 = vmatmul.mubr.msk.f32.gmra.mrb[16].mxu0 %vm2205_vm9, %v2178_v0  ;;  %v1949_v0 = vsel %vm438_vm0, %v9358_v51, %v977_v5 }
 0x1c8   : > { %1628 = vrot.lane.b32.xlu1 %v9739_v4, %s8398_s22 }
 0x1c9   : > { %v1103_v3 = vpop.permute.xlu0 %1102 }
 0x1ca   : > { %v1105_v48 = vpop.permute.xlu1 %1104  ;;  %v1981_v11 = vsel %vm1962_vm2, %v1948_v45, %v1103_v3 }
 0x1cb   : > { %1754 = vrot.lane.b32.xlu0 %v9747_v41, %s8399_s23  ;;  %v1982_v3 = vsel %vm1962_vm2, %v1949_v0, %v1105_v48  ;;  %v12657_v0 = vmov 0.0|0.0  }
 0x1cc   : > { %1756 = vrot.lane.b32.xlu1 %v9749_v40, %s8399_s23  ;;  %7178 = vmatprep.subr.bf16.mxu1 %v12657_v0 }
 0x1cd   : > { %v1231_v57 = vpop.permute.xlu0 %1230 }
 0x1ce   : > { %v1233_v62 = vpop.permute.xlu1 %1232 }
 0x1cf   : > { %1882 = vrot.lane.b32.xlu0 %v9755_v44, %s8400_s27 }
 0x1d0   : > { %990 = vrot.lane.b32.xlu1 %v9679_v7, %s8394_s18 }
 0x1d1   : > { %v1359_v15 = vpop.permute.xlu0 %1358 }
 0x1d2   : > { %v1361_v56 = vpop.permute.xlu1 %1360 }
 0x1d3   : > { %1884 = vrot.lane.b32.xlu0 %v9761_v47, %s8400_s27 }
 0x1d4   : > { %992 = vrot.lane.b32.xlu1 %v9681_v22, %s8394_s18 }
 0x1d5   : > { %v1487_v61 = vpop.permute.xlu0 %1486 }
 0x1d6   : > { %v1489_v16 = vpop.permute.xlu1 %1488 }
 0x1d7   : > { %1118 = vrot.lane.b32.xlu0 %v9687_v60, %s8393_s17 }
 0x1d8   : > { %1120 = vrot.lane.b32.xlu1 %v9693_v49, %s8393_s17  ;;  %v2014_v49 = vsel %vm1995_vm3, %v1981_v11, %v1231_v57  ;;  %v9809_v11 = vld [vmem:[#allocation2 + $0x1ef] sm:$0xff] }
 0x1d9   : > { %v1615_v55 = vpop.permute.xlu0 %1614  ;;  %v2047_v42 = vsel %vm2028_vm4, %v2014_v49, %v1359_v15  ;;  %v2015_v15 = vsel %vm1995_vm3, %v1982_v3, %v1233_v62  ;;  %v9806_v62 = vld [vmem:[#allocation2 + $0x1e7] sm:$0xff] }
 0x1da   : > { %v1617_v7 = vpop.permute.xlu1 %1616  ;;  %v7002_v43 = vpop.f32.mrb[4].mxu0 }
 0x1db   : > { %v2398_v59 = vadd.f32 %v7002_v43, %v9633_v37  ;;  %1246 = vrot.lane.b32.xlu0 %v9736_v20, %s8395_s19  ;;  %v2392_v22 = vpop.f32.mrb[5].mxu0  ;;  %v2080_v43 = vsel %vm2061_vm5, %v2047_v42, %v1487_v61  ;;  %v2048_v61 = vsel %vm2028_vm4, %v2015_v15, %v1361_v56  ;;  %v3526_v42 = vld [vmem:[%s12643_s4 + $0x8] sm:$0xff]  ;;  %v3528_v15 = vld [vmem:[%s12643_s4 + $0x18] sm:$0xff] }
 0x1dc   : > { %1248 = vrot.lane.b32.xlu1 %v9739_v4, %s8395_s19  ;;  %v2393_v60 = vadd.f32 %v9633_v37, %v2392_v22  ;;  %v2113_v57 = vsel %vm2094_vm6, %v2080_v43, %v1615_v55  ;;  %v2081_v48 = vsel %vm2061_vm5, %v2048_v61, %v1489_v16  ;;  %v9836_v43 = vld [vmem:[#allocation2 + $0x1e9] sm:$0xff]  ;;  %v9849_v61 = vld [vmem:[#allocation2 + $0x1f1] sm:$0xff] }
 0x1dd   : > { %v2536_v8 = vmax.f32 %v2398_v59, 0.0  ;;  %v1743_v31 = vpop.permute.xlu0 %1742  ;;  %v2114_v55 = vsel %vm2094_vm6, %v2081_v48, %v1617_v7  ;;  %v9819_v7 = vld [vmem:[#allocation2 + $0x1e8] sm:$0xff]  ;;  %v3529_v48 = vld [vmem:[%s12643_s4 + $0x20] sm:$0xff] }
 0x1de   : > { %v2535_v39 = vmax.f32 %v2393_v60, 0.0  ;;  %v1745_v36 = vpop.permute.xlu1 %1744  ;;  %v2146_v51 = vsel %vm2127_vm7, %v2113_v57, %v1743_v31  ;;  %v3525_v31 = vld [vmem:[%s12643_s4] sm:$0xff]  ;;  %v3527_v57 = vld [vmem:[%s12643_s4 + $0x10] sm:$0xff] }
 0x1df   : > { %2569 = vst.msk [vmem:[#allocation3 + $0x70] sm:$0xff] %vm511_vm10, %v2536_v8  ;;  %1374 = vrot.lane.b32.xlu0 %v9747_v41, %s8396_s20  ;;  %v2147_v56 = vsel %vm2127_vm7, %v2114_v55, %v1745_v36  ;;  %v9821_v8 = vld [vmem:[#allocation2 + $0x1f0] sm:$0xff]  ;;  %v7179_v36 = vpack.c.bf16 %v3526_v42, %v3525_v31  ;;  %v3530_v55 = vld [vmem:[%s12643_s4 + $0x28] sm:$0xff]  ;;  %v3532_v31 = vld [vmem:[%s12643_s4 + $0x38] sm:$0xff] }
 0x1e0   : > { %2568 = vst.msk [vmem:[#allocation3 + $0x68] sm:$0xff] %vm511_vm10, %v2535_v39  ;;  %1376 = vrot.lane.b32.xlu1 %v9749_v40, %s8396_s20 }
 0x1e1   : > { %v1871_v5 = vpop.permute.xlu0 %1870  ;;  %7180 = vmatpush1.bf16.msra.mxu1 %v7179_v36 }
 0x1e2   : > { %v2179_v45 = vsel %vm2160_vm8, %v2146_v51, %v1871_v5  ;;  %v9797_v59 = vpop.permute.xlu1 %978  ;;  %7181 = vmatprep.subr.bf16.mxu1 %v12657_v0  ;;  %v7182_v5 = vpack.c.bf16 %v3528_v15, %v3527_v57  ;;  %v3533_v57 = vld [vmem:[%s12643_s4 + $0x40] sm:$0xff]  ;;  %v3534_v15 = vld [vmem:[%s12643_s4 + $0x48] sm:$0xff] }
 0x1e3   : > { %1502 = vrot.lane.b32.xlu0 %v9755_v44, %s8397_s21  ;;  %7021 = vmatprep.mubr.msk.f32.mxu0 %vm2205_vm9, %v2179_v45 }
 0x1e4   : > { %1504 = vrot.lane.b32.xlu1 %v9761_v47, %s8397_s21 }
 0x1e5   : > { %v1873_v22 = vpop.permute.xlu0 %1872  ;;  %7183 = vmatpush1.bf16.msra.mxu1 %v7182_v5 }
 0x1e6   : > { %v2180_v60 = vsel %vm2160_vm8, %v2147_v56, %v1873_v22  ;;  %v9812_v16 = vpop.permute.xlu1 %980  ;;  %7184 = vmatprep.subr.bf16.mxu1 %v12657_v0  ;;  %v7185_v22 = vpack.c.bf16 %v3530_v55, %v3529_v48  ;;  %v7191_v55 = vpack.c.bf16 %v3534_v15, %v3533_v57  ;;  %v2635_v50 = vld [vmem:[#allocation3 + $0x70] sm:$0xff] }
 0x1e7   : > { %1630 = vrot.lane.b32.xlu0 %v9806_v62, %s8398_s22  ;;  %7022 = vmatmul.mubr.msk.f32.gmra.mrb[18].mxu0 %vm2205_vm9, %v2180_v60  ;;  %v3531_v60 = vld [vmem:[%s12643_s4 + $0x30] sm:$0xff] }
 0x1e8   : > { %1632 = vrot.lane.b32.xlu1 %v9809_v11, %s8398_s22  ;;  %v7188_v36 = vpack.c.bf16 %v3532_v31, %v3531_v60 }
 0x1e9   : > { %v1107_v49 = vpop.permute.xlu0 %1106  ;;  %7186 = vmatpush1.bf16.msra.mxu1 %v7185_v22 }
 0x1ea   : > { %v9829_v39 = vpop.permute.xlu1 %1108  ;;  %7187 = vmatprep.subr.bf16.mxu1 %v12657_v0 }
 0x1eb   : > { %1758 = vrot.lane.b32.xlu0 %v9819_v7, %s8399_s23 }
 0x1ec   : > { %1760 = vrot.lane.b32.xlu1 %v9821_v8, %s8399_s23 }
 0x1ed   : > { %v1235_v3 = vpop.permute.xlu0 %1234  ;;  %7189 = vmatpush1.bf16.msra.mxu1 %v7188_v36 }
 0x1ee   : > { %v1237_v51 = vpop.permute.xlu1 %1236  ;;  %7190 = vmatprep.subr.bf16.mxu1 %v12657_v0 }
 0x1ef   : > { %1886 = vrot.lane.b32.xlu0 %v9836_v43, %s8400_s27 }
 0x1f0   : > { %994 = vrot.lane.b32.xlu1 %v9747_v41, %s8394_s18 }
 0x1f1   : > { %v1363_v45 = vpop.permute.xlu0 %1362  ;;  %7192 = vmatpush1.bf16.msra.mxu1 %v7191_v55 }
 0x1f2   : > { %v1365_v56 = vpop.permute.xlu1 %1364  ;;  %7193 = vmatprep.subr.bf16.mxu1 %v12657_v0 }
 0x1f3   : > { %1888 = vrot.lane.b32.xlu0 %v9849_v61, %s8400_s27 }
 0x1f4   : > { %996 = vrot.lane.b32.xlu1 %v9749_v40, %s8394_s18 }
 0x1f5   : > { %v1491_v41 = vpop.permute.xlu0 %1490 }
 0x1f6   : > { %v1493_v42 = vpop.permute.xlu1 %1492 }
 0x1f7   : > { %1122 = vrot.lane.b32.xlu0 %v9755_v44, %s8393_s17  ;;  %v1950_v44 = vsel %vm438_vm0, %v9435_v13, %v9797_v59  ;;  %v3535_v13 = vld [vmem:[%s12643_s4 + $0x50] sm:$0xff]  ;;  %v3536_v59 = vld [vmem:[%s12643_s4 + $0x58] sm:$0xff] }
 0x1f8   : > { %1124 = vrot.lane.b32.xlu1 %v9761_v47, %s8393_s17  ;;  %v1983_v60 = vsel %vm1962_vm2, %v1950_v44, %v1107_v49 }
 0x1f9   : > { %v1619_v40 = vpop.permute.xlu0 %1618  ;;  %v2016_v36 = vsel %vm1995_vm3, %v1983_v60, %v1235_v3  ;;  %v1951_v3 = vsel %vm438_vm0, %v9438_v9, %v9812_v16 }
 0x1fa   : > { %v1621_v5 = vpop.permute.xlu1 %1620  ;;  %v7005_v48 = vpop.f32.mrb[6].mxu0  ;;  %v2049_v49 = vsel %vm2028_vm4, %v2016_v36, %v1363_v45 }
 0x1fb   : > { %v2408_v47 = vadd.f32 %v7005_v48, %v9633_v37  ;;  %1250 = vrot.lane.b32.xlu0 %v9806_v62, %s8395_s19  ;;  %v2402_v22 = vpop.f32.mrb[7].mxu0  ;;  %v2082_v55 = vsel %vm2061_vm5, %v2049_v49, %v1491_v41  ;;  %v3537_v41 = vld [vmem:[%s12643_s4 + $0x60] sm:$0xff]  ;;  %v9935_v49 = vld [vmem:[#allocation2 + $0x20f] sm:$0xff] }
 0x1fc   : > { %1252 = vrot.lane.b32.xlu1 %v9809_v11, %s8395_s19  ;;  %v2403_v31 = vadd.f32 %v9633_v37, %v2402_v22  ;;  %v7194_v22 = vpack.c.bf16 %v3536_v59, %v3535_v13  ;;  %v2115_v60 = vsel %vm2094_vm6, %v2082_v55, %v1619_v40  ;;  %v9932_v13 = vld [vmem:[#allocation2 + $0x207] sm:$0xff] }
 0x1fd   : > { %v2538_v57 = vmax.f32 %v2408_v47, 0.0  ;;  %v1747_v15 = vpop.permute.xlu0 %1746  ;;  %v1984_v47 = vsel %vm1962_vm2, %v1951_v3, %v9829_v39  ;;  %v3538_v39 = vld [vmem:[%s12643_s4 + $0x68] sm:$0xff] }
 0x1fe   : > { %v2537_v48 = vmax.f32 %v2403_v31, 0.0  ;;  %v1749_v44 = vpop.permute.xlu1 %1748  ;;  %7195 = vmatpush1.bf16.msra.mxu1 %v7194_v22  ;;  %v2017_v9 = vsel %vm1995_vm3, %v1984_v47, %v1237_v51  ;;  %v2148_v16 = vsel %vm2127_vm7, %v2115_v60, %v1747_v15  ;;  %v7197_v51 = vpack.c.bf16 %v3538_v39, %v3537_v41  ;;  %v9954_v47 = vld [vmem:[#allocation2 + $0x210] sm:$0xff]  ;;  %v3541_v60 = vld [vmem:[%s12643_s4 + $0x80] sm:$0xff] }
 0x1ff   : > { %2571 = vst.msk [vmem:[#allocation3 + $0x90] sm:$0xff] %vm511_vm10, %v2538_v57  ;;  %1378 = vrot.lane.b32.xlu0 %v9819_v7, %s8396_s20  ;;  %7196 = vmatprep.subr.bf16.mxu1 %v12657_v0  ;;  %v2050_v40 = vsel %vm2028_vm4, %v2017_v9, %v1365_v56  ;;  %v3542_v9 = vld [vmem:[%s12643_s4 + $0x88] sm:$0xff] }
 0x200   : > { %2570 = vst.msk [vmem:[#allocation3 + $0x88] sm:$0xff] %vm511_vm10, %v2537_v48  ;;  %1380 = vrot.lane.b32.xlu1 %v9821_v8, %s8396_s20  ;;  %v2083_v57 = vsel %vm2061_vm5, %v2050_v40, %v1493_v42  ;;  %v3539_v42 = vld [vmem:[%s12643_s4 + $0x70] sm:$0xff] }
 0x201   : > { %v1875_v45 = vpop.permute.xlu0 %1874  ;;  %v2116_v15 = vsel %vm2094_vm6, %v2083_v57, %v1621_v5  ;;  %v3540_v5 = vld [vmem:[%s12643_s4 + $0x78] sm:$0xff]  ;;  %v9969_v41 = vld [vmem:[#allocation2 + $0x209] sm:$0xff] }
 0x202   : > { %v2181_v31 = vsel %vm2160_vm8, %v2148_v16, %v1875_v45  ;;  %v9923_v36 = vpop.permute.xlu1 %982  ;;  %7198 = vmatpush1.bf16.msra.mxu1 %v7197_v51  ;;  %v2149_v56 = vsel %vm2127_vm7, %v2116_v15, %v1749_v44  ;;  %v7200_v3 = vpack.c.bf16 %v3540_v5, %v3539_v42  ;;  %v9952_v44 = vld [vmem:[#allocation2 + $0x208] sm:$0xff]  ;;  %v7203_v45 = vpack.c.bf16 %v3542_v9, %v3541_v60  ;;  %v3543_v40 = vld [vmem:[%s12643_s4 + $0x90] sm:$0xff]  ;;  %v3548_v60 = vld [vmem:[%s12643_s4 + $0xb8] sm:$0xff] }
 0x203   : > { %1506 = vrot.lane.b32.xlu0 %v9836_v43, %s8397_s21  ;;  %7024 = vmatprep.mubr.msk.f32.mxu0 %vm2205_vm9, %v2181_v31  ;;  %v3544_v31 = vld [vmem:[%s12643_s4 + $0x98] sm:$0xff]  ;;  %v3546_v42 = vld [vmem:[%s12643_s4 + $0xa8] sm:$0xff] }
 0x204   : > { %1508 = vrot.lane.b32.xlu1 %v9849_v61, %s8397_s21  ;;  %7199 = vmatprep.subr.bf16.mxu1 %v12657_v0  ;;  %v7206_v57 = vpack.c.bf16 %v3544_v31, %v3543_v40  ;;  %v9984_v15 = vld [vmem:[#allocation2 + $0x211] sm:$0xff]  ;;  %v3589_v40 = vld [vmem:[%s12643_s4 + $0x200] sm:$0xff] }
 0x205   : > { %v1877_v59 = vpop.permute.xlu0 %1876 }
 0x206   : > { %v2182_v48 = vsel %vm2160_vm8, %v2149_v56, %v1877_v59  ;;  %v9945_v22 = vpop.permute.xlu1 %984  ;;  %7201 = vmatpush1.bf16.msra.mxu1 %v7200_v3  ;;  %v3545_v59 = vld [vmem:[%s12643_s4 + $0xa0] sm:$0xff]  ;;  %v3547_v3 = vld [vmem:[%s12643_s4 + $0xb0] sm:$0xff] }
 0x207   : > { %1634 = vrot.lane.b32.xlu0 %v9932_v13, %s8398_s22  ;;  %7025 = vmatmul.mubr.msk.f32.gmra.mrb[20].mxu0 %vm2205_vm9, %v2182_v48  ;;  %v7209_v48 = vpack.c.bf16 %v3546_v42, %v3545_v59  ;;  %v3549_v59 = vld [vmem:[%s12643_s4 + $0xc0] sm:$0xff]  ;;  %v3550_v42 = vld [vmem:[%s12643_s4 + $0xc8] sm:$0xff] }
 0x208   : > { %1636 = vrot.lane.b32.xlu1 %v9935_v49, %s8398_s22  ;;  %7202 = vmatprep.subr.bf16.mxu1 %v12657_v0 }
 0x209   : > { %v1111_v55 = vpop.permute.xlu0 %1110 }
 0x20a   : > { %v9963_v16 = vpop.permute.xlu1 %1112  ;;  %7204 = vmatpush1.bf16.msra.mxu1 %v7203_v45  ;;  %v7212_v45 = vpack.c.bf16 %v3548_v60, %v3547_v3  ;;  %v3592_v60 = vld [vmem:[%s12643_s4 + $0x218] sm:$0xff] }
 0x20b   : > { %1762 = vrot.lane.b32.xlu0 %v9952_v44, %s8399_s23  ;;  %7205 = vmatprep.subr.bf16.mxu1 %v12657_v0 }
 0x20c   : > { %1764 = vrot.lane.b32.xlu1 %v9954_v47, %s8399_s23 }
 0x20d   : > { %v1239_v39 = vpop.permute.xlu0 %1238 }
 0x20e   : > { %v9978_v51 = vpop.permute.xlu1 %1240  ;;  %7207 = vmatpush1.bf16.msra.mxu1 %v7206_v57 }
 0x20f   : > { %1890 = vrot.lane.b32.xlu0 %v9969_v41, %s8400_s27  ;;  %7208 = vmatprep.subr.bf16.mxu1 %v12657_v0 }
 0x210   : > { %998 = vrot.lane.b32.xlu1 %v9819_v7, %s8394_s18 }
 0x211   : > { %v1367_v56 = vpop.permute.xlu0 %1366 }
 0x212   : > { %v9993_v5 = vpop.permute.xlu1 %1368  ;;  %7210 = vmatpush1.bf16.msra.mxu1 %v7209_v48 }
 0x213   : > { %1892 = vrot.lane.b32.xlu0 %v9984_v15, %s8400_s27  ;;  %7211 = vmatprep.subr.bf16.mxu1 %v12657_v0 }
 0x214   : > { %1000 = vrot.lane.b32.xlu1 %v9821_v8, %s8394_s18  ;;  %v3590_v8 = vld [vmem:[%s12643_s4 + $0x208] sm:$0xff]  ;;  %s341_s18 = scalar_lea.vmem %s12648_s9, %s12867_s10 }
 0x215   : > { %v1495_v7 = vpop.permute.xlu0 %1494  ;;  %v7274_v31 = vpack.c.bf16 %v3590_v8, %v3589_v40 }
 0x216   : > { %v10006_v9 = vpop.permute.xlu1 %1496  ;;  %7213 = vmatpush1.bf16.msra.mxu1 %v7212_v45  ;;  %v1952_v45 = vsel %vm438_vm0, %v9515_v10, %v9923_v36  ;;  %v12739_v10 = vmov 0.0|0.0   ;;  %v3551_v36 = vld [vmem:[%s12643_s4 + $0xd0] sm:$0xff] }
 0x217   : > { %1126 = vrot.lane.b32.xlu0 %v9836_v43, %s8393_s17  ;;  %7275 = vmatprep.subr.bf16.mxu0 %v7274_v31  ;;  %v7215_v43 = vpack.c.bf16 %v3550_v42, %v3549_v59  ;;  %v1985_v59 = vsel %vm1962_vm2, %v1952_v45, %v1111_v55 }
 0x218   : > { %1128 = vrot.lane.b32.xlu1 %v9849_v61, %s8393_s17  ;;  %7214 = vmatprep.subr.bf16.mxu1 %v12657_v0  ;;  %v3591_v61 = vld [vmem:[%s12643_s4 + $0x210] sm:$0xff]  ;;  %v2018_v0 = vsel %vm1995_vm3, %v1985_v59, %v1239_v39  ;;  %v3593_v39 = vld [vmem:[%s12643_s4 + $0x220] sm:$0xff] }
 0x219   : > { %v1623_v57 = vpop.permute.xlu0 %1622  ;;  %7277 = vmatpush3.bf16.msra.mxu0 %v7274_v31  ;;  %v7278_v31 = vpack.c.bf16 %v3592_v60, %v3591_v61  ;;  %v3594_v61 = vld [vmem:[%s12643_s4 + $0x228] sm:$0xff]  ;;  %v1953_v60 = vsel %vm438_vm0, %v9518_v6, %v9945_v22 }
 0x21a   : > { %v1625_v48 = vpop.permute.xlu1 %1624  ;;  %v7008_v3 = vpop.f32.mrb[8].mxu0  ;;  %7216 = vmatpush1.bf16.msra.mxu1 %v7215_v43 }
 0x21b   : > { %v2418_v40 = vadd.f32 %v7008_v3, %v9633_v37  ;;  %1254 = vrot.lane.b32.xlu0 %v9932_v13, %s8395_s19  ;;  %v2412_v8 = vpop.f32.mrb[9].mxu0  ;;  %7279 = vmatprep.subr.bf16.mxu0 %v7278_v31  ;;  %v3552_v13 = vld [vmem:[%s12643_s4 + $0xd8] sm:$0xff] }
 0x21c   : > { %1256 = vrot.lane.b32.xlu1 %v9935_v49, %s8395_s19  ;;  %v2413_v42 = vadd.f32 %v9633_v37, %v2412_v8  ;;  %7217 = vmatprep.subr.bf16.mxu1 %v12739_v10  ;;  %v2051_v49 = vsel %vm2028_vm4, %v2018_v0, %v1367_v56  ;;  %v7218_v43 = vpack.c.bf16 %v3552_v13, %v3551_v36  ;;  %v3596_v8 = vld [vmem:[%s12643_s4 + $0x238] sm:$0xff] }
 0x21d   : > { %v2540_v27 = vmax.f32 %v2418_v40, 0.0  ;;  %v1751_v1 = vpop.permute.xlu0 %1750  ;;  %7281 = vmatpush3.bf16.msra.mxu0 %v7278_v31  ;;  %v2084_v45 = vsel %vm2061_vm5, %v2051_v49, %v1495_v7  ;;  %v7282_v0 = vpack.c.bf16 %v3594_v61, %v3593_v39  ;;  %v1986_v56 = vsel %vm1962_vm2, %v1953_v60, %v9963_v16  ;;  %v3554_v16 = vld [vmem:[%s12643_s4 + $0xe8] sm:$0xff]  ;;  %v873_v39 = vld [vmem:[#allocation2 + $0x230] sm:$0xff] }
 0x21e   : > { %v2539_v55 = vmax.f32 %v2413_v42, 0.0  ;;  %v1753_v3 = vpop.permute.xlu1 %1752  ;;  %v2117_v40 = vsel %vm2094_vm6, %v2084_v45, %v1623_v57  ;;  %7219 = vmatpush1.bf16.msra.mxu1 %v7218_v43  ;;  %v2019_v6 = vsel %vm1995_vm3, %v1986_v56, %v9978_v51  ;;  %v3595_v57 = vld [vmem:[%s12643_s4 + $0x230] sm:$0xff]  ;;  %v840_v42 = vld [vmem:[#allocation2 + $0x227] sm:$0xff] }
 0x21f   : > { %2573 = vst.msk [vmem:[#allocation3 + $0xb0] sm:$0xff] %vm511_vm10, %v2540_v27  ;;  %1382 = vrot.lane.b32.xlu0 %v9952_v44, %s8396_s20  ;;  %v2150_v27 = vsel %vm2127_vm7, %v2117_v40, %v1751_v1  ;;  %7283 = vmatprep.subr.bf16.mxu0 %v7282_v0  ;;  %v3553_v44 = vld [vmem:[%s12643_s4 + $0xe0] sm:$0xff]  ;;  %v841_v49 = vld [vmem:[#allocation2 + $0x22f] sm:$0xff] }
 0x220   : > { %2572 = vst.msk [vmem:[#allocation3 + $0xa8] sm:$0xff] %vm511_vm10, %v2539_v55  ;;  %1384 = vrot.lane.b32.xlu1 %v9954_v47, %s8396_s20  ;;  %7220 = vmatprep.subr.bf16.mxu1 %v12739_v10  ;;  %v2052_v47 = vsel %vm2028_vm4, %v2019_v6, %v9993_v5  ;;  %v7221_v1 = vpack.c.bf16 %v3554_v16, %v3553_v44  ;;  %v904_v60 = vld [vmem:[#allocation2 + $0x229] sm:$0xff] }
 0x221   : > { %v1879_v22 = vpop.permute.xlu0 %1878  ;;  %7285 = vmatpush3.bf16.msra.mxu0 %v7282_v0  ;;  %v2085_v31 = vsel %vm2061_vm5, %v2052_v47, %v10006_v9  ;;  %v7286_v5 = vpack.c.bf16 %v3596_v8, %v3595_v57  ;;  %v3556_v9 = vld [vmem:[%s12643_s4 + $0xf8] sm:$0xff]  ;;  %v2628_v40 = vld [vmem:[#allocation3 + $0x8] sm:$0xff] }
 0x222   : > { %v2183_v7 = vsel %vm2160_vm8, %v2150_v27, %v1879_v22  ;;  %v10082_v51 = vpop.permute.xlu1 %986  ;;  %v2118_v59 = vsel %vm2094_vm6, %v2085_v31, %v1625_v48  ;;  %7222 = vmatpush1.bf16.msra.mxu1 %v7221_v1  ;;  %v905_v0 = vld [vmem:[#allocation2 + $0x231] sm:$0xff]  ;;  %v10120_v6 = vld [vmem:[#allocation3 + $0x27] sm:$0xff] }
 0x223   : > { %1510 = vrot.lane.b32.xlu0 %v9969_v41, %s8397_s21  ;;  %7027 = vmatprep.mubr.msk.f32.mxu0 %vm2205_vm9, %v2183_v7  ;;  %v2151_v36 = vsel %vm2127_vm7, %v2118_v59, %v1753_v3  ;;  %v3555_v41 = vld [vmem:[%s12643_s4 + $0xf0] sm:$0xff]  ;;  %v872_v3 = vld [vmem:[#allocation2 + $0x228] sm:$0xff]  ;;  %v7614_v16 = vpack.i.bf16 %v2628_v40, %v10120_v6  ;;  %v1954_v40 = vsel %vm438_vm0, %v9595_v25, %v10082_v51 }
 0x224   : > { %1512 = vrot.lane.b32.xlu1 %v9984_v15, %s8397_s21  ;;  %7287 = vmatprep.subr.bf16.mxu0 %v7286_v5  ;;  %v7224_v55 = vpack.c.bf16 %v3556_v9, %v3555_v41  ;;  %v2629_v27 = vld [vmem:[#allocation3 + $0x10] sm:$0xff]  ;;  %v10128_v1 = vld [vmem:[#allocation3 + $0x47] sm:$0xff]  ;;  %s8402_s21 = smov 64  }
 0x225   : > { %v1881_v13 = vpop.permute.xlu0 %1880  ;;  %7223 = vmatprep.subr.bf16.mxu1 %v12739_v10  ;;  %7289 = vmatpush3.bf16.msra.mxu0 %v7286_v5  ;;  %v10123_v22 = vld [vmem:[#allocation3 + $0x2f] sm:$0xff] }
 0x226   : > { %v2184_v48 = vsel %vm2160_vm8, %v2151_v36, %v1881_v13  ;;  %v10107_v15 = vpop.permute.xlu1 %988  ;;  %7225 = vmatpush1.bf16.msra.mxu1 %v7224_v55  ;;  %7290 = vmatprep.subr.bf16.mxu0 %v12739_v10  ;;  %v7619_v7 = vpack.i.bf16 %v2629_v27, %v10123_v22  ;;  %v10131_v57 = vld [vmem:[#allocation3 + $0x4f] sm:$0xff]  ;;  %v10136_v13 = vld [vmem:[#allocation3 + $0x67] sm:$0xff] }
 0x227   : > { %1638 = vrot.lane.b32.xlu0 %v840_v42, %s8398_s22  ;;  %7028 = vmatmul.mubr.msk.f32.gmra.mrb[22].mxu0 %vm2205_vm9, %v2184_v48  ;;  %v2630_v8 = vld [vmem:[#allocation3 + $0x28] sm:$0xff]  ;;  %v2631_v5 = vld [vmem:[#allocation3 + $0x30] sm:$0xff] }
 0x228   : > { %1640 = vrot.lane.b32.xlu1 %v841_v49, %s8398_s22  ;;  %7226 = vmatprep.subr.bf16.mxu1 %v12739_v10  ;;  %v7624_v59 = vpack.i.bf16 %v2630_v8, %v10128_v1  ;;  %v7629_v36 = vpack.i.bf16 %v2631_v5, %v10131_v57  ;;  %v10139_v49 = vld [vmem:[#allocation3 + $0x6f] sm:$0xff]  ;;  %v10160_v26 = vld [vmem:[#allocation3 + $0xa7] sm:$0xff]  ;;  %s12371_s22 = scalar_lea.vmem %s12647_s8, %s6865_s15 }
 0x229   : > { %v1115_v43 = vpop.permute.xlu0 %1114  ;;  %v2632_v41 = vld [vmem:[#allocation3 + $0x48] sm:$0xff]  ;;  %v2633_v48 = vld [vmem:[#allocation3 + $0x50] sm:$0xff] }
 0x22a   : > { %v10114_v61 = vpop.permute.xlu1 %1116  ;;  %v7634_v55 = vpack.i.bf16 %v2632_v41, %v10136_v13  ;;  %v1987_v8 = vsel %vm1962_vm2, %v1954_v40, %v1115_v43  ;;  %v2637_v40 = vld [vmem:[#allocation3 + $0x90] sm:$0xff] }
 0x22b   : > { %1766 = vrot.lane.b32.xlu0 %v872_v3, %s8399_s23 }
 0x22c   : > { %1768 = vrot.lane.b32.xlu1 %v873_v39, %s8399_s23 }
 0x22d   : > { %v1243_v45 = vpop.permute.xlu0 %1242 }
 0x22e   : > { %v10118_v56 = vpop.permute.xlu1 %1244 }
 0x22f   : > { %1894 = vrot.lane.b32.xlu0 %v904_v60, %s8400_s27  ;;  %v7639_v60 = vpack.i.bf16 %v2633_v48, %v10139_v49 }
 0x230   : > { %1896 = vrot.lane.b32.xlu1 %v905_v0, %s8400_s27  ;;  %v10144_v0 = vld [vmem:[#allocation3 + $0x87] sm:$0xff] }
 0x231   : > { %v1371_v44 = vpop.permute.xlu0 %1370 }
 0x232   : > { %v1373_v47 = vpop.permute.xlu1 %1372 }
 0x233   : > { %7615 = vrot.lane.b32.xlu0 %v7614_v16, %s8402_s21 }
 0x234   : > { %7620 = vrot.lane.b32.xlu1 %v7619_v7, %s8402_s21  ;;  %v10151_v7 = vld [vmem:[#allocation3 + $0x8f] sm:$0xff] }
 0x235   : > { %v1499_v31 = vpop.permute.xlu0 %1498  ;;  %v7649_v46 = vpack.i.bf16 %v2635_v50, %v10151_v7  ;;  %v2636_v50 = vld [vmem:[#allocation3 + $0x88] sm:$0xff] }
 0x236   : > { %v1501_v42 = vpop.permute.xlu1 %1500 }
 0x237   : > { %7625 = vrot.lane.b32.xlu0 %v7624_v59, %s8402_s21  ;;  %v2634_v59 = vld [vmem:[#allocation3 + $0x68] sm:$0xff] }
 0x238   : > { %7630 = vrot.lane.b32.xlu1 %v7629_v36, %s8402_s21  ;;  %v2020_v36 = vsel %vm1995_vm3, %v1987_v8, %v1243_v45  ;;  %v7644_v25 = vpack.i.bf16 %v2634_v59, %v10144_v0  ;;  %v10168_v45 = vld [vmem:[#allocation3 + $0xaf] sm:$0xff] }
 0x239   : > { %v1627_v9 = vpop.permute.xlu0 %1626  ;;  %v2053_v51 = vsel %vm2028_vm4, %v2020_v36, %v1371_v44 }
 0x23a   : > { %v1629_v3 = vpop.permute.xlu1 %1628  ;;  %v7011_v39 = vpop.f32.mrb[10].mxu0  ;;  %v2086_v43 = vsel %vm2061_vm5, %v2053_v51, %v1499_v31 }
 0x23b   : > { %v2428_v27 = vadd.f32 %v7011_v39, %v9633_v37  ;;  %v2422_v16 = vpop.f32.mrb[11].mxu0  ;;  %7635 = vrot.lane.b32.xlu0 %v7634_v55, %s8402_s21 }
 0x23c   : > { %v2423_v5 = vadd.f32 %v9633_v37, %v2422_v16  ;;  %7640 = vrot.lane.b32.xlu1 %v7639_v60, %s8402_s21  ;;  %v1955_v37 = vsel %vm438_vm0, %v9598_v52, %v10107_v15  ;;  %v2119_v60 = vsel %vm2094_vm6, %v2086_v43, %v1627_v9  ;;  %v7659_v9 = vpack.i.bf16 %v2637_v40, %v10168_v45 }
 0x23d   : > { %v2542_v41 = vmax.f32 %v2428_v27, 0.0  ;;  %v1755_v48 = vpop.permute.xlu0 %1754  ;;  %v1988_v44 = vsel %vm1962_vm2, %v1955_v37, %v10114_v61  ;;  %v7654_v27 = vpack.i.bf16 %v2636_v50, %v10160_v26 }
 0x23e   : > { %v2541_v39 = vmax.f32 %v2423_v5, 0.0  ;;  %v1757_v55 = vpop.permute.xlu1 %1756  ;;  %v2021_v52 = vsel %vm1995_vm3, %v1988_v44, %v10118_v56  ;;  %v2152_v15 = vsel %vm2127_vm7, %v2119_v60, %v1755_v48 }
 0x23f   : > { %2575 = vst.msk [vmem:[#allocation3 + $0xd0] sm:$0xff] %vm511_vm10, %v2542_v41  ;;  %7645 = vrot.lane.b32.xlu0 %v7644_v25, %s8402_s21  ;;  %v2054_v16 = vsel %vm2028_vm4, %v2021_v52, %v1373_v47  ;;  %v2639_v41 = vld [vmem:[#allocation3 + $0xb0] sm:$0xff] }
 0x240   : > { %2574 = vst.msk [vmem:[#allocation3 + $0xc8] sm:$0xff] %vm511_vm10, %v2541_v39  ;;  %7650 = vrot.lane.b32.xlu1 %v7649_v46, %s8402_s21  ;;  %v2087_v5 = vsel %vm2061_vm5, %v2054_v16, %v1501_v42  ;;  %v2638_v42 = vld [vmem:[#allocation3 + $0xa8] sm:$0xff]  ;;  %v10203_v16 = vld [vmem:[%s12642_s3] ss:$0 sm:$0xff] }
 0x241   : > { %v1883_v31 = vpop.permute.xlu0 %1882  ;;  %v2120_v46 = vsel %vm2094_vm6, %v2087_v5, %v1629_v3 }
 0x242   : > { %v2185_v61 = vsel %vm2160_vm8, %v2152_v15, %v1883_v31  ;;  %v991_v8 = vpop.permute.xlu1 %990  ;;  %v2153_v56 = vsel %vm2127_vm7, %v2120_v46, %v1757_v55 }
 0x243   : > { %7030 = vmatprep.mubr.msk.f32.mxu0 %vm2205_vm9, %v2185_v61  ;;  %7655 = vrot.lane.b32.xlu0 %v7654_v27, %s8402_s21  ;;  %v1956_v27 = vsel %vm438_vm0, %v9668_v58, %v991_v8 }
 0x244   : > { %7660 = vrot.lane.b32.xlu1 %v7659_v9, %s8402_s21 }
 0x245   : > { %v1885_v59 = vpop.permute.xlu0 %1884 }
 0x246   : > { %v2186_v47 = vsel %vm2160_vm8, %v2153_v56, %v1885_v59  ;;  %v993_v36 = vpop.permute.xlu1 %992 }
 0x247   : > { %7031 = vmatmul.mubr.msk.f32.gmra.mrb[24].mxu0 %vm2205_vm9, %v2186_v47  ;;  %v10190_v48 = vld [vmem:[#allocation3 + $0xcf] sm:$0xff]  ;;  %v10192_v25 = vld [vmem:[#allocation3 + $0xc7] sm:$0xff]  ;;  %v1957_v8 = vsel %vm438_vm0, %v9671_v35, %v993_v36 }
 0x248   : > { %v7669_v51 = vpack.i.bf16 %v2639_v41, %v10190_v48  ;;  %v7664_v3 = vpack.i.bf16 %v2638_v42, %v10192_v25 }
 0x249   : > { %v1119_v39 = vpop.permute.xlu0 %1118 }
 0x24a   : > { %v1121_v37 = vpop.permute.xlu1 %1120  ;;  %7670 = vrot.lane.b32.xlu1 %v7669_v51, %s8402_s21  ;;  %7665 = vrot.lane.b32.xlu0 %v7664_v3, %s8402_s21  ;;  %v1989_v5 = vsel %vm1962_vm2, %v1956_v27, %v1119_v39 }
 0x24b   : > { %v1990_v3 = vsel %vm1962_vm2, %v1957_v8, %v1121_v37 }
 0x24d   : > { %v1247_v55 = vpop.permute.xlu0 %1246 }
 0x24e   : > { %v1249_v43 = vpop.permute.xlu1 %1248  ;;  %v2022_v56 = vsel %vm1995_vm3, %v1989_v5, %v1247_v55  ;;  %v2641_v5 = vld [vmem:[#allocation3 + $0xd0] sm:$0xff] }
 0x24f   : > { %v2023_v55 = vsel %vm1995_vm3, %v1990_v3, %v1249_v43 }
 0x251   : > { %v1375_v44 = vpop.permute.xlu0 %1374 }
 0x252   : > { %v1377_v60 = vpop.permute.xlu1 %1376  ;;  %v2055_v41 = vsel %vm2028_vm4, %v2022_v56, %v1375_v44 }
 0x253   : > { %v2056_v27 = vsel %vm2028_vm4, %v2023_v55, %v1377_v60  ;;  %v2640_v60 = vld [vmem:[#allocation3 + $0xc8] sm:$0xff] }
 0x255   : > { %v1503_v50 = vpop.permute.xlu0 %1502 }
 0x256   : > { %v1505_v52 = vpop.permute.xlu1 %1504  ;;  %v2088_v51 = vsel %vm2061_vm5, %v2055_v41, %v1503_v50 }
 0x257   : > { %v2089_v36 = vsel %vm2061_vm5, %v2056_v27, %v1505_v52 }
 0x259   : > { %v1631_v15 = vpop.permute.xlu0 %1630 }
 0x25a   : > { %v1633_v31 = vpop.permute.xlu1 %1632  ;;  %v7014_v40 = vpop.f32.mrb[12].mxu0  ;;  %v2121_v39 = vsel %vm2094_vm6, %v2088_v51, %v1631_v15 }
 0x25b   : > { %v2438_v61 = vadd.f32 %v10203_v16, %v7014_v40  ;;  %v2432_v9 = vpop.f32.mrb[13].mxu0  ;;  %v2122_v37 = vsel %vm2094_vm6, %v2089_v36, %v1633_v31 }
 0x25c   : > { %v2433_v46 = vadd.f32 %v10203_v16, %v2432_v9 }
 0x25d   : > { %v2544_v59 = vmax.f32 %v2438_v61, 0.0  ;;  %v1759_v47 = vpop.permute.xlu0 %1758 }
 0x25e   : > { %v2543_v42 = vmax.f32 %v2433_v46, 0.0  ;;  %v1761_v58 = vpop.permute.xlu1 %1760  ;;  %v2154_v40 = vsel %vm2127_vm7, %v2121_v39, %v1759_v47 }
 0x25f   : > { %2577 = vst.msk [vmem:[#allocation3 + $0xf0] sm:$0xff] %vm511_vm10, %v2544_v59  ;;  %v2155_v50 = vsel %vm2127_vm7, %v2122_v37, %v1761_v58 }
 0x260   : > { %2576 = vst.msk [vmem:[#allocation3 + $0xe8] sm:$0xff] %vm511_vm10, %v2543_v42 }
 0x261   : > { %v1887_v44 = vpop.permute.xlu0 %1886 }
 0x262   : > { %v2187_v61 = vsel %vm2160_vm8, %v2154_v40, %v1887_v44  ;;  %v995_v35 = vpop.permute.xlu1 %994 }
 0x263   : > { %7033 = vmatprep.mubr.msk.f32.mxu0 %vm2205_vm9, %v2187_v61  ;;  %v1958_v44 = vsel %vm438_vm0, %v9736_v20, %v995_v35 }
 0x265   : > { %v1889_v15 = vpop.permute.xlu0 %1888 }
 0x266   : > { %v2188_v9 = vsel %vm2160_vm8, %v2155_v50, %v1889_v15  ;;  %v997_v43 = vpop.permute.xlu1 %996  ;;  %v10372_v21 = vld [vmem:[#allocation3 + $0xf1] sm:$0xff] }
 0x267   : > { %7034 = vmatmul.mubr.msk.f32.gmra.mrb[26].mxu0 %vm2205_vm9, %v2188_v9  ;;  %v10227_v46 = vld [vmem:[#allocation3 + $0xef] sm:$0xff]  ;;  %v10229_v56 = vld [vmem:[#allocation3 + $0xe7] sm:$0xff] }
 0x268   : > { %v7679_v52 = vpack.i.bf16 %v2641_v5, %v10227_v46  ;;  %v7674_v59 = vpack.i.bf16 %v2640_v60, %v10229_v56 }
 0x269   : > { %v1123_v47 = vpop.permute.xlu0 %1122 }
 0x26a   : > { %v1125_v31 = vpop.permute.xlu1 %1124  ;;  %7680 = vrot.lane.b32.xlu1 %v7679_v52, %s8402_s21  ;;  %7675 = vrot.lane.b32.xlu0 %v7674_v59, %s8402_s21  ;;  %v1991_v36 = vsel %vm1962_vm2, %v1958_v44, %v1123_v47  ;;  %v1959_v59 = vsel %vm438_vm0, %v9739_v4, %v997_v43 }
 0x26b   : > { %v1992_v35 = vsel %vm1962_vm2, %v1959_v59, %v1125_v31 }
 0x26d   : > { %v1251_v41 = vpop.permute.xlu0 %1250 }
 0x26e   : > { %v1253_v42 = vpop.permute.xlu1 %1252  ;;  %v2024_v50 = vsel %vm1995_vm3, %v1991_v36, %v1251_v41  ;;  %v2643_v36 = vld [vmem:[#allocation3 + $0xf0] sm:$0xff] }
 0x26f   : > { %v2025_v41 = vsel %vm1995_vm3, %v1992_v35, %v1253_v42 }
 0x271   : > { %v1379_v58 = vpop.permute.xlu0 %1378 }
 0x272   : > { %v1381_v8 = vpop.permute.xlu1 %1380  ;;  %v2057_v5 = vsel %vm2028_vm4, %v2024_v50, %v1379_v58 }
 0x273   : > { %v2058_v44 = vsel %vm2028_vm4, %v2025_v41, %v1381_v8  ;;  %v2642_v8 = vld [vmem:[#allocation3 + $0xe8] sm:$0xff] }
 0x275   : > { %v1507_v51 = vpop.permute.xlu0 %1506 }
 0x276   : > { %v1509_v3 = vpop.permute.xlu1 %1508  ;;  %v2090_v20 = vsel %vm2061_vm5, %v2057_v5, %v1507_v51 }
 0x277   : > { %v2091_v43 = vsel %vm2061_vm5, %v2058_v44, %v1509_v3 }
 0x279   : > { %v1635_v39 = vpop.permute.xlu0 %1634 }
 0x27a   : > { %v1637_v55 = vpop.permute.xlu1 %1636  ;;  %v7017_v40 = vpop.f32.mrb[14].mxu0  ;;  %v2123_v47 = vsel %vm2094_vm6, %v2090_v20, %v1635_v39 }
 0x27b   : > { %v2448_v27 = vadd.f32 %v10203_v16, %v7017_v40  ;;  %v2442_v61 = vpop.f32.mrb[15].mxu0  ;;  %v2124_v31 = vsel %vm2094_vm6, %v2091_v43, %v1637_v55 }
 0x27c   : > { %v2443_v37 = vadd.f32 %v10203_v16, %v2442_v61 }
 0x27d   : > { %v2546_v15 = vmax.f32 %v2448_v27, 0.0  ;;  %v1763_v9 = vpop.permute.xlu0 %1762 }
 0x27e   : > { %v2545_v60 = vmax.f32 %v2443_v37, 0.0  ;;  %v1765_v52 = vpop.permute.xlu1 %1764  ;;  %v2156_v40 = vsel %vm2127_vm7, %v2123_v47, %v1763_v9 }
 0x27f   : > { %2579 = vst.msk [vmem:[#allocation3 + $0x110] sm:$0xff] %vm511_vm10, %v2546_v15  ;;  %v2157_v51 = vsel %vm2127_vm7, %v2124_v31, %v1765_v52 }
 0x280   : > { %2578 = vst.msk [vmem:[#allocation3 + $0x108] sm:$0xff] %vm511_vm10, %v2545_v60 }
 0x281   : > { %v1891_v58 = vpop.permute.xlu0 %1890 }
 0x282   : > { %v2189_v27 = vsel %vm2160_vm8, %v2156_v40, %v1891_v58  ;;  %v999_v4 = vpop.permute.xlu1 %998 }
 0x283   : > { %7036 = vmatprep.mubr.msk.f32.mxu0 %vm2205_vm9, %v2189_v27  ;;  %v1960_v58 = vsel %vm438_vm0, %v9806_v62, %v999_v4 }
 0x285   : > { %v1893_v39 = vpop.permute.xlu0 %1892 }
 0x286   : > { %v2190_v61 = vsel %vm2160_vm8, %v2157_v51, %v1893_v39  ;;  %v1001_v42 = vpop.permute.xlu1 %1000  ;;  %v10386_v32 = vld [vmem:[#allocation3 + $0x111] sm:$0xff] }
 0x287   : > { %7037 = vmatmul.mubr.msk.f32.gmra.mrb[28].mxu0 %vm2205_vm9, %v2190_v61  ;;  %v10259_v37 = vld [vmem:[#allocation3 + $0x10f] sm:$0xff]  ;;  %v10261_v50 = vld [vmem:[#allocation3 + $0x107] sm:$0xff]  ;;  %v1961_v43 = vsel %vm438_vm0, %v9809_v11, %v1001_v42 }
 0x288   : > { %v7689_v3 = vpack.i.bf16 %v2643_v36, %v10259_v37  ;;  %v7684_v15 = vpack.i.bf16 %v2642_v8, %v10261_v50  ;;  %v10377_v38 = vld [vmem:[#allocation3 + $0x109] sm:$0xff] }
 0x289   : > { %v1127_v9 = vpop.permute.xlu0 %1126 }
 0x28a   : > { %v1129_v55 = vpop.permute.xlu1 %1128  ;;  %7690 = vrot.lane.b32.xlu1 %v7689_v3, %s8402_s21  ;;  %7685 = vrot.lane.b32.xlu0 %v7684_v15, %s8402_s21  ;;  %v1993_v31 = vsel %vm1962_vm2, %v1960_v58, %v1127_v9 }
 0x28b   : > { %v1994_v39 = vsel %vm1962_vm2, %v1961_v43, %v1129_v55 }
 0x28d   : > { %v1255_v5 = vpop.permute.xlu0 %1254 }
 0x28e   : > { %v1257_v60 = vpop.permute.xlu1 %1256  ;;  %v2026_v61 = vsel %vm1995_vm3, %v1993_v31, %v1255_v5 }
 0x28f   : > { %v2027_v3 = vsel %vm1995_vm3, %v1994_v39, %v1257_v60  ;;  %v10297_v39 = vld [vmem:[#allocation3 + $0x110] sm:$0xff] }
 0x291   : > { %v1383_v52 = vpop.permute.xlu0 %1382 }
 0x292   : > { %v1385_v59 = vpop.permute.xlu1 %1384  ;;  %v2059_v62 = vsel %vm2028_vm4, %v2026_v61, %v1383_v52  ;;  %v2661_v61 = vld [vmem:[#allocation3 + $0x11] sm:$0xff] }
 0x295   : > { %v1511_v20 = vpop.permute.xlu0 %1510 }
 0x296   : > { %v1513_v35 = vpop.permute.xlu1 %1512  ;;  %v2092_v11 = vsel %vm2061_vm5, %v2059_v62, %v1511_v20 }
 0x299   : > { %v1639_v47 = vpop.permute.xlu0 %1638 }
 0x29a   : > { %v1641_v41 = vpop.permute.xlu1 %1640  ;;  %v7020_v40 = vpop.f32.mrb[16].mxu0  ;;  %v2125_v9 = vsel %vm2094_vm6, %v2092_v11, %v1639_v47 }
 0x29b   : > { %v2458_v44 = vadd.f32 %v10203_v16, %v7020_v40  ;;  %v2452_v27 = vpop.f32.mrb[17].mxu0  ;;  %v2060_v40 = vsel %vm2028_vm4, %v2027_v3, %v1385_v59  ;;  %v10301_v3 = vld [vmem:[#allocation3 + $0x108] sm:$0xff] }
 0x29c   : > { %v2453_v51 = vadd.f32 %v10203_v16, %v2452_v27  ;;  %v2093_v42 = vsel %vm2061_vm5, %v2060_v40, %v1513_v35  ;;  %v10291_v35 = vld [vmem:[#allocation3 + $0x49] sm:$0xff] }
 0x29d   : > { %v2548_v36 = vmax.f32 %v2458_v44, 0.0  ;;  %v1767_v8 = vpop.permute.xlu0 %1766  ;;  %v2126_v55 = vsel %vm2094_vm6, %v2093_v42, %v1641_v41  ;;  %v2660_v41 = vld [vmem:[#allocation3 + $0x9] sm:$0xff] }
 0x29e   : > { %v2547_v4 = vmax.f32 %v2453_v51, 0.0  ;;  %v1769_v15 = vpop.permute.xlu1 %1768  ;;  %v2158_v5 = vsel %vm2127_vm7, %v2125_v9, %v1767_v8  ;;  %v2596_v44 = vld [vmem:[#allocation3 + $0x7] sm:$0xff]  ;;  %v10295_v51 = vld [vmem:[#allocation3 + $0x51] sm:$0xff] }
 0x29f   : > { %2581 = vst.msk [vmem:[#allocation3 + $0x130] sm:$0xff] %vm511_vm10, %v2548_v36  ;;  %v2159_v52 = vsel %vm2127_vm7, %v2126_v55, %v1769_v15  ;;  %v10308_v15 = vld [vmem:[#allocation3 + $0x69] sm:$0xff] }
 0x2a0   : > { %2580 = vst.msk [vmem:[#allocation3 + $0x128] sm:$0xff] %vm511_vm10, %v2547_v4 }
 0x2a1   : > { %v1895_v60 = vpop.permute.xlu0 %1894 }
 0x2a2   : > { %v2191_v58 = vsel %vm2160_vm8, %v2158_v5, %v1895_v60  ;;  %v1897_v59 = vpop.permute.xlu1 %1896 }
 0x2a3   : > { %v2192_v20 = vsel %vm2160_vm8, %v2159_v52, %v1897_v59  ;;  %7039 = vmatprep.mubr.msk.f32.mxu0 %vm2205_vm9, %v2191_v58  ;;  %v2597_v52 = vld [vmem:[#allocation3 + $0xf] sm:$0xff] }
 0x2a4   : > { %7040 = vmatmul.mubr.msk.f32.gmra.mrb[30].mxu0 %vm2205_vm9, %v2192_v20  ;;  %v10320_v59 = vld [vmem:[#allocation3 + $0x71] sm:$0xff]  ;;  %v10324_v20 = vld [vmem:[#allocation3 + $0x89] sm:$0xff] }
 0x2a5   : > { %v7616_v47 = vpop.permute.xlu0 %7615  ;;  %7058 = vmatprep.mubr.msk.f32.mxu0 %vm511_vm10, %v10291_v35 }
 0x2a6   : > { %v7618_v27 = vunpack.i.h.bf16 %v7616_v47  ;;  %v7617_v43 = vunpack.i.l.bf16 %v7616_v47  ;;  %v7621_v31 = vpop.permute.xlu1 %7620 }
 0x2a7   : > { %v7622_v36 = vunpack.i.l.bf16 %v7621_v31  ;;  %v10299_v8 = vld [vmem:[#allocation3 + $0x12f] sm:$0xff]  ;;  %v10303_v62 = vld [vmem:[#allocation3 + $0x127] sm:$0xff]  ;;  %v7623_v9 = vunpack.i.h.bf16 %v7621_v31 }
 0x2a8   : > { %7059 = vmatmul.mubr.msk.f32.vlgmr.msra.gmra.mrb[32].mxu0 %vm511_vm10, %v10295_v51  ;;  %v3429_v4 = vsel %vm511_vm10, %v2660_v41, %v7617_v43  ;;  %v3397_v40 = vsel %vm511_vm10, %v2596_v44, %v7618_v27  ;;  %v7699_v11 = vpack.i.bf16 %v10297_v39, %v10299_v8  ;;  %v7694_v42 = vpack.i.bf16 %v10301_v3, %v10303_v62  ;;  %v10329_v44 = vld [vmem:[#allocation3 + $0x29] sm:$0xff] }
 0x2a9   : > { %3764 = vmatprep.mubr.f32.mxu1 %v3429_v4  ;;  %7061 = vmatprep.mubr.msk.f32.mxu0 %vm511_vm10, %v10308_v15  ;;  %v7626_v55 = vpop.permute.xlu0 %7625  ;;  %v3430_v60 = vsel %vm511_vm10, %v2661_v61, %v7622_v36  ;;  %v3398_v41 = vsel %vm511_vm10, %v2597_v52, %v7623_v9  ;;  %v10333_v61 = vld [vmem:[#allocation3 + $0x91] sm:$0xff]  ;;  %v10337_v36 = vld [vmem:[#allocation3 + $0xa9] sm:$0xff] }
 0x2aa   : > { %v7627_v5 = vunpack.i.l.bf16 %v7626_v55  ;;  %3765 = vmatmul.mubr.f32.vlgmr.msra.gmra.mrb[0].mxu1 %v3397_v40  ;;  %7700 = vrot.lane.b32.xlu1 %v7699_v11, %s8402_s21  ;;  %v7631_v58 = vpop.permute.xlu1 %7630  ;;  %v7628_v47 = vunpack.i.h.bf16 %v7626_v55  ;;  %v10343_v11 = vld [vmem:[#allocation3 + $0x31] sm:$0xff] }
 0x2ab   : > { %7695 = vrot.lane.b32.xlu0 %v7694_v42, %s8402_s21  ;;  %3769 = vmatprep.mubr.f32.mxu1 %v3430_v60  ;;  %v7632_v27 = vunpack.i.l.bf16 %v7631_v58  ;;  %v7633_v4 = vunpack.i.h.bf16 %v7631_v58  ;;  %v10351_v60 = vld [vmem:[#allocation3 + $0xc9] sm:$0xff] }
 0x2ac   : > { %7062 = vmatmul.mubr.msk.f32.gmra.mrb[34].mxu0 %vm511_vm10, %v10320_v59  ;;  %v3431_v43 = vsel %vm511_vm10, %v10329_v44, %v7627_v5  ;;  %v3399_v40 = vsel %vm511_vm10, %v10120_v6, %v7628_v47  ;;  %v10347_v5 = vld [vmem:[#allocation3 + $0xb1] sm:$0xff] }
 0x2ad   : > { %7064 = vmatprep.mubr.msk.f32.mxu0 %vm511_vm10, %v10324_v20  ;;  %v7636_v31 = vpop.permute.xlu0 %7635  ;;  %v3432_v9 = vsel %vm511_vm10, %v10343_v11, %v7632_v27  ;;  %v3400_v6 = vsel %vm511_vm10, %v10123_v22, %v7633_v4  ;;  %v10359_v27 = vld [vmem:[#allocation3 + $0xd1] sm:$0xff] }
 0x2ae   : > { %3770 = vmatmul.mubr.f32.gmra.mrb[2].mxu1 %v3398_v41  ;;  %v7637_v42 = vunpack.i.l.bf16 %v7636_v31  ;;  %v7641_v55 = vpop.permute.xlu1 %7640  ;;  %v7638_v52 = vunpack.i.h.bf16 %v7636_v31 }
 0x2af   : > { %3774 = vmatprep.mubr.f32.mxu1 %v3431_v43  ;;  %v7642_v58 = vunpack.i.l.bf16 %v7641_v55  ;;  %v10363_v43 = vld [vmem:[#allocation3 + $0xe9] sm:$0xff]  ;;  %v7643_v31 = vunpack.i.h.bf16 %v7641_v55 }
 0x2b0   : > { %7065 = vmatmul.mubr.msk.f32.gmra.mrb[36].mxu0 %vm511_vm10, %v10333_v61  ;;  %v3433_v47 = vsel %vm511_vm10, %v10291_v35, %v7637_v42  ;;  %v3401_v22 = vsel %vm511_vm10, %v10128_v1, %v7638_v52 }
 0x2b1   : > { %7067 = vmatprep.mubr.msk.f32.mxu0 %vm511_vm10, %v10337_v36  ;;  %v7646_v41 = vpop.permute.xlu0 %7645  ;;  %v3434_v42 = vsel %vm511_vm10, %v10295_v51, %v7642_v58  ;;  %v3402_v58 = vsel %vm511_vm10, %v10131_v57, %v7643_v31 }
 0x2b2   : > { %3775 = vmatmul.mubr.f32.gmra.mrb[4].mxu1 %v3399_v40  ;;  %v7647_v4 = vunpack.i.l.bf16 %v7646_v41  ;;  %v7648_v1 = vunpack.i.h.bf16 %v7646_v41  ;;  %v10391_v41 = vld [vmem:[#allocation3 + $0x129] sm:$0xff] }
 0x2b3   : > { %3779 = vmatprep.mubr.f32.mxu1 %v3432_v9  ;;  %v7651_v9 = vpop.permute.xlu1 %7650 }
 0x2b4   : > { %7068 = vmatmul.mubr.msk.f32.gmra.mrb[38].mxu0 %vm511_vm10, %v10347_v5  ;;  %v7653_v57 = vunpack.i.h.bf16 %v7651_v9  ;;  %v3403_v31 = vsel %vm511_vm10, %v10136_v13, %v7648_v1  ;;  %v10407_v1 = vld [vmem:[#allocation3 + $0x130] sm:$0xff] }
 0x2b5   : > { %7070 = vmatprep.mubr.msk.f32.mxu0 %vm511_vm10, %v10351_v60 }
 0x2b6   : > { %3780 = vmatmul.mubr.f32.gmra.mrb[6].mxu1 %v3400_v6 }
 0x2b7   : > { %3784 = vmatprep.mubr.f32.mxu1 %v3433_v47 }
 0x2b8   : > { %7071 = vmatmul.mubr.msk.f32.gmra.mrb[40].mxu0 %vm511_vm10, %v10359_v27 }
 0x2b9   : > { %7073 = vmatprep.mubr.msk.f32.mxu0 %vm511_vm10, %v10363_v43 }
 0x2ba   : > { %v7023_v40 = vpop.f32.mrb[18].mxu0  ;;  %3785 = vmatmul.mubr.f32.gmra.mrb[8].mxu1 %v3401_v22  ;;  %v7652_v22 = vunpack.i.l.bf16 %v7651_v9  ;;  %v3404_v9 = vsel %vm511_vm10, %v10139_v49, %v7653_v57 }
 0x2bb   : > { %v2468_v6 = vadd.f32 %v10203_v16, %v7023_v40  ;;  %v2462_v47 = vpop.f32.mrb[19].mxu0  ;;  %3789 = vmatprep.mubr.f32.mxu1 %v3434_v42  ;;  %v3435_v42 = vsel %vm511_vm10, %v10308_v15, %v7647_v4 }
 0x2bc   : > { %v2463_v55 = vadd.f32 %v10203_v16, %v2462_v47  ;;  %7074 = vmatmul.mubr.msk.f32.gmra.mrb[42].mxu0 %vm511_vm10, %v10372_v21  ;;  %v7656_v47 = vpop.permute.xlu0 %7655 }
 0x2bd   : > { %v2550_v52 = vmax.f32 %v2468_v6, 0.0  ;;  %7076 = vmatprep.mubr.msk.f32.mxu0 %vm511_vm10, %v10377_v38  ;;  %v7657_v4 = vunpack.i.l.bf16 %v7656_v47  ;;  %v3436_v6 = vsel %vm511_vm10, %v10320_v59, %v7652_v22 }
 0x2be   : > { %v2549_v40 = vmax.f32 %v2463_v55, 0.0  ;;  %3790 = vmatmul.mubr.f32.gmra.mrb[10].mxu1 %v3402_v58  ;;  %v10399_v55 = vld [vmem:[#allocation3 + $0x131] sm:$0xff]  ;;  %v7658_v58 = vunpack.i.h.bf16 %v7656_v47 }
 0x2bf   : > { %2583 = vst.msk [vmem:[#allocation3 + $0x150] sm:$0xff] %vm511_vm10, %v2550_v52  ;;  %3794 = vmatprep.mubr.f32.mxu1 %v3435_v42  ;;  %v7661_v52 = vpop.permute.xlu1 %7660  ;;  %v3437_v13 = vsel %vm511_vm10, %v10324_v20, %v7657_v4 }
 0x2c0   : > { %2582 = vst.msk [vmem:[#allocation3 + $0x148] sm:$0xff] %vm511_vm10, %v2549_v40  ;;  %7077 = vmatmul.mubr.msk.f32.gmra.mrb[44].mxu0 %vm511_vm10, %v10386_v32  ;;  %v10409_v40 = vld [vmem:[#allocation3 + $0x128] sm:$0xff]  ;;  %v7662_v22 = vunpack.i.l.bf16 %v7661_v52  ;;  %v7666_v14 = vpop.permute.xlu0 %7665  ;;  %v7663_v4 = vunpack.i.h.bf16 %v7661_v52 }
 0x2c1   : > { %7079 = vmatprep.mubr.msk.f32.mxu0 %vm511_vm10, %v10391_v41  ;;  %v7668_v63 = vunpack.i.h.bf16 %v7666_v14 }
 0x2c2   : > { %3795 = vmatmul.mubr.f32.gmra.mrb[12].mxu1 %v3403_v31  ;;  %v3438_v12 = vsel %vm511_vm10, %v10333_v61, %v7662_v22  ;;  %v3406_v54 = vsel %vm511_vm10, %v10151_v7, %v7663_v4 }
 0x2c3   : > { %3799 = vmatprep.mubr.f32.mxu1 %v3436_v6  ;;  %v7671_v2 = vpop.permute.xlu1 %7670 }
 0x2c4   : > { %7080 = vmatmul.mubr.msk.f32.gmra.mrb[46].mxu0 %vm511_vm10, %v10399_v55  ;;  %v7672_v53 = vunpack.i.l.bf16 %v7671_v2 }
 0x2c6   : > { %3800 = vmatmul.mubr.f32.gmra.mrb[14].mxu1 %v3404_v9  ;;  %v10419_v49 = vld [vmem:[#allocation3 + $0x151] sm:$0xff]  ;;  %v3405_v9 = vsel %vm511_vm10, %v10144_v0, %v7658_v58  ;;  %v3407_v0 = vsel %vm511_vm10, %v10160_v26, %v7668_v63  ;;  %v3440_v58 = vsel %vm511_vm10, %v10347_v5, %v7672_v53 }
 0x2c7   : > { %3804 = vmatprep.mubr.f32.mxu1 %v3437_v13  ;;  %v10411_v42 = vld [vmem:[#allocation3 + $0x149] sm:$0xff]  ;;  %v7667_v13 = vunpack.i.l.bf16 %v7666_v14 }
 0x2c8   : > { %v10413_v31 = vld [vmem:[#allocation3 + $0x14f] sm:$0xff]  ;;  %v10415_v6 = vld [vmem:[#allocation3 + $0x147] sm:$0xff]  ;;  %7082 = vmatprep.mubr.msk.f32.mxu0 %vm511_vm10, %v10411_v42 }
 0x2c9   : > { %v7709_v47 = vpack.i.bf16 %v10407_v1, %v10413_v31  ;;  %v7704_v57 = vpack.i.bf16 %v10409_v40, %v10415_v6  ;;  %7083 = vmatmul.mubr.msk.f32.gmra.mrb[48].mxu0 %vm511_vm10, %v10419_v49  ;;  %v3439_v52 = vsel %vm511_vm10, %v10337_v36, %v7667_v13 }
 0x2ca   : > { %3805 = vmatmul.mubr.f32.gmra.mrb[16].mxu1 %v3405_v9 }
 0x2cb   : > { %7710 = vrot.lane.b32.xlu1 %v7709_v47, %s8402_s21  ;;  %7705 = vrot.lane.b32.xlu0 %v7704_v57, %s8402_s21  ;;  %v7673_v47 = vunpack.i.h.bf16 %v7671_v2 }
 0x2cc   : > { %3809 = vmatprep.mubr.f32.mxu1 %v3438_v12 }
 0x2cd   : > { %v3408_v12 = vsel %vm511_vm10, %v10168_v45, %v7673_v47 }
 0x2ce   : > { %3810 = vmatmul.mubr.f32.gmra.mrb[18].mxu1 %v3406_v54 }
 0x2cf   : > { %3814 = vmatprep.mubr.f32.mxu1 %v3439_v52 }
 0x2d2   : > { %3815 = vmatmul.mubr.f32.gmra.mrb[20].mxu1 %v3407_v0 }
 0x2d3   : > { %3819 = vmatprep.mubr.f32.mxu1 %v3440_v58  ;;  %v10455_v58 = vld [vmem:[#allocation3 + $0x150] sm:$0xff] }
 0x2d6   : > { %3820 = vmatmul.mubr.f32.gmra.mrb[22].mxu1 %v3408_v12  ;;  %v10457_v12 = vld [vmem:[#allocation3 + $0x148] sm:$0xff] }
 0x2da   : > { %v7026_v14 = vpop.f32.mrb[20].mxu0 }
 0x2db   : > { %v2478_v54 = vadd.f32 %v10203_v16, %v7026_v14  ;;  %v2472_v7 = vpop.f32.mrb[21].mxu0 }
 0x2dc   : > { %v2473_v22 = vadd.f32 %v10203_v16, %v2472_v7  ;;  %v7681_v57 = vpop.permute.xlu1 %7680  ;;  %v7676_v2 = vpop.permute.xlu0 %7675 }
 0x2dd   : > { %v2552_v4 = vmax.f32 %v2478_v54, 0.0  ;;  %v7678_v9 = vunpack.i.h.bf16 %v7676_v2  ;;  %v7682_v26 = vunpack.i.l.bf16 %v7681_v57  ;;  %v7677_v13 = vunpack.i.l.bf16 %v7676_v2 }
 0x2de   : > { %v2551_v63 = vmax.f32 %v2473_v22, 0.0  ;;  %v7683_v52 = vunpack.i.h.bf16 %v7681_v57 }
 0x2df   : > { %2585 = vst.msk [vmem:[#allocation3 + $0x170] sm:$0xff] %vm511_vm10, %v2552_v4  ;;  %v3409_v53 = vsel %vm511_vm10, %v10192_v25, %v7678_v9  ;;  %v3441_v45 = vsel %vm511_vm10, %v10351_v60, %v7677_v13  ;;  %v3442_v47 = vsel %vm511_vm10, %v10359_v27, %v7682_v26 }
 0x2e0   : > { %2584 = vst.msk [vmem:[#allocation3 + $0x168] sm:$0xff] %vm511_vm10, %v2551_v63  ;;  %3824 = vmatprep.mubr.f32.mxu1 %v3441_v45  ;;  %v3410_v0 = vsel %vm511_vm10, %v10190_v48, %v7683_v52 }
 0x2e1   : > { %3825 = vmatmul.mubr.f32.gmra.mrb[24].mxu1 %v3409_v53 }
 0x2e2   : > { %3829 = vmatprep.mubr.f32.mxu1 %v3442_v47 }
 0x2e5   : > { %3830 = vmatmul.mubr.f32.gmra.mrb[26].mxu1 %v3410_v0 }
 0x2e6   : > { %v10467_v7 = vld [vmem:[#allocation3 + $0x171] sm:$0xff] }
 0x2e7   : > { %v10459_v25 = vld [vmem:[#allocation3 + $0x169] sm:$0xff] }
 0x2e8   : > { %v10461_v14 = vld [vmem:[#allocation3 + $0x16f] sm:$0xff]  ;;  %v10463_v54 = vld [vmem:[#allocation3 + $0x167] sm:$0xff]  ;;  %7085 = vmatprep.mubr.msk.f32.mxu0 %vm511_vm10, %v10459_v25 }
 0x2e9   : > { %v7719_v22 = vpack.i.bf16 %v10455_v58, %v10461_v14  ;;  %v7714_v48 = vpack.i.bf16 %v10457_v12, %v10463_v54  ;;  %7086 = vmatmul.mubr.msk.f32.gmra.mrb[50].mxu0 %vm511_vm10, %v10467_v7 }
 0x2eb   : > { %7720 = vrot.lane.b32.xlu1 %v7719_v22, %s8402_s21  ;;  %7715 = vrot.lane.b32.xlu0 %v7714_v48, %s8402_s21 }
 0x2fa   : > { %v7029_v57 = vpop.f32.mrb[22].mxu0 }
 0x2fb   : > { %v2488_v2 = vadd.f32 %v10203_v16, %v7029_v57  ;;  %v2482_v4 = vpop.f32.mrb[23].mxu0 }
 0x2fc   : > { %v2483_v9 = vadd.f32 %v10203_v16, %v2482_v4  ;;  %v7691_v63 = vpop.permute.xlu1 %7690  ;;  %v7686_v26 = vpop.permute.xlu0 %7685  ;;  %v10489_v4 = vld [vmem:[#allocation3 + $0x170] sm:$0xff] }
 0x2fd   : > { %v2554_v13 = vmax.f32 %v2488_v2, 0.0  ;;  %v7688_v53 = vunpack.i.h.bf16 %v7686_v26  ;;  %v7692_v52 = vunpack.i.l.bf16 %v7691_v63  ;;  %v7687_v47 = vunpack.i.l.bf16 %v7686_v26 }
 0x2fe   : > { %v2553_v45 = vmax.f32 %v2483_v9, 0.0  ;;  %v7693_v48 = vunpack.i.h.bf16 %v7691_v63  ;;  %v10491_v9 = vld [vmem:[#allocation3 + $0x168] sm:$0xff] }
 0x2ff   : > { %2587 = vst.msk [vmem:[#allocation3 + $0x190] sm:$0xff] %vm511_vm10, %v2554_v13  ;;  %v3411_v0 = vsel %vm511_vm10, %v10229_v56, %v7688_v53  ;;  %v3443_v22 = vsel %vm511_vm10, %v10363_v43, %v7687_v47  ;;  %v3444_v57 = vsel %vm511_vm10, %v10372_v21, %v7692_v52  ;;  %v3557_v56 = vld [vmem:[%s12643_s4 + $0x100] sm:$0xff]  ;;  %v3558_v52 = vld [vmem:[%s12643_s4 + $0x108] sm:$0xff] }
 0x300   : > { %2586 = vst.msk [vmem:[#allocation3 + $0x188] sm:$0xff] %vm511_vm10, %v2553_v45  ;;  %3834 = vmatprep.mubr.f32.mxu1 %v3443_v22  ;;  %v3412_v2 = vsel %vm511_vm10, %v10227_v46, %v7693_v48  ;;  %v7227_v47 = vpack.c.bf16 %v3558_v52, %v3557_v56  ;;  %v3560_v22 = vld [vmem:[%s12643_s4 + $0x118] sm:$0xff] }
 0x301   : > { %3835 = vmatmul.mubr.f32.gmra.mrb[28].mxu1 %v3411_v0  ;;  %v3559_v0 = vld [vmem:[%s12643_s4 + $0x110] sm:$0xff] }
 0x302   : > { %3839 = vmatprep.mubr.f32.mxu1 %v3444_v57  ;;  %7228 = vmatpush1.bf16.msra.mxu1 %v7227_v47  ;;  %v7230_v48 = vpack.c.bf16 %v3560_v22, %v3559_v0  ;;  %v3561_v57 = vld [vmem:[%s12643_s4 + $0x120] sm:$0xff] }
 0x303   : > { %7229 = vmatprep.subr.bf16.mxu1 %v12739_v10 }
 0x305   : > { %3840 = vmatmul.mubr.f32.gmra.mrb[30].mxu1 %v3412_v2  ;;  %v3562_v2 = vld [vmem:[%s12643_s4 + $0x128] sm:$0xff] }
 0x306   : > { %v10504_v53 = vld [vmem:[#allocation3 + $0x191] sm:$0xff]  ;;  %7231 = vmatpush1.bf16.msra.mxu1 %v7230_v48  ;;  %v7233_v56 = vpack.c.bf16 %v3562_v2, %v3561_v57 }
 0x307   : > { %v10496_v26 = vld [vmem:[#allocation3 + $0x189] sm:$0xff]  ;;  %7232 = vmatprep.subr.bf16.mxu1 %v12739_v10  ;;  %v3564_v2 = vld [vmem:[%s12643_s4 + $0x138] sm:$0xff] }
 0x308   : > { %v10498_v63 = vld [vmem:[#allocation3 + $0x18f] sm:$0xff]  ;;  %v10500_v13 = vld [vmem:[#allocation3 + $0x187] sm:$0xff]  ;;  %7088 = vmatprep.mubr.msk.f32.mxu0 %vm511_vm10, %v10496_v26 }
 0x309   : > { %v7729_v46 = vpack.i.bf16 %v10489_v4, %v10498_v63  ;;  %v7724_v45 = vpack.i.bf16 %v10491_v9, %v10500_v13  ;;  %7089 = vmatmul.mubr.msk.f32.gmra.mrb[52].mxu0 %vm511_vm10, %v10504_v53  ;;  %v3563_v57 = vld [vmem:[%s12643_s4 + $0x130] sm:$0xff] }
 0x30a   : > { %7234 = vmatpush1.bf16.msra.mxu1 %v7233_v56  ;;  %v7236_v56 = vpack.c.bf16 %v3564_v2, %v3563_v57  ;;  %v3566_v2 = vld [vmem:[%s12643_s4 + $0x148] sm:$0xff] }
 0x30b   : > { %7730 = vrot.lane.b32.xlu1 %v7729_v46, %s8402_s21  ;;  %7725 = vrot.lane.b32.xlu0 %v7724_v45, %s8402_s21 }
 0x30c   : > { %7235 = vmatprep.subr.bf16.mxu1 %v12739_v10 }
 0x30e   : > { %7237 = vmatpush1.bf16.msra.mxu1 %v7236_v56 }
 0x30f   : > { %7238 = vmatprep.subr.bf16.mxu1 %v12739_v10 }
 0x31a   : > { %v7032_v46 = vpop.f32.mrb[24].mxu0 }
 0x31b   : > { %v2498_v45 = vadd.f32 %v10203_v16, %v7032_v46  ;;  %v2492_v52 = vpop.f32.mrb[25].mxu0 }
 0x31c   : > { %v2493_v47 = vadd.f32 %v10203_v16, %v2492_v52  ;;  %v7701_v0 = vpop.permute.xlu1 %7700 }
 0x31d   : > { %v2556_v22 = vmax.f32 %v2498_v45, 0.0  ;;  %v7696_v48 = vpop.permute.xlu0 %7695  ;;  %v7702_v33 = vunpack.i.l.bf16 %v7701_v0  ;;  %v7703_v52 = vunpack.i.h.bf16 %v7701_v0 }
 0x31e   : > { %v2555_v34 = vmax.f32 %v2493_v47, 0.0  ;;  %v7698_v30 = vunpack.i.h.bf16 %v7696_v48  ;;  %v7697_v29 = vunpack.i.l.bf16 %v7696_v48 }
 0x31f   : > { %2589 = vst.msk [vmem:[#allocation3 + $0x1b0] sm:$0xff] %vm511_vm10, %v2556_v22  ;;  %v3446_v47 = vsel %vm511_vm10, %v10386_v32, %v7702_v33  ;;  %v3414_v22 = vsel %vm511_vm10, %v10259_v37, %v7703_v52 }
 0x320   : > { %2588 = vst.msk [vmem:[#allocation3 + $0x1a8] sm:$0xff] %vm511_vm10, %v2555_v34  ;;  %v3445_v46 = vsel %vm511_vm10, %v10377_v38, %v7697_v29  ;;  %v3413_v45 = vsel %vm511_vm10, %v10261_v50, %v7698_v30  ;;  %v10551_v34 = vld [vmem:[#allocation3 + $0x190] sm:$0xff]  ;;  %v10553_v29 = vld [vmem:[#allocation3 + $0x188] sm:$0xff]  ;;  %v3565_v30 = vld [vmem:[%s12643_s4 + $0x140] sm:$0xff] }
 0x321   : > { %3844 = vmatprep.mubr.f32.mxu1 %v3445_v46  ;;  %v7239_v56 = vpack.c.bf16 %v3566_v2, %v3565_v30  ;;  %v3567_v46 = vld [vmem:[%s12643_s4 + $0x150] sm:$0xff] }
 0x322   : > { %3845 = vmatmul.mubr.f32.gmra.mrb[32].mxu1 %v3413_v45  ;;  %v3568_v45 = vld [vmem:[%s12643_s4 + $0x158] sm:$0xff] }
 0x323   : > { %3849 = vmatprep.mubr.f32.mxu1 %v3446_v47  ;;  %7240 = vmatpush1.bf16.msra.mxu1 %v7239_v56  ;;  %v7242_v52 = vpack.c.bf16 %v3568_v45, %v3567_v46  ;;  %v3569_v47 = vld [vmem:[%s12643_s4 + $0x160] sm:$0xff] }
 0x324   : > { %7241 = vmatprep.subr.bf16.mxu1 %v12739_v10 }
 0x326   : > { %3850 = vmatmul.mubr.f32.gmra.mrb[34].mxu1 %v3414_v22  ;;  %v10566_v48 = vld [vmem:[#allocation3 + $0x1b1] sm:$0xff]  ;;  %v3570_v22 = vld [vmem:[%s12643_s4 + $0x168] sm:$0xff] }
 0x327   : > { %v10558_v50 = vld [vmem:[#allocation3 + $0x1a9] sm:$0xff]  ;;  %7243 = vmatpush1.bf16.msra.mxu1 %v7242_v52  ;;  %v7245_v30 = vpack.c.bf16 %v3570_v22, %v3569_v47  ;;  %v3572_v22 = vld [vmem:[%s12643_s4 + $0x178] sm:$0xff] }
 0x328   : > { %v10560_v0 = vld [vmem:[#allocation3 + $0x1af] sm:$0xff]  ;;  %v10562_v33 = vld [vmem:[#allocation3 + $0x1a7] sm:$0xff]  ;;  %7091 = vmatprep.mubr.msk.f32.mxu0 %vm511_vm10, %v10558_v50  ;;  %7244 = vmatprep.subr.bf16.mxu1 %v12739_v10 }
 0x329   : > { %12740 = vst [vmem:[#allocation36_spill] sm:$0xff] %v10560_v0  ;;  %v7739_v37 = vpack.i.bf16 %v10551_v34, %v10560_v0  ;;  %v7734_v57 = vpack.i.bf16 %v10553_v29, %v10562_v33  ;;  %7092 = vmatmul.mubr.msk.f32.gmra.mrb[54].mxu0 %vm511_vm10, %v10566_v48  ;;  %v3571_v47 = vld [vmem:[%s12643_s4 + $0x170] sm:$0xff] }
 0x32b   : > { %7740 = vrot.lane.b32.xlu1 %v7739_v37, %s8402_s21  ;;  %7735 = vrot.lane.b32.xlu0 %v7734_v57, %s8402_s21 }
 0x32c   : > { %7246 = vmatpush1.bf16.msra.mxu1 %v7245_v30 }
 0x32d   : > { %7247 = vmatprep.subr.bf16.mxu1 %v12739_v10 }
 0x33a   : > { %v7035_v37 = vpop.f32.mrb[26].mxu0 }
 0x33b   : > { %v2508_v57 = vadd.f32 %v10203_v16, %v7035_v37  ;;  %v2502_v2 = vpop.f32.mrb[27].mxu0  ;;  %v7248_v37 = vpack.c.bf16 %v3572_v22, %v3571_v47  ;;  %v3574_v22 = vld [vmem:[%s12643_s4 + $0x188] sm:$0xff] }
 0x33c   : > { %v2503_v56 = vadd.f32 %v10203_v16, %v2502_v2 }
 0x33d   : > { %v7711_v46 = vpop.permute.xlu1 %7710  ;;  %v7706_v45 = vpop.permute.xlu0 %7705  ;;  %v2558_v52 = vmax.f32 %v2508_v57, 0.0  ;;  %7249 = vmatpush1.bf16.msra.mxu1 %v7248_v37 }
 0x33e   : > { %v7708_v28 = vunpack.i.h.bf16 %v7706_v45  ;;  %v2557_v24 = vmax.f32 %v2503_v56, 0.0  ;;  %v7712_v23 = vunpack.i.l.bf16 %v7711_v46  ;;  %v7707_v19 = vunpack.i.l.bf16 %v7706_v45  ;;  %7250 = vmatprep.subr.bf16.mxu1 %v12739_v10 }
 0x33f   : > { %2591 = vst.msk [vmem:[#allocation3 + $0x1d0] sm:$0xff] %vm511_vm10, %v2558_v52  ;;  %v7713_v2 = vunpack.i.h.bf16 %v7711_v46 }
 0x340   : > { %v3415_v30 = vsel %vm511_vm10, %v10303_v62, %v7708_v28  ;;  %2590 = vst.msk [vmem:[#allocation3 + $0x1c8] sm:$0xff] %vm511_vm10, %v2557_v24  ;;  %v3447_v57 = vsel %vm511_vm10, %v10391_v41, %v7707_v19  ;;  %v3448_v56 = vsel %vm511_vm10, %v10399_v55, %v7712_v23  ;;  %v10613_v28 = vld [vmem:[#allocation3 + $0x1b0] sm:$0xff]  ;;  %v10615_v24 = vld [vmem:[#allocation3 + $0x1a8] sm:$0xff]  ;;  %v3573_v19 = vld [vmem:[%s12643_s4 + $0x180] sm:$0xff] }
 0x341   : > { %3854 = vmatprep.mubr.f32.mxu1 %v3447_v57  ;;  %v3416_v45 = vsel %vm511_vm10, %v10299_v8, %v7713_v2  ;;  %v7251_v37 = vpack.c.bf16 %v3574_v22, %v3573_v19  ;;  %v3576_v57 = vld [vmem:[%s12643_s4 + $0x198] sm:$0xff] }
 0x342   : > { %3855 = vmatmul.mubr.f32.gmra.mrb[36].mxu1 %v3415_v30  ;;  %v3575_v30 = vld [vmem:[%s12643_s4 + $0x190] sm:$0xff] }
 0x343   : > { %3859 = vmatprep.mubr.f32.mxu1 %v3448_v56  ;;  %7252 = vmatpush1.bf16.msra.mxu1 %v7251_v37  ;;  %v7254_v2 = vpack.c.bf16 %v3576_v57, %v3575_v30  ;;  %v3577_v56 = vld [vmem:[%s12643_s4 + $0x1a0] sm:$0xff] }
 0x344   : > { %7253 = vmatprep.subr.bf16.mxu1 %v12739_v10 }
 0x346   : > { %3860 = vmatmul.mubr.f32.gmra.mrb[38].mxu1 %v3416_v45  ;;  %v10628_v52 = vld [vmem:[#allocation3 + $0x1d1] sm:$0xff]  ;;  %v3578_v45 = vld [vmem:[%s12643_s4 + $0x1a8] sm:$0xff] }
 0x347   : > { %v10620_v62 = vld [vmem:[#allocation3 + $0x1c9] sm:$0xff]  ;;  %7255 = vmatpush1.bf16.msra.mxu1 %v7254_v2  ;;  %v7257_v19 = vpack.c.bf16 %v3578_v45, %v3577_v56  ;;  %v3580_v56 = vld [vmem:[%s12643_s4 + $0x1b8] sm:$0xff] }
 0x348   : > { %v10622_v46 = vld [vmem:[#allocation3 + $0x1cf] sm:$0xff]  ;;  %v10624_v23 = vld [vmem:[#allocation3 + $0x1c7] sm:$0xff]  ;;  %7094 = vmatprep.mubr.msk.f32.mxu0 %vm511_vm10, %v10620_v62  ;;  %7256 = vmatprep.subr.bf16.mxu1 %v12739_v10 }
 0x349   : > { %12741 = vst [vmem:[#allocation37_spill] sm:$0xff] %v10622_v46  ;;  %12742 = vst [vmem:[#allocation38_spill] sm:$0xff] %v10624_v23  ;;  %v7749_v8 = vpack.i.bf16 %v10613_v28, %v10622_v46  ;;  %v7744_v47 = vpack.i.bf16 %v10615_v24, %v10624_v23  ;;  %7095 = vmatmul.mubr.msk.f32.gmra.mrb[56].mxu0 %vm511_vm10, %v10628_v52  ;;  %v3579_v2 = vld [vmem:[%s12643_s4 + $0x1b0] sm:$0xff] }
 0x34a   : > { %v7260_v45 = vpack.c.bf16 %v3580_v56, %v3579_v2  ;;  %v3583_v2 = vld [vmem:[%s12643_s4 + $0x1d0] sm:$0xff] }
 0x34b   : > { %7750 = vrot.lane.b32.xlu1 %v7749_v8, %s8402_s21  ;;  %7745 = vrot.lane.b32.xlu0 %v7744_v47, %s8402_s21 }
 0x34c   : > { %7258 = vmatpush1.bf16.msra.mxu1 %v7257_v19 }
 0x34d   : > { %7259 = vmatprep.subr.bf16.mxu1 %v12739_v10 }
 0x350   : > { %7261 = vmatpush1.bf16.msra.mxu1 %v7260_v45 }
 0x351   : > { %7262 = vmatprep.subr.bf16.mxu1 %v12739_v10 }
 0x35a   : > { %v7038_v8 = vpop.f32.mrb[28].mxu0 }
 0x35b   : > { %v2518_v47 = vadd.f32 %v10203_v16, %v7038_v8  ;;  %v2512_v22 = vpop.f32.mrb[29].mxu0 }
 0x35c   : > { %v2513_v30 = vadd.f32 %v10203_v16, %v2512_v22 }
 0x35d   : > { %v7721_v37 = vpop.permute.xlu1 %7720  ;;  %v7716_v57 = vpop.permute.xlu0 %7715  ;;  %v2560_v18 = vmax.f32 %v2518_v47, 0.0 }
 0x35e   : > { %v7718_v17 = vunpack.i.h.bf16 %v7716_v57  ;;  %v2559_v46 = vmax.f32 %v2513_v30, 0.0  ;;  %v7722_v23 = vunpack.i.l.bf16 %v7721_v37  ;;  %v7717_v0 = vunpack.i.l.bf16 %v7716_v57  ;;  %v3582_v57 = vld [vmem:[%s12643_s4 + $0x1c8] sm:$0xff] }
 0x35f   : > { %2593 = vst.msk [vmem:[#allocation3 + $0x1f0] sm:$0xff] %vm511_vm10, %v2560_v18  ;;  %v7723_v8 = vunpack.i.h.bf16 %v7721_v37 }
 0x360   : > { %v3417_v16 = vsel %vm511_vm10, %v10415_v6, %v7718_v17  ;;  %2592 = vst.msk [vmem:[#allocation3 + $0x1e8] sm:$0xff] %vm511_vm10, %v2559_v46  ;;  %v3449_v19 = vsel %vm511_vm10, %v10411_v42, %v7717_v0  ;;  %v3450_v47 = vsel %vm511_vm10, %v10419_v49, %v7722_v23  ;;  %v10675_v17 = vld [vmem:[#allocation3 + $0x1d0] sm:$0xff]  ;;  %v10677_v6 = vld [vmem:[#allocation3 + $0x1c8] sm:$0xff]  ;;  %v3581_v0 = vld [vmem:[%s12643_s4 + $0x1c0] sm:$0xff] }
 0x361   : > { %3864 = vmatprep.mubr.f32.mxu1 %v3449_v19  ;;  %v3418_v18 = vsel %vm511_vm10, %v10413_v31, %v7723_v8  ;;  %v7263_v56 = vpack.c.bf16 %v3582_v57, %v3581_v0  ;;  %v3585_v19 = vld [vmem:[%s12643_s4 + $0x1e0] sm:$0xff]  ;;  %v3586_v8 = vld [vmem:[%s12643_s4 + $0x1e8] sm:$0xff] }
 0x362   : > { %3865 = vmatmul.mubr.f32.gmra.mrb[40].mxu1 %v3417_v16  ;;  %v3584_v16 = vld [vmem:[%s12643_s4 + $0x1d8] sm:$0xff]  ;;  %v8319_v0 = vld [vmem:[%s12642_s3] ss:$0 sm:$0xff] }
 0x363   : > { %3869 = vmatprep.mubr.f32.mxu1 %v3450_v47  ;;  %7264 = vmatpush1.bf16.msra.mxu1 %v7263_v56  ;;  %v7266_v45 = vpack.c.bf16 %v3584_v16, %v3583_v2  ;;  %v7269_v47 = vpack.c.bf16 %v3586_v8, %v3585_v19 }
 0x364   : > { %7265 = vmatprep.subr.bf16.mxu1 %v12739_v10 }
 0x366   : > { %3870 = vmatmul.mubr.f32.gmra.mrb[42].mxu1 %v3418_v18  ;;  %v10690_v30 = vld [vmem:[#allocation3 + $0x1f1] sm:$0xff] }
 0x367   : > { %v10682_v46 = vld [vmem:[#allocation3 + $0x1e9] sm:$0xff]  ;;  %7267 = vmatpush1.bf16.msra.mxu1 %v7266_v45 }
 0x368   : > { %v10684_v22 = vld [vmem:[#allocation3 + $0x1ef] sm:$0xff]  ;;  %v10686_v23 = vld [vmem:[#allocation3 + $0x1e7] sm:$0xff]  ;;  %7097 = vmatprep.mubr.msk.f32.mxu0 %vm511_vm10, %v10682_v46  ;;  %7268 = vmatprep.subr.bf16.mxu1 %v12739_v10 }
 0x369   : > { %12743 = vst [vmem:[#allocation39_spill] sm:$0xff] %v10684_v22  ;;  %12744 = vst [vmem:[#allocation40_spill] sm:$0xff] %v10686_v23  ;;  %v7759_v31 = vpack.i.bf16 %v10675_v17, %v10684_v22  ;;  %v7754_v37 = vpack.i.bf16 %v10677_v6, %v10686_v23  ;;  %7098 = vmatmul.mubr.msk.f32.gmra.mrb[58].mxu0 %vm511_vm10, %v10690_v30 }
 0x36b   : > { %7760 = vrot.lane.b32.xlu1 %v7759_v31, %s8402_s21  ;;  %7755 = vrot.lane.b32.xlu0 %v7754_v37, %s8402_s21 }
 0x36c   : > { %7270 = vmatpush1.bf16.msra.mxu1 %v7269_v47 }
 0x36d   : > { %7271 = vmatprep.subr.bf16.mxu1 %v12739_v10 }
 0x377   : > { %v7041_v18 = vpop.f32.mrb[30].mxu0 }
 0x378   : > { %v2528_v31 = vadd.f32 %v8319_v0, %v7041_v18  ;;  %v2522_v37 = vpop.f32.mrb[31].mxu0  ;;  %v3587_v18 = vld [vmem:[%s12643_s4 + $0x1f0] sm:$0xff] }
 0x379   : > { %v2523_v57 = vadd.f32 %v8319_v0, %v2522_v37  ;;  %v3588_v0 = vld [vmem:[%s12643_s4 + $0x1f8] sm:$0xff] }
 0x37a   : > { %v2562_v2 = vmax.f32 %v2528_v31, 0.0 }
 0x37b   : > { %v2561_v56 = vmax.f32 %v2523_v57, 0.0  ;;  %v10721_v16 = vpop.f32.mrb[32].mxu0 }
 0x37c   : > { %12745 = vst [vmem:[#allocation41_spill] sm:$0xff] %v10721_v16  ;;  %2595 = vst.msk [vmem:[#allocation3 + $0x210] sm:$0xff] %vm511_vm10, %v2562_v2  ;;  %v10724_v45 = vpop.f32.mrb[33].mxu0  ;;  %v7272_v2 = vpack.c.bf16 %v3588_v0, %v3587_v18  ;;  %v10745_v16 = vld [vmem:[#allocation3 + $0x1f0] sm:$0xff] }
 0x37d   : > { %12746 = vst [vmem:[#allocation42_spill] sm:$0xff] %v10724_v45  ;;  %v7731_v19 = vpop.permute.xlu1 %7730  ;;  %2594 = vst.msk [vmem:[#allocation3 + $0x208] sm:$0xff] %vm511_vm10, %v2561_v56  ;;  %v7726_v8 = vpop.permute.xlu0 %7725  ;;  %v10747_v45 = vld [vmem:[#allocation3 + $0x1e8] sm:$0xff] }
 0x37e   : > { %v7732_v47 = vunpack.i.l.bf16 %v7731_v19  ;;  %v7728_v10 = vunpack.i.h.bf16 %v7726_v8  ;;  %v7727_v22 = vunpack.i.l.bf16 %v7726_v8  ;;  %v7733_v56 = vunpack.i.h.bf16 %v7731_v19  ;;  %7273 = vmatpush1.bf16.msra.mxu1 %v7272_v2 }
 0x37f   : > { %v10727_v23 = vpop.f32.mrb[34].mxu0 }
 0x380   : > { %12747 = vst [vmem:[#allocation43_spill] sm:$0xff] %v10727_v23  ;;  %v3451_v31 = vsel %vm511_vm10, %v10459_v25, %v7727_v22  ;;  %v10737_v37 = vpop.f32.mrb[35].mxu0  ;;  %v3419_v57 = vsel %vm511_vm10, %v10463_v54, %v7728_v10  ;;  %v3452_v8 = vsel %vm511_vm10, %v10467_v7, %v7732_v47  ;;  %v3420_v19 = vsel %vm511_vm10, %v10461_v14, %v7733_v56 }
 0x381   : > { %12748 = vst [vmem:[#allocation44_spill] sm:$0xff] %v10737_v37  ;;  %3874 = vmatprep.mubr.f32.mxu1 %v3451_v31  ;;  %v10763_v31 = vld [vmem:[#allocation3 + $0x50] sm:$0xff] }
 0x382   : > { %3875 = vmatmul.mubr.f32.gmra.mrb[44].mxu1 %v3419_v57  ;;  %v10765_v57 = vld [vmem:[#allocation3 + $0x48] sm:$0xff]  ;;  %v7779_v56 = vpack.i.bf16 %v10343_v11, %v10763_v31 }
 0x383   : > { %3879 = vmatprep.mubr.f32.mxu1 %v3452_v8  ;;  %v10743_v23 = vpop.f32.mrb[36].mxu0  ;;  %v10757_v47 = vld [vmem:[#allocation3 + $0x211] sm:$0xff]  ;;  %v7774_v8 = vpack.i.bf16 %v10329_v44, %v10765_v57  ;;  %v10793_v44 = vld [vmem:[#allocation3 + $0x88] sm:$0xff] }
 0x384   : > { %12749 = vst [vmem:[#allocation45_spill] sm:$0xff] %v10743_v23  ;;  %v10749_v22 = vpop.f32.mrb[37].mxu0  ;;  %v10751_v37 = vld [vmem:[#allocation3 + $0x209] sm:$0xff] }
 0x385   : > { %12750 = vst [vmem:[#allocation46_spill] sm:$0xff] %v10749_v22  ;;  %v2723_v10 = vld [vmem:[#allocation3 + $0x20f] sm:$0xff]  ;;  %v2722_v54 = vld [vmem:[#allocation3 + $0x207] sm:$0xff]  ;;  %7100 = vmatprep.mubr.msk.f32.mxu0 %vm511_vm10, %v10751_v37 }
 0x386   : > { %v7769_v18 = vpack.i.bf16 %v10745_v16, %v2723_v10  ;;  %v7764_v0 = vpack.i.bf16 %v10747_v45, %v2722_v54  ;;  %3880 = vmatmul.mubr.f32.gmra.mrb[46].mxu1 %v3420_v19  ;;  %7101 = vmatmul.mubr.msk.f32.gmra.mrb[60].mxu0 %vm511_vm10, %v10757_v47  ;;  %v10777_v10 = vld [vmem:[#allocation3 + $0x70] sm:$0xff]  ;;  %v10779_v54 = vld [vmem:[#allocation3 + $0x68] sm:$0xff] }
 0x387   : > { %v10767_v2 = vpop.f32.mrb[38].mxu0  ;;  %v7784_v11 = vpack.i.bf16 %v10291_v35, %v10779_v54  ;;  %v10807_v35 = vld [vmem:[#allocation3 + $0xa8] sm:$0xff] }
 0x388   : > { %12751 = vst [vmem:[#allocation47_spill] sm:$0xff] %v10767_v2  ;;  %7770 = vrot.lane.b32.xlu1 %v7769_v18, %s8402_s21  ;;  %7765 = vrot.lane.b32.xlu0 %v7764_v0, %s8402_s21  ;;  %v10771_v14 = vpop.f32.mrb[39].mxu0  ;;  %v7789_v0 = vpack.i.bf16 %v10295_v51, %v10777_v10  ;;  %v10791_v2 = vld [vmem:[#allocation3 + $0x90] sm:$0xff]  ;;  %v7794_v51 = vpack.i.bf16 %v10308_v15, %v10793_v44  ;;  %v10821_v15 = vld [vmem:[#allocation3 + $0xc8] sm:$0xff] }
 0x389   : > { %12752 = vst [vmem:[#allocation48_spill] sm:$0xff] %v10771_v14 }
 0x38b   : > { %v10781_v19 = vpop.f32.mrb[40].mxu0 }
 0x38c   : > { %12753 = vst [vmem:[#allocation49_spill] sm:$0xff] %v10781_v19  ;;  %7780 = vrot.lane.b32.xlu1 %v7779_v56, %s8402_s21  ;;  %7775 = vrot.lane.b32.xlu0 %v7774_v8, %s8402_s21  ;;  %v10785_v18 = vpop.f32.mrb[41].mxu0  ;;  %v7799_v8 = vpack.i.bf16 %v10320_v59, %v10791_v2  ;;  %v10805_v19 = vld [vmem:[#allocation3 + $0xb0] sm:$0xff]  ;;  %v7804_v59 = vpack.i.bf16 %v10324_v20, %v10807_v35  ;;  %v10835_v20 = vld [vmem:[#allocation3 + $0xe8] sm:$0xff] }
 0x38d   : > { %12754 = vst [vmem:[#allocation50_spill] sm:$0xff] %v10785_v18 }
 0x38f   : > { %v10795_v14 = vpop.f32.mrb[42].mxu0 }
 0x390   : > { %12755 = vst [vmem:[#allocation51_spill] sm:$0xff] %v10795_v14  ;;  %7790 = vrot.lane.b32.xlu1 %v7789_v0, %s8402_s21  ;;  %7785 = vrot.lane.b32.xlu0 %v7784_v11, %s8402_s21  ;;  %v10799_v56 = vpop.f32.mrb[43].mxu0  ;;  %v7809_v11 = vpack.i.bf16 %v10333_v61, %v10805_v19  ;;  %v10819_v14 = vld [vmem:[#allocation3 + $0xd0] sm:$0xff]  ;;  %v7814_v61 = vpack.i.bf16 %v10337_v36, %v10821_v15 }
 0x391   : > { %12756 = vst [vmem:[#allocation52_spill] sm:$0xff] %v10799_v56  ;;  %v7824_v36 = vpack.i.bf16 %v10351_v60, %v10835_v20 }
 0x393   : > { %v10809_v18 = vpop.f32.mrb[44].mxu0 }
 0x394   : > { %12757 = vst [vmem:[#allocation53_spill] sm:$0xff] %v10809_v18  ;;  %7800 = vrot.lane.b32.xlu1 %v7799_v8, %s8402_s21  ;;  %7795 = vrot.lane.b32.xlu0 %v7794_v51, %s8402_s21  ;;  %v10813_v0 = vpop.f32.mrb[45].mxu0  ;;  %v7819_v51 = vpack.i.bf16 %v10347_v5, %v10819_v14  ;;  %v10833_v18 = vld [vmem:[#allocation3 + $0xf0] sm:$0xff] }
 0x395   : > { %12758 = vst [vmem:[#allocation54_spill] sm:$0xff] %v10813_v0  ;;  %v7829_v5 = vpack.i.bf16 %v10359_v27, %v10833_v18  ;;  %v7839_v27 = vpack.i.bf16 %v10372_v21, %v10297_v39  ;;  %v7844_v21 = vpack.i.bf16 %v10377_v38, %v10409_v40  ;;  %v7859_v39 = vpack.i.bf16 %v10399_v55, %v10455_v58 }
 0x396   : > { %v7864_v38 = vpack.i.bf16 %v10411_v42, %v10491_v9  ;;  %v7889_v55 = vpack.i.bf16 %v10504_v53, %v10613_v28  ;;  %v7899_v40 = vpack.i.bf16 %v10566_v48, %v10675_v17  ;;  %v7894_v42 = vpack.i.bf16 %v10558_v50, %v10677_v6 }
 0x397   : > { %v10823_v56 = vpop.f32.mrb[46].mxu0 }
 0x398   : > { %12759 = vst [vmem:[#allocation55_spill] sm:$0xff] %v10823_v56  ;;  %7810 = vrot.lane.b32.xlu1 %v7809_v11, %s8402_s21  ;;  %7805 = vrot.lane.b32.xlu0 %v7804_v59, %s8402_s21  ;;  %v10827_v8 = vpop.f32.mrb[47].mxu0 }
 0x399   : > { %12760 = vst [vmem:[#allocation56_spill] sm:$0xff] %v10827_v8 }
 0x39c   : > { %7820 = vrot.lane.b32.xlu1 %v7819_v51, %s8402_s21  ;;  %7815 = vrot.lane.b32.xlu0 %v7814_v61, %s8402_s21  ;;  %v10839_v56 = vpop.f32.mrb[48].mxu0 }
 0x39d   : > { %12761 = vst [vmem:[#allocation57_spill] sm:$0xff] %v10839_v56  ;;  %v7741_v11 = vpop.permute.xlu1 %7740  ;;  %v7736_v59 = vpop.permute.xlu0 %7735 }
 0x39e   : > { %v10841_v0 = vpop.f32.mrb[49].mxu0  ;;  %v7742_v8 = vunpack.i.l.bf16 %v7741_v11  ;;  %v7738_v23 = vunpack.i.h.bf16 %v7736_v59  ;;  %v7737_v22 = vunpack.i.l.bf16 %v7736_v59  ;;  %v7743_v56 = vunpack.i.h.bf16 %v7741_v11 }
 0x39f   : > { %v7834_v59 = vpack.i.bf16 %v10363_v43, %v10301_v3  ;;  %v7854_v3 = vpack.i.bf16 %v10391_v41, %v10457_v12  ;;  %v7879_v43 = vpack.i.bf16 %v10467_v7, %v10551_v34  ;;  %v7874_v41 = vpack.i.bf16 %v10459_v25, %v10553_v29  ;;  %v10910_v34 = vld [vmem:[#allocation3 + $0x208] sm:$0xff] }
 0x3a0   : > { %7830 = vrot.lane.b32.xlu1 %v7829_v5, %s8402_s21  ;;  %7825 = vrot.lane.b32.xlu0 %v7824_v36, %s8402_s21  ;;  %v3453_v51 = vsel %vm511_vm10, %v10496_v26, %v7737_v22  ;;  %v3421_v61 = vsel %vm511_vm10, %v10500_v13, %v7738_v23  ;;  %v3454_v60 = vsel %vm511_vm10, %v10504_v53, %v7742_v8  ;;  %v10907_v53 = vld [vmem:[#allocation3 + $0x210] sm:$0xff] }
 0x3a1   : > { %3884 = vmatprep.mubr.f32.mxu1 %v3453_v51  ;;  %v3422_v13 = vsel %vm511_vm10, %v10498_v63, %v7743_v56  ;;  %v7849_v23 = vpack.i.bf16 %v10386_v32, %v10407_v1  ;;  %v7869_v32 = vpack.i.bf16 %v10419_v49, %v10489_v4  ;;  %v7884_v1 = vpack.i.bf16 %v10496_v26, %v10615_v24 }
 0x3a2   : > { %3885 = vmatmul.mubr.f32.gmra.mrb[48].mxu1 %v3421_v61  ;;  %v7909_v7 = vpack.i.bf16 %v10628_v52, %v10745_v16  ;;  %v7904_v63 = vpack.i.bf16 %v10620_v62, %v10747_v45  ;;  %v7919_v17 = vpack.i.bf16 %v10690_v30, %v10907_v53  ;;  %v7914_v16 = vpack.i.bf16 %v10682_v46, %v10910_v34  ;;  %v2852_v45 = vld [vmem:[#allocation3 + $0x230] sm:$0xff] }
 0x3a3   : > { %3889 = vmatprep.mubr.f32.mxu1 %v3454_v60  ;;  %v7929_v56 = vpack.i.bf16 %v10757_v47, %v2852_v45  ;;  %v12763_v47 = vld [vmem:[#allocation38_spill] sm:$0xff] }
 0x3a4   : > { %7840 = vrot.lane.b32.xlu1 %v7839_v27, %s8402_s21  ;;  %7835 = vrot.lane.b32.xlu0 %v7834_v59, %s8402_s21  ;;  %v2790_v45 = vld [vmem:[#allocation3 + $0x4f] sm:$0xff] }
 0x3a6   : > { %3890 = vmatmul.mubr.f32.gmra.mrb[50].mxu1 %v3422_v13 }
 0x3a8   : > { %7850 = vrot.lane.b32.xlu1 %v7849_v23, %s8402_s21  ;;  %7845 = vrot.lane.b32.xlu0 %v7844_v21, %s8402_s21  ;;  %v12764_v23 = vld [vmem:[#allocation37_spill] sm:$0xff] }
 0x3ac   : > { %7860 = vrot.lane.b32.xlu1 %v7859_v39, %s8402_s21  ;;  %7855 = vrot.lane.b32.xlu0 %v7854_v3, %s8402_s21 }
 0x3b0   : > { %7870 = vrot.lane.b32.xlu1 %v7869_v32, %s8402_s21  ;;  %7865 = vrot.lane.b32.xlu0 %v7864_v38, %s8402_s21 }
 0x3b4   : > { %7880 = vrot.lane.b32.xlu1 %v7879_v43, %s8402_s21  ;;  %7875 = vrot.lane.b32.xlu0 %v7874_v41, %s8402_s21 }
 0x3b8   : > { %7890 = vrot.lane.b32.xlu1 %v7889_v55, %s8402_s21  ;;  %7885 = vrot.lane.b32.xlu0 %v7884_v1, %s8402_s21  ;;  %v12765_v1 = vld [vmem:[#allocation40_spill] sm:$0xff] }
 0x3bc   : > { %7900 = vrot.lane.b32.xlu1 %v7899_v40, %s8402_s21  ;;  %7895 = vrot.lane.b32.xlu0 %v7894_v42, %s8402_s21  ;;  %v10899_v49 = vpop.f32.mrb[50].mxu0 }
 0x3bd   : > { %v7751_v58 = vpop.permute.xlu1 %7750  ;;  %v7746_v12 = vpop.permute.xlu0 %7745 }
 0x3be   : > { %v10901_v25 = vpop.f32.mrb[51].mxu0  ;;  %v7752_v4 = vunpack.i.l.bf16 %v7751_v58  ;;  %v7748_v9 = vunpack.i.h.bf16 %v7746_v12  ;;  %v7747_v26 = vunpack.i.l.bf16 %v7746_v12  ;;  %v7753_v24 = vunpack.i.h.bf16 %v7751_v58 }
 0x3c0   : > { %7910 = vrot.lane.b32.xlu1 %v7909_v7, %s8402_s21  ;;  %7905 = vrot.lane.b32.xlu0 %v7904_v63, %s8402_s21  ;;  %v3455_v29 = vsel %vm511_vm10, %v10558_v50, %v7747_v26  ;;  %v3423_v28 = vsel %vm511_vm10, %v10562_v33, %v7748_v9  ;;  %v3456_v6 = vsel %vm511_vm10, %v10566_v48, %v7752_v4  ;;  %v2851_v50 = vld [vmem:[#allocation3 + $0x228] sm:$0xff]  ;;  %v12762_v33 = vld [vmem:[#allocation36_spill] sm:$0xff]  ;;  %v2884_v7 = vld [vmem:[#allocation3 + $0x231] sm:$0xff] }
 0x3c1   : > { %3894 = vmatprep.mubr.f32.mxu1 %v3455_v29  ;;  %v3424_v22 = vsel %vm511_vm10, %v12762_v33, %v7753_v24  ;;  %v7924_v8 = vpack.i.bf16 %v10751_v37, %v2851_v50  ;;  %v12766_v26 = vld [vmem:[#allocation39_spill] sm:$0xff]  ;;  %v2789_v29 = vld [vmem:[#allocation3 + $0x47] sm:$0xff] }
 0x3c2   : > { %3895 = vmatmul.mubr.f32.gmra.mrb[52].mxu1 %v3423_v28 }
 0x3c3   : > { %3899 = vmatprep.mubr.f32.mxu1 %v3456_v6  ;;  %v2724_v6 = vld [vmem:[#allocation3 + $0x28] sm:$0xff] }
 0x3c4   : > { %7920 = vrot.lane.b32.xlu1 %v7919_v17, %s8402_s21  ;;  %7915 = vrot.lane.b32.xlu0 %v7914_v16, %s8402_s21 }
 0x3c6   : > { %3900 = vmatmul.mubr.f32.gmra.mrb[54].mxu1 %v3424_v22 }
 0x3c8   : > { %7930 = vrot.lane.b32.xlu1 %v7929_v56, %s8402_s21  ;;  %7925 = vrot.lane.b32.xlu0 %v7924_v8, %s8402_s21  ;;  %v2725_v56 = vld [vmem:[#allocation3 + $0x30] sm:$0xff] }
 0x3dc   : > { %v10931_v48 = vpop.f32.mrb[52].mxu0 }
 0x3dd   : > { %v7761_v11 = vpop.permute.xlu1 %7760  ;;  %v7756_v5 = vpop.permute.xlu0 %7755 }
 0x3de   : > { %v10933_v36 = vpop.f32.mrb[53].mxu0  ;;  %v7762_v51 = vunpack.i.l.bf16 %v7761_v11  ;;  %v7758_v61 = vunpack.i.h.bf16 %v7756_v5  ;;  %v7757_v27 = vunpack.i.l.bf16 %v7756_v5  ;;  %v7763_v37 = vunpack.i.h.bf16 %v7761_v11  ;;  %v2791_v5 = vld [vmem:[#allocation3 + $0x67] sm:$0xff] }
 0x3e0   : > { %v3457_v60 = vsel %vm511_vm10, %v10620_v62, %v7757_v27  ;;  %v3425_v59 = vsel %vm511_vm10, %v12763_v47, %v7758_v61  ;;  %v3458_v13 = vsel %vm511_vm10, %v10628_v52, %v7762_v51  ;;  %v3426_v21 = vsel %vm511_vm10, %v12764_v23, %v7763_v37  ;;  %v2883_v62 = vld [vmem:[#allocation3 + $0x229] sm:$0xff] }
 0x3e1   : > { %3904 = vmatprep.mubr.f32.mxu1 %v3457_v60  ;;  %7103 = vmatprep.mubr.msk.f32.mxu0 %vm511_vm10, %v2883_v62 }
 0x3e2   : > { %3905 = vmatmul.mubr.f32.gmra.mrb[56].mxu1 %v3425_v59  ;;  %7104 = vmatmul.mubr.msk.f32.gmra.mrb[62].mxu0 %vm511_vm10, %v2884_v7  ;;  %v2792_v59 = vld [vmem:[#allocation3 + $0x6f] sm:$0xff] }
 0x3e3   : > { %3909 = vmatprep.mubr.f32.mxu1 %v3458_v13 }
 0x3e6   : > { %3910 = vmatmul.mubr.f32.gmra.mrb[58].mxu1 %v3426_v21 }
 0x3fa   : > { %v7771_v39 = vpop.permute.xlu1 %7770  ;;  %v7766_v3 = vpop.permute.xlu0 %7765 }
 0x3fb   : > { %v7772_v32 = vunpack.i.l.bf16 %v7771_v39  ;;  %v7768_v38 = vunpack.i.h.bf16 %v7766_v3  ;;  %v7767_v43 = vunpack.i.l.bf16 %v7766_v3  ;;  %v7773_v52 = vunpack.i.h.bf16 %v7771_v39  ;;  %v2793_v3 = vld [vmem:[#allocation3 + $0x87] sm:$0xff] }
 0x3fc   : > { %v10943_v41 = vpop.f32.mrb[54].mxu0 }
 0x3fd   : > { %v3459_v55 = vsel %vm511_vm10, %v10682_v46, %v7767_v43  ;;  %v3427_v40 = vsel %vm511_vm10, %v12765_v1, %v7768_v38  ;;  %v10950_v42 = vpop.f32.mrb[55].mxu0  ;;  %v3460_v12 = vsel %vm511_vm10, %v10690_v30, %v7772_v32  ;;  %v3428_v63 = vsel %vm511_vm10, %v12766_v26, %v7773_v52 }
 0x3fe   : > { %3914 = vmatprep.mubr.f32.mxu1 %v3459_v55  ;;  %v7776_v58 = vpop.permute.xlu0 %7775  ;;  %v7781_v4 = vpop.permute.xlu1 %7780  ;;  %v2794_v55 = vld [vmem:[#allocation3 + $0x8f] sm:$0xff] }
 0x3ff   : > { %3915 = vmatmul.mubr.f32.gmra.mrb[60].mxu1 %v3427_v40  ;;  %v7777_v9 = vunpack.i.l.bf16 %v7776_v58  ;;  %v7778_v46 = vunpack.i.h.bf16 %v7776_v58  ;;  %v7782_v28 = vunpack.i.l.bf16 %v7781_v4  ;;  %v7783_v16 = vunpack.i.h.bf16 %v7781_v4 }
 0x400   : > { %3919 = vmatprep.mubr.f32.mxu1 %v3460_v12  ;;  %v2795_v12 = vld [vmem:[#allocation3 + $0xa7] sm:$0xff] }
 0x401   : > { %v3493_v24 = vsel %vm511_vm10, %v2789_v29, %v7777_v9  ;;  %v3461_v30 = vsel %vm511_vm10, %v2724_v6, %v7778_v46  ;;  %v3494_v33 = vsel %vm511_vm10, %v2790_v45, %v7782_v28  ;;  %v3462_v11 = vsel %vm511_vm10, %v2725_v56, %v7783_v16  ;;  %v2796_v29 = vld [vmem:[#allocation3 + $0xaf] sm:$0xff]  ;;  %v2797_v16 = vld [vmem:[#allocation3 + $0xc7] sm:$0xff] }
 0x402   : > { %v7786_v17 = vpop.permute.xlu0 %7785  ;;  %v7791_v22 = vpop.permute.xlu1 %7790 }
 0x403   : > { %3920 = vmatmul.mubr.f32.gmra.mrb[62].mxu1 %v3428_v63  ;;  %v7787_v50 = vunpack.i.l.bf16 %v7786_v17  ;;  %v7788_v8 = vunpack.i.h.bf16 %v7786_v17  ;;  %v7792_v51 = vunpack.i.l.bf16 %v7791_v22  ;;  %v7793_v60 = vunpack.i.h.bf16 %v7791_v22  ;;  %v2798_v22 = vld [vmem:[#allocation3 + $0xcf] sm:$0xff] }
 0x404   : > { %3989 = vmatprep.mubr.f32.mxu1 %v3493_v24 }
 0x405   : > { %v3495_v61 = vsel %vm511_vm10, %v2791_v5, %v7787_v50  ;;  %v3463_v47 = vsel %vm511_vm10, %v10765_v57, %v7788_v8  ;;  %v3496_v13 = vsel %vm511_vm10, %v2792_v59, %v7792_v51  ;;  %v3464_v39 = vsel %vm511_vm10, %v10763_v31, %v7793_v60  ;;  %v2799_v51 = vld [vmem:[#allocation3 + $0xe7] sm:$0xff]  ;;  %v2800_v59 = vld [vmem:[#allocation3 + $0xef] sm:$0xff] }
 0x406   : > { %v7796_v27 = vpop.permute.xlu0 %7795  ;;  %v7801_v23 = vpop.permute.xlu1 %7800 }
 0x407   : > { %3990 = vmatmul.mubr.f32.vlgmr.msra.gmra.mrb[0].mxu1 %v3461_v30  ;;  %v7797_v37 = vunpack.i.l.bf16 %v7796_v27  ;;  %v7798_v21 = vunpack.i.h.bf16 %v7796_v27  ;;  %v7802_v32 = vunpack.i.l.bf16 %v7801_v23  ;;  %v7803_v62 = vunpack.i.h.bf16 %v7801_v23 }
 0x408   : > { %3994 = vmatprep.mubr.f32.mxu1 %v3494_v33 }
 0x409   : > { %v3497_v38 = vsel %vm511_vm10, %v2793_v3, %v7797_v37  ;;  %v3465_v57 = vsel %vm511_vm10, %v10779_v54, %v7798_v21  ;;  %v3498_v40 = vsel %vm511_vm10, %v2794_v55, %v7802_v32  ;;  %v3466_v31 = vsel %vm511_vm10, %v10777_v10, %v7803_v62  ;;  %v2802_v62 = vld [vmem:[#allocation3 + $0x10f] sm:$0xff] }
 0x40a   : > { %v7806_v43 = vpop.permute.xlu0 %7805  ;;  %v7811_v52 = vpop.permute.xlu1 %7810 }
 0x40b   : > { %3995 = vmatmul.mubr.f32.gmra.mrb[2].mxu1 %v3462_v11  ;;  %v7807_v1 = vunpack.i.l.bf16 %v7806_v43  ;;  %v7808_v58 = vunpack.i.h.bf16 %v7806_v43  ;;  %v7812_v7 = vunpack.i.l.bf16 %v7811_v52  ;;  %v7813_v54 = vunpack.i.h.bf16 %v7811_v52  ;;  %v2803_v52 = vld [vmem:[#allocation3 + $0x127] sm:$0xff] }
 0x40c   : > { %3999 = vmatprep.mubr.f32.mxu1 %v3495_v61 }
 0x40d   : > { %v3499_v4 = vsel %vm511_vm10, %v2795_v12, %v7807_v1  ;;  %v3467_v63 = vsel %vm511_vm10, %v10793_v44, %v7808_v58  ;;  %v3500_v10 = vsel %vm511_vm10, %v2796_v29, %v7812_v7  ;;  %v3468_v6 = vsel %vm511_vm10, %v10791_v2, %v7813_v54 }
 0x40e   : > { %v7816_v9 = vpop.permute.xlu0 %7815  ;;  %v7821_v24 = vpop.permute.xlu1 %7820 }
 0x40f   : > { %4000 = vmatmul.mubr.f32.gmra.mrb[4].mxu1 %v3463_v47  ;;  %v7817_v28 = vunpack.i.l.bf16 %v7816_v9  ;;  %v7818_v17 = vunpack.i.h.bf16 %v7816_v9  ;;  %v7822_v30 = vunpack.i.l.bf16 %v7821_v24  ;;  %v7823_v33 = vunpack.i.h.bf16 %v7821_v24 }
 0x410   : > { %4004 = vmatprep.mubr.f32.mxu1 %v3496_v13 }
 0x411   : > { %v3501_v45 = vsel %vm511_vm10, %v2797_v16, %v7817_v28  ;;  %v3469_v44 = vsel %vm511_vm10, %v10807_v35, %v7818_v17  ;;  %v3502_v8 = vsel %vm511_vm10, %v2798_v22, %v7822_v30  ;;  %v3470_v2 = vsel %vm511_vm10, %v10805_v19, %v7823_v33  ;;  %v2806_v22 = vld [vmem:[#allocation3 + $0x14f] sm:$0xff] }
 0x412   : > { %v7826_v50 = vpop.permute.xlu0 %7825  ;;  %v7831_v11 = vpop.permute.xlu1 %7830 }
 0x413   : > { %4005 = vmatmul.mubr.f32.gmra.mrb[6].mxu1 %v3464_v39  ;;  %v7827_v56 = vunpack.i.l.bf16 %v7826_v50  ;;  %v7828_v5 = vunpack.i.h.bf16 %v7826_v50  ;;  %v7832_v61 = vunpack.i.l.bf16 %v7831_v11  ;;  %v7833_v47 = vunpack.i.h.bf16 %v7831_v11  ;;  %v2801_v39 = vld [vmem:[#allocation3 + $0x107] sm:$0xff] }
 0x414   : > { %4009 = vmatprep.mubr.f32.mxu1 %v3497_v38  ;;  %v2740_v50 = vld [vmem:[#allocation3 + $0x128] sm:$0xff] }
 0x415   : > { %v3503_v27 = vsel %vm511_vm10, %v2799_v51, %v7827_v56  ;;  %v3471_v35 = vsel %vm511_vm10, %v10821_v15, %v7828_v5  ;;  %v3504_v13 = vsel %vm511_vm10, %v2800_v59, %v7832_v61  ;;  %v3472_v19 = vsel %vm511_vm10, %v10819_v14, %v7833_v47  ;;  %v2741_v5 = vld [vmem:[#allocation3 + $0x130] sm:$0xff]  ;;  %v2807_v61 = vld [vmem:[#allocation3 + $0x167] sm:$0xff] }
 0x416   : > { %v7836_v60 = vpop.permute.xlu0 %7835  ;;  %v7841_v23 = vpop.permute.xlu1 %7840 }
 0x417   : > { %4010 = vmatmul.mubr.f32.gmra.mrb[8].mxu1 %v3465_v57  ;;  %v7837_v37 = vunpack.i.l.bf16 %v7836_v60  ;;  %v7838_v21 = vunpack.i.h.bf16 %v7836_v60  ;;  %v7842_v3 = vunpack.i.l.bf16 %v7841_v23  ;;  %v7843_v43 = vunpack.i.h.bf16 %v7841_v23 }
 0x418   : > { %4014 = vmatprep.mubr.f32.mxu1 %v3498_v40 }
 0x419   : > { %v3505_v32 = vsel %vm511_vm10, %v2801_v39, %v7837_v37  ;;  %v3473_v15 = vsel %vm511_vm10, %v10835_v20, %v7838_v21  ;;  %v3506_v55 = vsel %vm511_vm10, %v2802_v62, %v7842_v3  ;;  %v3474_v14 = vsel %vm511_vm10, %v10833_v18, %v7843_v43  ;;  %v2738_v20 = vld [vmem:[#allocation3 + $0x108] sm:$0xff]  ;;  %v2743_v39 = vld [vmem:[#allocation3 + $0x150] sm:$0xff] }
 0x41a   : > { %v7846_v38 = vpop.permute.xlu0 %7845  ;;  %v7851_v1 = vpop.permute.xlu1 %7850 }
 0x41b   : > { %4015 = vmatmul.mubr.f32.gmra.mrb[10].mxu1 %v3466_v31  ;;  %v7847_v57 = vunpack.i.l.bf16 %v7846_v38  ;;  %v7848_v40 = vunpack.i.h.bf16 %v7846_v38  ;;  %v7852_v58 = vunpack.i.l.bf16 %v7851_v1  ;;  %v2809_v38 = vld [vmem:[#allocation3 + $0x187] sm:$0xff] }
 0x41c   : > { %4019 = vmatprep.mubr.f32.mxu1 %v3499_v4  ;;  %v10974_v46 = vpop.f32.mrb[56].mxu0  ;;  %v7853_v4 = vunpack.i.h.bf16 %v7851_v1 }
 0x41d   : > { %v10976_v26 = vpop.f32.mrb[57].mxu0  ;;  %v3507_v31 = vsel %vm511_vm10, %v2803_v52, %v7847_v57  ;;  %v3475_v54 = vsel %vm511_vm10, %v2738_v20, %v7848_v40  ;;  %v2744_v57 = vld [vmem:[#allocation3 + $0x168] sm:$0xff] }
 0x41e   : > { %v7856_v12 = vpop.permute.xlu0 %7855  ;;  %v7861_v28 = vpop.permute.xlu1 %7860  ;;  %v2810_v40 = vld [vmem:[#allocation3 + $0x18f] sm:$0xff] }
 0x41f   : > { %4020 = vmatmul.mubr.f32.gmra.mrb[12].mxu1 %v3467_v63  ;;  %v2804_v63 = vld [vmem:[#allocation3 + $0x12f] sm:$0xff]  ;;  %v7857_v29 = vunpack.i.l.bf16 %v7856_v12  ;;  %v7858_v24 = vunpack.i.h.bf16 %v7856_v12  ;;  %v7862_v16 = vunpack.i.l.bf16 %v7861_v28  ;;  %v7863_v33 = vunpack.i.h.bf16 %v7861_v28 }
 0x420   : > { %4024 = vmatprep.mubr.f32.mxu1 %v3500_v10  ;;  %v3508_v18 = vsel %vm511_vm10, %v2804_v63, %v7852_v58  ;;  %v2739_v10 = vld [vmem:[#allocation3 + $0x110] sm:$0xff] }
 0x421   : > { %v3476_v17 = vsel %vm511_vm10, %v2739_v10, %v7853_v4  ;;  %v3478_v51 = vsel %vm511_vm10, %v2741_v5, %v7863_v33  ;;  %v2746_v10 = vld [vmem:[#allocation3 + $0x188] sm:$0xff] }
 0x422   : > { %v7871_v11 = vpop.permute.xlu1 %7870  ;;  %v2748_v5 = vld [vmem:[#allocation3 + $0x1a8] sm:$0xff] }
 0x423   : > { %4025 = vmatmul.mubr.f32.gmra.mrb[14].mxu1 %v3468_v6  ;;  %v2805_v6 = vld [vmem:[#allocation3 + $0x147] sm:$0xff]  ;;  %v7873_v59 = vunpack.i.h.bf16 %v7871_v11 }
 0x424   : > { %4029 = vmatprep.mubr.f32.mxu1 %v3501_v45  ;;  %v3509_v30 = vsel %vm511_vm10, %v2805_v6, %v7857_v29  ;;  %v7866_v45 = vpop.permute.xlu0 %7865  ;;  %v2812_v6 = vld [vmem:[#allocation3 + $0x1af] sm:$0xff] }
 0x425   : > { %v7867_v56 = vunpack.i.l.bf16 %v7866_v45 }
 0x427   : > { %4030 = vmatmul.mubr.f32.gmra.mrb[16].mxu1 %v3469_v44  ;;  %v3477_v44 = vsel %vm511_vm10, %v2740_v50, %v7858_v24  ;;  %v3511_v60 = vsel %vm511_vm10, %v2807_v61, %v7867_v56  ;;  %v2747_v50 = vld [vmem:[#allocation3 + $0x190] sm:$0xff] }
 0x428   : > { %4034 = vmatprep.mubr.f32.mxu1 %v3502_v8  ;;  %v3510_v8 = vsel %vm511_vm10, %v2806_v22, %v7862_v16  ;;  %v7876_v47 = vpop.permute.xlu0 %7875  ;;  %v2813_v22 = vld [vmem:[#allocation3 + $0x1c7] sm:$0xff]  ;;  %v2814_v61 = vld [vmem:[#allocation3 + $0x1cf] sm:$0xff] }
 0x429   : > { %v7877_v23 = vunpack.i.l.bf16 %v7876_v47  ;;  %v7878_v3 = vunpack.i.h.bf16 %v7876_v47 }
 0x42b   : > { %4035 = vmatmul.mubr.f32.gmra.mrb[18].mxu1 %v3470_v2  ;;  %v7868_v2 = vunpack.i.h.bf16 %v7866_v45  ;;  %v3481_v1 = vsel %vm511_vm10, %v2744_v57, %v7878_v3 }
 0x42c   : > { %4039 = vmatprep.mubr.f32.mxu1 %v3503_v27  ;;  %v7872_v27 = vunpack.i.l.bf16 %v7871_v11  ;;  %v7886_v62 = vpop.permute.xlu0 %7885 }
 0x42d   : > { %v7888_v12 = vunpack.i.h.bf16 %v7886_v62 }
 0x42f   : > { %4040 = vmatmul.mubr.f32.gmra.mrb[20].mxu1 %v3471_v35  ;;  %v2742_v35 = vld [vmem:[#allocation3 + $0x148] sm:$0xff] }
 0x430   : > { %4044 = vmatprep.mubr.f32.mxu1 %v3504_v13  ;;  %v3479_v37 = vsel %vm511_vm10, %v2742_v35, %v7868_v2  ;;  %v2808_v13 = vld [vmem:[#allocation3 + $0x16f] sm:$0xff]  ;;  %v7896_v28 = vpop.permute.xlu0 %7895  ;;  %v5431_v35 = vld [vmem:[%s12645_s6 + $0x200] sm:$0xff] }
 0x431   : > { %v3512_v21 = vsel %vm511_vm10, %v2808_v13, %v7872_v27  ;;  %v7897_v16 = vunpack.i.l.bf16 %v7896_v28  ;;  %v7898_v33 = vunpack.i.h.bf16 %v7896_v28 }
 0x433   : > { %4045 = vmatmul.mubr.f32.gmra.mrb[22].mxu1 %v3472_v19  ;;  %v7881_v19 = vpop.permute.xlu1 %7880 }
 0x434   : > { %4049 = vmatprep.mubr.f32.mxu1 %v3505_v32  ;;  %v3480_v32 = vsel %vm511_vm10, %v2743_v39, %v7873_v59  ;;  %v7882_v43 = vunpack.i.l.bf16 %v7881_v19  ;;  %v7906_v11 = vpop.permute.xlu0 %7905  ;;  %v5432_v59 = vld [vmem:[%s12645_s6 + $0x208] sm:$0xff] }
 0x435   : > { %v7907_v27 = vunpack.i.l.bf16 %v7906_v11  ;;  %v7386_v13 = vpack.c.bf16 %v5432_v59, %v5431_v35 }
 0x436   : > { %v3514_v52 = vsel %vm511_vm10, %v2810_v40, %v7882_v43  ;;  %v5434_v43 = vld [vmem:[%s12645_s6 + $0x218] sm:$0xff] }
 0x437   : > { %4050 = vmatmul.mubr.f32.gmra.mrb[24].mxu1 %v3473_v15  ;;  %v3513_v15 = vsel %vm511_vm10, %v2809_v38, %v7877_v23  ;;  %v7891_v58 = vpop.permute.xlu1 %7890  ;;  %v7908_v23 = vunpack.i.h.bf16 %v7906_v11  ;;  %7387 = vmatprep.subr.bf16.mxu1 %v7386_v13  ;;  %v5433_v38 = vld [vmem:[%s12645_s6 + $0x210] sm:$0xff] }
 0x438   : > { %4054 = vmatprep.mubr.f32.mxu1 %v3506_v55  ;;  %v7883_v55 = vunpack.i.h.bf16 %v7881_v19  ;;  %v7892_v63 = vunpack.i.l.bf16 %v7891_v58  ;;  %v7893_v24 = vunpack.i.h.bf16 %v7891_v58  ;;  %v2815_v19 = vld [vmem:[#allocation3 + $0x1e7] sm:$0xff]  ;;  %7389 = vmatpush3.bf16.msra.mxu1 %v7386_v13  ;;  %v2753_v11 = vld [vmem:[#allocation3 + $0x1f0] sm:$0xff] }
 0x439   : > { %v3519_v3 = vsel %vm511_vm10, %v2815_v19, %v7907_v27  ;;  %v5435_v58 = vld [vmem:[%s12645_s6 + $0x220] sm:$0xff]  ;;  %v2820_v27 = vld [vmem:[#allocation3 + $0x22f] sm:$0xff] }
 0x43a   : > { %v5368_v13 = vld [vmem:[%s12645_s6 + $0x8] sm:$0xff] }
 0x43b   : > { %4055 = vmatmul.mubr.f32.gmra.mrb[26].mxu1 %v3474_v14  ;;  %v7887_v14 = vunpack.i.l.bf16 %v7886_v62  ;;  %v7901_v45 = vpop.permute.xlu1 %7900  ;;  %v7390_v62 = vpack.c.bf16 %v5434_v43, %v5433_v38  ;;  %v5373_v38 = vld [vmem:[%s12645_s6 + $0x30] sm:$0xff]  ;;  %v5374_v43 = vld [vmem:[%s12645_s6 + $0x38] sm:$0xff] }
 0x43c   : > { %4059 = vmatprep.mubr.f32.mxu1 %v3507_v31  ;;  %v11002_v7 = vpop.f32.mrb[58].mxu0  ;;  %v2745_v31 = vld [vmem:[#allocation3 + $0x170] sm:$0xff]  ;;  %v7902_v56 = vunpack.i.l.bf16 %v7901_v45  ;;  %v7903_v2 = vunpack.i.h.bf16 %v7901_v45 }
 0x43d   : > { %v11004_v9 = vpop.f32.mrb[59].mxu0  ;;  %v3482_v4 = vsel %vm511_vm10, %v2745_v31, %v7883_v55  ;;  %7391 = vmatprep.subr.bf16.mxu1 %v7390_v62  ;;  %v5436_v31 = vld [vmem:[%s12645_s6 + $0x228] sm:$0xff] }
 0x43e   : > { %7393 = vmatpush3.bf16.msra.mxu1 %v7390_v62  ;;  %v5375_v62 = vld [vmem:[%s12645_s6 + $0x40] sm:$0xff] }
 0x43f   : > { %4060 = vmatmul.mubr.f32.gmra.mrb[28].mxu1 %v3475_v54  ;;  %v2811_v54 = vld [vmem:[#allocation3 + $0x1a7] sm:$0xff]  ;;  %v7911_v47 = vpop.permute.xlu1 %7910 }
 0x440   : > { %4064 = vmatprep.mubr.f32.mxu1 %v3508_v18  ;;  %v3515_v18 = vsel %vm511_vm10, %v2811_v54, %v7887_v14  ;;  %v7912_v39 = vunpack.i.l.bf16 %v7911_v47  ;;  %v7913_v57 = vunpack.i.h.bf16 %v7911_v47 }
 0x443   : > { %4065 = vmatmul.mubr.f32.gmra.mrb[30].mxu1 %v3476_v17  ;;  %v3483_v17 = vsel %vm511_vm10, %v2746_v10, %v7888_v12  ;;  %v2751_v12 = vld [vmem:[#allocation3 + $0x1d0] sm:$0xff] }
 0x444   : > { %4069 = vmatprep.mubr.f32.mxu1 %v3509_v30  ;;  %v3516_v30 = vsel %vm511_vm10, %v2812_v6, %v7892_v63  ;;  %v3488_v63 = vsel %vm511_vm10, %v2751_v12, %v7913_v57  ;;  %v5438_v6 = vld [vmem:[%s12645_s6 + $0x238] sm:$0xff]  ;;  %v5376_v57 = vld [vmem:[%s12645_s6 + $0x48] sm:$0xff]  ;;  %v5381_v12 = vld [vmem:[%s12645_s6 + $0x70] sm:$0xff] }
 0x447   : > { %4070 = vmatmul.mubr.f32.gmra.mrb[32].mxu1 %v3477_v44  ;;  %v3484_v44 = vsel %vm511_vm10, %v2747_v50, %v7893_v24 }
 0x448   : > { %4074 = vmatprep.mubr.f32.mxu1 %v3510_v8  ;;  %v3517_v8 = vsel %vm511_vm10, %v2813_v22, %v7897_v16  ;;  %v2752_v16 = vld [vmem:[#allocation3 + $0x1e8] sm:$0xff] }
 0x44b   : > { %4075 = vmatmul.mubr.f32.gmra.mrb[34].mxu1 %v3478_v51  ;;  %v3485_v51 = vsel %vm511_vm10, %v2748_v5, %v7898_v33  ;;  %v2818_v33 = vld [vmem:[#allocation3 + $0x20f] sm:$0xff] }
 0x44c   : > { %4079 = vmatprep.mubr.f32.mxu1 %v3511_v60  ;;  %v3518_v60 = vsel %vm511_vm10, %v2814_v61, %v7902_v56 }
 0x44f   : > { %4080 = vmatmul.mubr.f32.gmra.mrb[36].mxu1 %v3479_v37  ;;  %v2749_v37 = vld [vmem:[#allocation3 + $0x1b0] sm:$0xff] }
 0x450   : > { %4084 = vmatprep.mubr.f32.mxu1 %v3512_v21  ;;  %v3486_v21 = vsel %vm511_vm10, %v2749_v37, %v7903_v2  ;;  %v5367_v37 = vld [vmem:[%s12645_s6] sm:$0xff] }
 0x453   : > { %4085 = vmatmul.mubr.f32.gmra.mrb[38].mxu1 %v3480_v32  ;;  %v7916_v32 = vpop.permute.xlu0 %7915 }
 0x454   : > { %4089 = vmatprep.mubr.f32.mxu1 %v3513_v15  ;;  %v2750_v15 = vld [vmem:[#allocation3 + $0x1c8] sm:$0xff]  ;;  %v7917_v40 = vunpack.i.l.bf16 %v7916_v32  ;;  %v7918_v54 = vunpack.i.h.bf16 %v7916_v32 }
 0x455   : > { %v3487_v55 = vsel %vm511_vm10, %v2750_v15, %v7908_v23  ;;  %v7291_v23 = vpack.c.bf16 %v5368_v13, %v5367_v37  ;;  %v7300_v15 = vpack.c.bf16 %v5374_v43, %v5373_v38  ;;  %v5395_v37 = vld [vmem:[%s12645_s6 + $0xe0] sm:$0xff]  ;;  %v5396_v13 = vld [vmem:[%s12645_s6 + $0xe8] sm:$0xff] }
 0x456   : > { %v3489_v50 = vsel %vm511_vm10, %v2752_v16, %v7918_v54  ;;  %v5388_v16 = vld [vmem:[%s12645_s6 + $0xa8] sm:$0xff] }
 0x457   : > { %4090 = vmatmul.mubr.f32.gmra.mrb[40].mxu1 %v3481_v1  ;;  %v2816_v1 = vld [vmem:[#allocation3 + $0x1ef] sm:$0xff]  ;;  %v7926_v24 = vpop.permute.xlu0 %7925  ;;  %7292 = vmatpush1.bf16.msra.mxu0 %v7291_v23 }
 0x458   : > { %4094 = vmatprep.mubr.f32.mxu1 %v3514_v52  ;;  %v3520_v14 = vsel %vm511_vm10, %v2816_v1, %v7912_v39  ;;  %v7921_v52 = vpop.permute.xlu1 %7920  ;;  %v7928_v5 = vunpack.i.h.bf16 %v7926_v24  ;;  %v5371_v39 = vld [vmem:[%s12645_s6 + $0x20] sm:$0xff]  ;;  %v5377_v1 = vld [vmem:[%s12645_s6 + $0x50] sm:$0xff]  ;;  %v12769_v43 = vld [vmem:[#allocation41_spill] sm:$0xff] }
 0x459   : > { %v11020_v20 = vpop.f32.mrb[60].mxu0  ;;  %v7922_v28 = vunpack.i.l.bf16 %v7921_v52  ;;  %v7923_v45 = vunpack.i.h.bf16 %v7921_v52  ;;  %v5379_v52 = vld [vmem:[%s12645_s6 + $0x60] sm:$0xff] }
 0x45a   : > { %v11023_v29 = vpop.f32.mrb[61].mxu0  ;;  %v3491_v47 = vsel %vm511_vm10, %v10910_v34, %v7928_v5  ;;  %v5369_v34 = vld [vmem:[%s12645_s6 + $0x10] sm:$0xff]  ;;  %v11168_v5 = vld [vmem:[%s12644_s5] ss:$0 sm:$0xff] }
 0x45b   : > { %4095 = vmatmul.mubr.f32.gmra.mrb[42].mxu1 %v3482_v4  ;;  %v7394_v4 = vpack.c.bf16 %v5436_v31, %v5435_v58  ;;  %v3522_v22 = vsel %vm511_vm10, %v2818_v33, %v7922_v28  ;;  %v3490_v2 = vsel %vm511_vm10, %v2753_v11, %v7923_v45  ;;  %v5380_v58 = vld [vmem:[%s12645_s6 + $0x68] sm:$0xff]  ;;  %v5389_v45 = vld [vmem:[%s12645_s6 + $0xb0] sm:$0xff] }
 0x45c   : > { %4099 = vmatprep.mubr.f32.mxu1 %v3515_v18  ;;  %v2817_v18 = vld [vmem:[#allocation3 + $0x207] sm:$0xff]  ;;  %v7931_v56 = vpop.permute.xlu1 %7930  ;;  %v7309_v31 = vpack.c.bf16 %v5380_v58, %v5379_v52 }
 0x45d   : > { %v3521_v10 = vsel %vm511_vm10, %v2817_v18, %v7917_v40  ;;  %7395 = vmatprep.subr.bf16.mxu1 %v7394_v4  ;;  %v5378_v40 = vld [vmem:[%s12645_s6 + $0x58] sm:$0xff]  ;;  %v5384_v18 = vld [vmem:[%s12645_s6 + $0x88] sm:$0xff] }
 0x45e   : > { %7397 = vmatpush3.bf16.msra.mxu1 %v7394_v4  ;;  %v5382_v4 = vld [vmem:[%s12645_s6 + $0x78] sm:$0xff]  ;;  %v4471_v58 = vld [vmem:[#allocation3 + $0x8] sm:$0xff] }
 0x45f   : > { %4100 = vmatmul.mubr.f32.gmra.mrb[44].mxu1 %v3483_v17  ;;  %v5437_v17 = vld [vmem:[%s12645_s6 + $0x230] sm:$0xff]  ;;  %v7312_v54 = vpack.c.bf16 %v5382_v4, %v5381_v12 }
 0x460   : > { %4104 = vmatprep.mubr.f32.mxu1 %v3516_v30  ;;  %v7398_v30 = vpack.c.bf16 %v5438_v6, %v5437_v17  ;;  %v5387_v6 = vld [vmem:[%s12645_s6 + $0xa0] sm:$0xff] }
 0x462   : > { %7399 = vmatprep.subr.bf16.mxu1 %v7398_v30 }
 0x463   : > { %4105 = vmatmul.mubr.f32.gmra.mrb[46].mxu1 %v3484_v44  ;;  %v7927_v44 = vunpack.i.l.bf16 %v7926_v24  ;;  %v5386_v24 = vld [vmem:[%s12645_s6 + $0x98] sm:$0xff] }
 0x464   : > { %4109 = vmatprep.mubr.f32.mxu1 %v3517_v8  ;;  %v2819_v8 = vld [vmem:[#allocation3 + $0x227] sm:$0xff]  ;;  %7401 = vmatpush3.bf16.msra.mxu1 %v7398_v30  ;;  %v7321_v30 = vpack.c.bf16 %v5388_v16, %v5387_v6 }
 0x465   : > { %v3523_v61 = vsel %vm511_vm10, %v2819_v8, %v7927_v44 }
 0x467   : > { %4110 = vmatmul.mubr.f32.gmra.mrb[48].mxu1 %v3485_v51  ;;  %v7932_v51 = vunpack.i.l.bf16 %v7931_v56 }
 0x468   : > { %4114 = vmatprep.mubr.f32.mxu1 %v3518_v60  ;;  %v7933_v60 = vunpack.i.h.bf16 %v7931_v56  ;;  %v5392_v56 = vld [vmem:[%s12645_s6 + $0xc8] sm:$0xff] }
 0x469   : > { %v3524_v35 = vsel %vm511_vm10, %v2820_v27, %v7932_v51  ;;  %v5394_v51 = vld [vmem:[%s12645_s6 + $0xd8] sm:$0xff] }
 0x46a   : > { %v3492_v59 = vsel %vm511_vm10, %v10907_v53, %v7933_v60  ;;  %v5370_v53 = vld [vmem:[%s12645_s6 + $0x18] sm:$0xff] }
 0x46b   : > { %4115 = vmatmul.mubr.f32.gmra.mrb[50].mxu1 %v3486_v21  ;;  %v12767_v21 = vmov 0.0|0.0   ;;  %v7294_v19 = vpack.c.bf16 %v5370_v53, %v5369_v34  ;;  %v7333_v34 = vpack.c.bf16 %v5396_v13, %v5395_v37  ;;  %v5397_v53 = vld [vmem:[%s12645_s6 + $0xf0] sm:$0xff] }
 0x46c   : > { %4119 = vmatprep.mubr.f32.mxu1 %v3519_v3  ;;  %7293 = vmatprep.subr.bf16.mxu0 %v12767_v21  ;;  %v5372_v3 = vld [vmem:[%s12645_s6 + $0x28] sm:$0xff] }
 0x46d   : > { %7295 = vmatpush1.bf16.msra.mxu0 %v7294_v19  ;;  %v7297_v32 = vpack.c.bf16 %v5372_v3, %v5371_v39  ;;  %v5398_v19 = vld [vmem:[%s12645_s6 + $0xf8] sm:$0xff] }
 0x46e   : > { %7296 = vmatprep.subr.bf16.mxu0 %v12767_v21  ;;  %v7336_v38 = vpack.c.bf16 %v5398_v19, %v5397_v53 }
 0x46f   : > { %4120 = vmatmul.mubr.f32.gmra.mrb[52].mxu1 %v3487_v55  ;;  %v7303_v55 = vpack.c.bf16 %v5376_v57, %v5375_v62 }
 0x470   : > { %4124 = vmatprep.mubr.f32.mxu1 %v3520_v14  ;;  %v7306_v14 = vpack.c.bf16 %v5378_v40, %v5377_v1  ;;  %v12770_v40 = vld [vmem:[#allocation44_spill] sm:$0xff] }
 0x471   : > { %7298 = vmatpush1.bf16.msra.mxu0 %v7297_v32 }
 0x472   : > { %7299 = vmatprep.subr.bf16.mxu0 %v12767_v21 }
 0x473   : > { %4125 = vmatmul.mubr.f32.gmra.mrb[54].mxu1 %v3488_v63  ;;  %v5383_v63 = vld [vmem:[%s12645_s6 + $0x80] sm:$0xff] }
 0x474   : > { %4129 = vmatprep.mubr.f32.mxu1 %v3521_v10  ;;  %v7315_v28 = vpack.c.bf16 %v5384_v18, %v5383_v63  ;;  %v5385_v10 = vld [vmem:[%s12645_s6 + $0x90] sm:$0xff]  ;;  %v12771_v63 = vld [vmem:[#allocation43_spill] sm:$0xff] }
 0x475   : > { %7301 = vmatpush1.bf16.msra.mxu0 %v7300_v15  ;;  %v7318_v17 = vpack.c.bf16 %v5386_v24, %v5385_v10  ;;  %v4472_v24 = vld [vmem:[#allocation3 + $0x10] sm:$0xff] }
 0x476   : > { %7302 = vmatprep.subr.bf16.mxu0 %v12767_v21 }
 0x477   : > { %4130 = vmatmul.mubr.f32.gmra.mrb[56].mxu1 %v3489_v50  ;;  %v5390_v50 = vld [vmem:[%s12645_s6 + $0xb8] sm:$0xff] }
 0x478   : > { %4134 = vmatprep.mubr.f32.mxu1 %v3522_v22  ;;  %v7324_v33 = vpack.c.bf16 %v5390_v50, %v5389_v45  ;;  %v5391_v22 = vld [vmem:[%s12645_s6 + $0xc0] sm:$0xff]  ;;  %v12772_v45 = vld [vmem:[#allocation46_spill] sm:$0xff] }
 0x479   : > { %7304 = vmatpush1.bf16.msra.mxu0 %v7303_v55  ;;  %v7327_v8 = vpack.c.bf16 %v5392_v56, %v5391_v22 }
 0x47a   : > { %7305 = vmatprep.subr.bf16.mxu0 %v12767_v21 }
 0x47b   : > { %4135 = vmatmul.mubr.f32.gmra.mrb[58].mxu1 %v3490_v2  ;;  %v5393_v2 = vld [vmem:[%s12645_s6 + $0xd0] sm:$0xff] }
 0x47c   : > { %4139 = vmatprep.mubr.f32.mxu1 %v3523_v61  ;;  %v7330_v27 = vpack.c.bf16 %v5394_v51, %v5393_v2 }
 0x47d   : > { %7307 = vmatpush1.bf16.msra.mxu0 %v7306_v14 }
 0x47e   : > { %7308 = vmatprep.subr.bf16.mxu0 %v12767_v21 }
 0x47f   : > { %4140 = vmatmul.mubr.f32.gmra.mrb[60].mxu1 %v3491_v47 }
 0x480   : > { %4144 = vmatprep.mubr.f32.mxu1 %v3524_v35  ;;  %v12768_v35 = vld [vmem:[#allocation42_spill] sm:$0xff] }
 0x481   : > { %7310 = vmatpush1.bf16.msra.mxu0 %v7309_v31 }
 0x482   : > { %7311 = vmatprep.subr.bf16.mxu0 %v12767_v21 }
 0x483   : > { %4145 = vmatmul.mubr.f32.gmra.mrb[62].mxu1 %v3492_v59 }
 0x485   : > { %7313 = vmatpush1.bf16.msra.mxu0 %v7312_v54 }
 0x486   : > { %7314 = vmatprep.subr.bf16.mxu0 %v12767_v21 }
 0x489   : > { %7316 = vmatpush1.bf16.msra.mxu0 %v7315_v28 }
 0x48a   : > { %7317 = vmatprep.subr.bf16.mxu0 %v12767_v21 }
 0x48d   : > { %7319 = vmatpush1.bf16.msra.mxu0 %v7318_v17 }
 0x48e   : > { %7320 = vmatprep.subr.bf16.mxu0 %v12767_v21 }
 0x491   : > { %7322 = vmatpush1.bf16.msra.mxu0 %v7321_v30 }
 0x492   : > { %7323 = vmatprep.subr.bf16.mxu0 %v12767_v21 }
 0x495   : > { %7325 = vmatpush1.bf16.msra.mxu0 %v7324_v33 }
 0x496   : > { %7326 = vmatprep.subr.bf16.mxu0 %v12767_v21 }
 0x499   : > { %7328 = vmatpush1.bf16.msra.mxu0 %v7327_v8 }
 0x49a   : > { %7329 = vmatprep.subr.bf16.mxu0 %v12767_v21 }
 0x49d   : > { %7331 = vmatpush1.bf16.msra.mxu0 %v7330_v27  ;;  %v12773_v27 = vld [vmem:[#allocation45_spill] sm:$0xff] }
 0x49e   : > { %7332 = vmatprep.subr.bf16.mxu0 %v12767_v21 }
 0x4a1   : > { %7334 = vmatpush1.bf16.msra.mxu0 %v7333_v34 }
 0x4a2   : > { %7335 = vmatprep.subr.bf16.mxu0 %v12767_v21 }
 0x4a5   : > { %7337 = vmatpush1.bf16.msra.mxu0 %v7336_v38 }
 0x4a6   : > { %7338 = vmatprep.subr.bf16.mxu0 %v12767_v21 }
 0x4b5   : > { %v11155_v44 = vpop.f32.mrb[62].mxu0 }
 0x4b6   : > { %v11163_v11 = vpop.f32.mrb[63].mxu0 }
 0x4da   : > { %v3991_v61 = vpop.f32.mrb[0].mxu1 }
 0x4db   : > { %v7402_v60 = vadd.f32 %v11168_v5, %v3991_v61  ;;  %v3993_v47 = vpop.f32.mrb[1].mxu1 }
 0x4dd   : > { %v4217_v59 = vadd.f32 %v7402_v60, %v12768_v35 }
 0x4de   : > { %v3996_v23 = vpop.f32.mrb[2].mxu1 }
 0x4df   : > { %v4375_v39 = vmax.f32 %v4217_v59, 0.0  ;;  %v7403_v3 = vadd.f32 %v11168_v5, %v3996_v23  ;;  %v3998_v32 = vpop.f32.mrb[3].mxu1 }
 0x4e1   : > { %4407 = vst.msk [vmem:[#allocation3 + $0x28] sm:$0xff] %vm511_vm10, %v4375_v39  ;;  %v4222_v15 = vadd.f32 %v7403_v3, %v12769_v43  ;;  %v12774_v39 = vld [vmem:[#allocation48_spill] sm:$0xff] }
 0x4e2   : > { %v4001_v62 = vpop.f32.mrb[4].mxu1 }
 0x4e3   : > { %v4376_v57 = vmax.f32 %v4222_v15, 0.0  ;;  %v7404_v55 = vadd.f32 %v11168_v5, %v4001_v62  ;;  %v4003_v1 = vpop.f32.mrb[5].mxu1 }
 0x4e4   : > { %v12775_v1 = vld [vmem:[#allocation47_spill] sm:$0xff] }
 0x4e5   : > { %4408 = vst.msk [vmem:[#allocation3 + $0x30] sm:$0xff] %vm511_vm10, %v4376_v57  ;;  %v4227_v14 = vadd.f32 %v7404_v55, %v12770_v40 }
 0x4e6   : > { %v4006_v52 = vpop.f32.mrb[6].mxu1 }
 0x4e7   : > { %v4377_v31 = vmax.f32 %v4227_v14, 0.0  ;;  %v7405_v12 = vadd.f32 %v11168_v5, %v4006_v52  ;;  %v4008_v4 = vpop.f32.mrb[7].mxu1 }
 0x4e8   : > { %v11201_v54 = vld [vmem:[#allocation3 + $0x27] sm:$0xff] }
 0x4e9   : > { %4409 = vst.msk [vmem:[#allocation3 + $0x48] sm:$0xff] %vm511_vm10, %v4377_v31  ;;  %v4232_v18 = vadd.f32 %v7405_v12, %v12771_v63  ;;  %v7934_v28 = vpack.i.bf16 %v4471_v58, %v11201_v54  ;;  %v4473_v51 = vld [vmem:[#allocation3 + $0x28] sm:$0xff] }
 0x4ea   : > { %v4011_v10 = vpop.f32.mrb[8].mxu1 }
 0x4eb   : > { %v4378_v17 = vmax.f32 %v4232_v18, 0.0  ;;  %v7406_v6 = vadd.f32 %v11168_v5, %v4011_v10  ;;  %v4013_v16 = vpop.f32.mrb[9].mxu1  ;;  %7935 = vrot.lane.b32.xlu0 %v7934_v28, %s8402_s21  ;;  %v12776_v10 = vld [vmem:[#allocation50_spill] sm:$0xff] }
 0x4ec   : > { %v11208_v30 = vld [vmem:[#allocation3 + $0x2f] sm:$0xff] }
 0x4ed   : > { %4410 = vst.msk [vmem:[#allocation3 + $0x50] sm:$0xff] %vm511_vm10, %v4378_v17  ;;  %v4237_v50 = vadd.f32 %v7406_v6, %v12772_v45  ;;  %v7939_v33 = vpack.i.bf16 %v4472_v24, %v11208_v30  ;;  %v4474_v23 = vld [vmem:[#allocation3 + $0x30] sm:$0xff] }
 0x4ee   : > { %v4016_v22 = vpop.f32.mrb[10].mxu1 }
 0x4ef   : > { %v4379_v56 = vmax.f32 %v4237_v50, 0.0  ;;  %v7407_v8 = vadd.f32 %v11168_v5, %v4016_v22  ;;  %v4018_v2 = vpop.f32.mrb[11].mxu1  ;;  %7940 = vrot.lane.b32.xlu1 %v7939_v33, %s8402_s21 }
 0x4f0   : > { %v11215_v61 = vld [vmem:[#allocation3 + $0x47] sm:$0xff] }
 0x4f1   : > { %4411 = vst.msk [vmem:[#allocation3 + $0x68] sm:$0xff] %vm511_vm10, %v4379_v56  ;;  %v4242_v60 = vadd.f32 %v7407_v8, %v12773_v27  ;;  %v7944_v47 = vpack.i.bf16 %v4473_v51, %v11215_v61  ;;  %v11237_v57 = vld [vmem:[#allocation3 + $0x48] sm:$0xff] }
 0x4f2   : > { %v4021_v35 = vpop.f32.mrb[12].mxu1  ;;  %v12777_v56 = vld [vmem:[#allocation49_spill] sm:$0xff] }
 0x4f3   : > { %v4380_v59 = vmax.f32 %v4242_v60, 0.0  ;;  %v7408_v37 = vadd.f32 %v11168_v5, %v4021_v35  ;;  %v4023_v13 = vpop.f32.mrb[13].mxu1  ;;  %7945 = vrot.lane.b32.xlu0 %v7944_v47, %s8402_s21 }
 0x4f4   : > { %v11222_v34 = vld [vmem:[#allocation3 + $0x49] sm:$0xff]  ;;  %v11224_v53 = vld [vmem:[#allocation3 + $0x51] sm:$0xff] }
 0x4f5   : > { %v11226_v19 = vld [vmem:[#allocation3 + $0x4f] sm:$0xff]  ;;  %4412 = vst.msk [vmem:[#allocation3 + $0x70] sm:$0xff] %vm511_vm10, %v4380_v59  ;;  %v4247_v3 = vadd.f32 %v7408_v37, %v12774_v39  ;;  %7122 = vmatprep.mubr.msk.f32.mxu1 %vm511_vm10, %v11222_v34 }
 0x4f6   : > { %v7949_v32 = vpack.i.bf16 %v4474_v23, %v11226_v19  ;;  %v4026_v38 = vpop.f32.mrb[14].mxu1  ;;  %7123 = vmatmul.mubr.msk.f32.vlgmr.msra.gmra.mrb[64].mxu1 %vm511_vm10, %v11224_v53  ;;  %v11247_v4 = vld [vmem:[#allocation3 + $0x50] sm:$0xff]  ;;  %v12778_v23 = vld [vmem:[#allocation52_spill] sm:$0xff] }
 0x4f7   : > { %v4381_v43 = vmax.f32 %v4247_v3, 0.0  ;;  %v7409_v15 = vadd.f32 %v11168_v5, %v4026_v38  ;;  %v4028_v62 = vpop.f32.mrb[15].mxu1 }
 0x4f8   : > { %7950 = vrot.lane.b32.xlu1 %v7949_v32, %s8402_s21  ;;  %v11239_v55 = vld [vmem:[#allocation3 + $0x67] sm:$0xff] }
 0x4f9   : > { %4413 = vst.msk [vmem:[#allocation3 + $0x88] sm:$0xff] %vm511_vm10, %v4381_v43  ;;  %v4252_v40 = vadd.f32 %v7409_v15, %v12775_v1  ;;  %v7954_v14 = vpack.i.bf16 %v11237_v57, %v11239_v55  ;;  %v11265_v33 = vld [vmem:[#allocation3 + $0x68] sm:$0xff] }
 0x4fa   : > { %v4031_v52 = vpop.f32.mrb[16].mxu1 }
 0x4fb   : > { %v4382_v58 = vmax.f32 %v4252_v40, 0.0  ;;  %v7410_v31 = vadd.f32 %v11168_v5, %v4031_v52  ;;  %v4033_v12 = vpop.f32.mrb[17].mxu1  ;;  %7955 = vrot.lane.b32.xlu0 %v7954_v14, %s8402_s21  ;;  %v12779_v40 = vld [vmem:[#allocation51_spill] sm:$0xff] }
 0x4fc   : > { %v11249_v63 = vld [vmem:[#allocation3 + $0x69] sm:$0xff]  ;;  %v11251_v18 = vld [vmem:[#allocation3 + $0x71] sm:$0xff] }
 0x4fd   : > { %v11253_v28 = vld [vmem:[#allocation3 + $0x6f] sm:$0xff]  ;;  %4414 = vst.msk [vmem:[#allocation3 + $0x90] sm:$0xff] %vm511_vm10, %v4382_v58  ;;  %v4257_v24 = vadd.f32 %v7410_v31, %v12776_v10  ;;  %7125 = vmatprep.mubr.msk.f32.mxu1 %vm511_vm10, %v11249_v63 }
 0x4fe   : > { %v7959_v17 = vpack.i.bf16 %v11247_v4, %v11253_v28  ;;  %v4036_v6 = vpop.f32.mrb[18].mxu1  ;;  %7126 = vmatmul.mubr.msk.f32.gmra.mrb[66].mxu1 %vm511_vm10, %v11251_v18  ;;  %v11272_v35 = vld [vmem:[#allocation3 + $0x70] sm:$0xff] }
 0x4ff   : > { %v4383_v16 = vmax.f32 %v4257_v24, 0.0  ;;  %v7411_v45 = vadd.f32 %v11168_v5, %v4036_v6  ;;  %v4038_v50 = vpop.f32.mrb[19].mxu1 }
 0x500   : > { %7960 = vrot.lane.b32.xlu1 %v7959_v17, %s8402_s21  ;;  %v4541_v22 = vld [vmem:[#allocation3 + $0x87] sm:$0xff] }
 0x501   : > { %4415 = vst.msk [vmem:[#allocation3 + $0xa8] sm:$0xff] %vm511_vm10, %v4383_v16  ;;  %v4262_v8 = vadd.f32 %v7411_v45, %v12777_v56  ;;  %v7964_v2 = vpack.i.bf16 %v11265_v33, %v4541_v22  ;;  %v11287_v62 = vld [vmem:[#allocation3 + $0x88] sm:$0xff]  ;;  %v12780_v45 = vld [vmem:[#allocation54_spill] sm:$0xff] }
 0x502   : > { %v4041_v51 = vpop.f32.mrb[20].mxu1 }
 0x503   : > { %v4384_v27 = vmax.f32 %v4262_v8, 0.0  ;;  %v7412_v60 = vadd.f32 %v11168_v5, %v4041_v51  ;;  %v4043_v47 = vpop.f32.mrb[21].mxu1  ;;  %7965 = vrot.lane.b32.xlu0 %v7964_v2, %s8402_s21 }
 0x504   : > { %v11274_v59 = vld [vmem:[#allocation3 + $0x89] sm:$0xff]  ;;  %v11276_v37 = vld [vmem:[#allocation3 + $0x91] sm:$0xff] }
 0x505   : > { %v4542_v13 = vld [vmem:[#allocation3 + $0x8f] sm:$0xff]  ;;  %4416 = vst.msk [vmem:[#allocation3 + $0xb0] sm:$0xff] %vm511_vm10, %v4384_v27  ;;  %v4267_v39 = vadd.f32 %v7412_v60, %v12778_v23  ;;  %7128 = vmatprep.mubr.msk.f32.mxu1 %vm511_vm10, %v11274_v59 }
 0x506   : > { %v7969_v3 = vpack.i.bf16 %v11272_v35, %v4542_v13  ;;  %v4046_v32 = vpop.f32.mrb[22].mxu1  ;;  %7129 = vmatmul.mubr.msk.f32.gmra.mrb[68].mxu1 %vm511_vm10, %v11276_v37  ;;  %v11294_v24 = vld [vmem:[#allocation3 + $0x90] sm:$0xff] }
 0x507   : > { %v4385_v38 = vmax.f32 %v4267_v39, 0.0  ;;  %v7413_v43 = vadd.f32 %v11168_v5, %v4046_v32  ;;  %v4048_v15 = vpop.f32.mrb[23].mxu1  ;;  %v12781_v39 = vld [vmem:[#allocation53_spill] sm:$0xff] }
 0x508   : > { %7970 = vrot.lane.b32.xlu1 %v7969_v3, %s8402_s21  ;;  %v4543_v1 = vld [vmem:[#allocation3 + $0xa7] sm:$0xff] }
 0x509   : > { %4417 = vst.msk [vmem:[#allocation3 + $0xc8] sm:$0xff] %vm511_vm10, %v4385_v38  ;;  %v4272_v14 = vadd.f32 %v7413_v43, %v12779_v40  ;;  %v7974_v52 = vpack.i.bf16 %v11287_v62, %v4543_v1  ;;  %v11313_v47 = vld [vmem:[#allocation3 + $0xa8] sm:$0xff] }
 0x50a   : > { %v4051_v58 = vpop.f32.mrb[24].mxu1 }
 0x50b   : > { %v4386_v31 = vmax.f32 %v4272_v14, 0.0  ;;  %v7414_v12 = vadd.f32 %v11168_v5, %v4051_v58  ;;  %v4053_v10 = vpop.f32.mrb[25].mxu1  ;;  %7975 = vrot.lane.b32.xlu0 %v7974_v52, %s8402_s21 }
 0x50c   : > { %v11296_v17 = vld [vmem:[#allocation3 + $0xa9] sm:$0xff]  ;;  %v11298_v6 = vld [vmem:[#allocation3 + $0xb1] sm:$0xff] }
 0x50d   : > { %v4544_v16 = vld [vmem:[#allocation3 + $0xaf] sm:$0xff]  ;;  %4418 = vst.msk [vmem:[#allocation3 + $0xd0] sm:$0xff] %vm511_vm10, %v4386_v31  ;;  %v4277_v50 = vadd.f32 %v7414_v12, %v12780_v45  ;;  %7131 = vmatprep.mubr.msk.f32.mxu1 %vm511_vm10, %v11296_v17  ;;  %v12782_v31 = vld [vmem:[#allocation56_spill] sm:$0xff] }
 0x50e   : > { %v7979_v22 = vpack.i.bf16 %v11294_v24, %v4544_v16  ;;  %v11305_v56 = vld [vmem:[#allocation3 + $0xb0] sm:$0xff]  ;;  %v4056_v8 = vpop.f32.mrb[26].mxu1  ;;  %7132 = vmatmul.mubr.msk.f32.gmra.mrb[70].mxu1 %vm511_vm10, %v11298_v6 }
 0x50f   : > { %v4387_v51 = vmax.f32 %v4277_v50, 0.0  ;;  %v7415_v27 = vadd.f32 %v11168_v5, %v4056_v8  ;;  %v4058_v60 = vpop.f32.mrb[27].mxu1 }
 0x510   : > { %7980 = vrot.lane.b32.xlu1 %v7979_v22, %s8402_s21  ;;  %v4545_v13 = vld [vmem:[#allocation3 + $0xc7] sm:$0xff] }
 0x511   : > { %v11315_v23 = vld [vmem:[#allocation3 + $0xc8] sm:$0xff]  ;;  %4419 = vst.msk [vmem:[#allocation3 + $0xe8] sm:$0xff] %vm511_vm10, %v4387_v51  ;;  %v4282_v3 = vadd.f32 %v7415_v27, %v12781_v39  ;;  %v7984_v32 = vpack.i.bf16 %v11313_v47, %v4545_v13  ;;  %v12783_v13 = vld [vmem:[#allocation55_spill] sm:$0xff] }
 0x512   : > { %v4061_v43 = vpop.f32.mrb[28].mxu1 }
 0x513   : > { %v4388_v15 = vmax.f32 %v4282_v3, 0.0  ;;  %v7416_v1 = vadd.f32 %v11168_v5, %v4061_v43  ;;  %v4063_v40 = vpop.f32.mrb[29].mxu1  ;;  %7985 = vrot.lane.b32.xlu0 %v7984_v32, %s8402_s21 }
 0x514   : > { %v11324_v14 = vld [vmem:[#allocation3 + $0xc9] sm:$0xff]  ;;  %v11326_v52 = vld [vmem:[#allocation3 + $0xd1] sm:$0xff] }
 0x515   : > { %v4546_v58 = vld [vmem:[#allocation3 + $0xcf] sm:$0xff]  ;;  %4420 = vst.msk [vmem:[#allocation3 + $0xf0] sm:$0xff] %vm511_vm10, %v4388_v15  ;;  %v4287_v12 = vadd.f32 %v7416_v1, %v12782_v31  ;;  %7134 = vmatprep.mubr.msk.f32.mxu1 %vm511_vm10, %v11324_v14 }
 0x516   : > { %v7989_v10 = vpack.i.bf16 %v11305_v56, %v4546_v58  ;;  %v11333_v16 = vld [vmem:[#allocation3 + $0xd0] sm:$0xff]  ;;  %v4066_v45 = vpop.f32.mrb[30].mxu1  ;;  %7135 = vmatmul.mubr.msk.f32.gmra.mrb[72].mxu1 %vm511_vm10, %v11326_v52 }
 0x517   : > { %v4389_v22 = vmax.f32 %v4287_v12, 0.0  ;;  %v7417_v8 = vadd.f32 %v11168_v5, %v4066_v45  ;;  %v4068_v51 = vpop.f32.mrb[31].mxu1 }
 0x518   : > { %7990 = vrot.lane.b32.xlu1 %v7989_v10, %s8402_s21  ;;  %v4547_v27 = vld [vmem:[#allocation3 + $0xe7] sm:$0xff] }
 0x519   : > { %v11341_v60 = vld [vmem:[#allocation3 + $0xe8] sm:$0xff]  ;;  %4421 = vst.msk [vmem:[#allocation3 + $0x108] sm:$0xff] %vm511_vm10, %v4389_v22  ;;  %v4292_v39 = vadd.f32 %v7417_v8, %v12783_v13  ;;  %v7994_v3 = vpack.i.bf16 %v11315_v23, %v4547_v27 }
 0x51a   : > { %v4071_v43 = vpop.f32.mrb[32].mxu1 }
 0x51b   : > { %v4390_v15 = vmax.f32 %v4292_v39, 0.0  ;;  %v7418_v1 = vadd.f32 %v11168_v5, %v4071_v43  ;;  %v4073_v40 = vpop.f32.mrb[33].mxu1  ;;  %7995 = vrot.lane.b32.xlu0 %v7994_v3, %s8402_s21  ;;  %v12784_v43 = vld [vmem:[#allocation57_spill] sm:$0xff] }
 0x51c   : > { %v11350_v58 = vld [vmem:[#allocation3 + $0xe9] sm:$0xff]  ;;  %v11352_v31 = vld [vmem:[#allocation3 + $0xf1] sm:$0xff] }
 0x51d   : > { %v4548_v12 = vld [vmem:[#allocation3 + $0xef] sm:$0xff]  ;;  %4422 = vst.msk [vmem:[#allocation3 + $0x110] sm:$0xff] %vm511_vm10, %v4390_v15  ;;  %v4297_v10 = vadd.f32 %v7418_v1, %v10841_v0  ;;  %7137 = vmatprep.mubr.msk.f32.mxu1 %vm511_vm10, %v11350_v58 }
 0x51e   : > { %v7999_v45 = vpack.i.bf16 %v11333_v16, %v4548_v12  ;;  %v11359_v22 = vld [vmem:[#allocation3 + $0xf0] sm:$0xff]  ;;  %v4076_v8 = vpop.f32.mrb[34].mxu1  ;;  %7138 = vmatmul.mubr.msk.f32.gmra.mrb[74].mxu1 %vm511_vm10, %v11352_v31 }
 0x51f   : > { %v4391_v27 = vmax.f32 %v4297_v10, 0.0  ;;  %v7419_v13 = vadd.f32 %v11168_v5, %v4076_v8  ;;  %v4078_v39 = vpop.f32.mrb[35].mxu1 }
 0x520   : > { %8000 = vrot.lane.b32.xlu1 %v7999_v45, %s8402_s21  ;;  %v4549_v0 = vld [vmem:[#allocation3 + $0x107] sm:$0xff] }
 0x521   : > { %v11367_v3 = vld [vmem:[#allocation3 + $0x108] sm:$0xff]  ;;  %4423 = vst.msk [vmem:[#allocation3 + $0x128] sm:$0xff] %vm511_vm10, %v4391_v27  ;;  %v4302_v15 = vadd.f32 %v7419_v13, %v12784_v43  ;;  %v8004_v1 = vpack.i.bf16 %v11341_v60, %v4549_v0 }
 0x522   : > { %v4081_v12 = vpop.f32.mrb[36].mxu1 }
 0x523   : > { %v4392_v51 = vmax.f32 %v4302_v15, 0.0  ;;  %v7420_v10 = vadd.f32 %v11168_v5, %v4081_v12  ;;  %v4083_v8 = vpop.f32.mrb[37].mxu1  ;;  %8005 = vrot.lane.b32.xlu0 %v8004_v1, %s8402_s21 }
 0x524   : > { %v11376_v45 = vld [vmem:[#allocation3 + $0x109] sm:$0xff]  ;;  %v11378_v39 = vld [vmem:[#allocation3 + $0x111] sm:$0xff] }
 0x525   : > { %12785 = vst [vmem:[#allocation36_spill] sm:$0xff] %v11378_v39  ;;  %v4550_v32 = vld [vmem:[#allocation3 + $0x10f] sm:$0xff]  ;;  %4424 = vst.msk [vmem:[#allocation3 + $0x130] sm:$0xff] %vm511_vm10, %v4392_v51  ;;  %v4307_v27 = vadd.f32 %v7420_v10, %v10901_v25  ;;  %7140 = vmatprep.mubr.msk.f32.mxu1 %vm511_vm10, %v11376_v45 }
 0x526   : > { %v8009_v13 = vpack.i.bf16 %v11359_v22, %v4550_v32  ;;  %v11385_v0 = vld [vmem:[#allocation3 + $0x110] sm:$0xff]  ;;  %v4086_v43 = vpop.f32.mrb[38].mxu1  ;;  %7141 = vmatmul.mubr.msk.f32.gmra.mrb[76].mxu1 %vm511_vm10, %v11378_v39 }
 0x527   : > { %v4393_v1 = vmax.f32 %v4307_v27, 0.0  ;;  %v7421_v12 = vadd.f32 %v11168_v5, %v4086_v43  ;;  %v4088_v51 = vpop.f32.mrb[39].mxu1 }
 0x528   : > { %8010 = vrot.lane.b32.xlu1 %v8009_v13, %s8402_s21  ;;  %v4551_v25 = vld [vmem:[#allocation3 + $0x127] sm:$0xff] }
 0x529   : > { %v11393_v10 = vld [vmem:[#allocation3 + $0x128] sm:$0xff]  ;;  %4425 = vst.msk [vmem:[#allocation3 + $0x148] sm:$0xff] %vm511_vm10, %v4393_v1  ;;  %v4312_v32 = vadd.f32 %v7421_v12, %v10899_v49  ;;  %v8014_v8 = vpack.i.bf16 %v11367_v3, %v4551_v25 }
 0x52a   : > { %v4091_v50 = vpop.f32.mrb[40].mxu1 }
 0x52b   : > { %v4394_v15 = vmax.f32 %v4312_v32, 0.0  ;;  %v7422_v27 = vadd.f32 %v11168_v5, %v4091_v50  ;;  %v4093_v43 = vpop.f32.mrb[41].mxu1  ;;  %8015 = vrot.lane.b32.xlu0 %v8014_v8, %s8402_s21 }
 0x52c   : > { %v11402_v13 = vld [vmem:[#allocation3 + $0x129] sm:$0xff]  ;;  %v11404_v51 = vld [vmem:[#allocation3 + $0x131] sm:$0xff] }
 0x52d   : > { %12786 = vst [vmem:[#allocation38_spill] sm:$0xff] %v11402_v13  ;;  %12787 = vst [vmem:[#allocation37_spill] sm:$0xff] %v11404_v51  ;;  %v4552_v38 = vld [vmem:[#allocation3 + $0x12f] sm:$0xff]  ;;  %v4317_v49 = vadd.f32 %v7422_v27, %v10933_v36  ;;  %7143 = vmatprep.mubr.msk.f32.mxu1 %vm511_vm10, %v11402_v13 }
 0x52e   : > { %4426 = vst.msk [vmem:[#allocation3 + $0x150] sm:$0xff] %vm511_vm10, %v4394_v15  ;;  %v8019_v1 = vpack.i.bf16 %v11385_v0, %v4552_v38  ;;  %v11411_v12 = vld [vmem:[#allocation3 + $0x130] sm:$0xff]  ;;  %v4096_v50 = vpop.f32.mrb[42].mxu1  ;;  %7144 = vmatmul.mubr.msk.f32.gmra.mrb[78].mxu1 %vm511_vm10, %v11404_v51 }
 0x52f   : > { %v4395_v32 = vmax.f32 %v4317_v49, 0.0  ;;  %v7423_v8 = vadd.f32 %v11168_v5, %v4096_v50  ;;  %v4098_v15 = vpop.f32.mrb[43].mxu1 }
 0x530   : > { %8020 = vrot.lane.b32.xlu1 %v8019_v1, %s8402_s21  ;;  %v4553_v36 = vld [vmem:[#allocation3 + $0x147] sm:$0xff] }
 0x531   : > { %v11419_v27 = vld [vmem:[#allocation3 + $0x148] sm:$0xff]  ;;  %4427 = vst.msk [vmem:[#allocation3 + $0x168] sm:$0xff] %vm511_vm10, %v4395_v32  ;;  %v4322_v38 = vadd.f32 %v7423_v8, %v10931_v48  ;;  %v8024_v43 = vpack.i.bf16 %v11393_v10, %v4553_v36 }
 0x532   : > { %v4101_v2 = vpop.f32.mrb[44].mxu1 }
 0x533   : > { %v4396_v25 = vmax.f32 %v4322_v38, 0.0  ;;  %v7424_v49 = vadd.f32 %v11168_v5, %v4101_v2  ;;  %v4103_v50 = vpop.f32.mrb[45].mxu1  ;;  %8025 = vrot.lane.b32.xlu0 %v8024_v43, %s8402_s21 }
 0x535   : > { %v11428_v1 = vld [vmem:[#allocation3 + $0x149] sm:$0xff]  ;;  %v11430_v15 = vld [vmem:[#allocation3 + $0x151] sm:$0xff]  ;;  %4428 = vst.msk [vmem:[#allocation3 + $0x170] sm:$0xff] %vm511_vm10, %v4396_v25  ;;  %v4327_v48 = vadd.f32 %v7424_v49, %v10950_v42 }
 0x536   : > { %12788 = vst [vmem:[#allocation40_spill] sm:$0xff] %v11428_v1  ;;  %12789 = vst [vmem:[#allocation39_spill] sm:$0xff] %v11430_v15  ;;  %v4554_v39 = vld [vmem:[#allocation3 + $0x14f] sm:$0xff]  ;;  %7146 = vmatprep.mubr.msk.f32.mxu1 %vm511_vm10, %v11428_v1  ;;  %v4106_v2 = vpop.f32.mrb[46].mxu1 }
 0x537   : > { %v8029_v32 = vpack.i.bf16 %v11411_v12, %v4554_v39  ;;  %v11437_v8 = vld [vmem:[#allocation3 + $0x150] sm:$0xff]  ;;  %7147 = vmatmul.mubr.msk.f32.gmra.mrb[80].mxu1 %vm511_vm10, %v11430_v15  ;;  %v4397_v38 = vmax.f32 %v4327_v48, 0.0  ;;  %v7425_v43 = vadd.f32 %v11168_v5, %v4106_v2  ;;  %v4108_v25 = vpop.f32.mrb[47].mxu1 }
 0x538   : > { %v4555_v42 = vld [vmem:[#allocation3 + $0x167] sm:$0xff] }
 0x539   : > { %8030 = vrot.lane.b32.xlu1 %v8029_v32, %s8402_s21  ;;  %v11445_v49 = vld [vmem:[#allocation3 + $0x168] sm:$0xff]  ;;  %4429 = vst.msk [vmem:[#allocation3 + $0x188] sm:$0xff] %vm511_vm10, %v4397_v38  ;;  %v4332_v39 = vadd.f32 %v7425_v43, %v10943_v41  ;;  %v8034_v50 = vpack.i.bf16 %v11419_v27, %v4555_v42 }
 0x53a   : > { %v4111_v13 = vpop.f32.mrb[48].mxu1 }
 0x53b   : > { %v4398_v36 = vmax.f32 %v4332_v39, 0.0  ;;  %v7426_v48 = vadd.f32 %v11168_v5, %v4111_v13  ;;  %v4113_v2 = vpop.f32.mrb[49].mxu1  ;;  %8035 = vrot.lane.b32.xlu0 %v8034_v50, %s8402_s21 }
 0x53c   : > { %v11454_v32 = vld [vmem:[#allocation3 + $0x169] sm:$0xff]  ;;  %v11456_v25 = vld [vmem:[#allocation3 + $0x171] sm:$0xff] }
 0x53d   : > { %12790 = vst [vmem:[#allocation42_spill] sm:$0xff] %v11454_v32  ;;  %12791 = vst [vmem:[#allocation41_spill] sm:$0xff] %v11456_v25  ;;  %v4556_v51 = vld [vmem:[#allocation3 + $0x16f] sm:$0xff]  ;;  %v4337_v41 = vadd.f32 %v7426_v48, %v10976_v26  ;;  %7149 = vmatprep.mubr.msk.f32.mxu1 %vm511_vm10, %v11454_v32 }
 0x53e   : > { %4430 = vst.msk [vmem:[#allocation3 + $0x190] sm:$0xff] %vm511_vm10, %v4398_v36  ;;  %v8039_v38 = vpack.i.bf16 %v11437_v8, %v4556_v51  ;;  %v11463_v43 = vld [vmem:[#allocation3 + $0x170] sm:$0xff]  ;;  %v4116_v13 = vpop.f32.mrb[50].mxu1  ;;  %7150 = vmatmul.mubr.msk.f32.gmra.mrb[82].mxu1 %vm511_vm10, %v11456_v25 }
 0x53f   : > { %v4399_v39 = vmax.f32 %v4337_v41, 0.0  ;;  %v7427_v50 = vadd.f32 %v11168_v5, %v4116_v13  ;;  %v4118_v36 = vpop.f32.mrb[51].mxu1 }
 0x540   : > { %8040 = vrot.lane.b32.xlu1 %v8039_v38, %s8402_s21  ;;  %v4557_v26 = vld [vmem:[#allocation3 + $0x187] sm:$0xff] }
 0x541   : > { %v11471_v48 = vld [vmem:[#allocation3 + $0x188] sm:$0xff]  ;;  %4431 = vst.msk [vmem:[#allocation3 + $0x1a8] sm:$0xff] %vm511_vm10, %v4399_v39  ;;  %v4342_v51 = vadd.f32 %v7427_v50, %v10974_v46  ;;  %v8044_v2 = vpack.i.bf16 %v11445_v49, %v4557_v26 }
 0x542   : > { %v4121_v1 = vpop.f32.mrb[52].mxu1 }
 0x543   : > { %v4400_v42 = vmax.f32 %v4342_v51, 0.0  ;;  %v7428_v41 = vadd.f32 %v11168_v5, %v4121_v1  ;;  %v4123_v13 = vpop.f32.mrb[53].mxu1  ;;  %8045 = vrot.lane.b32.xlu0 %v8044_v2, %s8402_s21 }
 0x545   : > { %v11480_v38 = vld [vmem:[#allocation3 + $0x189] sm:$0xff]  ;;  %v11482_v36 = vld [vmem:[#allocation3 + $0x191] sm:$0xff]  ;;  %4432 = vst.msk [vmem:[#allocation3 + $0x1b0] sm:$0xff] %vm511_vm10, %v4400_v42  ;;  %v4347_v46 = vadd.f32 %v7428_v41, %v11004_v9 }
 0x546   : > { %v4558_v15 = vld [vmem:[#allocation3 + $0x18f] sm:$0xff]  ;;  %7152 = vmatprep.mubr.msk.f32.mxu1 %vm511_vm10, %v11480_v38  ;;  %v4126_v1 = vpop.f32.mrb[54].mxu1 }
 0x547   : > { %v8049_v39 = vpack.i.bf16 %v11463_v43, %v4558_v15  ;;  %v11489_v50 = vld [vmem:[#allocation3 + $0x190] sm:$0xff]  ;;  %7153 = vmatmul.mubr.msk.f32.gmra.mrb[84].mxu1 %vm511_vm10, %v11482_v36  ;;  %v4401_v51 = vmax.f32 %v4347_v46, 0.0  ;;  %v7429_v2 = vadd.f32 %v11168_v5, %v4126_v1  ;;  %v4128_v42 = vpop.f32.mrb[55].mxu1 }
 0x548   : > { %v4559_v9 = vld [vmem:[#allocation3 + $0x1a7] sm:$0xff] }
 0x549   : > { %8050 = vrot.lane.b32.xlu1 %v8049_v39, %s8402_s21  ;;  %v11497_v41 = vld [vmem:[#allocation3 + $0x1a8] sm:$0xff]  ;;  %4433 = vst.msk [vmem:[#allocation3 + $0x1c8] sm:$0xff] %vm511_vm10, %v4401_v51  ;;  %v4352_v15 = vadd.f32 %v7429_v2, %v11002_v7  ;;  %v8054_v13 = vpack.i.bf16 %v11471_v48, %v4559_v9 }
 0x54a   : > { %v4131_v32 = vpop.f32.mrb[56].mxu1 }
 0x54b   : > { %v4402_v26 = vmax.f32 %v4352_v15, 0.0  ;;  %v7430_v46 = vadd.f32 %v11168_v5, %v4131_v32  ;;  %v4133_v1 = vpop.f32.mrb[57].mxu1  ;;  %8055 = vrot.lane.b32.xlu0 %v8054_v13, %s8402_s21 }
 0x54c   : > { %v11506_v39 = vld [vmem:[#allocation3 + $0x1a9] sm:$0xff]  ;;  %v11508_v42 = vld [vmem:[#allocation3 + $0x1b1] sm:$0xff] }
 0x54d   : > { %12792 = vst [vmem:[#allocation44_spill] sm:$0xff] %v11506_v39  ;;  %12793 = vst [vmem:[#allocation43_spill] sm:$0xff] %v11508_v42  ;;  %v4560_v25 = vld [vmem:[#allocation3 + $0x1af] sm:$0xff]  ;;  %v4357_v7 = vadd.f32 %v7430_v46, %v11023_v29  ;;  %7155 = vmatprep.mubr.msk.f32.mxu1 %vm511_vm10, %v11506_v39 }
 0x54e   : > { %4434 = vst.msk [vmem:[#allocation3 + $0x1d0] sm:$0xff] %vm511_vm10, %v4402_v26  ;;  %v8059_v51 = vpack.i.bf16 %v11489_v50, %v4560_v25  ;;  %v11515_v2 = vld [vmem:[#allocation3 + $0x1b0] sm:$0xff]  ;;  %v4136_v32 = vpop.f32.mrb[58].mxu1  ;;  %7156 = vmatmul.mubr.msk.f32.gmra.mrb[86].mxu1 %vm511_vm10, %v11508_v42 }
 0x54f   : > { %12794 = vst [vmem:[#allocation46_spill] sm:$0xff] %v11515_v2  ;;  %v4403_v15 = vmax.f32 %v4357_v7, 0.0  ;;  %v7431_v13 = vadd.f32 %v11168_v5, %v4136_v32  ;;  %v4138_v26 = vpop.f32.mrb[59].mxu1 }
 0x550   : > { %8060 = vrot.lane.b32.xlu1 %v8059_v51, %s8402_s21  ;;  %v4561_v29 = vld [vmem:[#allocation3 + $0x1c7] sm:$0xff] }
 0x551   : > { %4435 = vst.msk [vmem:[#allocation3 + $0x1e8] sm:$0xff] %vm511_vm10, %v4403_v15  ;;  %v4362_v25 = vadd.f32 %v7431_v13, %v11020_v20  ;;  %v8064_v46 = vpack.i.bf16 %v11497_v41, %v4561_v29 }
 0x552   : > { %v4141_v1 = vpop.f32.mrb[60].mxu1 }
 0x553   : > { %v4404_v40 = vmax.f32 %v4362_v25, 0.0  ;;  %v7432_v42 = vadd.f32 %v11168_v5, %v4141_v1  ;;  %v4143_v39 = vpop.f32.mrb[61].mxu1  ;;  %8065 = vrot.lane.b32.xlu0 %v8064_v46, %s8402_s21  ;;  %v11541_v25 = vld [vmem:[#allocation3 + $0x1c8] sm:$0xff] }
 0x555   : > { %v11528_v7 = vld [vmem:[#allocation3 + $0x1c9] sm:$0xff]  ;;  %v11530_v32 = vld [vmem:[#allocation3 + $0x1d1] sm:$0xff]  ;;  %4436 = vst.msk [vmem:[#allocation3 + $0x1f0] sm:$0xff] %vm511_vm10, %v4404_v40  ;;  %v4367_v51 = vadd.f32 %v7432_v42, %v11163_v11 }
 0x556   : > { %12795 = vst [vmem:[#allocation45_spill] sm:$0xff] %v11528_v7  ;;  %12796 = vst [vmem:[#allocation48_spill] sm:$0xff] %v11530_v32  ;;  %v4562_v26 = vld [vmem:[#allocation3 + $0x1cf] sm:$0xff]  ;;  %7158 = vmatprep.mubr.msk.f32.mxu1 %vm511_vm10, %v11528_v7  ;;  %v4146_v15 = vpop.f32.mrb[62].mxu1 }
 0x557   : > { %v8069_v20 = vpack.i.bf16 %v11515_v2, %v4562_v26  ;;  %7159 = vmatmul.mubr.msk.f32.gmra.mrb[88].mxu1 %vm511_vm10, %v11530_v32  ;;  %v4405_v39 = vmax.f32 %v4367_v51, 0.0  ;;  %v7433_v13 = vadd.f32 %v11168_v5, %v4146_v15  ;;  %v4148_v29 = vpop.f32.mrb[63].mxu1  ;;  %v11547_v1 = vld [vmem:[#allocation3 + $0x1d0] sm:$0xff]  ;;  %v5399_v5 = vld [vmem:[%s12645_s6 + $0x100] sm:$0xff]  ;;  %v5400_v26 = vld [vmem:[%s12645_s6 + $0x108] sm:$0xff] }
 0x558   : > { %v4563_v40 = vld [vmem:[#allocation3 + $0x1e7] sm:$0xff]  ;;  %12797 = vst [vmem:[#allocation47_spill] sm:$0xff] %v11547_v1  ;;  %v4504_v7 = vld [vmem:[#allocation3 + $0x11] sm:$0xff] }
 0x559   : > { %8070 = vrot.lane.b32.xlu1 %v8069_v20, %s8402_s21  ;;  %4437 = vst.msk [vmem:[#allocation3 + $0x208] sm:$0xff] %vm511_vm10, %v4405_v39  ;;  %v4372_v11 = vadd.f32 %v7433_v13, %v11155_v44  ;;  %v8074_v42 = vpack.i.bf16 %v11541_v25, %v4563_v40  ;;  %v4503_v13 = vld [vmem:[#allocation3 + $0x9] sm:$0xff] }
 0x55a   : > { %v4439_v29 = vld [vmem:[#allocation3 + $0x7] sm:$0xff] }
 0x55b   : > { %v4406_v46 = vmax.f32 %v4372_v11, 0.0  ;;  %8075 = vrot.lane.b32.xlu0 %v8074_v42, %s8402_s21  ;;  %v7339_v42 = vpack.c.bf16 %v5400_v26, %v5399_v5  ;;  %v11568_v32 = vld [vmem:[#allocation3 + $0x1e8] sm:$0xff]  ;;  %v5402_v5 = vld [vmem:[%s12645_s6 + $0x118] sm:$0xff] }
 0x55c   : > { %v11555_v51 = vld [vmem:[#allocation3 + $0x1e9] sm:$0xff]  ;;  %v11557_v20 = vld [vmem:[#allocation3 + $0x1f1] sm:$0xff]  ;;  %12800 = vst [vmem:[#allocation52_spill] sm:$0xff] %v11568_v32 }
 0x55d   : > { %12798 = vst [vmem:[#allocation50_spill] sm:$0xff] %v11555_v51  ;;  %12799 = vst [vmem:[#allocation49_spill] sm:$0xff] %v11557_v20  ;;  %v4564_v44 = vld [vmem:[#allocation3 + $0x1ef] sm:$0xff]  ;;  %7161 = vmatprep.mubr.msk.f32.mxu1 %vm511_vm10, %v11555_v51  ;;  %v7936_v15 = vpop.permute.xlu0 %7935 }
 0x55e   : > { %4438 = vst.msk [vmem:[#allocation3 + $0x210] sm:$0xff] %vm511_vm10, %v4406_v46  ;;  %v8079_v39 = vpack.i.bf16 %v11547_v1, %v4564_v44  ;;  %v7938_v40 = vunpack.i.h.bf16 %v7936_v15  ;;  %v7937_v11 = vunpack.i.l.bf16 %v7936_v15  ;;  %7162 = vmatmul.mubr.msk.f32.gmra.mrb[90].mxu1 %vm511_vm10, %v11557_v20  ;;  %v4440_v1 = vld [vmem:[#allocation3 + $0xf] sm:$0xff] }
 0x55f   : > { %v5401_v15 = vld [vmem:[%s12645_s6 + $0x110] sm:$0xff] }
 0x560   : > { %8080 = vrot.lane.b32.xlu1 %v8079_v39, %s8402_s21  ;;  %v5271_v9 = vsel %vm511_vm10, %v4503_v13, %v7937_v11  ;;  %v5239_v46 = vsel %vm511_vm10, %v4439_v29, %v7938_v40  ;;  %v4565_v51 = vld [vmem:[#allocation3 + $0x207] sm:$0xff]  ;;  %v11578_v13 = vld [vmem:[#allocation3 + $0x1f0] sm:$0xff] }
 0x561   : > { %v7941_v2 = vpop.permute.xlu1 %7940  ;;  %5606 = vmatprep.mubr.f32.mxu0 %v5271_v9  ;;  %v8084_v44 = vpack.i.bf16 %v11568_v32, %v4565_v51  ;;  %v4599_v9 = vld [vmem:[#allocation3 + $0x29] sm:$0xff]  ;;  %v7342_v32 = vpack.c.bf16 %v5402_v5, %v5401_v15  ;;  %v4600_v15 = vld [vmem:[#allocation3 + $0x31] sm:$0xff] }
 0x562   : > { %v7943_v26 = vunpack.i.h.bf16 %v7941_v2  ;;  %v7942_v39 = vunpack.i.l.bf16 %v7941_v2  ;;  %5607 = vmatmul.mubr.f32.vlgmr.msra.gmra.mrb[64].mxu0 %v5239_v46  ;;  %v8094_v46 = vpack.i.bf16 %v4599_v9, %v11237_v57 }
 0x563   : > { %7340 = vmatpush1.bf16.msra.mxu0 %v7339_v42  ;;  %8085 = vrot.lane.b32.xlu0 %v8084_v44, %s8402_s21 }
 0x564   : > { %v5272_v51 = vsel %vm511_vm10, %v4504_v7, %v7942_v39  ;;  %v5240_v40 = vsel %vm511_vm10, %v4440_v1, %v7943_v26  ;;  %7341 = vmatprep.subr.bf16.mxu0 %v12767_v21  ;;  %v5403_v7 = vld [vmem:[%s12645_s6 + $0x120] sm:$0xff]  ;;  %v5404_v1 = vld [vmem:[%s12645_s6 + $0x128] sm:$0xff] }
 0x565   : > { %v11581_v29 = vld [vmem:[#allocation3 + $0x209] sm:$0xff]  ;;  %v11584_v11 = vld [vmem:[#allocation3 + $0x211] sm:$0xff]  ;;  %5611 = vmatprep.mubr.f32.mxu0 %v5272_v51  ;;  %v7946_v2 = vpop.permute.xlu0 %7945  ;;  %v7345_v5 = vpack.c.bf16 %v5404_v1, %v5403_v7  ;;  %v8099_v51 = vpack.i.bf16 %v4600_v15, %v11247_v4  ;;  %v8109_v7 = vpack.i.bf16 %v11224_v53, %v11272_v35  ;;  %v8114_v1 = vpack.i.bf16 %v11249_v63, %v11287_v62 }
 0x566   : > { %v4566_v20 = vld [vmem:[#allocation3 + $0x20f] sm:$0xff]  ;;  %7164 = vmatprep.mubr.msk.f32.mxu1 %vm511_vm10, %v11581_v29  ;;  %v7948_v44 = vunpack.i.h.bf16 %v7946_v2  ;;  %v7947_v26 = vunpack.i.l.bf16 %v7946_v2  ;;  %5612 = vmatmul.mubr.f32.gmra.mrb[66].mxu0 %v5240_v40  ;;  %v8104_v40 = vpack.i.bf16 %v11222_v34, %v11265_v33 }
 0x567   : > { %v8089_v42 = vpack.i.bf16 %v11578_v13, %v4566_v20  ;;  %7165 = vmatmul.mubr.msk.f32.gmra.mrb[92].mxu1 %vm511_vm10, %v11584_v11  ;;  %8095 = vrot.lane.b32.xlu0 %v8094_v46, %s8402_s21  ;;  %v5405_v2 = vld [vmem:[%s12645_s6 + $0x130] sm:$0xff] }
 0x568   : > { %v5273_v57 = vsel %vm511_vm10, %v4599_v9, %v7947_v26  ;;  %v5241_v20 = vsel %vm511_vm10, %v11201_v54, %v7948_v44  ;;  %7343 = vmatpush1.bf16.msra.mxu0 %v7342_v32  ;;  %v5406_v54 = vld [vmem:[%s12645_s6 + $0x138] sm:$0xff]  ;;  %v5407_v44 = vld [vmem:[%s12645_s6 + $0x140] sm:$0xff] }
 0x569   : > { %8090 = vrot.lane.b32.xlu1 %v8089_v42, %s8402_s21  ;;  %5616 = vmatprep.mubr.f32.mxu0 %v5273_v57  ;;  %v7348_v42 = vpack.c.bf16 %v5406_v54, %v5405_v2 }
 0x56a   : > { %v7951_v39 = vpop.permute.xlu1 %7950  ;;  %7344 = vmatprep.subr.bf16.mxu0 %v12767_v21  ;;  %5617 = vmatmul.mubr.f32.gmra.mrb[68].mxu0 %v5241_v20 }
 0x56b   : > { %v7953_v32 = vunpack.i.h.bf16 %v7951_v39  ;;  %v7952_v9 = vunpack.i.l.bf16 %v7951_v39  ;;  %8105 = vrot.lane.b32.xlu0 %v8104_v40, %s8402_s21  ;;  %v8124_v39 = vpack.i.bf16 %v11274_v59, %v11313_v47 }
 0x56c   : > { %7346 = vmatpush1.bf16.msra.mxu0 %v7345_v5  ;;  %v8119_v5 = vpack.i.bf16 %v11251_v18, %v11294_v24 }
 0x56d   : > { %8100 = vrot.lane.b32.xlu1 %v8099_v51, %s8402_s21  ;;  %v5274_v4 = vsel %vm511_vm10, %v4600_v15, %v7952_v9  ;;  %v5242_v33 = vsel %vm511_vm10, %v11208_v30, %v7953_v32  ;;  %v7956_v46 = vpop.permute.xlu0 %7955  ;;  %7347 = vmatprep.subr.bf16.mxu0 %v12767_v21  ;;  %v5408_v30 = vld [vmem:[%s12645_s6 + $0x148] sm:$0xff]  ;;  %v5409_v51 = vld [vmem:[%s12645_s6 + $0x150] sm:$0xff]  ;;  %v5411_v32 = vld [vmem:[%s12645_s6 + $0x160] sm:$0xff] }
 0x56e   : > { %5621 = vmatprep.mubr.f32.mxu0 %v5274_v4  ;;  %v7958_v26 = vunpack.i.h.bf16 %v7956_v46  ;;  %v7957_v57 = vunpack.i.l.bf16 %v7956_v46  ;;  %v7351_v20 = vpack.c.bf16 %v5408_v30, %v5407_v44  ;;  %v5412_v9 = vld [vmem:[%s12645_s6 + $0x168] sm:$0xff] }
 0x56f   : > { %5622 = vmatmul.mubr.f32.gmra.mrb[70].mxu0 %v5242_v33  ;;  %8115 = vrot.lane.b32.xlu0 %v8114_v1, %s8402_s21 }
 0x570   : > { %v5275_v35 = vsel %vm511_vm10, %v11222_v34, %v7957_v57  ;;  %v5243_v62 = vsel %vm511_vm10, %v11215_v61, %v7958_v26  ;;  %7349 = vmatpush1.bf16.msra.mxu0 %v7348_v42  ;;  %v5410_v61 = vld [vmem:[%s12645_s6 + $0x158] sm:$0xff] }
 0x571   : > { %8110 = vrot.lane.b32.xlu1 %v8109_v7, %s8402_s21  ;;  %5626 = vmatprep.mubr.f32.mxu0 %v5275_v35  ;;  %v7354_v2 = vpack.c.bf16 %v5410_v61, %v5409_v51  ;;  %v7357_v7 = vpack.c.bf16 %v5412_v9, %v5411_v32  ;;  %v11706_v35 = vld [vmem:[#allocation3 + $0x87] sm:$0xff]  ;;  %v4512_v51 = vld [vmem:[#allocation3 + $0x91] sm:$0xff] }
 0x572   : > { %v7961_v15 = vpop.permute.xlu1 %7960  ;;  %7350 = vmatprep.subr.bf16.mxu0 %v12767_v21  ;;  %v11727_v61 = vld [vmem:[#allocation3 + $0x8f] sm:$0xff] }
 0x573   : > { %v7963_v34 = vunpack.i.h.bf16 %v7961_v15  ;;  %v7962_v40 = vunpack.i.l.bf16 %v7961_v15  ;;  %5627 = vmatmul.mubr.f32.gmra.mrb[72].mxu0 %v5243_v62  ;;  %8125 = vrot.lane.b32.xlu0 %v8124_v39, %s8402_s21  ;;  %v12808_v39 = vpack.i.bf16 %v11376_v45, %v11393_v10  ;;  %v5420_v45 = vld [vmem:[%s12645_s6 + $0x1a8] sm:$0xff]  ;;  %v12811_v32 = vld [vmem:[#allocation38_spill] sm:$0xff] }
 0x574   : > { %7352 = vmatpush1.bf16.msra.mxu0 %v7351_v20  ;;  %v12812_v9 = vpack.i.bf16 %v12811_v32, %v11419_v27  ;;  %v5422_v27 = vld [vmem:[%s12645_s6 + $0x1b8] sm:$0xff] }
 0x575   : > { %8120 = vrot.lane.b32.xlu1 %v8119_v5, %s8402_s21  ;;  %v5276_v24 = vsel %vm511_vm10, %v11224_v53, %v7962_v40  ;;  %v5244_v47 = vsel %vm511_vm10, %v11226_v19, %v7963_v34  ;;  %v7966_v54 = vpop.permute.xlu0 %7965  ;;  %7353 = vmatprep.subr.bf16.mxu0 %v12767_v21  ;;  %v12801_v53 = vpack.i.bf16 %v11276_v37, %v11305_v56  ;;  %v5413_v37 = vld [vmem:[%s12645_s6 + $0x170] sm:$0xff] }
 0x576   : > { %5631 = vmatprep.mubr.f32.mxu0 %v5276_v24  ;;  %v7968_v4 = vunpack.i.h.bf16 %v7966_v54  ;;  %v7967_v33 = vunpack.i.l.bf16 %v7966_v54  ;;  %v12802_v19 = vpack.i.bf16 %v11296_v17, %v11315_v23  ;;  %v5414_v17 = vld [vmem:[%s12645_s6 + $0x178] sm:$0xff] }
 0x577   : > { %5632 = vmatmul.mubr.f32.gmra.mrb[74].mxu0 %v5244_v47  ;;  %v7360_v26 = vpack.c.bf16 %v5414_v17, %v5413_v37  ;;  %v12813_v37 = vld [vmem:[#allocation37_spill] sm:$0xff] }
 0x578   : > { %8135 = vrot.lane.b32.xlu0 %v12802_v19, %s8402_s21  ;;  %v5277_v42 = vsel %vm511_vm10, %v11249_v63, %v7967_v33  ;;  %v5245_v46 = vsel %vm511_vm10, %v11239_v55, %v7968_v4  ;;  %7355 = vmatpush1.bf16.msra.mxu0 %v7354_v2  ;;  %v12803_v55 = vpack.i.bf16 %v11298_v6, %v11333_v16  ;;  %v5415_v6 = vld [vmem:[%s12645_s6 + $0x180] sm:$0xff]  ;;  %v4513_v4 = vld [vmem:[#allocation3 + $0xa9] sm:$0xff] }
 0x579   : > { %8130 = vrot.lane.b32.xlu1 %v12801_v53, %s8402_s21  ;;  %5636 = vmatprep.mubr.f32.mxu0 %v5277_v42  ;;  %v12804_v63 = vpack.i.bf16 %v11324_v14, %v11341_v60  ;;  %v5416_v14 = vld [vmem:[%s12645_s6 + $0x188] sm:$0xff]  ;;  %v12809_v2 = vld [vmem:[#allocation36_spill] sm:$0xff]  ;;  %v12814_v17 = vpack.i.bf16 %v12813_v37, %v11437_v8  ;;  %v5429_v37 = vld [vmem:[%s12645_s6 + $0x1f0] sm:$0xff] }
 0x57a   : > { %v7971_v1 = vpop.permute.xlu1 %7970  ;;  %7356 = vmatprep.subr.bf16.mxu0 %v12767_v21  ;;  %v7363_v15 = vpack.c.bf16 %v5416_v14, %v5415_v6  ;;  %v12810_v54 = vpack.i.bf16 %v12809_v2, %v11411_v12  ;;  %v11747_v33 = vld [vmem:[#allocation3 + $0xa7] sm:$0xff]  ;;  %v5421_v12 = vld [vmem:[%s12645_s6 + $0x1b0] sm:$0xff] }
 0x57b   : > { %v7973_v56 = vunpack.i.h.bf16 %v7971_v1  ;;  %v7972_v23 = vunpack.i.l.bf16 %v7971_v1  ;;  %5637 = vmatmul.mubr.f32.gmra.mrb[76].mxu0 %v5245_v46  ;;  %v5423_v8 = vld [vmem:[%s12645_s6 + $0x1c0] sm:$0xff] }
 0x57c   : > { %8145 = vrot.lane.b32.xlu0 %v12804_v63, %s8402_s21  ;;  %7358 = vmatpush1.bf16.msra.mxu0 %v7357_v7  ;;  %v11767_v63 = vld [vmem:[#allocation3 + $0xaf] sm:$0xff] }
 0x57d   : > { %8140 = vrot.lane.b32.xlu1 %v12803_v55, %s8402_s21  ;;  %v5278_v44 = vsel %vm511_vm10, %v11251_v18, %v7972_v23  ;;  %v5246_v30 = vsel %vm511_vm10, %v11253_v28, %v7973_v56  ;;  %v7976_v57 = vpop.permute.xlu0 %7975  ;;  %7359 = vmatprep.subr.bf16.mxu0 %v12767_v21  ;;  %v12805_v18 = vpack.i.bf16 %v11326_v52, %v11359_v22  ;;  %v5417_v52 = vld [vmem:[%s12645_s6 + $0x190] sm:$0xff]  ;;  %v12815_v56 = vld [vmem:[#allocation40_spill] sm:$0xff] }
 0x57e   : > { %5641 = vmatprep.mubr.f32.mxu0 %v5278_v44  ;;  %v7978_v16 = vunpack.i.h.bf16 %v7976_v57  ;;  %v7977_v60 = vunpack.i.l.bf16 %v7976_v57  ;;  %v12806_v28 = vpack.i.bf16 %v11350_v58, %v11367_v3  ;;  %v5418_v58 = vld [vmem:[%s12645_s6 + $0x198] sm:$0xff]  ;;  %v12816_v23 = vpack.i.bf16 %v12815_v56, %v11445_v49  ;;  %v5424_v49 = vld [vmem:[%s12645_s6 + $0x1c8] sm:$0xff] }
 0x57f   : > { %5642 = vmatmul.mubr.f32.gmra.mrb[78].mxu0 %v5246_v30  ;;  %v7366_v24 = vpack.c.bf16 %v5418_v58, %v5417_v52  ;;  %v4514_v55 = vld [vmem:[#allocation3 + $0xb1] sm:$0xff]  ;;  %v7375_v52 = vpack.c.bf16 %v5424_v49, %v5423_v8 }
 0x580   : > { %8155 = vrot.lane.b32.xlu0 %v12806_v28, %s8402_s21  ;;  %v5279_v62 = vsel %vm511_vm10, %v11274_v59, %v7977_v60  ;;  %v5247_v20 = vsel %vm511_vm10, %v11706_v35, %v7978_v16  ;;  %7361 = vmatpush1.bf16.msra.mxu0 %v7360_v26  ;;  %v12807_v59 = vpack.i.bf16 %v11352_v31, %v11385_v0  ;;  %v5419_v31 = vld [vmem:[%s12645_s6 + $0x1a0] sm:$0xff]  ;;  %v12817_v16 = vld [vmem:[#allocation39_spill] sm:$0xff] }
 0x581   : > { %8150 = vrot.lane.b32.xlu1 %v12805_v18, %s8402_s21  ;;  %5646 = vmatprep.mubr.f32.mxu0 %v5279_v62  ;;  %v7369_v42 = vpack.c.bf16 %v5420_v45, %v5419_v31  ;;  %v7372_v26 = vpack.c.bf16 %v5422_v27, %v5421_v12  ;;  %v12818_v60 = vpack.i.bf16 %v12817_v16, %v11463_v43  ;;  %v12819_v18 = vld [vmem:[#allocation42_spill] sm:$0xff]  ;;  %v12828_v12 = vld [vmem:[#allocation43_spill] sm:$0xff] }
 0x582   : > { %v7981_v5 = vpop.permute.xlu1 %7980  ;;  %7362 = vmatprep.subr.bf16.mxu0 %v12767_v21  ;;  %v12820_v28 = vpack.i.bf16 %v12819_v18, %v11471_v48  ;;  %v4515_v62 = vld [vmem:[#allocation3 + $0xc9] sm:$0xff]  ;;  %v5426_v48 = vld [vmem:[%s12645_s6 + $0x1d8] sm:$0xff] }
 0x583   : > { %v7983_v22 = vunpack.i.h.bf16 %v7981_v5  ;;  %v7982_v3 = vunpack.i.l.bf16 %v7981_v5  ;;  %5647 = vmatmul.mubr.f32.gmra.mrb[80].mxu0 %v5247_v20  ;;  %v11787_v20 = vld [vmem:[#allocation3 + $0xc7] sm:$0xff]  ;;  %v5425_v43 = vld [vmem:[%s12645_s6 + $0x1d0] sm:$0xff] }
 0x584   : > { %8165 = vrot.lane.b32.xlu0 %v12808_v39, %s8402_s21  ;;  %7364 = vmatpush1.bf16.msra.mxu0 %v7363_v15  ;;  %v7378_v31 = vpack.c.bf16 %v5426_v48, %v5425_v43  ;;  %v12832_v16 = vld [vmem:[#allocation50_spill] sm:$0xff]  ;;  %v12833_v43 = vld [vmem:[#allocation49_spill] sm:$0xff] }
 0x585   : > { %8160 = vrot.lane.b32.xlu1 %v12807_v59, %s8402_s21  ;;  %v5280_v34 = vsel %vm511_vm10, %v4512_v51, %v7982_v3  ;;  %v5248_v40 = vsel %vm511_vm10, %v11727_v61, %v7983_v22  ;;  %v7986_v47 = vpop.permute.xlu0 %7985  ;;  %7365 = vmatprep.subr.bf16.mxu0 %v12767_v21  ;;  %v12821_v59 = vld [vmem:[#allocation41_spill] sm:$0xff]  ;;  %v12823_v51 = vpack.i.bf16 %v11480_v38, %v11497_v41  ;;  %v5427_v38 = vld [vmem:[%s12645_s6 + $0x1e0] sm:$0xff] }
 0x586   : > { %5651 = vmatprep.mubr.f32.mxu0 %v5280_v34  ;;  %v7988_v0 = vunpack.i.h.bf16 %v7986_v47  ;;  %v7987_v10 = vunpack.i.l.bf16 %v7986_v47  ;;  %v12822_v39 = vpack.i.bf16 %v12821_v59, %v11489_v50  ;;  %v4516_v34 = vld [vmem:[#allocation3 + $0xd1] sm:$0xff]  ;;  %v12824_v50 = vld [vmem:[#allocation44_spill] sm:$0xff]  ;;  %v5428_v41 = vld [vmem:[%s12645_s6 + $0x1e8] sm:$0xff] }
 0x587   : > { %5652 = vmatmul.mubr.f32.gmra.mrb[82].mxu0 %v5248_v40  ;;  %v11807_v40 = vld [vmem:[#allocation3 + $0xcf] sm:$0xff] }
 0x588   : > { %8175 = vrot.lane.b32.xlu0 %v12812_v9, %s8402_s21  ;;  %v5281_v53 = vsel %vm511_vm10, %v4513_v4, %v7987_v10  ;;  %v5249_v19 = vsel %vm511_vm10, %v11747_v33, %v7988_v0  ;;  %7367 = vmatpush1.bf16.msra.mxu0 %v7366_v24  ;;  %v8214_v0 = vpack.i.bf16 %v12824_v50, %v11541_v25  ;;  %v4517_v25 = vld [vmem:[#allocation3 + $0xe9] sm:$0xff] }
 0x589   : > { %8170 = vrot.lane.b32.xlu1 %v12810_v54, %s8402_s21  ;;  %5656 = vmatprep.mubr.f32.mxu0 %v5281_v53  ;;  %v12825_v54 = vld [vmem:[#allocation46_spill] sm:$0xff]  ;;  %v11826_v9 = vld [vmem:[#allocation3 + $0xe7] sm:$0xff] }
 0x58a   : > { %v7991_v46 = vpop.permute.xlu1 %7990  ;;  %7368 = vmatprep.subr.bf16.mxu0 %v12767_v21  ;;  %v12826_v32 = vpack.i.bf16 %v11482_v36, %v12825_v54  ;;  %v12830_v36 = vld [vmem:[#allocation45_spill] sm:$0xff] }
 0x58b   : > { %v7993_v7 = vunpack.i.h.bf16 %v7991_v46  ;;  %v7992_v1 = vunpack.i.l.bf16 %v7991_v46  ;;  %5657 = vmatmul.mubr.f32.gmra.mrb[84].mxu0 %v5249_v19  ;;  %v7381_v19 = vpack.c.bf16 %v5428_v41, %v5427_v38  ;;  %v12827_v46 = vld [vmem:[#allocation47_spill] sm:$0xff]  ;;  %v11877_v38 = vld [vmem:[#allocation3 + $0x127] sm:$0xff] }
 0x58c   : > { %8185 = vrot.lane.b32.xlu0 %v12816_v23, %s8402_s21  ;;  %7370 = vmatpush1.bf16.msra.mxu0 %v7369_v42  ;;  %v8219_v27 = vpack.i.bf16 %v12828_v12, %v12827_v46  ;;  %v4523_v12 = vld [vmem:[#allocation3 + $0x149] sm:$0xff] }
 0x58d   : > { %8180 = vrot.lane.b32.xlu1 %v12814_v17, %s8402_s21  ;;  %v5282_v44 = vsel %vm511_vm10, %v4514_v55, %v7992_v1  ;;  %v5250_v30 = vsel %vm511_vm10, %v11767_v63, %v7993_v7  ;;  %v7996_v57 = vpop.permute.xlu0 %7995  ;;  %7371 = vmatprep.subr.bf16.mxu0 %v12767_v21  ;;  %v12829_v7 = vld [vmem:[#allocation52_spill] sm:$0xff]  ;;  %v5430_v17 = vld [vmem:[%s12645_s6 + $0x1f8] sm:$0xff]  ;;  %v11842_v55 = vld [vmem:[#allocation3 + $0x208] sm:$0xff] }
 0x58e   : > { %5661 = vmatprep.mubr.f32.mxu0 %v5282_v44  ;;  %v7998_v6 = vunpack.i.h.bf16 %v7996_v57  ;;  %v7997_v14 = vunpack.i.l.bf16 %v7996_v57  ;;  %v8224_v1 = vpack.i.bf16 %v12830_v36, %v12829_v7  ;;  %v4518_v44 = vld [vmem:[#allocation3 + $0xf1] sm:$0xff]  ;;  %v7384_v8 = vpack.c.bf16 %v5430_v17, %v5429_v37 }
 0x58f   : > { %5662 = vmatmul.mubr.f32.gmra.mrb[86].mxu0 %v5250_v30  ;;  %v11846_v30 = vld [vmem:[#allocation3 + $0xef] sm:$0xff] }
 0x590   : > { %8195 = vrot.lane.b32.xlu0 %v12820_v28, %s8402_s21  ;;  %v5283_v15 = vsel %vm511_vm10, %v4515_v62, %v7997_v14  ;;  %v5251_v5 = vsel %vm511_vm10, %v11787_v20, %v7998_v6  ;;  %7373 = vmatpush1.bf16.msra.mxu0 %v7372_v26  ;;  %v12831_v6 = vld [vmem:[#allocation48_spill] sm:$0xff]  ;;  %v11856_v62 = vld [vmem:[#allocation3 + $0x210] sm:$0xff] }
 0x591   : > { %8190 = vrot.lane.b32.xlu1 %v12818_v60, %s8402_s21  ;;  %5666 = vmatprep.mubr.f32.mxu0 %v5283_v15  ;;  %v8229_v14 = vpack.i.bf16 %v12831_v6, %v11578_v13  ;;  %v8234_v60 = vpack.i.bf16 %v12832_v16, %v11842_v55  ;;  %v4693_v15 = vld [vmem:[#allocation3 + $0x228] sm:$0xff]  ;;  %v8239_v48 = vpack.i.bf16 %v12833_v43, %v11856_v62 }
 0x592   : > { %v8001_v58 = vpop.permute.xlu1 %8000  ;;  %7374 = vmatprep.subr.bf16.mxu0 %v12767_v21 }
 0x593   : > { %v8003_v22 = vunpack.i.h.bf16 %v8001_v58  ;;  %v8002_v3 = vunpack.i.l.bf16 %v8001_v58  ;;  %5667 = vmatmul.mubr.f32.gmra.mrb[88].mxu0 %v5251_v5  ;;  %v4519_v5 = vld [vmem:[#allocation3 + $0x109] sm:$0xff] }
 0x594   : > { %8205 = vrot.lane.b32.xlu0 %v12823_v51, %s8402_s21  ;;  %7376 = vmatpush1.bf16.msra.mxu0 %v7375_v52  ;;  %v11860_v52 = vld [vmem:[#allocation3 + $0x107] sm:$0xff]  ;;  %v4520_v51 = vld [vmem:[#allocation3 + $0x111] sm:$0xff] }
 0x595   : > { %8200 = vrot.lane.b32.xlu1 %v12822_v39, %s8402_s21  ;;  %v5284_v24 = vsel %vm511_vm10, %v4516_v34, %v8002_v3  ;;  %v5252_v47 = vsel %vm511_vm10, %v11807_v40, %v8003_v22  ;;  %v8006_v45 = vpop.permute.xlu0 %8005  ;;  %7377 = vmatprep.subr.bf16.mxu0 %v12767_v21  ;;  %v8244_v22 = vpack.i.bf16 %v11581_v29, %v4693_v15  ;;  %v4694_v39 = vld [vmem:[#allocation3 + $0x230] sm:$0xff] }
 0x596   : > { %5671 = vmatprep.mubr.f32.mxu0 %v5284_v24  ;;  %v8008_v10 = vunpack.i.h.bf16 %v8006_v45  ;;  %v8007_v2 = vunpack.i.l.bf16 %v8006_v45  ;;  %v11870_v34 = vld [vmem:[#allocation3 + $0x10f] sm:$0xff]  ;;  %v8249_v29 = vpack.i.bf16 %v11584_v11, %v4694_v39 }
 0x597   : > { %5672 = vmatmul.mubr.f32.gmra.mrb[90].mxu0 %v5252_v47  ;;  %v11882_v11 = vld [vmem:[#allocation3 + $0x12f] sm:$0xff] }
 0x598   : > { %8215 = vrot.lane.b32.xlu0 %v8214_v0, %s8402_s21  ;;  %v5285_v4 = vsel %vm511_vm10, %v4517_v25, %v8007_v2  ;;  %v5253_v53 = vsel %vm511_vm10, %v11826_v9, %v8008_v10  ;;  %7379 = vmatpush1.bf16.msra.mxu0 %v7378_v31  ;;  %v4521_v0 = vld [vmem:[#allocation3 + $0x129] sm:$0xff]  ;;  %v4522_v25 = vld [vmem:[#allocation3 + $0x131] sm:$0xff] }
 0x599   : > { %8210 = vrot.lane.b32.xlu1 %v12826_v32, %s8402_s21  ;;  %5676 = vmatprep.mubr.f32.mxu0 %v5285_v4  ;;  %v4527_v39 = vld [vmem:[#allocation3 + $0x189] sm:$0xff] }
 0x59a   : > { %v8011_v42 = vpop.permute.xlu1 %8010  ;;  %7380 = vmatprep.subr.bf16.mxu0 %v12767_v21 }
 0x59b   : > { %v8013_v56 = vunpack.i.h.bf16 %v8011_v42  ;;  %v8012_v23 = vunpack.i.l.bf16 %v8011_v42  ;;  %5677 = vmatmul.mubr.f32.gmra.mrb[92].mxu0 %v5253_v53 }
 0x59c   : > { %8225 = vrot.lane.b32.xlu0 %v8224_v1, %s8402_s21  ;;  %7382 = vmatpush1.bf16.msra.mxu0 %v7381_v19 }
 0x59d   : > { %8220 = vrot.lane.b32.xlu1 %v8219_v27, %s8402_s21  ;;  %v5286_v26 = vsel %vm511_vm10, %v4518_v44, %v8012_v23  ;;  %v5254_v57 = vsel %vm511_vm10, %v11846_v30, %v8013_v56  ;;  %v8016_v49 = vpop.permute.xlu0 %8015  ;;  %7383 = vmatprep.subr.bf16.mxu0 %v12767_v21  ;;  %v11887_v27 = vld [vmem:[#allocation3 + $0x147] sm:$0xff]  ;;  %v4524_v23 = vld [vmem:[#allocation3 + $0x151] sm:$0xff] }
 0x59e   : > { %5681 = vmatprep.mubr.f32.mxu0 %v5286_v26  ;;  %v8018_v18 = vunpack.i.h.bf16 %v8016_v49  ;;  %v8017_v28 = vunpack.i.l.bf16 %v8016_v49  ;;  %v11892_v44 = vld [vmem:[#allocation3 + $0x14f] sm:$0xff] }
 0x59f   : > { %5682 = vmatmul.mubr.f32.gmra.mrb[94].mxu0 %v5254_v57 }
 0x5a0   : > { %8235 = vrot.lane.b32.xlu0 %v8234_v60, %s8402_s21  ;;  %v5287_v13 = vsel %vm511_vm10, %v4519_v5, %v8017_v28  ;;  %v5255_v58 = vsel %vm511_vm10, %v11860_v52, %v8018_v18  ;;  %7385 = vmatpush1.bf16.msra.mxu0 %v7384_v8  ;;  %v11897_v60 = vld [vmem:[#allocation3 + $0x167] sm:$0xff] }
 0x5a1   : > { %8230 = vrot.lane.b32.xlu1 %v8229_v14, %s8402_s21  ;;  %5686 = vmatprep.mubr.f32.mxu0 %v5287_v13  ;;  %v4525_v14 = vld [vmem:[#allocation3 + $0x169] sm:$0xff] }
 0x5a2   : > { %v8021_v21 = vpop.permute.xlu1 %8020 }
 0x5a3   : > { %v8023_v3 = vunpack.i.h.bf16 %v8021_v21  ;;  %v8022_v59 = vunpack.i.l.bf16 %v8021_v21  ;;  %5687 = vmatmul.mubr.f32.gmra.mrb[96].mxu0 %v5255_v58  ;;  %v4526_v58 = vld [vmem:[#allocation3 + $0x171] sm:$0xff] }
 0x5a4   : > { %8245 = vrot.lane.b32.xlu0 %v8244_v22, %s8402_s21  ;;  %v11902_v21 = vld [vmem:[#allocation3 + $0x16f] sm:$0xff] }
 0x5a5   : > { %8240 = vrot.lane.b32.xlu1 %v8239_v48, %s8402_s21  ;;  %v5288_v24 = vsel %vm511_vm10, %v4520_v51, %v8022_v59  ;;  %v5256_v47 = vsel %vm511_vm10, %v11870_v34, %v8023_v3  ;;  %v8026_v31 = vpop.permute.xlu0 %8025  ;;  %v11907_v51 = vld [vmem:[#allocation3 + $0x187] sm:$0xff] }
 0x5a6   : > { %5691 = vmatprep.mubr.f32.mxu0 %v5288_v24  ;;  %v8028_v45 = vunpack.i.h.bf16 %v8026_v31  ;;  %v8027_v50 = vunpack.i.l.bf16 %v8026_v31 }
 0x5a7   : > { %5692 = vmatmul.mubr.f32.gmra.mrb[98].mxu0 %v5256_v47 }
 0x5a8   : > { %v5289_v41 = vsel %vm511_vm10, %v4521_v0, %v8027_v50  ;;  %v5257_v10 = vsel %vm511_vm10, %v11877_v38, %v8028_v45  ;;  %v4528_v50 = vld [vmem:[#allocation3 + $0x191] sm:$0xff] }
 0x5a9   : > { %8250 = vrot.lane.b32.xlu1 %v8249_v29, %s8402_s21  ;;  %5696 = vmatprep.mubr.f32.mxu0 %v5289_v41  ;;  %v11912_v0 = vld [vmem:[#allocation3 + $0x18f] sm:$0xff] }
 0x5ab   : > { %v8031_v2 = vpop.permute.xlu1 %8030  ;;  %5697 = vmatmul.mubr.f32.gmra.mrb[100].mxu0 %v5257_v10 }
 0x5ac   : > { %v8033_v54 = vunpack.i.h.bf16 %v8031_v2  ;;  %v8032_v32 = vunpack.i.l.bf16 %v8031_v2 }
 0x5ad   : > { %v8036_v19 = vpop.permute.xlu0 %8035 }
 0x5ae   : > { %v5290_v4 = vsel %vm511_vm10, %v4522_v25, %v8032_v32  ;;  %v5258_v53 = vsel %vm511_vm10, %v11882_v11, %v8033_v54  ;;  %v8038_v42 = vunpack.i.h.bf16 %v8036_v19  ;;  %v8037_v46 = vunpack.i.l.bf16 %v8036_v19  ;;  %v4529_v25 = vld [vmem:[#allocation3 + $0x1a9] sm:$0xff] }
 0x5af   : > { %5701 = vmatprep.mubr.f32.mxu0 %v5290_v4  ;;  %v11917_v4 = vld [vmem:[#allocation3 + $0x1a7] sm:$0xff] }
 0x5b0   : > { %5702 = vmatmul.mubr.f32.gmra.mrb[102].mxu0 %v5258_v53  ;;  %v5291_v7 = vsel %vm511_vm10, %v4523_v12, %v8037_v46  ;;  %v5259_v1 = vsel %vm511_vm10, %v11887_v27, %v8038_v42 }
 0x5b1   : > { %5706 = vmatprep.mubr.f32.mxu0 %v5291_v7 }
 0x5b2   : > { %v8041_v37 = vpop.permute.xlu1 %8040 }
 0x5b3   : > { %v8043_v17 = vunpack.i.h.bf16 %v8041_v37  ;;  %v8042_v56 = vunpack.i.l.bf16 %v8041_v37  ;;  %v4530_v37 = vld [vmem:[#allocation3 + $0x1b1] sm:$0xff] }
 0x5b4   : > { %5707 = vmatmul.mubr.f32.gmra.mrb[104].mxu0 %v5259_v1 }
 0x5b5   : > { %v5292_v26 = vsel %vm511_vm10, %v4524_v23, %v8042_v56  ;;  %v5260_v57 = vsel %vm511_vm10, %v11892_v44, %v8043_v17  ;;  %v8046_v8 = vpop.permute.xlu0 %8045  ;;  %v11926_v17 = vld [vmem:[#allocation3 + $0x1af] sm:$0xff] }
 0x5b6   : > { %5711 = vmatprep.mubr.f32.mxu0 %v5292_v26  ;;  %v8048_v49 = vunpack.i.h.bf16 %v8046_v8  ;;  %v8047_v6 = vunpack.i.l.bf16 %v8046_v8 }
 0x5b8   : > { %5712 = vmatmul.mubr.f32.gmra.mrb[106].mxu0 %v5260_v57  ;;  %v5293_v18 = vsel %vm511_vm10, %v4525_v14, %v8047_v6  ;;  %v5261_v28 = vsel %vm511_vm10, %v11897_v60, %v8048_v49  ;;  %v11931_v49 = vld [vmem:[#allocation3 + $0x1c7] sm:$0xff] }
 0x5b9   : > { %5716 = vmatprep.mubr.f32.mxu0 %v5293_v18 }
 0x5bb   : > { %v8051_v15 = vpop.permute.xlu1 %8050 }
 0x5bc   : > { %v8053_v5 = vunpack.i.h.bf16 %v8051_v15  ;;  %v8052_v13 = vunpack.i.l.bf16 %v8051_v15  ;;  %5717 = vmatmul.mubr.f32.gmra.mrb[108].mxu0 %v5261_v28 }
 0x5bd   : > { %v8056_v22 = vpop.permute.xlu0 %8055 }
 0x5be   : > { %v5294_v43 = vsel %vm511_vm10, %v4526_v58, %v8052_v13  ;;  %v5262_v48 = vsel %vm511_vm10, %v11902_v21, %v8053_v5  ;;  %v8058_v3 = vunpack.i.h.bf16 %v8056_v22  ;;  %v8057_v59 = vunpack.i.l.bf16 %v8056_v22  ;;  %v4532_v58 = vld [vmem:[#allocation3 + $0x1d1] sm:$0xff] }
 0x5bf   : > { %5721 = vmatprep.mubr.f32.mxu0 %v5294_v43  ;;  %v11941_v43 = vld [vmem:[#allocation3 + $0x1cf] sm:$0xff] }
 0x5c0   : > { %5722 = vmatmul.mubr.f32.gmra.mrb[110].mxu0 %v5262_v48  ;;  %v5295_v24 = vsel %vm511_vm10, %v4527_v39, %v8057_v59  ;;  %v5263_v47 = vsel %vm511_vm10, %v11907_v51, %v8058_v3  ;;  %v11946_v39 = vld [vmem:[#allocation3 + $0x1e7] sm:$0xff] }
 0x5c1   : > { %5726 = vmatprep.mubr.f32.mxu0 %v5295_v24 }
 0x5c2   : > { %v8061_v31 = vpop.permute.xlu1 %8060 }
 0x5c3   : > { %v8063_v29 = vunpack.i.h.bf16 %v8061_v31  ;;  %v8062_v45 = vunpack.i.l.bf16 %v8061_v31 }
 0x5c4   : > { %5727 = vmatmul.mubr.f32.gmra.mrb[112].mxu0 %v5263_v47 }
 0x5c5   : > { %v5296_v41 = vsel %vm511_vm10, %v4528_v50, %v8062_v45  ;;  %v5264_v10 = vsel %vm511_vm10, %v11912_v0, %v8063_v29  ;;  %v8066_v2 = vpop.permute.xlu0 %8065 }
 0x5c6   : > { %5731 = vmatprep.mubr.f32.mxu0 %v5296_v41  ;;  %v8068_v54 = vunpack.i.h.bf16 %v8066_v2  ;;  %v8067_v32 = vunpack.i.l.bf16 %v8066_v2  ;;  %v4725_v2 = vld [vmem:[#allocation3 + $0x229] sm:$0xff] }
 0x5c7   : > { %7167 = vmatprep.mubr.msk.f32.mxu1 %vm511_vm10, %v4725_v2  ;;  %v4634_v2 = vld [vmem:[#allocation3 + $0x6f] sm:$0xff] }
 0x5c8   : > { %5732 = vmatmul.mubr.f32.gmra.mrb[114].mxu0 %v5264_v10  ;;  %v5297_v53 = vsel %vm511_vm10, %v4529_v25, %v8067_v32  ;;  %v5265_v19 = vsel %vm511_vm10, %v11917_v4, %v8068_v54  ;;  %v4534_v32 = vld [vmem:[#allocation3 + $0x1f1] sm:$0xff] }
 0x5c9   : > { %v11922_v42 = vpop.f32.mrb[64].mxu1  ;;  %5736 = vmatprep.mubr.f32.mxu0 %v5297_v53  ;;  %v11956_v25 = vld [vmem:[#allocation3 + $0x1ef] sm:$0xff] }
 0x5ca   : > { %v11924_v1 = vpop.f32.mrb[65].mxu1 }
 0x5cb   : > { %v8071_v46 = vpop.permute.xlu1 %8070 }
 0x5cc   : > { %v8073_v12 = vunpack.i.h.bf16 %v8071_v46  ;;  %v8072_v7 = vunpack.i.l.bf16 %v8071_v46  ;;  %5737 = vmatmul.mubr.f32.gmra.mrb[116].mxu0 %v5265_v19 }
 0x5cd   : > { %v8076_v26 = vpop.permute.xlu0 %8075 }
 0x5ce   : > { %v5298_v56 = vsel %vm511_vm10, %v4530_v37, %v8072_v7  ;;  %v5266_v23 = vsel %vm511_vm10, %v11926_v17, %v8073_v12  ;;  %v8078_v57 = vunpack.i.h.bf16 %v8076_v26  ;;  %v8077_v8 = vunpack.i.l.bf16 %v8076_v26  ;;  %v4631_v7 = vld [vmem:[#allocation3 + $0x47] sm:$0xff] }
 0x5cf   : > { %5741 = vmatprep.mubr.f32.mxu0 %v5298_v56  ;;  %v4567_v26 = vld [vmem:[#allocation3 + $0x28] sm:$0xff] }
 0x5d0   : > { %5742 = vmatmul.mubr.f32.gmra.mrb[118].mxu0 %v5266_v23  ;;  %v5299_v6 = vsel %vm511_vm10, %v12830_v36, %v8077_v8  ;;  %v5267_v14 = vsel %vm511_vm10, %v11931_v49, %v8078_v57 }
 0x5d1   : > { %v11937_v18 = vpop.f32.mrb[66].mxu1  ;;  %5746 = vmatprep.mubr.f32.mxu0 %v5299_v6 }
 0x5d2   : > { %v8081_v28 = vpop.permute.xlu1 %8080  ;;  %v11939_v13 = vpop.f32.mrb[67].mxu1 }
 0x5d3   : > { %v8083_v15 = vunpack.i.h.bf16 %v8081_v28  ;;  %v8082_v5 = vunpack.i.l.bf16 %v8081_v28 }
 0x5d4   : > { %5747 = vmatmul.mubr.f32.gmra.mrb[120].mxu0 %v5267_v14  ;;  %v4632_v14 = vld [vmem:[#allocation3 + $0x4f] sm:$0xff] }
 0x5d5   : > { %v5300_v48 = vsel %vm511_vm10, %v4532_v58, %v8082_v5  ;;  %v5268_v36 = vsel %vm511_vm10, %v11941_v43, %v8083_v15  ;;  %v8086_v22 = vpop.permute.xlu0 %8085 }
 0x5d6   : > { %5751 = vmatprep.mubr.f32.mxu0 %v5300_v48  ;;  %v8088_v3 = vunpack.i.h.bf16 %v8086_v22  ;;  %v8087_v59 = vunpack.i.l.bf16 %v8086_v22  ;;  %v4568_v48 = vld [vmem:[#allocation3 + $0x30] sm:$0xff] }
 0x5d8   : > { %5752 = vmatmul.mubr.f32.gmra.mrb[122].mxu0 %v5268_v36  ;;  %v5301_v24 = vsel %vm511_vm10, %v12832_v16, %v8087_v59  ;;  %v5269_v47 = vsel %vm511_vm10, %v11946_v39, %v8088_v3  ;;  %v4726_v16 = vld [vmem:[#allocation3 + $0x231] sm:$0xff]  ;;  %v4633_v3 = vld [vmem:[#allocation3 + $0x67] sm:$0xff] }
 0x5d9   : > { %v11952_v31 = vpop.f32.mrb[68].mxu1  ;;  %5756 = vmatprep.mubr.f32.mxu0 %v5301_v24  ;;  %v8096_v41 = vpop.permute.xlu0 %8095  ;;  %7168 = vmatmul.mubr.msk.f32.gmra.mrb[94].mxu1 %vm511_vm10, %v4726_v16 }
 0x5da   : > { %v11954_v10 = vpop.f32.mrb[69].mxu1  ;;  %v8097_v54 = vunpack.i.l.bf16 %v8096_v41  ;;  %v8098_v46 = vunpack.i.h.bf16 %v8096_v41 }
 0x5db   : > { %v8091_v29 = vpop.permute.xlu1 %8090 }
 0x5dc   : > { %v8093_v45 = vunpack.i.h.bf16 %v8091_v29  ;;  %v8092_v50 = vunpack.i.l.bf16 %v8091_v29  ;;  %5757 = vmatmul.mubr.f32.gmra.mrb[124].mxu0 %v5269_v47  ;;  %v5335_v56 = vsel %vm511_vm10, %v4631_v7, %v8097_v54  ;;  %v5303_v6 = vsel %vm511_vm10, %v4567_v26, %v8098_v46  ;;  %v4569_v29 = vld [vmem:[#allocation3 + $0x48] sm:$0xff] }
 0x5dd   : > { %v8106_v23 = vpop.permute.xlu0 %8105 }
 0x5de   : > { %v5302_v53 = vsel %vm511_vm10, %v4534_v32, %v8092_v50  ;;  %v5270_v19 = vsel %vm511_vm10, %v11956_v25, %v8093_v45  ;;  %v8107_v28 = vunpack.i.l.bf16 %v8106_v23  ;;  %v8108_v36 = vunpack.i.h.bf16 %v8106_v23  ;;  %v4571_v23 = vld [vmem:[#allocation3 + $0x68] sm:$0xff] }
 0x5df   : > { %v8101_v12 = vpop.permute.xlu1 %8100  ;;  %5761 = vmatprep.mubr.f32.mxu0 %v5302_v53 }
 0x5e0   : > { %v8102_v37 = vunpack.i.l.bf16 %v8101_v12  ;;  %5762 = vmatmul.mubr.f32.gmra.mrb[126].mxu0 %v5270_v19  ;;  %v8103_v57 = vunpack.i.h.bf16 %v8101_v12  ;;  %v5337_v24 = vsel %vm511_vm10, %v4633_v3, %v8107_v28  ;;  %v5305_v41 = vsel %vm511_vm10, %v4569_v29, %v8108_v36  ;;  %v4570_v19 = vld [vmem:[#allocation3 + $0x50] sm:$0xff] }
 0x5e1   : > { %5831 = vmatprep.mubr.f32.mxu0 %v5335_v56  ;;  %v11964_v8 = vpop.f32.mrb[70].mxu1  ;;  %v8116_v47 = vpop.permute.xlu0 %8115 }
 0x5e2   : > { %v11967_v15 = vpop.f32.mrb[71].mxu1  ;;  %v5336_v5 = vsel %vm511_vm10, %v4632_v14, %v8102_v37  ;;  %v5304_v22 = vsel %vm511_vm10, %v4568_v48, %v8103_v57  ;;  %v8117_v54 = vunpack.i.l.bf16 %v8116_v47  ;;  %v8118_v46 = vunpack.i.h.bf16 %v8116_v47  ;;  %v4572_v48 = vld [vmem:[#allocation3 + $0x70] sm:$0xff] }
 0x5e3   : > { %v8111_v58 = vpop.permute.xlu1 %8110 }
 0x5e4   : > { %5832 = vmatmul.mubr.f32.vlgmr.msra.gmra.mrb[64].mxu0 %v5303_v6  ;;  %v8112_v59 = vunpack.i.l.bf16 %v8111_v58  ;;  %v8113_v45 = vunpack.i.h.bf16 %v8111_v58  ;;  %v5339_v37 = vsel %vm511_vm10, %v11706_v35, %v8117_v54  ;;  %v5307_v6 = vsel %vm511_vm10, %v4571_v23, %v8118_v46 }
 0x5e5   : > { %5836 = vmatprep.mubr.f32.mxu0 %v5336_v5  ;;  %v8126_v56 = vpop.permute.xlu0 %8125 }
 0x5e6   : > { %v5338_v16 = vsel %vm511_vm10, %v4634_v2, %v8112_v59  ;;  %v5306_v12 = vsel %vm511_vm10, %v4570_v19, %v8113_v45  ;;  %v8127_v14 = vunpack.i.l.bf16 %v8126_v56  ;;  %v8128_v36 = vunpack.i.h.bf16 %v8126_v56 }
 0x5e7   : > { %v8121_v53 = vpop.permute.xlu1 %8120 }
 0x5e8   : > { %5837 = vmatmul.mubr.f32.gmra.mrb[66].mxu0 %v5304_v22  ;;  %v8122_v7 = vunpack.i.l.bf16 %v8121_v53  ;;  %v8123_v26 = vunpack.i.h.bf16 %v8121_v53  ;;  %v5341_v3 = vsel %vm511_vm10, %v11747_v33, %v8127_v14 }
 0x5e9   : > { %5841 = vmatprep.mubr.f32.mxu0 %v5337_v24  ;;  %v11972_v50 = vpop.f32.mrb[72].mxu1  ;;  %v4573_v24 = vld [vmem:[#allocation3 + $0x88] sm:$0xff] }
 0x5ea   : > { %v11975_v32 = vpop.f32.mrb[73].mxu1  ;;  %v5340_v5 = vsel %vm511_vm10, %v11727_v61, %v8122_v7  ;;  %v5308_v35 = vsel %vm511_vm10, %v4572_v48, %v8123_v26  ;;  %v8136_v59 = vpop.permute.xlu0 %8135  ;;  %v5309_v45 = vsel %vm511_vm10, %v4573_v24, %v8128_v36  ;;  %v4575_v7 = vld [vmem:[#allocation3 + $0xa8] sm:$0xff] }
 0x5eb   : > { %v8131_v58 = vpop.permute.xlu1 %8130  ;;  %v8137_v61 = vunpack.i.l.bf16 %v8136_v59  ;;  %v8138_v53 = vunpack.i.h.bf16 %v8136_v59 }
 0x5ec   : > { %5842 = vmatmul.mubr.f32.gmra.mrb[68].mxu0 %v5305_v41  ;;  %v8132_v22 = vunpack.i.l.bf16 %v8131_v58  ;;  %v8133_v47 = vunpack.i.h.bf16 %v8131_v58 }
 0x5ed   : > { %5846 = vmatprep.mubr.f32.mxu0 %v5338_v16  ;;  %v4574_v16 = vld [vmem:[#allocation3 + $0x90] sm:$0xff]  ;;  %v5343_v46 = vsel %vm511_vm10, %v11787_v20, %v8137_v61  ;;  %v5311_v23 = vsel %vm511_vm10, %v4575_v7, %v8138_v53 }
 0x5ee   : > { %v5342_v2 = vsel %vm511_vm10, %v11767_v63, %v8132_v22  ;;  %v5310_v33 = vsel %vm511_vm10, %v4574_v16, %v8133_v47  ;;  %v4577_v22 = vld [vmem:[#allocation3 + $0xc8] sm:$0xff] }
 0x5ef   : > { %v8141_v54 = vpop.permute.xlu1 %8140 }
 0x5f0   : > { %5847 = vmatmul.mubr.f32.gmra.mrb[70].mxu0 %v5306_v12  ;;  %v8142_v19 = vunpack.i.l.bf16 %v8141_v54  ;;  %v8146_v12 = vpop.permute.xlu0 %8145 }
 0x5f1   : > { %5851 = vmatprep.mubr.f32.mxu0 %v5339_v37  ;;  %v11981_v57 = vpop.f32.mrb[74].mxu1  ;;  %v8143_v37 = vunpack.i.h.bf16 %v8141_v54  ;;  %v8147_v63 = vunpack.i.l.bf16 %v8146_v12  ;;  %v8148_v58 = vunpack.i.h.bf16 %v8146_v12 }
 0x5f2   : > { %v11984_v28 = vpop.f32.mrb[75].mxu1 }
 0x5f3   : > { %v8151_v14 = vpop.permute.xlu1 %8150  ;;  %v5345_v36 = vsel %vm511_vm10, %v11826_v9, %v8147_v63  ;;  %v5313_v24 = vsel %vm511_vm10, %v4577_v22, %v8148_v58 }
 0x5f4   : > { %5852 = vmatmul.mubr.f32.gmra.mrb[72].mxu0 %v5307_v6  ;;  %v5344_v6 = vsel %vm511_vm10, %v11807_v40, %v8142_v19  ;;  %v8152_v48 = vunpack.i.l.bf16 %v8151_v14  ;;  %v4579_v19 = vld [vmem:[#allocation3 + $0xe8] sm:$0xff] }
 0x5f5   : > { %5856 = vmatprep.mubr.f32.mxu0 %v5340_v5  ;;  %v4576_v5 = vld [vmem:[#allocation3 + $0xb0] sm:$0xff] }
 0x5f6   : > { %v5312_v20 = vsel %vm511_vm10, %v4576_v5, %v8143_v37 }
 0x5f7   : > { %v8161_v61 = vpop.permute.xlu1 %8160 }
 0x5f8   : > { %5857 = vmatmul.mubr.f32.gmra.mrb[74].mxu0 %v5308_v35  ;;  %v8156_v35 = vpop.permute.xlu0 %8155  ;;  %v8162_v16 = vunpack.i.l.bf16 %v8161_v61 }
 0x5f9   : > { %5861 = vmatprep.mubr.f32.mxu0 %v5341_v3  ;;  %v11991_v29 = vpop.f32.mrb[76].mxu1  ;;  %v8153_v3 = vunpack.i.h.bf16 %v8151_v14  ;;  %v8157_v40 = vunpack.i.l.bf16 %v8156_v35  ;;  %v8158_v54 = vunpack.i.h.bf16 %v8156_v35 }
 0x5fa   : > { %v11994_v41 = vpop.f32.mrb[77].mxu1 }
 0x5fb   : > { %v5347_v53 = vsel %vm511_vm10, %v11860_v52, %v8157_v40  ;;  %v5315_v7 = vsel %vm511_vm10, %v4579_v19, %v8158_v54  ;;  %v8171_v63 = vpop.permute.xlu1 %8170 }
 0x5fc   : > { %5862 = vmatmul.mubr.f32.gmra.mrb[76].mxu0 %v5309_v45  ;;  %v5346_v45 = vsel %vm511_vm10, %v11846_v30, %v8152_v48  ;;  %v8172_v5 = vunpack.i.l.bf16 %v8171_v63  ;;  %v4581_v48 = vld [vmem:[#allocation3 + $0x108] sm:$0xff] }
 0x5fd   : > { %5866 = vmatprep.mubr.f32.mxu0 %v5342_v2  ;;  %v4578_v2 = vld [vmem:[#allocation3 + $0xd0] sm:$0xff] }
 0x5fe   : > { %v5314_v9 = vsel %vm511_vm10, %v4578_v2, %v8153_v3 }
 0x5ff   : > { %v8181_v40 = vpop.permute.xlu1 %8180 }
 0x600   : > { %5867 = vmatmul.mubr.f32.gmra.mrb[78].mxu0 %v5310_v33  ;;  %v8166_v33 = vpop.permute.xlu0 %8165  ;;  %v8182_v2 = vunpack.i.l.bf16 %v8181_v40 }
 0x601   : > { %5871 = vmatprep.mubr.f32.mxu0 %v5343_v46  ;;  %v12001_v56 = vpop.f32.mrb[78].mxu1  ;;  %v8163_v46 = vunpack.i.h.bf16 %v8161_v61  ;;  %v8167_v30 = vunpack.i.l.bf16 %v8166_v33  ;;  %v8168_v14 = vunpack.i.h.bf16 %v8166_v33 }
 0x602   : > { %v12004_v26 = vpop.f32.mrb[79].mxu1 }
 0x603   : > { %v5349_v58 = vsel %vm511_vm10, %v11877_v38, %v8167_v30  ;;  %v5317_v22 = vsel %vm511_vm10, %v4581_v48, %v8168_v14  ;;  %v8191_v30 = vpop.permute.xlu1 %8190 }
 0x604   : > { %5872 = vmatmul.mubr.f32.gmra.mrb[80].mxu0 %v5311_v23  ;;  %v5348_v23 = vsel %vm511_vm10, %v11870_v34, %v8162_v16  ;;  %v4583_v16 = vld [vmem:[#allocation3 + $0x128] sm:$0xff] }
 0x605   : > { %5876 = vmatprep.mubr.f32.mxu0 %v5344_v6  ;;  %v4580_v6 = vld [vmem:[#allocation3 + $0xf0] sm:$0xff] }
 0x606   : > { %v5316_v52 = vsel %vm511_vm10, %v4580_v6, %v8163_v46  ;;  %v8192_v6 = vunpack.i.l.bf16 %v8191_v30 }
 0x608   : > { %5877 = vmatmul.mubr.f32.gmra.mrb[82].mxu0 %v5312_v20  ;;  %v8176_v20 = vpop.permute.xlu0 %8175 }
 0x609   : > { %5881 = vmatprep.mubr.f32.mxu0 %v5345_v36  ;;  %v8173_v36 = vunpack.i.h.bf16 %v8171_v63  ;;  %v8177_v34 = vunpack.i.l.bf16 %v8176_v20  ;;  %v8178_v61 = vunpack.i.h.bf16 %v8176_v20 }
 0x60a   : > { %v12011_v59 = vpop.f32.mrb[80].mxu1 }
 0x60b   : > { %v12014_v47 = vpop.f32.mrb[81].mxu1  ;;  %v5351_v54 = vsel %vm511_vm10, %v11887_v27, %v8177_v34  ;;  %v5319_v19 = vsel %vm511_vm10, %v4583_v16, %v8178_v61  ;;  %v8201_v34 = vpop.permute.xlu1 %8200 }
 0x60c   : > { %5882 = vmatmul.mubr.f32.gmra.mrb[84].mxu0 %v5313_v24  ;;  %v5350_v24 = vsel %vm511_vm10, %v11882_v11, %v8172_v5  ;;  %v4585_v5 = vld [vmem:[#allocation3 + $0x148] sm:$0xff] }
 0x60d   : > { %5886 = vmatprep.mubr.f32.mxu0 %v5346_v45  ;;  %v4582_v45 = vld [vmem:[#allocation3 + $0x110] sm:$0xff] }
 0x60e   : > { %v5318_v38 = vsel %vm511_vm10, %v4582_v45, %v8173_v36  ;;  %v8202_v45 = vunpack.i.l.bf16 %v8201_v34 }
 0x610   : > { %5887 = vmatmul.mubr.f32.gmra.mrb[86].mxu0 %v5314_v9  ;;  %v8186_v9 = vpop.permute.xlu0 %8185 }
 0x611   : > { %5891 = vmatprep.mubr.f32.mxu0 %v5347_v53  ;;  %v12021_v12 = vpop.f32.mrb[82].mxu1  ;;  %v8183_v53 = vunpack.i.h.bf16 %v8181_v40  ;;  %v8187_v11 = vunpack.i.l.bf16 %v8186_v9  ;;  %v8188_v63 = vunpack.i.h.bf16 %v8186_v9 }
 0x612   : > { %v12024_v37 = vpop.f32.mrb[83].mxu1 }
 0x613   : > { %v5353_v14 = vsel %vm511_vm10, %v11897_v60, %v8187_v11  ;;  %v5321_v48 = vsel %vm511_vm10, %v4585_v5, %v8188_v63  ;;  %v8211_v11 = vpop.permute.xlu1 %8210 }
 0x614   : > { %5892 = vmatmul.mubr.f32.gmra.mrb[88].mxu0 %v5315_v7  ;;  %v5352_v7 = vsel %vm511_vm10, %v11892_v44, %v8182_v2  ;;  %v4587_v2 = vld [vmem:[#allocation3 + $0x168] sm:$0xff] }
 0x615   : > { %5896 = vmatprep.mubr.f32.mxu0 %v5348_v23  ;;  %v4584_v23 = vld [vmem:[#allocation3 + $0x130] sm:$0xff] }
 0x616   : > { %v5320_v27 = vsel %vm511_vm10, %v4584_v23, %v8183_v53  ;;  %v8212_v23 = vunpack.i.l.bf16 %v8211_v11 }
 0x618   : > { %5897 = vmatmul.mubr.f32.gmra.mrb[90].mxu0 %v5316_v52  ;;  %v8196_v52 = vpop.permute.xlu0 %8195 }
 0x619   : > { %5901 = vmatprep.mubr.f32.mxu0 %v5349_v58  ;;  %v8193_v58 = vunpack.i.h.bf16 %v8191_v30  ;;  %v8197_v44 = vunpack.i.l.bf16 %v8196_v52  ;;  %v8198_v40 = vunpack.i.h.bf16 %v8196_v52 }
 0x61a   : > { %v12031_v35 = vpop.f32.mrb[84].mxu1 }
 0x61b   : > { %v12034_v3 = vpop.f32.mrb[85].mxu1  ;;  %v5355_v61 = vsel %vm511_vm10, %v11907_v51, %v8197_v44  ;;  %v5323_v16 = vsel %vm511_vm10, %v4587_v2, %v8198_v40  ;;  %v8221_v44 = vpop.permute.xlu1 %8220 }
 0x61c   : > { %5902 = vmatmul.mubr.f32.gmra.mrb[92].mxu0 %v5317_v22  ;;  %v5354_v22 = vsel %vm511_vm10, %v11902_v21, %v8192_v6  ;;  %v4589_v6 = vld [vmem:[#allocation3 + $0x188] sm:$0xff] }
 0x61d   : > { %5906 = vmatprep.mubr.f32.mxu0 %v5350_v24  ;;  %v4586_v24 = vld [vmem:[#allocation3 + $0x150] sm:$0xff] }
 0x61e   : > { %v5322_v60 = vsel %vm511_vm10, %v4586_v24, %v8193_v58  ;;  %v8222_v24 = vunpack.i.l.bf16 %v8221_v44 }
 0x620   : > { %5907 = vmatmul.mubr.f32.gmra.mrb[94].mxu0 %v5318_v38  ;;  %v8206_v38 = vpop.permute.xlu0 %8205 }
 0x621   : > { %5911 = vmatprep.mubr.f32.mxu0 %v5351_v54  ;;  %v12041_v33 = vpop.f32.mrb[86].mxu1  ;;  %v8203_v54 = vunpack.i.h.bf16 %v8201_v34  ;;  %v8207_v21 = vunpack.i.l.bf16 %v8206_v38  ;;  %v8208_v30 = vunpack.i.h.bf16 %v8206_v38 }
 0x622   : > { %v12044_v46 = vpop.f32.mrb[87].mxu1 }
 0x623   : > { %v5357_v63 = vsel %vm511_vm10, %v11917_v4, %v8207_v21  ;;  %v5325_v5 = vsel %vm511_vm10, %v4589_v6, %v8208_v30  ;;  %v4593_v30 = vld [vmem:[#allocation3 + $0x1c8] sm:$0xff]  ;;  %v4594_v6 = vld [vmem:[#allocation3 + $0x1d0] sm:$0xff] }
 0x624   : > { %5912 = vmatmul.mubr.f32.gmra.mrb[96].mxu0 %v5319_v19  ;;  %v5356_v19 = vsel %vm511_vm10, %v11912_v0, %v8202_v45  ;;  %v4591_v45 = vld [vmem:[#allocation3 + $0x1a8] sm:$0xff] }
 0x625   : > { %5916 = vmatprep.mubr.f32.mxu0 %v5352_v7  ;;  %v4588_v7 = vld [vmem:[#allocation3 + $0x170] sm:$0xff] }
 0x626   : > { %v5324_v51 = vsel %vm511_vm10, %v4588_v7, %v8203_v54  ;;  %v8231_v54 = vpop.permute.xlu1 %8230 }
 0x628   : > { %5917 = vmatmul.mubr.f32.gmra.mrb[98].mxu0 %v5320_v27  ;;  %v8216_v27 = vpop.permute.xlu0 %8215 }
 0x629   : > { %5921 = vmatprep.mubr.f32.mxu0 %v5353_v14  ;;  %v8213_v14 = vunpack.i.h.bf16 %v8211_v11  ;;  %v8217_v0 = vunpack.i.l.bf16 %v8216_v27  ;;  %v8218_v34 = vunpack.i.h.bf16 %v8216_v27  ;;  %v8232_v11 = vunpack.i.l.bf16 %v8231_v54 }
 0x62a   : > { %v12051_v20 = vpop.f32.mrb[88].mxu1  ;;  %v8241_v27 = vpop.permute.xlu1 %8240 }
 0x62b   : > { %v12054_v36 = vpop.f32.mrb[89].mxu1  ;;  %v5359_v40 = vsel %vm511_vm10, %v11931_v49, %v8217_v0  ;;  %v5327_v38 = vsel %vm511_vm10, %v4591_v45, %v8218_v34  ;;  %v4659_v0 = vld [vmem:[#allocation3 + $0x207] sm:$0xff]  ;;  %v8243_v34 = vunpack.i.h.bf16 %v8241_v27 }
 0x62c   : > { %5922 = vmatmul.mubr.f32.gmra.mrb[100].mxu0 %v5321_v48  ;;  %v5358_v48 = vsel %vm511_vm10, %v11926_v17, %v8212_v23  ;;  %v5360_v17 = vsel %vm511_vm10, %v11941_v43, %v8222_v24  ;;  %v5362_v43 = vsel %vm511_vm10, %v11956_v25, %v8232_v11  ;;  %v4660_v24 = vld [vmem:[#allocation3 + $0x20f] sm:$0xff]  ;;  %v4661_v45 = vld [vmem:[#allocation3 + $0x227] sm:$0xff] }
 0x62d   : > { %5926 = vmatprep.mubr.f32.mxu0 %v5354_v22  ;;  %v4590_v22 = vld [vmem:[#allocation3 + $0x190] sm:$0xff] }
 0x62e   : > { %v5326_v4 = vsel %vm511_vm10, %v4590_v22, %v8213_v14  ;;  %v4595_v22 = vld [vmem:[#allocation3 + $0x1e8] sm:$0xff] }
 0x630   : > { %5927 = vmatmul.mubr.f32.gmra.mrb[102].mxu0 %v5322_v60  ;;  %v8226_v60 = vpop.permute.xlu0 %8225 }
 0x631   : > { %5931 = vmatprep.mubr.f32.mxu0 %v5355_v61  ;;  %v12061_v9 = vpop.f32.mrb[90].mxu1  ;;  %v8223_v61 = vunpack.i.h.bf16 %v8221_v44  ;;  %v8227_v2 = vunpack.i.l.bf16 %v8226_v60  ;;  %v8228_v21 = vunpack.i.h.bf16 %v8226_v60  ;;  %v8251_v60 = vpop.permute.xlu1 %8250 }
 0x632   : > { %v12064_v53 = vpop.f32.mrb[91].mxu1 }
 0x633   : > { %v5361_v49 = vsel %vm511_vm10, %v11946_v39, %v8227_v2  ;;  %v5329_v23 = vsel %vm511_vm10, %v4593_v30, %v8228_v21  ;;  %v8253_v21 = vunpack.i.h.bf16 %v8251_v60 }
 0x634   : > { %5932 = vmatmul.mubr.f32.gmra.mrb[104].mxu0 %v5323_v16  ;;  %v4592_v16 = vld [vmem:[#allocation3 + $0x1b0] sm:$0xff]  ;;  %v8236_v7 = vpop.permute.xlu0 %8235 }
 0x635   : > { %5936 = vmatprep.mubr.f32.mxu0 %v5356_v19  ;;  %v5328_v19 = vsel %vm511_vm10, %v4592_v16, %v8223_v61  ;;  %v8238_v14 = vunpack.i.h.bf16 %v8236_v7  ;;  %v4596_v61 = vld [vmem:[#allocation3 + $0x1f0] sm:$0xff] }
 0x636   : > { %v5332_v2 = vsel %vm511_vm10, %v4596_v61, %v8243_v34  ;;  %v4662_v16 = vld [vmem:[#allocation3 + $0x22f] sm:$0xff] }
 0x638   : > { %5937 = vmatmul.mubr.f32.gmra.mrb[106].mxu0 %v5324_v51  ;;  %v8233_v51 = vunpack.i.h.bf16 %v8231_v54  ;;  %v8246_v44 = vpop.permute.xlu0 %8245 }
 0x639   : > { %5941 = vmatprep.mubr.f32.mxu0 %v5357_v63  ;;  %v8237_v63 = vunpack.i.l.bf16 %v8236_v7 }
 0x63a   : > { %v12071_v52 = vpop.f32.mrb[92].mxu1 }
 0x63b   : > { %v12074_v58 = vpop.f32.mrb[93].mxu1  ;;  %v5363_v39 = vsel %vm511_vm10, %v4659_v0, %v8237_v63 }
 0x63c   : > { %5942 = vmatmul.mubr.f32.gmra.mrb[108].mxu0 %v5325_v5  ;;  %v5330_v5 = vsel %vm511_vm10, %v4594_v6, %v8233_v51  ;;  %v12108_v51 = vld [vmem:[%s12646_s7] ss:$0 sm:$0xff] }
 0x63d   : > { %5946 = vmatprep.mubr.f32.mxu0 %v5358_v48  ;;  %v8242_v48 = vunpack.i.l.bf16 %v8241_v27 }
 0x63f   : > { %v5364_v25 = vsel %vm511_vm10, %v4660_v24, %v8242_v48 }
 0x640   : > { %5947 = vmatmul.mubr.f32.gmra.mrb[110].mxu0 %v5326_v4  ;;  %v5331_v4 = vsel %vm511_vm10, %v4595_v22, %v8238_v14 }
 0x641   : > { %5951 = vmatprep.mubr.f32.mxu0 %v5359_v40  ;;  %v8247_v40 = vunpack.i.l.bf16 %v8246_v44 }
 0x643   : > { %v5365_v54 = vsel %vm511_vm10, %v4661_v45, %v8247_v40 }
 0x644   : > { %5952 = vmatmul.mubr.f32.gmra.mrb[112].mxu0 %v5327_v38  ;;  %v8248_v38 = vunpack.i.h.bf16 %v8246_v44 }
 0x645   : > { %5956 = vmatprep.mubr.f32.mxu0 %v5360_v17  ;;  %v8252_v17 = vunpack.i.l.bf16 %v8251_v60 }
 0x647   : > { %v5366_v11 = vsel %vm511_vm10, %v4662_v16, %v8252_v17 }
 0x648   : > { %5957 = vmatmul.mubr.f32.gmra.mrb[114].mxu0 %v5328_v19  ;;  %v5333_v19 = vsel %vm511_vm10, %v11842_v55, %v8248_v38 }
 0x649   : > { %5961 = vmatprep.mubr.f32.mxu0 %v5361_v49  ;;  %v5334_v49 = vsel %vm511_vm10, %v11856_v62, %v8253_v21 }
 0x64c   : > { %5962 = vmatmul.mubr.f32.gmra.mrb[116].mxu0 %v5329_v23 }
 0x64d   : > { %5966 = vmatprep.mubr.f32.mxu0 %v5362_v43 }
 0x650   : > { %5967 = vmatmul.mubr.f32.gmra.mrb[118].mxu0 %v5330_v5 }
 0x651   : > { %5971 = vmatprep.mubr.f32.mxu0 %v5363_v39 }
 0x654   : > { %5972 = vmatmul.mubr.f32.gmra.mrb[120].mxu0 %v5331_v4 }
 0x655   : > { %5976 = vmatprep.mubr.f32.mxu0 %v5364_v25 }
 0x658   : > { %5977 = vmatmul.mubr.f32.gmra.mrb[122].mxu0 %v5332_v2 }
 0x659   : > { %5981 = vmatprep.mubr.f32.mxu0 %v5365_v54 }
 0x65c   : > { %5982 = vmatmul.mubr.f32.gmra.mrb[124].mxu0 %v5333_v19 }
 0x65d   : > { %5986 = vmatprep.mubr.f32.mxu0 %v5366_v11 }
 0x660   : > { %5987 = vmatmul.mubr.f32.gmra.mrb[126].mxu0 %v5334_v49 }
 0x6ac   : > { %v12101_v7 = vpop.f32.mrb[94].mxu1 }
 0x6ad   : > { %v12103_v30 = vpop.f32.mrb[95].mxu1 }
 0x6b7   : > { %v5833_v23 = vpop.f32.mrb[64].mxu0 }
 0x6b8   : > { %v7434_v55 = vadd.f32 %v12108_v51, %v5833_v23  ;;  %v5835_v63 = vpop.f32.mrb[65].mxu0 }
 0x6ba   : > { %v12112_v43 = vadd.f32 %v7434_v55, %v11924_v1 }
 0x6bb   : > { %v5838_v27 = vpop.f32.mrb[66].mxu0 }
 0x6bc   : > { %v7435_v62 = vadd.f32 %v12108_v51, %v5838_v27  ;;  %v5840_v6 = vpop.f32.mrb[67].mxu0  ;;  %6409 = vrot.lane.b32.xlu1 %v12112_v43, %s8403_s28  ;;  %v6601_v0 = vsel %vm438_vm0, %v12112_v43, 0.0 }
 0x6be   : > { %v12118_v14 = vadd.f32 %v7435_v62, %v11922_v42 }
 0x6bf   : > { %v5843_v5 = vpop.f32.mrb[68].mxu0 }
 0x6c0   : > { %v6602_v48 = vsel %vm438_vm0, %v12118_v14, 0.0  ;;  %v7436_v1 = vadd.f32 %v12108_v51, %v5843_v5  ;;  %v5845_v39 = vpop.f32.mrb[69].mxu0  ;;  %6411 = vrot.lane.b32.xlu1 %v12118_v14, %s8403_s28 }
 0x6c1   : > { %v6603_v44 = vadd.f32 %v6602_v48, %v6601_v0 }
 0x6c2   : > { %v12128_v22 = vadd.f32 %v7436_v1, %v11939_v13 }
 0x6c3   : > { %v5848_v34 = vpop.f32.mrb[70].mxu0 }
 0x6c4   : > { %v6604_v42 = vsel %vm438_vm0, %v12128_v22, 0.0  ;;  %v7437_v4 = vadd.f32 %v12108_v51, %v5848_v34  ;;  %v5850_v24 = vpop.f32.mrb[71].mxu0  ;;  %6413 = vrot.lane.b32.xlu1 %v12128_v22, %s8403_s28 }
 0x6c5   : > { %v6605_v40 = vadd.f32 %v6604_v42, %v6603_v44 }
 0x6c6   : > { %v12136_v25 = vadd.f32 %v7437_v4, %v11937_v18 }
 0x6c7   : > { %v5853_v60 = vpop.f32.mrb[72].mxu0 }
 0x6c8   : > { %v6606_v45 = vsel %vm438_vm0, %v12136_v25, 0.0  ;;  %v7438_v13 = vadd.f32 %v12108_v51, %v5853_v60  ;;  %v5855_v61 = vpop.f32.mrb[73].mxu0  ;;  %6415 = vrot.lane.b32.xlu1 %v12136_v25, %s8403_s28 }
 0x6c9   : > { %v6607_v38 = vadd.f32 %v6606_v45, %v6605_v40 }
 0x6ca   : > { %v12144_v2 = vadd.f32 %v7438_v13, %v11954_v10 }
 0x6cb   : > { %v5858_v17 = vpop.f32.mrb[74].mxu0 }
 0x6cc   : > { %v6608_v54 = vsel %vm438_vm0, %v12144_v2, 0.0  ;;  %v7439_v18 = vadd.f32 %v12108_v51, %v5858_v17  ;;  %v5860_v16 = vpop.f32.mrb[75].mxu0  ;;  %6417 = vrot.lane.b32.xlu1 %v12144_v2, %s8403_s28 }
 0x6cd   : > { %v6609_v21 = vadd.f32 %v6608_v54, %v6607_v38 }
 0x6ce   : > { %v12152_v19 = vadd.f32 %v7439_v18, %v11952_v31 }
 0x6cf   : > { %v5863_v11 = vpop.f32.mrb[76].mxu0 }
 0x6d0   : > { %v6610_v49 = vsel %vm438_vm0, %v12152_v19, 0.0  ;;  %v7440_v10 = vadd.f32 %v12108_v51, %v5863_v11  ;;  %v5865_v23 = vpop.f32.mrb[77].mxu0  ;;  %6419 = vrot.lane.b32.xlu1 %v12152_v19, %s8403_s28 }
 0x6d1   : > { %v6611_v55 = vadd.f32 %v6610_v49, %v6609_v21 }
 0x6d2   : > { %v12160_v63 = vadd.f32 %v7440_v10, %v11967_v15 }
 0x6d3   : > { %v5868_v27 = vpop.f32.mrb[78].mxu0 }
 0x6d4   : > { %v6612_v62 = vsel %vm438_vm0, %v12160_v63, 0.0  ;;  %v7441_v31 = vadd.f32 %v12108_v51, %v5868_v27  ;;  %v5870_v6 = vpop.f32.mrb[79].mxu0  ;;  %6421 = vrot.lane.b32.xlu1 %v12160_v63, %s8403_s28 }
 0x6d5   : > { %v6613_v5 = vadd.f32 %v6612_v62, %v6611_v55 }
 0x6d6   : > { %v12168_v0 = vadd.f32 %v7441_v31, %v11964_v8 }
 0x6d7   : > { %v5873_v48 = vpop.f32.mrb[80].mxu0 }
 0x6d8   : > { %v6614_v1 = vsel %vm438_vm0, %v12168_v0, 0.0  ;;  %v7442_v15 = vadd.f32 %v12108_v51, %v5873_v48  ;;  %v5875_v39 = vpop.f32.mrb[81].mxu0  ;;  %6423 = vrot.lane.b32.xlu1 %v12168_v0, %s8403_s28 }
 0x6d9   : > { %v6615_v44 = vadd.f32 %v6614_v1, %v6613_v5 }
 0x6da   : > { %v12176_v34 = vadd.f32 %v7442_v15, %v11975_v32 }
 0x6db   : > { %v5878_v42 = vpop.f32.mrb[82].mxu0 }
 0x6dc   : > { %v6616_v4 = vsel %vm438_vm0, %v12176_v34, 0.0  ;;  %v7443_v8 = vadd.f32 %v12108_v51, %v5878_v42  ;;  %v5880_v24 = vpop.f32.mrb[83].mxu0  ;;  %6425 = vrot.lane.b32.xlu0 %v12176_v34, %s8403_s28 }
 0x6dd   : > { %v6617_v40 = vadd.f32 %v6616_v4, %v6615_v44 }
 0x6de   : > { %v12184_v60 = vadd.f32 %v7443_v8, %v11972_v50 }
 0x6df   : > { %v5883_v45 = vpop.f32.mrb[84].mxu0 }
 0x6e0   : > { %v6618_v13 = vsel %vm438_vm0, %v12184_v60, 0.0  ;;  %v7444_v32 = vadd.f32 %v12108_v51, %v5883_v45  ;;  %v5885_v61 = vpop.f32.mrb[85].mxu0  ;;  %6427 = vrot.lane.b32.xlu1 %v12184_v60, %s8403_s28 }
 0x6e1   : > { %v6619_v38 = vadd.f32 %v6618_v13, %v6617_v40 }
 0x6e2   : > { %v12192_v17 = vadd.f32 %v7444_v32, %v11984_v28 }
 0x6e3   : > { %v5888_v54 = vpop.f32.mrb[86].mxu0 }
 0x6e4   : > { %v6620_v18 = vsel %vm438_vm0, %v12192_v17, 0.0  ;;  %v7445_v50 = vadd.f32 %v12108_v51, %v5888_v54  ;;  %v5890_v16 = vpop.f32.mrb[87].mxu0  ;;  %6429 = vrot.lane.b32.xlu1 %v12192_v17, %s8403_s28 }
 0x6e5   : > { %v6621_v21 = vadd.f32 %v6620_v18, %v6619_v38 }
 0x6e6   : > { %v12200_v11 = vadd.f32 %v7445_v50, %v11981_v57 }
 0x6e7   : > { %v5893_v49 = vpop.f32.mrb[88].mxu0 }
 0x6e8   : > { %v6622_v10 = vsel %vm438_vm0, %v12200_v11, 0.0  ;;  %v7446_v28 = vadd.f32 %v12108_v51, %v5893_v49  ;;  %v5895_v23 = vpop.f32.mrb[89].mxu0  ;;  %6431 = vrot.lane.b32.xlu1 %v12200_v11, %s8403_s28 }
 0x6e9   : > { %v6623_v55 = vadd.f32 %v6622_v10, %v6621_v21 }
 0x6ea   : > { %v12208_v27 = vadd.f32 %v7446_v28, %v11994_v41 }
 0x6eb   : > { %v5898_v62 = vpop.f32.mrb[90].mxu0 }
 0x6ec   : > { %v6624_v31 = vsel %vm438_vm0, %v12208_v27, 0.0  ;;  %v7447_v57 = vadd.f32 %v12108_v51, %v5898_v62  ;;  %v5900_v6 = vpop.f32.mrb[91].mxu0  ;;  %6433 = vrot.lane.b32.xlu1 %v12208_v27, %s8403_s28 }
 0x6ed   : > { %v6625_v5 = vadd.f32 %v6624_v31, %v6623_v55 }
 0x6ee   : > { %v12216_v48 = vadd.f32 %v7447_v57, %v11991_v29 }
 0x6ef   : > { %v5903_v1 = vpop.f32.mrb[92].mxu0 }
 0x6f0   : > { %v6626_v15 = vsel %vm438_vm0, %v12216_v48, 0.0  ;;  %v7448_v41 = vadd.f32 %v12108_v51, %v5903_v1  ;;  %v5905_v39 = vpop.f32.mrb[93].mxu0  ;;  %6435 = vrot.lane.b32.xlu1 %v12216_v48, %s8403_s28 }
 0x6f1   : > { %v6627_v44 = vadd.f32 %v6626_v15, %v6625_v5 }
 0x6f2   : > { %v12224_v42 = vadd.f32 %v7448_v41, %v12004_v26 }
 0x6f3   : > { %v5908_v4 = vpop.f32.mrb[94].mxu0 }
 0x6f4   : > { %v6628_v8 = vsel %vm438_vm0, %v12224_v42, 0.0  ;;  %v7449_v29 = vadd.f32 %v12108_v51, %v5908_v4  ;;  %v5910_v24 = vpop.f32.mrb[95].mxu0  ;;  %6437 = vrot.lane.b32.xlu1 %v12224_v42, %s8403_s28 }
 0x6f5   : > { %v6629_v40 = vadd.f32 %v6628_v8, %v6627_v44 }
 0x6f6   : > { %v12232_v45 = vadd.f32 %v7449_v29, %v12001_v56 }
 0x6f7   : > { %v5913_v13 = vpop.f32.mrb[96].mxu0 }
 0x6f8   : > { %v6630_v32 = vsel %vm438_vm0, %v12232_v45, 0.0  ;;  %v7450_v26 = vadd.f32 %v12108_v51, %v5913_v13  ;;  %v5915_v61 = vpop.f32.mrb[97].mxu0  ;;  %6439 = vrot.lane.b32.xlu0 %v12232_v45, %s8403_s28 }
 0x6f9   : > { %v6631_v38 = vadd.f32 %v6630_v32, %v6629_v40 }
 0x6fa   : > { %v12240_v54 = vadd.f32 %v7450_v26, %v12014_v47 }
 0x6fb   : > { %v5918_v18 = vpop.f32.mrb[98].mxu0 }
 0x6fc   : > { %v6632_v50 = vsel %vm438_vm0, %v12240_v54, 0.0  ;;  %v7451_v56 = vadd.f32 %v12108_v51, %v5918_v18  ;;  %v5920_v16 = vpop.f32.mrb[99].mxu0  ;;  %6441 = vrot.lane.b32.xlu1 %v12240_v54, %s8403_s28 }
 0x6fd   : > { %v6633_v21 = vadd.f32 %v6632_v50, %v6631_v38 }
 0x6fe   : > { %v12248_v49 = vadd.f32 %v7451_v56, %v12011_v59 }
 0x6ff   : > { %v5923_v10 = vpop.f32.mrb[100].mxu0 }
 0x700   : > { %v6634_v28 = vsel %vm438_vm0, %v12248_v49, 0.0  ;;  %v7452_v47 = vadd.f32 %v12108_v51, %v5923_v10  ;;  %v5925_v23 = vpop.f32.mrb[101].mxu0  ;;  %6443 = vrot.lane.b32.xlu0 %v12248_v49, %s8403_s28 }
 0x701   : > { %v6635_v55 = vadd.f32 %v6634_v28, %v6633_v21 }
 0x702   : > { %v12256_v62 = vadd.f32 %v7452_v47, %v12024_v37 }
 0x703   : > { %v5928_v31 = vpop.f32.mrb[102].mxu0 }
 0x704   : > { %v6636_v57 = vsel %vm438_vm0, %v12256_v62, 0.0  ;;  %v7453_v59 = vadd.f32 %v12108_v51, %v5928_v31  ;;  %v5930_v6 = vpop.f32.mrb[103].mxu0  ;;  %6445 = vrot.lane.b32.xlu1 %v12256_v62, %s8403_s28 }
 0x705   : > { %v6637_v5 = vadd.f32 %v6636_v57, %v6635_v55 }
 0x706   : > { %v12264_v1 = vadd.f32 %v7453_v59, %v12021_v12  ;;  %v6281_v59 = vmul.f32 1.442695, %v12112_v43 }
 0x707   : > { %v5933_v15 = vpop.f32.mrb[104].mxu0 }
 0x708   : > { %v6638_v41 = vsel %vm438_vm0, %v12264_v1, 0.0  ;;  %v7454_v37 = vadd.f32 %v12108_v51, %v5933_v15  ;;  %v5935_v39 = vpop.f32.mrb[105].mxu0  ;;  %6447 = vrot.lane.b32.xlu0 %v12264_v1, %s8403_s28  ;;  %8254 = vpow2.f32 %v6281_v59 }
 0x709   : > { %v6639_v44 = vadd.f32 %v6638_v41, %v6637_v5 }
 0x70a   : > { %v12272_v4 = vadd.f32 %v7454_v37, %v12034_v3 }
 0x70b   : > { %v5938_v8 = vpop.f32.mrb[106].mxu0 }
 0x70c   : > { %v6640_v29 = vsel %vm438_vm0, %v12272_v4, 0.0  ;;  %v7455_v12 = vadd.f32 %v12108_v51, %v5938_v8  ;;  %v5940_v24 = vpop.f32.mrb[107].mxu0  ;;  %6449 = vrot.lane.b32.xlu1 %v12272_v4, %s8403_s28 }
 0x70d   : > { %v6641_v40 = vadd.f32 %v6640_v29, %v6639_v44 }
 0x70e   : > { %v12280_v13 = vadd.f32 %v7455_v12, %v12031_v35 }
 0x70f   : > { %v5943_v32 = vpop.f32.mrb[108].mxu0 }
 0x710   : > { %v6642_v26 = vsel %vm438_vm0, %v12280_v13, 0.0  ;;  %v7456_v3 = vadd.f32 %v12108_v51, %v5943_v32  ;;  %v5945_v61 = vpop.f32.mrb[109].mxu0  ;;  %6451 = vrot.lane.b32.xlu0 %v12280_v13, %s8403_s28 }
 0x711   : > { %v6643_v38 = vadd.f32 %v6642_v26, %v6641_v40  ;;  %v6287_v61 = vmul.f32 1.442695, %v12136_v25 }
 0x712   : > { %v12288_v18 = vadd.f32 %v7456_v3, %v12044_v46 }
 0x713   : > { %v5948_v50 = vpop.f32.mrb[110].mxu0 }
 0x714   : > { %v6644_v56 = vsel %vm438_vm0, %v12288_v18, 0.0  ;;  %v7457_v35 = vadd.f32 %v12108_v51, %v5948_v50  ;;  %v5950_v16 = vpop.f32.mrb[111].mxu0  ;;  %6453 = vrot.lane.b32.xlu1 %v12288_v18, %s8403_s28 }
 0x715   : > { %v6645_v21 = vadd.f32 %v6644_v56, %v6643_v38  ;;  %v8321_v16 = vld [vmem:[%s8633_s24] sm:$0xff] }
 0x716   : > { %v12296_v10 = vadd.f32 %v7457_v35, %v12041_v33 }
 0x717   : > { %v5953_v28 = vpop.f32.mrb[112].mxu0 }
 0x718   : > { %v6646_v47 = vsel %vm438_vm0, %v12296_v10, 0.0  ;;  %v7458_v46 = vadd.f32 %v12108_v51, %v5953_v28  ;;  %v5955_v23 = vpop.f32.mrb[113].mxu0  ;;  %6455 = vrot.lane.b32.xlu0 %v12296_v10, %s8403_s28 }
 0x719   : > { %v6647_v55 = vadd.f32 %v6646_v47, %v6645_v21  ;;  %v8255_v47 = vpop.eup %8254  ;;  %v8323_v23 = vld [vmem:[%s12640_s1 + $0x10] sm:$0xff] }
 0x71a   : > { %v12304_v31 = vadd.f32 %v7458_v46, %v12054_v36  ;;  %v6283_v36 = vmul.f32 1.442695, %v12118_v14 }
 0x71b   : > { %v5958_v57 = vpop.f32.mrb[114].mxu0 }
 0x71c   : > { %v6648_v33 = vsel %vm438_vm0, %v12304_v31, 0.0  ;;  %v7459_v6 = vadd.f32 %v12108_v51, %v5958_v57  ;;  %v5960_v5 = vpop.f32.mrb[115].mxu0  ;;  %6457 = vrot.lane.b32.xlu1 %v12304_v31, %s8403_s28  ;;  %8256 = vpow2.f32 %v6283_v36  ;;  %v6289_v57 = vmul.f32 1.442695, %v12144_v2 }
 0x71d   : > { %v6649_v15 = vadd.f32 %v6648_v33, %v6647_v55  ;;  %v6219_v55 = vsub.f32 1.0, %v8323_v23 }
 0x71e   : > { %v12313_v41 = vadd.f32 %v7459_v6, %v12051_v20  ;;  %v6285_v20 = vmul.f32 1.442695, %v12128_v22 }
 0x71f   : > { %v5963_v37 = vpop.f32.mrb[116].mxu0 }
 0x720   : > { %v6650_v43 = vsel %vm438_vm0, %v12313_v41, 0.0  ;;  %v7460_v39 = vadd.f32 %v12108_v51, %v5963_v37  ;;  %v5965_v44 = vpop.f32.mrb[117].mxu0  ;;  %6459 = vrot.lane.b32.xlu0 %v12313_v41, %s8403_s28  ;;  %8258 = vpow2.f32 %v6285_v20  ;;  %v6291_v20 = vmul.f32 1.442695, %v12152_v19  ;;  %v8326_v19 = vld [vmem:[%s12640_s1 + $0x18] sm:$0xff] }
 0x721   : > { %v6651_v8 = vadd.f32 %v6650_v43, %v6649_v15  ;;  %8260 = vpow2.f32 %v6287_v61  ;;  %v8324_v15 = vld [vmem:[%s8633_s24 + $0x8] sm:$0xff] }
 0x722   : > { %v12322_v29 = vadd.f32 %v7460_v39, %v12064_v53  ;;  %v8320_v53 = vld [vmem:[%s12640_s1] sm:$0xff]  ;;  %8262 = vpow2.f32 %v6289_v57  ;;  %v8328_v57 = vld [vmem:[%s8633_s24 + $0x18] sm:$0xff] }
 0x723   : > { %v5968_v12 = vpop.f32.mrb[118].mxu0  ;;  %v6217_v26 = vsub.f32 1.0, %v8320_v53  ;;  %8264 = vpow2.f32 %v6291_v20 }
 0x724   : > { %v6652_v14 = vsel %vm438_vm0, %v12322_v29, 0.0  ;;  %v7461_v24 = vadd.f32 %v12108_v51, %v5968_v12  ;;  %v5970_v40 = vpop.f32.mrb[119].mxu0  ;;  %6461 = vrot.lane.b32.xlu1 %v12322_v29, %s8403_s28 }
 0x725   : > { %v6653_v32 = vadd.f32 %v6652_v14, %v6651_v8  ;;  %v6249_v21 = vmul.f32 %v8321_v16, %v6217_v26  ;;  %v8325_v8 = vld [vmem:[%s8633_s24 + $0x10] sm:$0xff]  ;;  %v12834_v40 = vld [vmem:[#allocation4_spill] sm:$0xff]  ;;  %v6220_v26 = vsub.f32 1.0, %v8326_v19 }
 0x726   : > { %v12334_v3 = vadd.f32 %v7461_v24, %v12061_v9  ;;  %v8322_v9 = vld [vmem:[%s12640_s1 + $0x8] sm:$0xff]  ;;  %v8257_v36 = vpop.eup %8256  ;;  %v6251_v12 = vmul.f32 %v8325_v8, %v6219_v55  ;;  %v8327_v16 = vld [vmem:[%s12640_s1 + $0x20] sm:$0xff] }
 0x727   : > { %v5973_v22 = vpop.f32.mrb[120].mxu0  ;;  %v6218_v28 = vsub.f32 1.0, %v8322_v9  ;;  %v6345_v5 = vmul.f32 %v8255_v47, %v6249_v21  ;;  %v6221_v21 = vsub.f32 1.0, %v8327_v16  ;;  %v6293_v9 = vmul.f32 1.442695, %v12160_v63 }
 0x728   : > { %v6654_v38 = vsel %vm438_vm0, %v12334_v3, 0.0  ;;  %v7462_v50 = vadd.f32 %v12108_v51, %v5973_v22  ;;  %v5975_v56 = vpop.f32.mrb[121].mxu0  ;;  %6463 = vrot.lane.b32.xlu0 %v12334_v3, %s8403_s28 }
 0x729   : > { %v6655_v35 = vadd.f32 %v6654_v38, %v6653_v32  ;;  %v6250_v37 = vmul.f32 %v8324_v15, %v6218_v28  ;;  %8266 = vpow2.f32 %v6293_v9  ;;  %v8329_v15 = vld [vmem:[%s8633_s24 + $0x20] sm:$0xff]  ;;  %v8333_v9 = vld [vmem:[%s8633_s24 + $0x30] sm:$0xff] }
 0x72a   : > { %v12347_v25 = vadd.f32 %v7462_v50, %v12074_v58  ;;  %v8259_v61 = vpop.eup %8258 }
 0x72b   : > { %v5978_v46 = vpop.f32.mrb[122].mxu0  ;;  %v6346_v53 = vmul.f32 %v8257_v36, %v6250_v37  ;;  %v6347_v55 = vmul.f32 %v8259_v61, %v6251_v12  ;;  %v6253_v37 = vmul.f32 %v8329_v15, %v6221_v21 }
 0x72c   : > { %v6656_v59 = vsel %vm438_vm0, %v12347_v25, 0.0  ;;  %v7463_v33 = vadd.f32 %v12108_v51, %v5978_v46  ;;  %v5980_v6 = vpop.f32.mrb[123].mxu0  ;;  %6465 = vrot.lane.b32.xlu1 %v12347_v25, %s8403_s28  ;;  %v12835_v46 = vld [vmem:[#allocation5_spill] sm:$0xff] }
 0x72d   : > { %v6657_v58 = vadd.f32 %v6656_v59, %v6655_v35  ;;  %v6252_v59 = vmul.f32 %v8328_v57, %v6220_v26  ;;  %v8261_v6 = vpop.eup %8260  ;;  %v8332_v26 = vld [vmem:[%s12640_s1 + $0x30] sm:$0xff]  ;;  %v12839_v57 = vld [vmem:[#allocation9_spill] sm:$0xff] }
 0x72e   : > { %v12360_v43 = vadd.f32 %v7463_v33, %v12071_v52  ;;  %v6410_v39 = vpop.permute.xlu1 %6409  ;;  %v8263_v20 = vpop.eup %8262 }
 0x72f   : > { %v6505_v2 = vadd.f32 %v6410_v39, %v6345_v5  ;;  %v5983_v44 = vpop.f32.mrb[124].mxu0  ;;  %v12836_v39 = vld [vmem:[#allocation6_spill] sm:$0xff]  ;;  %v8265_v61 = vpop.eup %8264 }
 0x730   : > { %v6658_v14 = vsel %vm438_vm0, %v12360_v43, 0.0  ;;  %v7464_v52 = vadd.f32 %v12108_v51, %v5983_v44  ;;  %v5985_v24 = vpop.f32.mrb[125].mxu0  ;;  %6467 = vrot.lane.b32.xlu0 %v12360_v43, %s8403_s28  ;;  %v6348_v44 = vmul.f32 %v8261_v6, %v6252_v59  ;;  %v8335_v6 = vld [vmem:[%s8633_s24 + $0x38] sm:$0xff] }
 0x731   : > { %v6537_v32 = vadd.f32 %v6505_v2, %v12834_v40  ;;  %v6659_v22 = vadd.f32 %v6658_v14, %v6657_v58  ;;  %v12837_v24 = vld [vmem:[#allocation7_spill] sm:$0xff] }
 0x732   : > { %v12381_v38 = vadd.f32 %v7464_v52, %v12103_v30  ;;  %v6412_v50 = vpop.permute.xlu1 %6411  ;;  %v6297_v52 = vmul.f32 1.442695, %v12176_v34  ;;  %v6299_v34 = vmul.f32 1.442695, %v12184_v60  ;;  %v6301_v60 = vmul.f32 1.442695, %v12192_v17 }
 0x733   : > { %6569 = vst.msk [vmem:[%s12371_s22] sm:$0xff] %vm438_vm0, %v6537_v32  ;;  %v6506_v56 = vadd.f32 %v6412_v50, %v6346_v53  ;;  %v5988_v35 = vpop.f32.mrb[126].mxu0  ;;  %v6349_v32 = vmul.f32 %v8263_v20, %v6253_v37  ;;  %v8331_v53 = vld [vmem:[%s8633_s24 + $0x28] sm:$0xff]  ;;  %v6303_v17 = vmul.f32 1.442695, %v12200_v11  ;;  %v12841_v11 = vld [vmem:[#allocation11_spill] sm:$0xff] }
 0x734   : > { %v6660_v28 = vsel %vm438_vm0, %v12381_v38, 0.0  ;;  %v7465_v30 = vadd.f32 %v12108_v51, %v5988_v35  ;;  %v5990_v47 = vpop.f32.mrb[127].mxu0  ;;  %6469 = vrot.lane.b32.xlu1 %v12381_v38, %s8403_s28  ;;  %v6295_v51 = vmul.f32 1.442695, %v12168_v0  ;;  %v12838_v35 = vld [vmem:[#allocation8_spill] sm:$0xff]  ;;  %v8338_v20 = vld [vmem:[%s12640_s1 + $0x48] sm:$0xff] }
 0x735   : > { %v6538_v23 = vadd.f32 %v6506_v56, %v12835_v46  ;;  %v6661_v33 = vadd.f32 %v6660_v28, %v6659_v22  ;;  %v6223_v22 = vsub.f32 1.0, %v8332_v26  ;;  %v8267_v46 = vpop.eup %8266 }
 0x736   : > { %v12397_v58 = vadd.f32 %v7465_v30, %v12101_v7  ;;  %v6414_v63 = vpop.permute.xlu1 %6413  ;;  %v8330_v7 = vld [vmem:[%s12640_s1 + $0x28] sm:$0xff]  ;;  %8268 = vpow2.f32 %v6295_v51  ;;  %v8334_v30 = vld [vmem:[%s12640_s1 + $0x38] sm:$0xff] }
 0x737   : > { %6570 = vst.msk [vmem:[%s12371_s22 + $0x8] sm:$0xff] %vm438_vm0, %v6538_v23  ;;  %v6507_v5 = vadd.f32 %v6414_v63, %v6347_v55  ;;  %v6222_v8 = vsub.f32 1.0, %v8330_v7  ;;  %8270 = vpow2.f32 %v6297_v52  ;;  %v6255_v28 = vmul.f32 %v8333_v9, %v6223_v22  ;;  %v8337_v7 = vld [vmem:[%s8633_s24 + $0x40] sm:$0xff]  ;;  %v8340_v22 = vld [vmem:[%s12640_s1 + $0x50] sm:$0xff] }
 0x738   : > { %v6662_v36 = vsel %vm438_vm0, %v12397_v58, 0.0  ;;  %v6224_v47 = vsub.f32 1.0, %v8334_v30  ;;  %8272 = vpow2.f32 %v6299_v34  ;;  %v8341_v9 = vld [vmem:[%s8633_s24 + $0x50] sm:$0xff]  ;;  %v8342_v30 = vld [vmem:[%s12640_s1 + $0x58] sm:$0xff] }
 0x739   : > { %v6539_v2 = vadd.f32 %v6507_v5, %v12836_v39  ;;  %v12409_v12 = vadd.f32 %v6662_v36, %v6661_v33  ;;  %v6254_v19 = vmul.f32 %v8331_v53, %v6222_v8  ;;  %v6351_v33 = vmul.f32 %v8267_v46, %v6255_v28  ;;  %v8336_v5 = vld [vmem:[%s12640_s1 + $0x40] sm:$0xff]  ;;  %v12840_v39 = vld [vmem:[#allocation10_spill] sm:$0xff] }
 0x73a   : > { %v6416_v14 = vpop.permute.xlu1 %6415  ;;  %v6256_v63 = vmul.f32 %v8335_v6, %v6224_v47  ;;  %v6225_v51 = vsub.f32 1.0, %v8336_v5  ;;  %8274 = vpow2.f32 %v6301_v60  ;;  %v6228_v47 = vsub.f32 1.0, %v8342_v30  ;;  %v8344_v6 = vld [vmem:[%s12640_s1 + $0x60] sm:$0xff]  ;;  %v12847_v30 = vld [vmem:[#allocation17_spill] sm:$0xff] }
 0x73b   : > { %6571 = vst.msk [vmem:[%s12371_s22 + $0x10] sm:$0xff] %vm438_vm0, %v6539_v2  ;;  %v6508_v0 = vadd.f32 %v6416_v14, %v6348_v44  ;;  %v6350_v21 = vmul.f32 %v8265_v61, %v6254_v19  ;;  %v6226_v14 = vsub.f32 1.0, %v8338_v20  ;;  %8276 = vpow2.f32 %v6303_v17  ;;  %v8339_v19 = vld [vmem:[%s8633_s24 + $0x48] sm:$0xff] }
 0x73c   : > { %v6257_v8 = vmul.f32 %v8337_v7, %v6225_v51  ;;  %v6227_v61 = vsub.f32 1.0, %v8340_v22 }
 0x73d   : > { %v6540_v40 = vadd.f32 %v6508_v0, %v12837_v24  ;;  %v6258_v26 = vmul.f32 %v8339_v19, %v6226_v14 }
 0x73e   : > { %v6418_v50 = vpop.permute.xlu1 %6417  ;;  %v6259_v28 = vmul.f32 %v8341_v9, %v6227_v61  ;;  %v6315_v61 = vmul.f32 1.442695, %v12248_v49  ;;  %v6317_v49 = vmul.f32 1.442695, %v12256_v62 }
 0x73f   : > { %6572 = vst.msk [vmem:[%s12371_s22 + $0x18] sm:$0xff] %vm438_vm0, %v6540_v40  ;;  %v6509_v56 = vadd.f32 %v6418_v50, %v6349_v32  ;;  %v6305_v40 = vmul.f32 1.442695, %v12208_v27  ;;  %v6307_v27 = vmul.f32 1.442695, %v12216_v48 }
 0x740   : > { %v8269_v15 = vpop.eup %8268  ;;  %v6309_v48 = vmul.f32 1.442695, %v12224_v42  ;;  %v6311_v42 = vmul.f32 1.442695, %v12232_v45  ;;  %v6313_v45 = vmul.f32 1.442695, %v12240_v54 }
 0x741   : > { %v6541_v16 = vadd.f32 %v6509_v56, %v12838_v35  ;;  %v6352_v44 = vmul.f32 %v8269_v15, %v6256_v63  ;;  %v8271_v0 = vpop.eup %8270  ;;  %8278 = vpow2.f32 %v6305_v40  ;;  %v12842_v35 = vld [vmem:[#allocation12_spill] sm:$0xff]  ;;  %v6229_v63 = vsub.f32 1.0, %v8344_v6  ;;  %v8347_v40 = vld [vmem:[%s8633_s24 + $0x68] sm:$0xff] }
 0x742   : > { %v6420_v23 = vpop.permute.xlu1 %6419  ;;  %v6353_v53 = vmul.f32 %v8271_v0, %v6257_v8  ;;  %v8273_v50 = vpop.eup %8272  ;;  %8280 = vpow2.f32 %v6307_v27  ;;  %v12845_v0 = vld [vmem:[#allocation15_spill] sm:$0xff]  ;;  %v12846_v54 = vld [vmem:[#allocation16_spill] sm:$0xff] }
 0x743   : > { %6573 = vst.msk [vmem:[%s12371_s22 + $0x20] sm:$0xff] %vm438_vm0, %v6541_v16  ;;  %v6510_v55 = vadd.f32 %v6420_v23, %v6350_v21  ;;  %v6354_v21 = vmul.f32 %v8273_v50, %v6258_v26  ;;  %8282 = vpow2.f32 %v6309_v48  ;;  %v8352_v48 = vld [vmem:[%s12640_s1 + $0x80] sm:$0xff] }
 0x744   : > { %v8275_v46 = vpop.eup %8274  ;;  %8284 = vpow2.f32 %v6311_v42 }
 0x745   : > { %v6542_v59 = vadd.f32 %v6510_v55, %v12839_v57  ;;  %v12843_v55 = vld [vmem:[#allocation13_spill] sm:$0xff]  ;;  %v6355_v57 = vmul.f32 %v8275_v46, %v6259_v28  ;;  %v8277_v5 = vpop.eup %8276  ;;  %8286 = vpow2.f32 %v6313_v45 }
 0x746   : > { %v6422_v37 = vpop.permute.xlu1 %6421  ;;  %8288 = vpow2.f32 %v6315_v61 }
 0x747   : > { %6574 = vst.msk [vmem:[%s12371_s22 + $0x28] sm:$0xff] %vm438_vm0, %v6542_v59  ;;  %v6511_v36 = vadd.f32 %v6422_v37, %v6351_v33  ;;  %v8343_v59 = vld [vmem:[%s8633_s24 + $0x58] sm:$0xff]  ;;  %v12844_v37 = vld [vmem:[#allocation14_spill] sm:$0xff]  ;;  %8290 = vpow2.f32 %v6317_v49 }
 0x748   : > { %v6260_v33 = vmul.f32 %v8343_v59, %v6228_v47  ;;  %v6319_v59 = vmul.f32 1.442695, %v12264_v1  ;;  %v6321_v1 = vmul.f32 1.442695, %v12272_v4  ;;  %v6323_v4 = vmul.f32 1.442695, %v12280_v13 }
 0x749   : > { %v6543_v2 = vadd.f32 %v6511_v36, %v12840_v39  ;;  %v8345_v39 = vld [vmem:[%s8633_s24 + $0x60] sm:$0xff]  ;;  %v6325_v13 = vmul.f32 1.442695, %v12288_v18  ;;  %v6327_v18 = vmul.f32 1.442695, %v12296_v10 }
 0x74a   : > { %v6424_v52 = vpop.permute.xlu1 %6423  ;;  %v6356_v17 = vmul.f32 %v8277_v5, %v6260_v33  ;;  %v12848_v33 = vld [vmem:[#allocation18_spill] sm:$0xff]  ;;  %v8353_v5 = vld [vmem:[%s8633_s24 + $0x80] sm:$0xff]  ;;  %8292 = vpow2.f32 %v6319_v59  ;;  %v6329_v10 = vmul.f32 1.442695, %v12304_v31  ;;  %v12853_v59 = vld [vmem:[#allocation23_spill] sm:$0xff] }
 0x74b   : > { %6575 = vst.msk [vmem:[%s12371_s22 + $0x30] sm:$0xff] %vm438_vm0, %v6543_v2  ;;  %v6512_v24 = vadd.f32 %v6424_v52, %v6352_v44  ;;  %v6261_v2 = vmul.f32 %v8345_v39, %v6229_v63  ;;  %v8346_v44 = vld [vmem:[%s12640_s1 + $0x68] sm:$0xff]  ;;  %v8279_v8 = vpop.eup %8278  ;;  %v12849_v39 = vld [vmem:[#allocation19_spill] sm:$0xff]  ;;  %8294 = vpow2.f32 %v6321_v1  ;;  %v6331_v31 = vmul.f32 1.442695, %v12313_v41 }
 0x74c   : > { %v6230_v7 = vsub.f32 1.0, %v8346_v44  ;;  %v8281_v19 = vpop.eup %8280  ;;  %8296 = vpow2.f32 %v6323_v4  ;;  %v6333_v41 = vmul.f32 1.442695, %v12322_v29  ;;  %v6335_v29 = vmul.f32 1.442695, %v12334_v3 }
 0x74d   : > { %v6544_v32 = vadd.f32 %v6512_v24, %v12841_v11  ;;  %v6357_v24 = vmul.f32 %v8279_v8, %v6261_v2  ;;  %8298 = vpow2.f32 %v6325_v13  ;;  %v8369_v13 = vld [vmem:[%s8633_s24 + $0xc0] sm:$0xff]  ;;  %v6337_v3 = vmul.f32 1.442695, %v12347_v25 }
 0x74e   : > { %v6426_v56 = vpop.permute.xlu0 %6425  ;;  %v6262_v11 = vmul.f32 %v8347_v40, %v6230_v7  ;;  %v8355_v7 = vld [vmem:[%s8633_s24 + $0x88] sm:$0xff]  ;;  %8300 = vpow2.f32 %v6327_v18  ;;  %v6339_v25 = vmul.f32 1.442695, %v12360_v43  ;;  %v6341_v43 = vmul.f32 1.442695, %v12381_v38 }
 0x74f   : > { %6576 = vst.msk [vmem:[%s12371_s22 + $0x38] sm:$0xff] %vm438_vm0, %v6544_v32  ;;  %v6513_v34 = vadd.f32 %v6426_v56, %v6353_v53  ;;  %6664 = vadd.xlane.f32.xlu0 %v12409_v12  ;;  %v8348_v32 = vld [vmem:[%s12640_s1 + $0x70] sm:$0xff]  ;;  %8302 = vpow2.f32 %v6329_v10  ;;  %v8374_v10 = vld [vmem:[%s12640_s1 + $0xd8] sm:$0xff] }
 0x750   : > { %v6231_v53 = vsub.f32 1.0, %v8348_v32  ;;  %v6358_v56 = vmul.f32 %v8281_v19, %v6262_v11  ;;  %v8357_v32 = vld [vmem:[%s8633_s24 + $0x90] sm:$0xff]  ;;  %v8358_v19 = vld [vmem:[%s12640_s1 + $0x98] sm:$0xff]  ;;  %8304 = vpow2.f32 %v6331_v31 }
 0x751   : > { %v6545_v16 = vadd.f32 %v6513_v34, %v12842_v35  ;;  %v8349_v34 = vld [vmem:[%s8633_s24 + $0x70] sm:$0xff]  ;;  %v8350_v35 = vld [vmem:[%s12640_s1 + $0x78] sm:$0xff]  ;;  %8306 = vpow2.f32 %v6333_v41 }
 0x752   : > { %v6428_v23 = vpop.permute.xlu1 %6427  ;;  %v6263_v27 = vmul.f32 %v8349_v34, %v6231_v53  ;;  %8308 = vpow2.f32 %v6335_v29 }
 0x753   : > { %6577 = vst.msk [vmem:[%s12371_s22 + $0x40] sm:$0xff] %vm438_vm0, %v6545_v16  ;;  %v6514_v12 = vadd.f32 %v6428_v23, %v6354_v21  ;;  %v6232_v16 = vsub.f32 1.0, %v8350_v35  ;;  %v8283_v21 = vpop.eup %8282  ;;  %v8351_v23 = vld [vmem:[%s8633_s24 + $0x78] sm:$0xff]  ;;  %8310 = vpow2.f32 %v6337_v3 }
 0x754   : > { %v6359_v46 = vmul.f32 %v8283_v21, %v6263_v27  ;;  %v8359_v27 = vld [vmem:[%s8633_s24 + $0x98] sm:$0xff]  ;;  %8312 = vpow2.f32 %v6339_v25 }
 0x755   : > { %v6546_v60 = vadd.f32 %v6514_v12, %v12843_v55  ;;  %v6264_v12 = vmul.f32 %v8351_v23, %v6232_v16  ;;  %v6233_v55 = vsub.f32 1.0, %v8352_v48  ;;  %v8360_v16 = vld [vmem:[%s12640_s1 + $0xa0] sm:$0xff]  ;;  %v8362_v48 = vld [vmem:[%s12640_s1 + $0xa8] sm:$0xff]  ;;  %8314 = vpow2.f32 %v6341_v43 }
 0x756   : > { %v6430_v51 = vpop.permute.xlu1 %6429  ;;  %v6237_v21 = vsub.f32 1.0, %v8360_v16  ;;  %v8361_v23 = vld [vmem:[%s8633_s24 + $0xa0] sm:$0xff] }
 0x757   : > { %6578 = vst.msk [vmem:[%s12371_s22 + $0x48] sm:$0xff] %vm438_vm0, %v6546_v60  ;;  %v6515_v15 = vadd.f32 %v6430_v51, %v6355_v57  ;;  %v8285_v60 = vpop.eup %8284  ;;  %v6265_v51 = vmul.f32 %v8353_v5, %v6233_v55  ;;  %v6238_v55 = vsub.f32 1.0, %v8362_v48  ;;  %v12858_v48 = vld [vmem:[#allocation28_spill] sm:$0xff] }
 0x758   : > { %v6360_v63 = vmul.f32 %v8285_v60, %v6264_v12  ;;  %v6269_v12 = vmul.f32 %v8361_v23, %v6237_v21  ;;  %v12857_v21 = vld [vmem:[#allocation27_spill] sm:$0xff] }
 0x759   : > { %v6547_v36 = vadd.f32 %v6515_v15, %v12844_v37  ;;  %v8354_v15 = vld [vmem:[%s12640_s1 + $0x88] sm:$0xff]  ;;  %v8287_v37 = vpop.eup %8286 }
 0x75a   : > { %v6432_v20 = vpop.permute.xlu1 %6431  ;;  %v6234_v42 = vsub.f32 1.0, %v8354_v15  ;;  %v6361_v44 = vmul.f32 %v8287_v37, %v6265_v51  ;;  %v8289_v45 = vpop.eup %8288  ;;  %v8364_v51 = vld [vmem:[%s12640_s1 + $0xb0] sm:$0xff] }
 0x75b   : > { %6579 = vst.msk [vmem:[%s12371_s22 + $0x50] sm:$0xff] %vm438_vm0, %v6547_v36  ;;  %v6516_v14 = vadd.f32 %v6432_v20, %v6356_v17  ;;  %v8356_v20 = vld [vmem:[%s12640_s1 + $0x90] sm:$0xff]  ;;  %v6239_v15 = vsub.f32 1.0, %v8364_v51 }
 0x75c   : > { %v6266_v8 = vmul.f32 %v8355_v7, %v6234_v42  ;;  %v8366_v7 = vld [vmem:[%s12640_s1 + $0xb8] sm:$0xff] }
 0x75d   : > { %v6548_v52 = vadd.f32 %v6516_v14, %v12845_v0  ;;  %v6235_v14 = vsub.f32 1.0, %v8356_v20 }
 0x75e   : > { %v6434_v26 = vpop.permute.xlu1 %6433  ;;  %v6362_v11 = vmul.f32 %v8289_v45, %v6266_v8  ;;  %v6240_v8 = vsub.f32 1.0, %v8366_v7  ;;  %v8377_v7 = vld [vmem:[%s8633_s24 + $0xe0] sm:$0xff] }
 0x75f   : > { %6580 = vst.msk [vmem:[%s12371_s22 + $0x58] sm:$0xff] %vm438_vm0, %v6548_v52  ;;  %v6517_v22 = vadd.f32 %v6434_v26, %v6357_v24  ;;  %v12850_v24 = vld [vmem:[#allocation20_spill] sm:$0xff]  ;;  %v6267_v53 = vmul.f32 %v8357_v32, %v6235_v14  ;;  %v6236_v26 = vsub.f32 1.0, %v8358_v19 }
 0x761   : > { %v6549_v50 = vadd.f32 %v6517_v22, %v12846_v54  ;;  %v8291_v22 = vpop.eup %8290  ;;  %v6268_v35 = vmul.f32 %v8359_v27, %v6236_v26 }
 0x762   : > { %v6436_v9 = vpop.permute.xlu1 %6435  ;;  %v6363_v34 = vmul.f32 %v8291_v22, %v6267_v53  ;;  %v12856_v22 = vld [vmem:[#allocation26_spill] sm:$0xff] }
 0x763   : > { %6581 = vst.msk [vmem:[%s12371_s22 + $0x60] sm:$0xff] %vm438_vm0, %v6549_v50  ;;  %v6518_v28 = vadd.f32 %v6436_v9, %v6358_v56  ;;  %v12851_v50 = vld [vmem:[#allocation21_spill] sm:$0xff]  ;;  %v8293_v9 = vpop.eup %8292 }
 0x764   : > { %v8295_v60 = vpop.eup %8294 }
 0x765   : > { %v6550_v47 = vadd.f32 %v6518_v28, %v12847_v30  ;;  %6471 = vrot.lane.b32.xlu0 %v12397_v58, %s8403_s28  ;;  %v12852_v30 = vld [vmem:[#allocation22_spill] sm:$0xff]  ;;  %v8297_v42 = vpop.eup %8296 }
 0x766   : > { %v6438_v57 = vpop.permute.xlu1 %6437  ;;  %v8299_v20 = vpop.eup %8298 }
 0x767   : > { %6582 = vst.msk [vmem:[%s12371_s22 + $0x68] sm:$0xff] %vm438_vm0, %v6550_v47  ;;  %v6519_v62 = vadd.f32 %v6438_v57, %v6359_v46  ;;  %v6364_v46 = vmul.f32 %v8293_v9, %v6268_v35  ;;  %v8301_v53 = vpop.eup %8300 }
 0x768   : > { %v8303_v27 = vpop.eup %8302 }
 0x769   : > { %v6551_v6 = vadd.f32 %v6519_v62, %v12848_v33 }
 0x76a   : > { %v6440_v36 = vpop.permute.xlu0 %6439 }
 0x76b   : > { %6583 = vst.msk [vmem:[%s12371_s22 + $0x70] sm:$0xff] %vm438_vm0, %v6551_v6  ;;  %v6520_v17 = vadd.f32 %v6440_v36, %v6360_v63  ;;  %v6365_v6 = vmul.f32 %v8295_v60, %v6269_v12  ;;  %v8363_v63 = vld [vmem:[%s8633_s24 + $0xa8] sm:$0xff] }
 0x76c   : > { %v6270_v5 = vmul.f32 %v8363_v63, %v6238_v55 }
 0x76d   : > { %v6552_v2 = vadd.f32 %v6520_v17, %v12849_v39  ;;  %v12854_v17 = vld [vmem:[#allocation24_spill] sm:$0xff] }
 0x76e   : > { %v6442_v0 = vpop.permute.xlu1 %6441  ;;  %v6366_v39 = vmul.f32 %v8297_v42, %v6270_v5  ;;  %v12859_v5 = vld [vmem:[#allocation29_spill] sm:$0xff]  ;;  %v8375_v42 = vld [vmem:[%s8633_s24 + $0xd8] sm:$0xff] }
 0x76f   : > { %6584 = vst.msk [vmem:[%s12371_s22 + $0x78] sm:$0xff] %vm438_vm0, %v6552_v2  ;;  %v6521_v52 = vadd.f32 %v6442_v0, %v6361_v44  ;;  %v8365_v2 = vld [vmem:[%s8633_s24 + $0xb0] sm:$0xff]  ;;  %v12855_v0 = vld [vmem:[#allocation25_spill] sm:$0xff] }
 0x770   : > { %v6271_v44 = vmul.f32 %v8365_v2, %v6239_v15  ;;  %v12860_v2 = vld [vmem:[#allocation30_spill] sm:$0xff] }
 0x771   : > { %v6553_v40 = vadd.f32 %v6521_v52, %v12850_v24  ;;  %v8367_v24 = vld [vmem:[%s8633_s24 + $0xb8] sm:$0xff] }
 0x772   : > { %v6444_v61 = vpop.permute.xlu0 %6443  ;;  %v6367_v4 = vmul.f32 %v8299_v20, %v6271_v44  ;;  %v8378_v20 = vld [vmem:[%s12640_s1 + $0xe8] sm:$0xff] }
 0x773   : > { %6585 = vst.msk [vmem:[%s12371_s22 + $0x80] sm:$0xff] %vm438_vm0, %v6553_v40  ;;  %v6522_v54 = vadd.f32 %v6444_v61, %v6362_v11  ;;  %v6272_v40 = vmul.f32 %v8367_v24, %v6240_v8  ;;  %v8368_v11 = vld [vmem:[%s12640_s1 + $0xc0] sm:$0xff] }
 0x774   : > { %v6241_v32 = vsub.f32 1.0, %v8368_v11 }
 0x775   : > { %v6554_v56 = vadd.f32 %v6522_v54, %v12851_v50  ;;  %v6368_v54 = vmul.f32 %v8301_v53, %v6272_v40  ;;  %v8379_v40 = vld [vmem:[%s8633_s24 + $0xe8] sm:$0xff] }
 0x776   : > { %v6446_v28 = vpop.permute.xlu1 %6445  ;;  %v6273_v50 = vmul.f32 %v8369_v13, %v6241_v32  ;;  %v8380_v32 = vld [vmem:[%s12640_s1 + $0xf0] sm:$0xff] }
 0x777   : > { %6586 = vst.msk [vmem:[%s12371_s22 + $0x88] sm:$0xff] %vm438_vm0, %v6554_v56  ;;  %v6523_v49 = vadd.f32 %v6446_v28, %v6363_v34  ;;  %v8370_v56 = vld [vmem:[%s12640_s1 + $0xc8] sm:$0xff]  ;;  %v6247_v53 = vsub.f32 1.0, %v8380_v32  ;;  %v8381_v13 = vld [vmem:[%s8633_s24 + $0xf0] sm:$0xff] }
 0x778   : > { %v6242_v34 = vsub.f32 1.0, %v8370_v56  ;;  %v6369_v28 = vmul.f32 %v8303_v27, %v6273_v50 }
 0x779   : > { %v6555_v47 = vadd.f32 %v6523_v49, %v12852_v30  ;;  %v8371_v49 = vld [vmem:[%s8633_s24 + $0xc8] sm:$0xff]  ;;  %v8372_v30 = vld [vmem:[%s12640_s1 + $0xd0] sm:$0xff]  ;;  %v6279_v50 = vmul.f32 %v8381_v13, %v6247_v53 }
 0x77a   : > { %v6448_v57 = vpop.permute.xlu0 %6447  ;;  %v6274_v18 = vmul.f32 %v8371_v49, %v6242_v34 }
 0x77b   : > { %6587 = vst.msk [vmem:[%s12371_s22 + $0x90] sm:$0xff] %vm438_vm0, %v6555_v47  ;;  %v6524_v62 = vadd.f32 %v6448_v57, %v6364_v46  ;;  %v6243_v47 = vsub.f32 1.0, %v8372_v30  ;;  %v8305_v46 = vpop.eup %8304  ;;  %v8373_v57 = vld [vmem:[%s8633_s24 + $0xd0] sm:$0xff]  ;;  %v8382_v30 = vld [vmem:[%s12640_s1 + $0xf8] sm:$0xff] }
 0x77c   : > { %v6370_v60 = vmul.f32 %v8305_v46, %v6274_v18  ;;  %v6343_v18 = vmul.f32 1.442695, %v12397_v58  ;;  %v8383_v46 = vld [vmem:[%s8633_s24 + $0xf8] sm:$0xff] }
 0x77d   : > { %v6556_v33 = vadd.f32 %v6524_v62, %v12853_v59  ;;  %v6275_v62 = vmul.f32 %v8373_v57, %v6243_v47  ;;  %v6244_v59 = vsub.f32 1.0, %v8374_v10  ;;  %v6248_v47 = vsub.f32 1.0, %v8382_v30  ;;  %v12865_v58 = vld [vmem:[#allocation35_spill] sm:$0xff] }
 0x77e   : > { %v6450_v37 = vpop.permute.xlu1 %6449  ;;  %8316 = vpow2.f32 %v6343_v18 }
 0x77f   : > { %6588 = vst.msk [vmem:[%s12371_s22 + $0x98] sm:$0xff] %vm438_vm0, %v6556_v33  ;;  %v6525_v36 = vadd.f32 %v6450_v37, %v6365_v6  ;;  %v8307_v33 = vpop.eup %8306  ;;  %v6276_v37 = vmul.f32 %v8375_v42, %v6244_v59 }
 0x780   : > { %v6371_v15 = vmul.f32 %v8307_v33, %v6275_v62 }
 0x781   : > { %v6557_v1 = vadd.f32 %v6525_v36, %v12854_v17  ;;  %v8376_v36 = vld [vmem:[%s12640_s1 + $0xe0] sm:$0xff]  ;;  %v8309_v17 = vpop.eup %8308 }
 0x782   : > { %v6452_v14 = vpop.permute.xlu0 %6451  ;;  %v6245_v31 = vsub.f32 1.0, %v8376_v36  ;;  %v6372_v44 = vmul.f32 %v8309_v17, %v6276_v37 }
 0x783   : > { %6589 = vst.msk [vmem:[%s12371_s22 + $0xa0] sm:$0xff] %vm438_vm0, %v6557_v1  ;;  %v6526_v45 = vadd.f32 %v6452_v14, %v6366_v39  ;;  %v6246_v14 = vsub.f32 1.0, %v8378_v20 }
 0x784   : > { %v6277_v8 = vmul.f32 %v8377_v7, %v6245_v31 }
 0x785   : > { %v6558_v52 = vadd.f32 %v6526_v45, %v12855_v0  ;;  %v8311_v45 = vpop.eup %8310  ;;  %v6278_v11 = vmul.f32 %v8379_v40, %v6246_v14 }
 0x786   : > { %v6454_v19 = vpop.permute.xlu1 %6453  ;;  %v6373_v24 = vmul.f32 %v8311_v45, %v6277_v8 }
 0x787   : > { %6590 = vst.msk [vmem:[%s12371_s22 + $0xa8] sm:$0xff] %vm438_vm0, %v6558_v52  ;;  %v6527_v26 = vadd.f32 %v6454_v19, %v6367_v4  ;;  %v12861_v52 = vld [vmem:[#allocation31_spill] sm:$0xff]  ;;  %v8313_v19 = vpop.eup %8312 }
 0x788   : > { %v8315_v56 = vpop.eup %8314 }
 0x789   : > { %v6559_v61 = vadd.f32 %v6527_v26, %v12856_v22  ;;  %v12862_v22 = vld [vmem:[#allocation32_spill] sm:$0xff]  ;;  %v6375_v3 = vmul.f32 %v8315_v56, %v6279_v50 }
 0x78a   : > { %v6456_v35 = vpop.permute.xlu0 %6455 }
 0x78b   : > { %6591 = vst.msk [vmem:[%s12371_s22 + $0xb0] sm:$0xff] %vm438_vm0, %v6559_v61  ;;  %v6528_v16 = vadd.f32 %v6456_v35, %v6368_v54  ;;  %v6374_v54 = vmul.f32 %v8313_v19, %v6278_v11  ;;  %v12863_v35 = vld [vmem:[#allocation33_spill] sm:$0xff] }
 0x78d   : > { %v6560_v9 = vadd.f32 %v6528_v16, %v12857_v21 }
 0x78e   : > { %v6458_v23 = vpop.permute.xlu1 %6457 }
 0x78f   : > { %6592 = vst.msk [vmem:[%s12371_s22 + $0xb8] sm:$0xff] %vm438_vm0, %v6560_v9  ;;  %v6529_v12 = vadd.f32 %v6458_v23, %v6369_v28  ;;  %v12864_v28 = vld [vmem:[#allocation34_spill] sm:$0xff]  ;;  %v6280_v23 = vmul.f32 %v8383_v46, %v6248_v47 }
 0x791   : > { %v6561_v55 = vadd.f32 %v6529_v12, %v12858_v48  ;;  %v8317_v12 = vpop.eup %8316 }
 0x792   : > { %v6460_v6 = vpop.permute.xlu0 %6459 }
 0x793   : > { %6593 = vst.msk [vmem:[%s12371_s22 + $0xc0] sm:$0xff] %vm438_vm0, %v6561_v55  ;;  %v6530_v63 = vadd.f32 %v6460_v6, %v6370_v60  ;;  %v6376_v60 = vmul.f32 %v8317_v12, %v6280_v23 }
 0x795   : > { %v6562_v51 = vadd.f32 %v6530_v63, %v12859_v5 }
 0x796   : > { %v6462_v1 = vpop.permute.xlu1 %6461 }
 0x797   : > { %6594 = vst.msk [vmem:[%s12371_s22 + $0xc8] sm:$0xff] %vm438_vm0, %v6562_v51  ;;  %v6531_v39 = vadd.f32 %v6462_v1, %v6371_v15 }
 0x799   : > { %v6563_v38 = vadd.f32 %v6531_v39, %v12860_v2 }
 0x79a   : > { %v6464_v41 = vpop.permute.xlu0 %6463 }
 0x79b   : > { %6595 = vst.msk [vmem:[%s12371_s22 + $0xd0] sm:$0xff] %vm438_vm0, %v6563_v38  ;;  %v6532_v0 = vadd.f32 %v6464_v41, %v6372_v44 }
 0x79d   : > { %v6564_v4 = vadd.f32 %v6532_v0, %v12861_v52 }
 0x79e   : > { %v6466_v26 = vpop.permute.xlu1 %6465 }
 0x79f   : > { %6596 = vst.msk [vmem:[%s12371_s22 + $0xd8] sm:$0xff] %vm438_vm0, %v6564_v4  ;;  %v6533_v29 = vadd.f32 %v6466_v26, %v6373_v24 }
 0x7a1   : > { %v6565_v61 = vadd.f32 %v6533_v29, %v12862_v22 }
 0x7a2   : > { %v6468_v34 = vpop.permute.xlu0 %6467 }
 0x7a3   : > { %6597 = vst.msk [vmem:[%s12371_s22 + $0xe0] sm:$0xff] %vm438_vm0, %v6565_v61  ;;  %v6534_v27 = vadd.f32 %v6468_v34, %v6374_v54 }
 0x7a5   : > { %v6566_v16 = vadd.f32 %v6534_v27, %v12863_v35 }
 0x7a6   : > { %v6470_v21 = vpop.permute.xlu1 %6469 }
 0x7a7   : > { %6598 = vst.msk [vmem:[%s12371_s22 + $0xe8] sm:$0xff] %vm438_vm0, %v6566_v16  ;;  %v6535_v9 = vadd.f32 %v6470_v21, %v6375_v3 }
 0x7a9   : > { %v6567_v49 = vadd.f32 %v6535_v9, %v12864_v28 }
 0x7ab   : > { %6599 = vst.msk [vmem:[%s12371_s22 + $0xf0] sm:$0xff] %vm438_vm0, %v6567_v49 }
 0x7dc   : > { %v6665_v25 = vpop.xlane.xlu0 %6664 }
 0x7dd   : > { %v6666_v48 = vrot.slane %v6665_v25, 4 }
 0x7df   : > { %v6667_v55 = vadd.f32 %v6666_v48, %v6665_v25 }
 0x7e0   : > { %v6472_v57 = vpop.permute.xlu0 %6471 }
 0x7e1   : > { %v6668_v62 = vrot.slane %v6667_v55, 2  ;;  %v6536_v10 = vadd.f32 %v6472_v57, %v6376_v60 }
 0x7e3   : > { %v6669_v59 = vadd.f32 %v6668_v62, %v6667_v55  ;;  %v6568_v33 = vadd.f32 %v6536_v10, %v12865_v58 }
 0x7e5   : > { %v6670_v6 = vrot.slane %v6669_v59, 1  ;;  %6600 = vst.msk [vmem:[%s12371_s22 + $0xf8] sm:$0xff] %vm438_vm0, %v6568_v33 }
 0x7e7   : > { %v6671_v63 = vadd.f32 %v6670_v6, %v6669_v59 }
 0x7e9   : > { %6673 = vst.msk [vmem:[%s341_s18] sm:$0x1] %vm6672_vm11, %v6671_v63 }
 0x7ea PF: > { %s20_s30 = sadd.s32 1, %s8390_s30  }
 0x7eb   : > { %p17_p4 = scmp.ge.s32.totalorder %s20_s30, 4  }
 0x7ed   :  { %19 = sbr.rel (!%p17_p4) target bundleno = 1 (0x1), region = 98 }

</bundles_post_ra>
